<compile_context>
chip_gen: v6e
topology: v6e:2x2x1
jax: 0.10.0
libtpu: 0.0.40
codegen_flags: <defaults>
</compile_context>

<pallas_src>
import functools

import jax
import jax.numpy as jnp
from jax.experimental import pallas as pl
from jax.experimental.pallas import tpu as pltpu


def _make_gmf_kernel(block_b: int, n_items: int, n_users: int):
    def gmf_kernel(item_ids_ref, user_ids_ref,      # scalar-prefetch ids (SMEM), (B_pad,)
                   item_tab_ref, user_tab_ref,      # full embedding tables (VMEM)
                   out_ref,                         # (1, block_b) lane-dense scores
                   item_buf, user_buf):             # VMEM scratch, (block_b, D)
        base = pl.program_id(0) * block_b

        # Direct row gather: statically-unrolled loop; each row is a (1, D)
        # load at a dynamic sublane offset taken from the SMEM ids.
        # Ids are clamped into range (PyTorch nn.Embedding would raise on an
        # out-of-range id; here we clamp instead of reading out of bounds).
        for r in range(block_b):
            it_id = jnp.clip(item_ids_ref[base + r], 0, n_items - 1)
            us_id = jnp.clip(user_ids_ref[base + r], 0, n_users - 1)
            item_buf[pl.ds(r, 1), :] = item_tab_ref[pl.ds(it_id, 1), :]
            user_buf[pl.ds(r, 1), :] = user_tab_ref[pl.ds(us_id, 1), :]

        # GMF: elementwise product, reduce over the embedding dim, sigmoid.
        prod = item_buf[...] * user_buf[...]                 # (block_b, D) f32
        score = jnp.sum(prod, axis=1)                        # (block_b,)
        out_ref[...] = jax.nn.sigmoid(score).reshape(1, block_b)

    return gmf_kernel


@functools.partial(jax.jit, static_argnames=("block_b",))
def gmf_forward(items, users, item_table, user_table, *, block_b=128):
    """Pallas GMF forward. items/users: (B,) int ids. Returns (B,) f32."""
    B = items.shape[0]
    I, D = item_table.shape
    U, _ = user_table.shape

    nb = pl.cdiv(B, block_b)
    B_pad = nb * block_b
    items_p = jnp.zeros((B_pad,), jnp.int32).at[:B].set(items.astype(jnp.int32))
    users_p = jnp.zeros((B_pad,), jnp.int32).at[:B].set(users.astype(jnp.int32))

    # Explicit VMEM budget: (auto double-buffered) tables + gather scratch +
    # output block + generous headroom.  Tiny here; stays far under v7x limits.
    vmem_limit = (2 * 4 * (I * D + U * D)
                  + 2 * 4 * block_b * D
                  + 2 * 4 * block_b
                  + (4 << 20))

    kernel = _make_gmf_kernel(block_b, I, U)

    out = pl.pallas_call(
        kernel,
        out_shape=jax.ShapeDtypeStruct((1, B_pad), jnp.float32),
        grid_spec=pltpu.PrefetchScalarGridSpec(
            num_scalar_prefetch=2,               # item ids, user ids -> SMEM
            grid=(nb,),
            in_specs=[
                # Full tables with a constant block index: DMA'd into VMEM once
                # (no re-copy across grid steps).  For production-size tables,
                # use pl.BlockSpec(memory_space=pl.ANY) + make_async_copy gather.
                pl.BlockSpec((I, D), lambda i, *_: (0, 0)),
                pl.BlockSpec((U, D), lambda i, *_: (0, 0)),
            ],
            out_specs=pl.BlockSpec((1, block_b), lambda i, *_: (0, i)),
            scratch_shapes=[
                pltpu.VMEM((block_b, D), jnp.float32),
                pltpu.VMEM((block_b, D), jnp.float32),
            ],
        ),
        compiler_params=pltpu.CompilerParams(
            dimension_semantics=("parallel",),
            vmem_limit_bytes=int(vmem_limit),
        ),
    )(items_p, users_p, item_table, user_table)

    return out[0, :B]


def gmf_reference(items, users, item_table, user_table):
    iv = item_table[items]
    uv = user_table[users]
    return jax.nn.sigmoid(jnp.sum(iv * uv, axis=1))


if __name__ == "__main__":
    items_size, users_size, embedding_dim = 50, 40, 32
    B = 256   # 2 grid steps of 128 -> can shard across v7x's 2 TensorCores

    key = jax.random.PRNGKey(0)
    k_it, k_ut, k_iid, k_uid = jax.random.split(key, 4)

    # nn.Embedding default init: N(0, 1)
    item_table = jax.random.normal(k_it, (items_size, embedding_dim), jnp.float32)
    user_table = jax.random.normal(k_ut, (users_size, embedding_dim), jnp.float32)

    items = jax.random.randint(k_iid, (B,), 0, items_size, dtype=jnp.int32)
    users = jax.random.randint(k_uid, (B,), 0, users_size, dtype=jnp.int32)

    out = gmf_forward(items, users, item_table, user_table)
    out = jax.block_until_ready(out)

    ref = gmf_reference(items, users, item_table, user_table)
    assert out.shape == (B,)
    assert jnp.allclose(out, ref, atol=1e-5, rtol=1e-5), "mismatch vs reference"

    print("KERNEL_OK")
</pallas_src>

<mosaic_0001>
module attributes {stable_mosaic.version = 11 : i64} {
  func.func @gmf_kernel(%arg0: i32, %arg1: memref<256xi32, #tpu.memory_space<smem>>, %arg2: memref<256xi32, #tpu.memory_space<smem>>, %arg3: memref<50x32xf32, #tpu.memory_space<vmem>>, %arg4: memref<40x32xf32, #tpu.memory_space<vmem>>, %arg5: memref<1x128xf32, #tpu.memory_space<vmem>>, %arg6: memref<128x32xf32, #tpu.memory_space<vmem>>, %arg7: memref<128x32xf32, #tpu.memory_space<vmem>>) attributes {dimension_semantics = [#tpu.dimension_semantics<parallel>], iteration_bounds = array<i64: 2>, scalar_prefetch = 2 : i64, scratch_operands = 2 : i64, tpu.core_type = #tpu.core_type<tc>, window_params = [{pipeline_mode = #tpu.pipeline_mode<synchronous>, transform_indices = @transform_0, window_bounds = array<i64: 50, 32>}, {pipeline_mode = #tpu.pipeline_mode<synchronous>, transform_indices = @transform_1, window_bounds = array<i64: 40, 32>}, {transform_indices = @transform_2, window_bounds = array<i64: 1, 128>}]} {
    %c128_i32 = arith.constant 128 : i32
    %0 = arith.muli %arg0, %c128_i32 : i32
    %c0_i32 = arith.constant 0 : i32
    %1 = arith.addi %0, %c0_i32 : i32
    %2 = arith.index_cast %1 : i32 to index
    %3 = memref.load %arg1[%2] : memref<256xi32, #tpu.memory_space<smem>>
    %c0_i32_0 = arith.constant 0 : i32
    %c49_i32 = arith.constant 49 : i32
    %4 = arith.maxsi %c0_i32_0, %3 : i32
    %5 = arith.minsi %c49_i32, %4 : i32
    %c0_i32_1 = arith.constant 0 : i32
    %6 = arith.addi %0, %c0_i32_1 : i32
    %7 = arith.index_cast %6 : i32 to index
    %8 = memref.load %arg2[%7] : memref<256xi32, #tpu.memory_space<smem>>
    %c0_i32_2 = arith.constant 0 : i32
    %c39_i32 = arith.constant 39 : i32
    %9 = arith.maxsi %c0_i32_2, %8 : i32
    %10 = arith.minsi %c39_i32, %9 : i32
    %11 = arith.index_cast %5 : i32 to index
    %c0 = arith.constant 0 : index
    %12 = vector.load %arg3[%11, %c0] : memref<50x32xf32, #tpu.memory_space<vmem>>, vector<1x32xf32>
    %c0_3 = arith.constant 0 : index
    %c0_4 = arith.constant 0 : index
    %13 = vector.load %arg6[%c0_3, %c0_4] : memref<128x32xf32, #tpu.memory_space<vmem>>, vector<1x32xf32>
    tpu.vector_store %arg6[%c0_3, %c0_4], %12 {strides = array<i32>} : memref<128x32xf32, #tpu.memory_space<vmem>>, vector<1x32xf32>,
    %14 = arith.index_cast %10 : i32 to index
    %c0_5 = arith.constant 0 : index
    %15 = vector.load %arg4[%14, %c0_5] : memref<40x32xf32, #tpu.memory_space<vmem>>, vector<1x32xf32>
    %c0_6 = arith.constant 0 : index
    %c0_7 = arith.constant 0 : index
    %16 = vector.load %arg7[%c0_6, %c0_7] : memref<128x32xf32, #tpu.memory_space<vmem>>, vector<1x32xf32>
    tpu.vector_store %arg7[%c0_6, %c0_7], %15 {strides = array<i32>} : memref<128x32xf32, #tpu.memory_space<vmem>>, vector<1x32xf32>,
    %c1_i32 = arith.constant 1 : i32
    %17 = arith.addi %0, %c1_i32 : i32
    %18 = arith.index_cast %17 : i32 to index
    %19 = memref.load %arg1[%18] : memref<256xi32, #tpu.memory_space<smem>>
    %c0_i32_8 = arith.constant 0 : i32
    %c49_i32_9 = arith.constant 49 : i32
    %20 = arith.maxsi %c0_i32_8, %19 : i32
    %21 = arith.minsi %c49_i32_9, %20 : i32
    %c1_i32_10 = arith.constant 1 : i32
    %22 = arith.addi %0, %c1_i32_10 : i32
    %23 = arith.index_cast %22 : i32 to index
    %24 = memref.load %arg2[%23] : memref<256xi32, #tpu.memory_space<smem>>
    %c0_i32_11 = arith.constant 0 : i32
    %c39_i32_12 = arith.constant 39 : i32
    %25 = arith.maxsi %c0_i32_11, %24 : i32
    %26 = arith.minsi %c39_i32_12, %25 : i32
    %27 = arith.index_cast %21 : i32 to index
    %c0_13 = arith.constant 0 : index
    %28 = vector.load %arg3[%27, %c0_13] : memref<50x32xf32, #tpu.memory_space<vmem>>, vector<1x32xf32>
    %c1 = arith.constant 1 : index
    %c0_14 = arith.constant 0 : index
    %29 = vector.load %arg6[%c1, %c0_14] : memref<128x32xf32, #tpu.memory_space<vmem>>, vector<1x32xf32>
    tpu.vector_store %arg6[%c1, %c0_14], %28 {strides = array<i32>} : memref<128x32xf32, #tpu.memory_space<vmem>>, vector<1x32xf32>,
    %30 = arith.index_cast %26 : i32 to index
    %c0_15 = arith.constant 0 : index
    %31 = vector.load %arg4[%30, %c0_15] : memref<40x32xf32, #tpu.memory_space<vmem>>, vector<1x32xf32>
    %c1_16 = arith.constant 1 : index
    %c0_17 = arith.constant 0 : index
    %32 = vector.load %arg7[%c1_16, %c0_17] : memref<128x32xf32, #tpu.memory_space<vmem>>, vector<1x32xf32>
    tpu.vector_store %arg7[%c1_16, %c0_17], %31 {strides = array<i32>} : memref<128x32xf32, #tpu.memory_space<vmem>>, vector<1x32xf32>,
    %c2_i32 = arith.constant 2 : i32
    %33 = arith.addi %0, %c2_i32 : i32
    %34 = arith.index_cast %33 : i32 to index
    %35 = memref.load %arg1[%34] : memref<256xi32, #tpu.memory_space<smem>>
    %c0_i32_18 = arith.constant 0 : i32
    %c49_i32_19 = arith.constant 49 : i32
    %36 = arith.maxsi %c0_i32_18, %35 : i32
    %37 = arith.minsi %c49_i32_19, %36 : i32
    %c2_i32_20 = arith.constant 2 : i32
    %38 = arith.addi %0, %c2_i32_20 : i32
    %39 = arith.index_cast %38 : i32 to index
    %40 = memref.load %arg2[%39] : memref<256xi32, #tpu.memory_space<smem>>
    %c0_i32_21 = arith.constant 0 : i32
    %c39_i32_22 = arith.constant 39 : i32
    %41 = arith.maxsi %c0_i32_21, %40 : i32
    %42 = arith.minsi %c39_i32_22, %41 : i32
    %43 = arith.index_cast %37 : i32 to index
    %c0_23 = arith.constant 0 : index
    %44 = vector.load %arg3[%43, %c0_23] : memref<50x32xf32, #tpu.memory_space<vmem>>, vector<1x32xf32>
    %c2 = arith.constant 2 : index
    %c0_24 = arith.constant 0 : index
    %45 = vector.load %arg6[%c2, %c0_24] : memref<128x32xf32, #tpu.memory_space<vmem>>, vector<1x32xf32>
    tpu.vector_store %arg6[%c2, %c0_24], %44 {strides = array<i32>} : memref<128x32xf32, #tpu.memory_space<vmem>>, vector<1x32xf32>,
    %46 = arith.index_cast %42 : i32 to index
    %c0_25 = arith.constant 0 : index
    %47 = vector.load %arg4[%46, %c0_25] : memref<40x32xf32, #tpu.memory_space<vmem>>, vector<1x32xf32>
    %c2_26 = arith.constant 2 : index
    %c0_27 = arith.constant 0 : index
    %48 = vector.load %arg7[%c2_26, %c0_27] : memref<128x32xf32, #tpu.memory_space<vmem>>, vector<1x32xf32>
    tpu.vector_store %arg7[%c2_26, %c0_27], %47 {strides = array<i32>} : memref<128x32xf32, #tpu.memory_space<vmem>>, vector<1x32xf32>,
    %c3_i32 = arith.constant 3 : i32
    %49 = arith.addi %0, %c3_i32 : i32
    %50 = arith.index_cast %49 : i32 to index
    %51 = memref.load %arg1[%50] : memref<256xi32, #tpu.memory_space<smem>>
    %c0_i32_28 = arith.constant 0 : i32
    %c49_i32_29 = arith.constant 49 : i32
    %52 = arith.maxsi %c0_i32_28, %51 : i32
    %53 = arith.minsi %c49_i32_29, %52 : i32
    %c3_i32_30 = arith.constant 3 : i32
    %54 = arith.addi %0, %c3_i32_30 : i32
    %55 = arith.index_cast %54 : i32 to index
    %56 = memref.load %arg2[%55] : memref<256xi32, #tpu.memory_space<smem>>
    %c0_i32_31 = arith.constant 0 : i32
    %c39_i32_32 = arith.constant 39 : i32
    %57 = arith.maxsi %c0_i32_31, %56 : i32
    %58 = arith.minsi %c39_i32_32, %57 : i32
    %59 = arith.index_cast %53 : i32 to index
    %c0_33 = arith.constant 0 : index
    %60 = vector.load %arg3[%59, %c0_33] : memref<50x32xf32, #tpu.memory_space<vmem>>, vector<1x32xf32>
    %c3 = arith.constant 3 : index
    %c0_34 = arith.constant 0 : index
    %61 = vector.load %arg6[%c3, %c0_34] : memref<128x32xf32, #tpu.memory_space<vmem>>, vector<1x32xf32>
    tpu.vector_store %arg6[%c3, %c0_34], %60 {strides = array<i32>} : memref<128x32xf32, #tpu.memory_space<vmem>>, vector<1x32xf32>,
    %62 = arith.index_cast %58 : i32 to index
    %c0_35 = arith.constant 0 : index
    %63 = vector.load %arg4[%62, %c0_35] : memref<40x32xf32, #tpu.memory_space<vmem>>, vector<1x32xf32>
    %c3_36 = arith.constant 3 : index
    %c0_37 = arith.constant 0 : index
    %64 = vector.load %arg7[%c3_36, %c0_37] : memref<128x32xf32, #tpu.memory_space<vmem>>, vector<1x32xf32>
    tpu.vector_store %arg7[%c3_36, %c0_37], %63 {strides = array<i32>} : memref<128x32xf32, #tpu.memory_space<vmem>>, vector<1x32xf32>,
    %c4_i32 = arith.constant 4 : i32
    %65 = arith.addi %0, %c4_i32 : i32
    %66 = arith.index_cast %65 : i32 to index
    %67 = memref.load %arg1[%66] : memref<256xi32, #tpu.memory_space<smem>>
    %c0_i32_38 = arith.constant 0 : i32
    %c49_i32_39 = arith.constant 49 : i32
    %68 = arith.maxsi %c0_i32_38, %67 : i32
    %69 = arith.minsi %c49_i32_39, %68 : i32
    %c4_i32_40 = arith.constant 4 : i32
    %70 = arith.addi %0, %c4_i32_40 : i32
    %71 = arith.index_cast %70 : i32 to index
    %72 = memref.load %arg2[%71] : memref<256xi32, #tpu.memory_space<smem>>
    %c0_i32_41 = arith.constant 0 : i32
    %c39_i32_42 = arith.constant 39 : i32
    %73 = arith.maxsi %c0_i32_41, %72 : i32
    %74 = arith.minsi %c39_i32_42, %73 : i32
    %75 = arith.index_cast %69 : i32 to index
    %c0_43 = arith.constant 0 : index
    %76 = vector.load %arg3[%75, %c0_43] : memref<50x32xf32, #tpu.memory_space<vmem>>, vector<1x32xf32>
    %c4 = arith.constant 4 : index
    %c0_44 = arith.constant 0 : index
    %77 = vector.load %arg6[%c4, %c0_44] : memref<128x32xf32, #tpu.memory_space<vmem>>, vector<1x32xf32>
    tpu.vector_store %arg6[%c4, %c0_44], %76 {strides = array<i32>} : memref<128x32xf32, #tpu.memory_space<vmem>>, vector<1x32xf32>,
    %78 = arith.index_cast %74 : i32 to index
    %c0_45 = arith.constant 0 : index
    %79 = vector.load %arg4[%78, %c0_45] : memref<40x32xf32, #tpu.memory_space<vmem>>, vector<1x32xf32>
    %c4_46 = arith.constant 4 : index
    %c0_47 = arith.constant 0 : index
    %80 = vector.load %arg7[%c4_46, %c0_47] : memref<128x32xf32, #tpu.memory_space<vmem>>, vector<1x32xf32>
    tpu.vector_store %arg7[%c4_46, %c0_47], %79 {strides = array<i32>} : memref<128x32xf32, #tpu.memory_space<vmem>>, vector<1x32xf32>,
    %c5_i32 = arith.constant 5 : i32
    %81 = arith.addi %0, %c5_i32 : i32
    %82 = arith.index_cast %81 : i32 to index
    %83 = memref.load %arg1[%82] : memref<256xi32, #tpu.memory_space<smem>>
    %c0_i32_48 = arith.constant 0 : i32
    %c49_i32_49 = arith.constant 49 : i32
    %84 = arith.maxsi %c0_i32_48, %83 : i32
    %85 = arith.minsi %c49_i32_49, %84 : i32
    %c5_i32_50 = arith.constant 5 : i32
    %86 = arith.addi %0, %c5_i32_50 : i32
    %87 = arith.index_cast %86 : i32 to index
    %88 = memref.load %arg2[%87] : memref<256xi32, #tpu.memory_space<smem>>
    %c0_i32_51 = arith.constant 0 : i32
    %c39_i32_52 = arith.constant 39 : i32
    %89 = arith.maxsi %c0_i32_51, %88 : i32
    %90 = arith.minsi %c39_i32_52, %89 : i32
    %91 = arith.index_cast %85 : i32 to index
    %c0_53 = arith.constant 0 : index
    %92 = vector.load %arg3[%91, %c0_53] : memref<50x32xf32, #tpu.memory_space<vmem>>, vector<1x32xf32>
    %c5 = arith.constant 5 : index
    %c0_54 = arith.constant 0 : index
    %93 = vector.load %arg6[%c5, %c0_54] : memref<128x32xf32, #tpu.memory_space<vmem>>, vector<1x32xf32>
    tpu.vector_store %arg6[%c5, %c0_54], %92 {strides = array<i32>} : memref<128x32xf32, #tpu.memory_space<vmem>>, vector<1x32xf32>,
    %94 = arith.index_cast %90 : i32 to index
    %c0_55 = arith.constant 0 : index
    %95 = vector.load %arg4[%94, %c0_55] : memref<40x32xf32, #tpu.memory_space<vmem>>, vector<1x32xf32>
    %c5_56 = arith.constant 5 : index
    %c0_57 = arith.constant 0 : index
    %96 = vector.load %arg7[%c5_56, %c0_57] : memref<128x32xf32, #tpu.memory_space<vmem>>, vector<1x32xf32>
    tpu.vector_store %arg7[%c5_56, %c0_57], %95 {strides = array<i32>} : memref<128x32xf32, #tpu.memory_space<vmem>>, vector<1x32xf32>,
    %c6_i32 = arith.constant 6 : i32
    %97 = arith.addi %0, %c6_i32 : i32
    %98 = arith.index_cast %97 : i32 to index
    %99 = memref.load %arg1[%98] : memref<256xi32, #tpu.memory_space<smem>>
    %c0_i32_58 = arith.constant 0 : i32
    %c49_i32_59 = arith.constant 49 : i32
    %100 = arith.maxsi %c0_i32_58, %99 : i32
    %101 = arith.minsi %c49_i32_59, %100 : i32
    %c6_i32_60 = arith.constant 6 : i32
    %102 = arith.addi %0, %c6_i32_60 : i32
    %103 = arith.index_cast %102 : i32 to index
    %104 = memref.load %arg2[%103] : memref<256xi32, #tpu.memory_space<smem>>
    %c0_i32_61 = arith.constant 0 : i32
    %c39_i32_62 = arith.constant 39 : i32
    %105 = arith.maxsi %c0_i32_61, %104 : i32
    %106 = arith.minsi %c39_i32_62, %105 : i32
    %107 = arith.index_cast %101 : i32 to index
    %c0_63 = arith.constant 0 : index
    %108 = vector.load %arg3[%107, %c0_63] : memref<50x32xf32, #tpu.memory_space<vmem>>, vector<1x32xf32>
    %c6 = arith.constant 6 : index
    %c0_64 = arith.constant 0 : index
    %109 = vector.load %arg6[%c6, %c0_64] : memref<128x32xf32, #tpu.memory_space<vmem>>, vector<1x32xf32>
    tpu.vector_store %arg6[%c6, %c0_64], %108 {strides = array<i32>} : memref<128x32xf32, #tpu.memory_space<vmem>>, vector<1x32xf32>,
    %110 = arith.index_cast %106 : i32 to index
    %c0_65 = arith.constant 0 : index
    %111 = vector.load %arg4[%110, %c0_65] : memref<40x32xf32, #tpu.memory_space<vmem>>, vector<1x32xf32>
    %c6_66 = arith.constant 6 : index
    %c0_67 = arith.constant 0 : index
    %112 = vector.load %arg7[%c6_66, %c0_67] : memref<128x32xf32, #tpu.memory_space<vmem>>, vector<1x32xf32>
    tpu.vector_store %arg7[%c6_66, %c0_67], %111 {strides = array<i32>} : memref<128x32xf32, #tpu.memory_space<vmem>>, vector<1x32xf32>,
    %c7_i32 = arith.constant 7 : i32
    %113 = arith.addi %0, %c7_i32 : i32
    %114 = arith.index_cast %113 : i32 to index
    %115 = memref.load %arg1[%114] : memref<256xi32, #tpu.memory_space<smem>>
    %c0_i32_68 = arith.constant 0 : i32
    %c49_i32_69 = arith.constant 49 : i32
    %116 = arith.maxsi %c0_i32_68, %115 : i32
    %117 = arith.minsi %c49_i32_69, %116 : i32
    %c7_i32_70 = arith.constant 7 : i32
    %118 = arith.addi %0, %c7_i32_70 : i32
    %119 = arith.index_cast %118 : i32 to index
    %120 = memref.load %arg2[%119] : memref<256xi32, #tpu.memory_space<smem>>
    %c0_i32_71 = arith.constant 0 : i32
    %c39_i32_72 = arith.constant 39 : i32
    %121 = arith.maxsi %c0_i32_71, %120 : i32
    %122 = arith.minsi %c39_i32_72, %121 : i32
    %123 = arith.index_cast %117 : i32 to index
    %c0_73 = arith.constant 0 : index
    %124 = vector.load %arg3[%123, %c0_73] : memref<50x32xf32, #tpu.memory_space<vmem>>, vector<1x32xf32>
    %c7 = arith.constant 7 : index
    %c0_74 = arith.constant 0 : index
    %125 = vector.load %arg6[%c7, %c0_74] : memref<128x32xf32, #tpu.memory_space<vmem>>, vector<1x32xf32>
    tpu.vector_store %arg6[%c7, %c0_74], %124 {strides = array<i32>} : memref<128x32xf32, #tpu.memory_space<vmem>>, vector<1x32xf32>,
    %126 = arith.index_cast %122 : i32 to index
    %c0_75 = arith.constant 0 : index
    %127 = vector.load %arg4[%126, %c0_75] : memref<40x32xf32, #tpu.memory_space<vmem>>, vector<1x32xf32>
    %c7_76 = arith.constant 7 : index
    %c0_77 = arith.constant 0 : index
    %128 = vector.load %arg7[%c7_76, %c0_77] : memref<128x32xf32, #tpu.memory_space<vmem>>, vector<1x32xf32>
    tpu.vector_store %arg7[%c7_76, %c0_77], %127 {strides = array<i32>} : memref<128x32xf32, #tpu.memory_space<vmem>>, vector<1x32xf32>,
    %c8_i32 = arith.constant 8 : i32
    %129 = arith.addi %0, %c8_i32 : i32
    %130 = arith.index_cast %129 : i32 to index
    %131 = memref.load %arg1[%130] : memref<256xi32, #tpu.memory_space<smem>>
    %c0_i32_78 = arith.constant 0 : i32
    %c49_i32_79 = arith.constant 49 : i32
    %132 = arith.maxsi %c0_i32_78, %131 : i32
    %133 = arith.minsi %c49_i32_79, %132 : i32
    %c8_i32_80 = arith.constant 8 : i32
    %134 = arith.addi %0, %c8_i32_80 : i32
    %135 = arith.index_cast %134 : i32 to index
    %136 = memref.load %arg2[%135] : memref<256xi32, #tpu.memory_space<smem>>
    %c0_i32_81 = arith.constant 0 : i32
    %c39_i32_82 = arith.constant 39 : i32
    %137 = arith.maxsi %c0_i32_81, %136 : i32
    %138 = arith.minsi %c39_i32_82, %137 : i32
    %139 = arith.index_cast %133 : i32 to index
    %c0_83 = arith.constant 0 : index
    %140 = vector.load %arg3[%139, %c0_83] : memref<50x32xf32, #tpu.memory_space<vmem>>, vector<1x32xf32>
    %c8 = arith.constant 8 : index
    %c0_84 = arith.constant 0 : index
    %141 = vector.load %arg6[%c8, %c0_84] : memref<128x32xf32, #tpu.memory_space<vmem>>, vector<1x32xf32>
    tpu.vector_store %arg6[%c8, %c0_84], %140 {strides = array<i32>} : memref<128x32xf32, #tpu.memory_space<vmem>>, vector<1x32xf32>,
    %142 = arith.index_cast %138 : i32 to index
    %c0_85 = arith.constant 0 : index
    %143 = vector.load %arg4[%142, %c0_85] : memref<40x32xf32, #tpu.memory_space<vmem>>, vector<1x32xf32>
    %c8_86 = arith.constant 8 : index
    %c0_87 = arith.constant 0 : index
    %144 = vector.load %arg7[%c8_86, %c0_87] : memref<128x32xf32, #tpu.memory_space<vmem>>, vector<1x32xf32>
    tpu.vector_store %arg7[%c8_86, %c0_87], %143 {strides = array<i32>} : memref<128x32xf32, #tpu.memory_space<vmem>>, vector<1x32xf32>,
    %c9_i32 = arith.constant 9 : i32
    %145 = arith.addi %0, %c9_i32 : i32
    %146 = arith.index_cast %145 : i32 to index
    %147 = memref.load %arg1[%146] : memref<256xi32, #tpu.memory_space<smem>>
    %c0_i32_88 = arith.constant 0 : i32
    %c49_i32_89 = arith.constant 49 : i32
    %148 = arith.maxsi %c0_i32_88, %147 : i32
    %149 = arith.minsi %c49_i32_89, %148 : i32
    %c9_i32_90 = arith.constant 9 : i32
    %150 = arith.addi %0, %c9_i32_90 : i32
    %151 = arith.index_cast %150 : i32 to index
    %152 = memref.load %arg2[%151] : memref<256xi32, #tpu.memory_space<smem>>
    %c0_i32_91 = arith.constant 0 : i32
    %c39_i32_92 = arith.constant 39 : i32
    %153 = arith.maxsi %c0_i32_91, %152 : i32
    %154 = arith.minsi %c39_i32_92, %153 : i32
    %155 = arith.index_cast %149 : i32 to index
    %c0_93 = arith.constant 0 : index
    %156 = vector.load %arg3[%155, %c0_93] : memref<50x32xf32, #tpu.memory_space<vmem>>, vector<1x32xf32>
    %c9 = arith.constant 9 : index
    %c0_94 = arith.constant 0 : index
    %157 = vector.load %arg6[%c9, %c0_94] : memref<128x32xf32, #tpu.memory_space<vmem>>, vector<1x32xf32>
    tpu.vector_store %arg6[%c9, %c0_94], %156 {strides = array<i32>} : memref<128x32xf32, #tpu.memory_space<vmem>>, vector<1x32xf32>,
    %158 = arith.index_cast %154 : i32 to index
    %c0_95 = arith.constant 0 : index
    %159 = vector.load %arg4[%158, %c0_95] : memref<40x32xf32, #tpu.memory_space<vmem>>, vector<1x32xf32>
    %c9_96 = arith.constant 9 : index
    %c0_97 = arith.constant 0 : index
    %160 = vector.load %arg7[%c9_96, %c0_97] : memref<128x32xf32, #tpu.memory_space<vmem>>, vector<1x32xf32>
    tpu.vector_store %arg7[%c9_96, %c0_97], %159 {strides = array<i32>} : memref<128x32xf32, #tpu.memory_space<vmem>>, vector<1x32xf32>,
    %c10_i32 = arith.constant 10 : i32
    %161 = arith.addi %0, %c10_i32 : i32
    %162 = arith.index_cast %161 : i32 to index
    %163 = memref.load %arg1[%162] : memref<256xi32, #tpu.memory_space<smem>>
    %c0_i32_98 = arith.constant 0 : i32
    %c49_i32_99 = arith.constant 49 : i32
    %164 = arith.maxsi %c0_i32_98, %163 : i32
    %165 = arith.minsi %c49_i32_99, %164 : i32
    %c10_i32_100 = arith.constant 10 : i32
    %166 = arith.addi %0, %c10_i32_100 : i32
    %167 = arith.index_cast %166 : i32 to index
    %168 = memref.load %arg2[%167] : memref<256xi32, #tpu.memory_space<smem>>
    %c0_i32_101 = arith.constant 0 : i32
    %c39_i32_102 = arith.constant 39 : i32
    %169 = arith.maxsi %c0_i32_101, %168 : i32
    %170 = arith.minsi %c39_i32_102, %169 : i32
    %171 = arith.index_cast %165 : i32 to index
    %c0_103 = arith.constant 0 : index
    %172 = vector.load %arg3[%171, %c0_103] : memref<50x32xf32, #tpu.memory_space<vmem>>, vector<1x32xf32>
    %c10 = arith.constant 10 : index
    %c0_104 = arith.constant 0 : index
    %173 = vector.load %arg6[%c10, %c0_104] : memref<128x32xf32, #tpu.memory_space<vmem>>, vector<1x32xf32>
    tpu.vector_store %arg6[%c10, %c0_104], %172 {strides = array<i32>} : memref<128x32xf32, #tpu.memory_space<vmem>>, vector<1x32xf32>,
    %174 = arith.index_cast %170 : i32 to index
    %c0_105 = arith.constant 0 : index
    %175 = vector.load %arg4[%174, %c0_105] : memref<40x32xf32, #tpu.memory_space<vmem>>, vector<1x32xf32>
    %c10_106 = arith.constant 10 : index
    %c0_107 = arith.constant 0 : index
    %176 = vector.load %arg7[%c10_106, %c0_107] : memref<128x32xf32, #tpu.memory_space<vmem>>, vector<1x32xf32>
    tpu.vector_store %arg7[%c10_106, %c0_107], %175 {strides = array<i32>} : memref<128x32xf32, #tpu.memory_space<vmem>>, vector<1x32xf32>,
    %c11_i32 = arith.constant 11 : i32
    %177 = arith.addi %0, %c11_i32 : i32
    %178 = arith.index_cast %177 : i32 to index
    %179 = memref.load %arg1[%178] : memref<256xi32, #tpu.memory_space<smem>>
    %c0_i32_108 = arith.constant 0 : i32
    %c49_i32_109 = arith.constant 49 : i32
    %180 = arith.maxsi %c0_i32_108, %179 : i32
    %181 = arith.minsi %c49_i32_109, %180 : i32
    %c11_i32_110 = arith.constant 11 : i32
    %182 = arith.addi %0, %c11_i32_110 : i32
    %183 = arith.index_cast %182 : i32 to index
    %184 = memref.load %arg2[%183] : memref<256xi32, #tpu.memory_space<smem>>
    %c0_i32_111 = arith.constant 0 : i32
    %c39_i32_112 = arith.constant 39 : i32
    %185 = arith.maxsi %c0_i32_111, %184 : i32
    %186 = arith.minsi %c39_i32_112, %185 : i32
    %187 = arith.index_cast %181 : i32 to index
    %c0_113 = arith.constant 0 : index
    %188 = vector.load %arg3[%187, %c0_113] : memref<50x32xf32, #tpu.memory_space<vmem>>, vector<1x32xf32>
    %c11 = arith.constant 11 : index
    %c0_114 = arith.constant 0 : index
    %189 = vector.load %arg6[%c11, %c0_114] : memref<128x32xf32, #tpu.memory_space<vmem>>, vector<1x32xf32>
    tpu.vector_store %arg6[%c11, %c0_114], %188 {strides = array<i32>} : memref<128x32xf32, #tpu.memory_space<vmem>>, vector<1x32xf32>,
    %190 = arith.index_cast %186 : i32 to index
    %c0_115 = arith.constant 0 : index
    %191 = vector.load %arg4[%190, %c0_115] : memref<40x32xf32, #tpu.memory_space<vmem>>, vector<1x32xf32>
    %c11_116 = arith.constant 11 : index
    %c0_117 = arith.constant 0 : index
    %192 = vector.load %arg7[%c11_116, %c0_117] : memref<128x32xf32, #tpu.memory_space<vmem>>, vector<1x32xf32>
    tpu.vector_store %arg7[%c11_116, %c0_117], %191 {strides = array<i32>} : memref<128x32xf32, #tpu.memory_space<vmem>>, vector<1x32xf32>,
    %c12_i32 = arith.constant 12 : i32
    %193 = arith.addi %0, %c12_i32 : i32
    %194 = arith.index_cast %193 : i32 to index
    %195 = memref.load %arg1[%194] : memref<256xi32, #tpu.memory_space<smem>>
    %c0_i32_118 = arith.constant 0 : i32
    %c49_i32_119 = arith.constant 49 : i32
    %196 = arith.maxsi %c0_i32_118, %195 : i32
    %197 = arith.minsi %c49_i32_119, %196 : i32
    %c12_i32_120 = arith.constant 12 : i32
    %198 = arith.addi %0, %c12_i32_120 : i32
    %199 = arith.index_cast %198 : i32 to index
    %200 = memref.load %arg2[%199] : memref<256xi32, #tpu.memory_space<smem>>
    %c0_i32_121 = arith.constant 0 : i32
    %c39_i32_122 = arith.constant 39 : i32
    %201 = arith.maxsi %c0_i32_121, %200 : i32
    %202 = arith.minsi %c39_i32_122, %201 : i32
    %203 = arith.index_cast %197 : i32 to index
    %c0_123 = arith.constant 0 : index
    %204 = vector.load %arg3[%203, %c0_123] : memref<50x32xf32, #tpu.memory_space<vmem>>, vector<1x32xf32>
    %c12 = arith.constant 12 : index
    %c0_124 = arith.constant 0 : index
    %205 = vector.load %arg6[%c12, %c0_124] : memref<128x32xf32, #tpu.memory_space<vmem>>, vector<1x32xf32>
    tpu.vector_store %arg6[%c12, %c0_124], %204 {strides = array<i32>} : memref<128x32xf32, #tpu.memory_space<vmem>>, vector<1x32xf32>,
    %206 = arith.index_cast %202 : i32 to index
    %c0_125 = arith.constant 0 : index
    %207 = vector.load %arg4[%206, %c0_125] : memref<40x32xf32, #tpu.memory_space<vmem>>, vector<1x32xf32>
    %c12_126 = arith.constant 12 : index
    %c0_127 = arith.constant 0 : index
    %208 = vector.load %arg7[%c12_126, %c0_127] : memref<128x32xf32, #tpu.memory_space<vmem>>, vector<1x32xf32>
    tpu.vector_store %arg7[%c12_126, %c0_127], %207 {strides = array<i32>} : memref<128x32xf32, #tpu.memory_space<vmem>>, vector<1x32xf32>,
    %c13_i32 = arith.constant 13 : i32
    %209 = arith.addi %0, %c13_i32 : i32
    %210 = arith.index_cast %209 : i32 to index
    %211 = memref.load %arg1[%210] : memref<256xi32, #tpu.memory_space<smem>>
    %c0_i32_128 = arith.constant 0 : i32
    %c49_i32_129 = arith.constant 49 : i32
    %212 = arith.maxsi %c0_i32_128, %211 : i32
    %213 = arith.minsi %c49_i32_129, %212 : i32
    %c13_i32_130 = arith.constant 13 : i32
    %214 = arith.addi %0, %c13_i32_130 : i32
    %215 = arith.index_cast %214 : i32 to index
    %216 = memref.load %arg2[%215] : memref<256xi32, #tpu.memory_space<smem>>
    %c0_i32_131 = arith.constant 0 : i32
    %c39_i32_132 = arith.constant 39 : i32
    %217 = arith.maxsi %c0_i32_131, %216 : i32
    %218 = arith.minsi %c39_i32_132, %217 : i32
    %219 = arith.index_cast %213 : i32 to index
    %c0_133 = arith.constant 0 : index
    %220 = vector.load %arg3[%219, %c0_133] : memref<50x32xf32, #tpu.memory_space<vmem>>, vector<1x32xf32>
    %c13 = arith.constant 13 : index
    %c0_134 = arith.constant 0 : index
    %221 = vector.load %arg6[%c13, %c0_134] : memref<128x32xf32, #tpu.memory_space<vmem>>, vector<1x32xf32>
    tpu.vector_store %arg6[%c13, %c0_134], %220 {strides = array<i32>} : memref<128x32xf32, #tpu.memory_space<vmem>>, vector<1x32xf32>,
    %222 = arith.index_cast %218 : i32 to index
    %c0_135 = arith.constant 0 : index
    %223 = vector.load %arg4[%222, %c0_135] : memref<40x32xf32, #tpu.memory_space<vmem>>, vector<1x32xf32>
    %c13_136 = arith.constant 13 : index
    %c0_137 = arith.constant 0 : index
    %224 = vector.load %arg7[%c13_136, %c0_137] : memref<128x32xf32, #tpu.memory_space<vmem>>, vector<1x32xf32>
    tpu.vector_store %arg7[%c13_136, %c0_137], %223 {strides = array<i32>} : memref<128x32xf32, #tpu.memory_space<vmem>>, vector<1x32xf32>,
    %c14_i32 = arith.constant 14 : i32
    %225 = arith.addi %0, %c14_i32 : i32
    %226 = arith.index_cast %225 : i32 to index
    %227 = memref.load %arg1[%226] : memref<256xi32, #tpu.memory_space<smem>>
    %c0_i32_138 = arith.constant 0 : i32
    %c49_i32_139 = arith.constant 49 : i32
    %228 = arith.maxsi %c0_i32_138, %227 : i32
    %229 = arith.minsi %c49_i32_139, %228 : i32
    %c14_i32_140 = arith.constant 14 : i32
    %230 = arith.addi %0, %c14_i32_140 : i32
    %231 = arith.index_cast %230 : i32 to index
    %232 = memref.load %arg2[%231] : memref<256xi32, #tpu.memory_space<smem>>
    %c0_i32_141 = arith.constant 0 : i32
    %c39_i32_142 = arith.constant 39 : i32
    %233 = arith.maxsi %c0_i32_141, %232 : i32
    %234 = arith.minsi %c39_i32_142, %233 : i32
    %235 = arith.index_cast %229 : i32 to index
    %c0_143 = arith.constant 0 : index
    %236 = vector.load %arg3[%235, %c0_143] : memref<50x32xf32, #tpu.memory_space<vmem>>, vector<1x32xf32>
    %c14 = arith.constant 14 : index
    %c0_144 = arith.constant 0 : index
    %237 = vector.load %arg6[%c14, %c0_144] : memref<128x32xf32, #tpu.memory_space<vmem>>, vector<1x32xf32>
    tpu.vector_store %arg6[%c14, %c0_144], %236 {strides = array<i32>} : memref<128x32xf32, #tpu.memory_space<vmem>>, vector<1x32xf32>,
    %238 = arith.index_cast %234 : i32 to index
    %c0_145 = arith.constant 0 : index
    %239 = vector.load %arg4[%238, %c0_145] : memref<40x32xf32, #tpu.memory_space<vmem>>, vector<1x32xf32>
    %c14_146 = arith.constant 14 : index
    %c0_147 = arith.constant 0 : index
    %240 = vector.load %arg7[%c14_146, %c0_147] : memref<128x32xf32, #tpu.memory_space<vmem>>, vector<1x32xf32>
    tpu.vector_store %arg7[%c14_146, %c0_147], %239 {strides = array<i32>} : memref<128x32xf32, #tpu.memory_space<vmem>>, vector<1x32xf32>,
    %c15_i32 = arith.constant 15 : i32
    %241 = arith.addi %0, %c15_i32 : i32
    %242 = arith.index_cast %241 : i32 to index
    %243 = memref.load %arg1[%242] : memref<256xi32, #tpu.memory_space<smem>>
    %c0_i32_148 = arith.constant 0 : i32
    %c49_i32_149 = arith.constant 49 : i32
    %244 = arith.maxsi %c0_i32_148, %243 : i32
    %245 = arith.minsi %c49_i32_149, %244 : i32
    %c15_i32_150 = arith.constant 15 : i32
    %246 = arith.addi %0, %c15_i32_150 : i32
    %247 = arith.index_cast %246 : i32 to index
    %248 = memref.load %arg2[%247] : memref<256xi32, #tpu.memory_space<smem>>
    %c0_i32_151 = arith.constant 0 : i32
    %c39_i32_152 = arith.constant 39 : i32
    %249 = arith.maxsi %c0_i32_151, %248 : i32
    %250 = arith.minsi %c39_i32_152, %249 : i32
    %251 = arith.index_cast %245 : i32 to index
    %c0_153 = arith.constant 0 : index
    %252 = vector.load %arg3[%251, %c0_153] : memref<50x32xf32, #tpu.memory_space<vmem>>, vector<1x32xf32>
    %c15 = arith.constant 15 : index
    %c0_154 = arith.constant 0 : index
    %253 = vector.load %arg6[%c15, %c0_154] : memref<128x32xf32, #tpu.memory_space<vmem>>, vector<1x32xf32>
    tpu.vector_store %arg6[%c15, %c0_154], %252 {strides = array<i32>} : memref<128x32xf32, #tpu.memory_space<vmem>>, vector<1x32xf32>,
    %254 = arith.index_cast %250 : i32 to index
    %c0_155 = arith.constant 0 : index
    %255 = vector.load %arg4[%254, %c0_155] : memref<40x32xf32, #tpu.memory_space<vmem>>, vector<1x32xf32>
    %c15_156 = arith.constant 15 : index
    %c0_157 = arith.constant 0 : index
    %256 = vector.load %arg7[%c15_156, %c0_157] : memref<128x32xf32, #tpu.memory_space<vmem>>, vector<1x32xf32>
    tpu.vector_store %arg7[%c15_156, %c0_157], %255 {strides = array<i32>} : memref<128x32xf32, #tpu.memory_space<vmem>>, vector<1x32xf32>,
    %c16_i32 = arith.constant 16 : i32
    %257 = arith.addi %0, %c16_i32 : i32
    %258 = arith.index_cast %257 : i32 to index
    %259 = memref.load %arg1[%258] : memref<256xi32, #tpu.memory_space<smem>>
    %c0_i32_158 = arith.constant 0 : i32
    %c49_i32_159 = arith.constant 49 : i32
    %260 = arith.maxsi %c0_i32_158, %259 : i32
    %261 = arith.minsi %c49_i32_159, %260 : i32
    %c16_i32_160 = arith.constant 16 : i32
    %262 = arith.addi %0, %c16_i32_160 : i32
    %263 = arith.index_cast %262 : i32 to index
    %264 = memref.load %arg2[%263] : memref<256xi32, #tpu.memory_space<smem>>
    %c0_i32_161 = arith.constant 0 : i32
    %c39_i32_162 = arith.constant 39 : i32
    %265 = arith.maxsi %c0_i32_161, %264 : i32
    %266 = arith.minsi %c39_i32_162, %265 : i32
    %267 = arith.index_cast %261 : i32 to index
    %c0_163 = arith.constant 0 : index
    %268 = vector.load %arg3[%267, %c0_163] : memref<50x32xf32, #tpu.memory_space<vmem>>, vector<1x32xf32>
    %c16 = arith.constant 16 : index
    %c0_164 = arith.constant 0 : index
    %269 = vector.load %arg6[%c16, %c0_164] : memref<128x32xf32, #tpu.memory_space<vmem>>, vector<1x32xf32>
    tpu.vector_store %arg6[%c16, %c0_164], %268 {strides = array<i32>} : memref<128x32xf32, #tpu.memory_space<vmem>>, vector<1x32xf32>,
    %270 = arith.index_cast %266 : i32 to index
    %c0_165 = arith.constant 0 : index
    %271 = vector.load %arg4[%270, %c0_165] : memref<40x32xf32, #tpu.memory_space<vmem>>, vector<1x32xf32>
    %c16_166 = arith.constant 16 : index
    %c0_167 = arith.constant 0 : index
    %272 = vector.load %arg7[%c16_166, %c0_167] : memref<128x32xf32, #tpu.memory_space<vmem>>, vector<1x32xf32>
    tpu.vector_store %arg7[%c16_166, %c0_167], %271 {strides = array<i32>} : memref<128x32xf32, #tpu.memory_space<vmem>>, vector<1x32xf32>,
    %c17_i32 = arith.constant 17 : i32
    %273 = arith.addi %0, %c17_i32 : i32
    %274 = arith.index_cast %273 : i32 to index
    %275 = memref.load %arg1[%274] : memref<256xi32, #tpu.memory_space<smem>>
    %c0_i32_168 = arith.constant 0 : i32
    %c49_i32_169 = arith.constant 49 : i32
    %276 = arith.maxsi %c0_i32_168, %275 : i32
    %277 = arith.minsi %c49_i32_169, %276 : i32
    %c17_i32_170 = arith.constant 17 : i32
    %278 = arith.addi %0, %c17_i32_170 : i32
    %279 = arith.index_cast %278 : i32 to index
    %280 = memref.load %arg2[%279] : memref<256xi32, #tpu.memory_space<smem>>
    %c0_i32_171 = arith.constant 0 : i32
    %c39_i32_172 = arith.constant 39 : i32
    %281 = arith.maxsi %c0_i32_171, %280 : i32
    %282 = arith.minsi %c39_i32_172, %281 : i32
    %283 = arith.index_cast %277 : i32 to index
    %c0_173 = arith.constant 0 : index
    %284 = vector.load %arg3[%283, %c0_173] : memref<50x32xf32, #tpu.memory_space<vmem>>, vector<1x32xf32>
    %c17 = arith.constant 17 : index
    %c0_174 = arith.constant 0 : index
    %285 = vector.load %arg6[%c17, %c0_174] : memref<128x32xf32, #tpu.memory_space<vmem>>, vector<1x32xf32>
    tpu.vector_store %arg6[%c17, %c0_174], %284 {strides = array<i32>} : memref<128x32xf32, #tpu.memory_space<vmem>>, vector<1x32xf32>,
    %286 = arith.index_cast %282 : i32 to index
    %c0_175 = arith.constant 0 : index
    %287 = vector.load %arg4[%286, %c0_175] : memref<40x32xf32, #tpu.memory_space<vmem>>, vector<1x32xf32>
    %c17_176 = arith.constant 17 : index
    %c0_177 = arith.constant 0 : index
    %288 = vector.load %arg7[%c17_176, %c0_177] : memref<128x32xf32, #tpu.memory_space<vmem>>, vector<1x32xf32>
    tpu.vector_store %arg7[%c17_176, %c0_177], %287 {strides = array<i32>} : memref<128x32xf32, #tpu.memory_space<vmem>>, vector<1x32xf32>,
    %c18_i32 = arith.constant 18 : i32
    %289 = arith.addi %0, %c18_i32 : i32
    %290 = arith.index_cast %289 : i32 to index
    %291 = memref.load %arg1[%290] : memref<256xi32, #tpu.memory_space<smem>>
    %c0_i32_178 = arith.constant 0 : i32
    %c49_i32_179 = arith.constant 49 : i32
    %292 = arith.maxsi %c0_i32_178, %291 : i32
    %293 = arith.minsi %c49_i32_179, %292 : i32
    %c18_i32_180 = arith.constant 18 : i32
    %294 = arith.addi %0, %c18_i32_180 : i32
    %295 = arith.index_cast %294 : i32 to index
    %296 = memref.load %arg2[%295] : memref<256xi32, #tpu.memory_space<smem>>
    %c0_i32_181 = arith.constant 0 : i32
    %c39_i32_182 = arith.constant 39 : i32
    %297 = arith.maxsi %c0_i32_181, %296 : i32
    %298 = arith.minsi %c39_i32_182, %297 : i32
    %299 = arith.index_cast %293 : i32 to index
    %c0_183 = arith.constant 0 : index
    %300 = vector.load %arg3[%299, %c0_183] : memref<50x32xf32, #tpu.memory_space<vmem>>, vector<1x32xf32>
    %c18 = arith.constant 18 : index
    %c0_184 = arith.constant 0 : index
    %301 = vector.load %arg6[%c18, %c0_184] : memref<128x32xf32, #tpu.memory_space<vmem>>, vector<1x32xf32>
    tpu.vector_store %arg6[%c18, %c0_184], %300 {strides = array<i32>} : memref<128x32xf32, #tpu.memory_space<vmem>>, vector<1x32xf32>,
    %302 = arith.index_cast %298 : i32 to index
    %c0_185 = arith.constant 0 : index
    %303 = vector.load %arg4[%302, %c0_185] : memref<40x32xf32, #tpu.memory_space<vmem>>, vector<1x32xf32>
    %c18_186 = arith.constant 18 : index
    %c0_187 = arith.constant 0 : index
    %304 = vector.load %arg7[%c18_186, %c0_187] : memref<128x32xf32, #tpu.memory_space<vmem>>, vector<1x32xf32>
    tpu.vector_store %arg7[%c18_186, %c0_187], %303 {strides = array<i32>} : memref<128x32xf32, #tpu.memory_space<vmem>>, vector<1x32xf32>,
    %c19_i32 = arith.constant 19 : i32
    %305 = arith.addi %0, %c19_i32 : i32
    %306 = arith.index_cast %305 : i32 to index
    %307 = memref.load %arg1[%306] : memref<256xi32, #tpu.memory_space<smem>>
    %c0_i32_188 = arith.constant 0 : i32
    %c49_i32_189 = arith.constant 49 : i32
    %308 = arith.maxsi %c0_i32_188, %307 : i32
    %309 = arith.minsi %c49_i32_189, %308 : i32
    %c19_i32_190 = arith.constant 19 : i32
    %310 = arith.addi %0, %c19_i32_190 : i32
    %311 = arith.index_cast %310 : i32 to index
    %312 = memref.load %arg2[%311] : memref<256xi32, #tpu.memory_space<smem>>
    %c0_i32_191 = arith.constant 0 : i32
    %c39_i32_192 = arith.constant 39 : i32
    %313 = arith.maxsi %c0_i32_191, %312 : i32
    %314 = arith.minsi %c39_i32_192, %313 : i32
    %315 = arith.index_cast %309 : i32 to index
    %c0_193 = arith.constant 0 : index
    %316 = vector.load %arg3[%315, %c0_193] : memref<50x32xf32, #tpu.memory_space<vmem>>, vector<1x32xf32>
    %c19 = arith.constant 19 : index
    %c0_194 = arith.constant 0 : index
    %317 = vector.load %arg6[%c19, %c0_194] : memref<128x32xf32, #tpu.memory_space<vmem>>, vector<1x32xf32>
    tpu.vector_store %arg6[%c19, %c0_194], %316 {strides = array<i32>} : memref<128x32xf32, #tpu.memory_space<vmem>>, vector<1x32xf32>,
    %318 = arith.index_cast %314 : i32 to index
    %c0_195 = arith.constant 0 : index
    %319 = vector.load %arg4[%318, %c0_195] : memref<40x32xf32, #tpu.memory_space<vmem>>, vector<1x32xf32>
    %c19_196 = arith.constant 19 : index
    %c0_197 = arith.constant 0 : index
    %320 = vector.load %arg7[%c19_196, %c0_197] : memref<128x32xf32, #tpu.memory_space<vmem>>, vector<1x32xf32>
    tpu.vector_store %arg7[%c19_196, %c0_197], %319 {strides = array<i32>} : memref<128x32xf32, #tpu.memory_space<vmem>>, vector<1x32xf32>,
    %c20_i32 = arith.constant 20 : i32
    %321 = arith.addi %0, %c20_i32 : i32
    %322 = arith.index_cast %321 : i32 to index
    %323 = memref.load %arg1[%322] : memref<256xi32, #tpu.memory_space<smem>>
    %c0_i32_198 = arith.constant 0 : i32
    %c49_i32_199 = arith.constant 49 : i32
    %324 = arith.maxsi %c0_i32_198, %323 : i32
    %325 = arith.minsi %c49_i32_199, %324 : i32
    %c20_i32_200 = arith.constant 20 : i32
    %326 = arith.addi %0, %c20_i32_200 : i32
    %327 = arith.index_cast %326 : i32 to index
    %328 = memref.load %arg2[%327] : memref<256xi32, #tpu.memory_space<smem>>
    %c0_i32_201 = arith.constant 0 : i32
    %c39_i32_202 = arith.constant 39 : i32
    %329 = arith.maxsi %c0_i32_201, %328 : i32
    %330 = arith.minsi %c39_i32_202, %329 : i32
    %331 = arith.index_cast %325 : i32 to index
    %c0_203 = arith.constant 0 : index
    %332 = vector.load %arg3[%331, %c0_203] : memref<50x32xf32, #tpu.memory_space<vmem>>, vector<1x32xf32>
    %c20 = arith.constant 20 : index
    %c0_204 = arith.constant 0 : index
    %333 = vector.load %arg6[%c20, %c0_204] : memref<128x32xf32, #tpu.memory_space<vmem>>, vector<1x32xf32>
    tpu.vector_store %arg6[%c20, %c0_204], %332 {strides = array<i32>} : memref<128x32xf32, #tpu.memory_space<vmem>>, vector<1x32xf32>,
    %334 = arith.index_cast %330 : i32 to index
    %c0_205 = arith.constant 0 : index
    %335 = vector.load %arg4[%334, %c0_205] : memref<40x32xf32, #tpu.memory_space<vmem>>, vector<1x32xf32>
    %c20_206 = arith.constant 20 : index
    %c0_207 = arith.constant 0 : index
    %336 = vector.load %arg7[%c20_206, %c0_207] : memref<128x32xf32, #tpu.memory_space<vmem>>, vector<1x32xf32>
    tpu.vector_store %arg7[%c20_206, %c0_207], %335 {strides = array<i32>} : memref<128x32xf32, #tpu.memory_space<vmem>>, vector<1x32xf32>,
    %c21_i32 = arith.constant 21 : i32
    %337 = arith.addi %0, %c21_i32 : i32
    %338 = arith.index_cast %337 : i32 to index
    %339 = memref.load %arg1[%338] : memref<256xi32, #tpu.memory_space<smem>>
    %c0_i32_208 = arith.constant 0 : i32
    %c49_i32_209 = arith.constant 49 : i32
    %340 = arith.maxsi %c0_i32_208, %339 : i32
    %341 = arith.minsi %c49_i32_209, %340 : i32
    %c21_i32_210 = arith.constant 21 : i32
    %342 = arith.addi %0, %c21_i32_210 : i32
    %343 = arith.index_cast %342 : i32 to index
    %344 = memref.load %arg2[%343] : memref<256xi32, #tpu.memory_space<smem>>
    %c0_i32_211 = arith.constant 0 : i32
    %c39_i32_212 = arith.constant 39 : i32
    %345 = arith.maxsi %c0_i32_211, %344 : i32
    %346 = arith.minsi %c39_i32_212, %345 : i32
    %347 = arith.index_cast %341 : i32 to index
    %c0_213 = arith.constant 0 : index
    %348 = vector.load %arg3[%347, %c0_213] : memref<50x32xf32, #tpu.memory_space<vmem>>, vector<1x32xf32>
    %c21 = arith.constant 21 : index
    %c0_214 = arith.constant 0 : index
    %349 = vector.load %arg6[%c21, %c0_214] : memref<128x32xf32, #tpu.memory_space<vmem>>, vector<1x32xf32>
    tpu.vector_store %arg6[%c21, %c0_214], %348 {strides = array<i32>} : memref<128x32xf32, #tpu.memory_space<vmem>>, vector<1x32xf32>,
    %350 = arith.index_cast %346 : i32 to index
    %c0_215 = arith.constant 0 : index
    %351 = vector.load %arg4[%350, %c0_215] : memref<40x32xf32, #tpu.memory_space<vmem>>, vector<1x32xf32>
    %c21_216 = arith.constant 21 : index
    %c0_217 = arith.constant 0 : index
    %352 = vector.load %arg7[%c21_216, %c0_217] : memref<128x32xf32, #tpu.memory_space<vmem>>, vector<1x32xf32>
    tpu.vector_store %arg7[%c21_216, %c0_217], %351 {strides = array<i32>} : memref<128x32xf32, #tpu.memory_space<vmem>>, vector<1x32xf32>,
    %c22_i32 = arith.constant 22 : i32
    %353 = arith.addi %0, %c22_i32 : i32
    %354 = arith.index_cast %353 : i32 to index
    %355 = memref.load %arg1[%354] : memref<256xi32, #tpu.memory_space<smem>>
    %c0_i32_218 = arith.constant 0 : i32
    %c49_i32_219 = arith.constant 49 : i32
    %356 = arith.maxsi %c0_i32_218, %355 : i32
    %357 = arith.minsi %c49_i32_219, %356 : i32
    %c22_i32_220 = arith.constant 22 : i32
    %358 = arith.addi %0, %c22_i32_220 : i32
    %359 = arith.index_cast %358 : i32 to index
    %360 = memref.load %arg2[%359] : memref<256xi32, #tpu.memory_space<smem>>
    %c0_i32_221 = arith.constant 0 : i32
    %c39_i32_222 = arith.constant 39 : i32
    %361 = arith.maxsi %c0_i32_221, %360 : i32
    %362 = arith.minsi %c39_i32_222, %361 : i32
    %363 = arith.index_cast %357 : i32 to index
    %c0_223 = arith.constant 0 : index
    %364 = vector.load %arg3[%363, %c0_223] : memref<50x32xf32, #tpu.memory_space<vmem>>, vector<1x32xf32>
    %c22 = arith.constant 22 : index
    %c0_224 = arith.constant 0 : index
    %365 = vector.load %arg6[%c22, %c0_224] : memref<128x32xf32, #tpu.memory_space<vmem>>, vector<1x32xf32>
    tpu.vector_store %arg6[%c22, %c0_224], %364 {strides = array<i32>} : memref<128x32xf32, #tpu.memory_space<vmem>>, vector<1x32xf32>,
    %366 = arith.index_cast %362 : i32 to index
    %c0_225 = arith.constant 0 : index
    %367 = vector.load %arg4[%366, %c0_225] : memref<40x32xf32, #tpu.memory_space<vmem>>, vector<1x32xf32>
    %c22_226 = arith.constant 22 : index
    %c0_227 = arith.constant 0 : index
    %368 = vector.load %arg7[%c22_226, %c0_227] : memref<128x32xf32, #tpu.memory_space<vmem>>, vector<1x32xf32>
    tpu.vector_store %arg7[%c22_226, %c0_227], %367 {strides = array<i32>} : memref<128x32xf32, #tpu.memory_space<vmem>>, vector<1x32xf32>,
    %c23_i32 = arith.constant 23 : i32
    %369 = arith.addi %0, %c23_i32 : i32
    %370 = arith.index_cast %369 : i32 to index
    %371 = memref.load %arg1[%370] : memref<256xi32, #tpu.memory_space<smem>>
    %c0_i32_228 = arith.constant 0 : i32
    %c49_i32_229 = arith.constant 49 : i32
    %372 = arith.maxsi %c0_i32_228, %371 : i32
    %373 = arith.minsi %c49_i32_229, %372 : i32
    %c23_i32_230 = arith.constant 23 : i32
    %374 = arith.addi %0, %c23_i32_230 : i32
    %375 = arith.index_cast %374 : i32 to index
    %376 = memref.load %arg2[%375] : memref<256xi32, #tpu.memory_space<smem>>
    %c0_i32_231 = arith.constant 0 : i32
    %c39_i32_232 = arith.constant 39 : i32
    %377 = arith.maxsi %c0_i32_231, %376 : i32
    %378 = arith.minsi %c39_i32_232, %377 : i32
    %379 = arith.index_cast %373 : i32 to index
    %c0_233 = arith.constant 0 : index
    %380 = vector.load %arg3[%379, %c0_233] : memref<50x32xf32, #tpu.memory_space<vmem>>, vector<1x32xf32>
    %c23 = arith.constant 23 : index
    %c0_234 = arith.constant 0 : index
    %381 = vector.load %arg6[%c23, %c0_234] : memref<128x32xf32, #tpu.memory_space<vmem>>, vector<1x32xf32>
    tpu.vector_store %arg6[%c23, %c0_234], %380 {strides = array<i32>} : memref<128x32xf32, #tpu.memory_space<vmem>>, vector<1x32xf32>,
    %382 = arith.index_cast %378 : i32 to index
    %c0_235 = arith.constant 0 : index
    %383 = vector.load %arg4[%382, %c0_235] : memref<40x32xf32, #tpu.memory_space<vmem>>, vector<1x32xf32>
    %c23_236 = arith.constant 23 : index
    %c0_237 = arith.constant 0 : index
    %384 = vector.load %arg7[%c23_236, %c0_237] : memref<128x32xf32, #tpu.memory_space<vmem>>, vector<1x32xf32>
    tpu.vector_store %arg7[%c23_236, %c0_237], %383 {strides = array<i32>} : memref<128x32xf32, #tpu.memory_space<vmem>>, vector<1x32xf32>,
    %c24_i32 = arith.constant 24 : i32
    %385 = arith.addi %0, %c24_i32 : i32
    %386 = arith.index_cast %385 : i32 to index
    %387 = memref.load %arg1[%386] : memref<256xi32, #tpu.memory_space<smem>>
    %c0_i32_238 = arith.constant 0 : i32
    %c49_i32_239 = arith.constant 49 : i32
    %388 = arith.maxsi %c0_i32_238, %387 : i32
    %389 = arith.minsi %c49_i32_239, %388 : i32
    %c24_i32_240 = arith.constant 24 : i32
    %390 = arith.addi %0, %c24_i32_240 : i32
    %391 = arith.index_cast %390 : i32 to index
    %392 = memref.load %arg2[%391] : memref<256xi32, #tpu.memory_space<smem>>
    %c0_i32_241 = arith.constant 0 : i32
    %c39_i32_242 = arith.constant 39 : i32
    %393 = arith.maxsi %c0_i32_241, %392 : i32
    %394 = arith.minsi %c39_i32_242, %393 : i32
    %395 = arith.index_cast %389 : i32 to index
    %c0_243 = arith.constant 0 : index
    %396 = vector.load %arg3[%395, %c0_243] : memref<50x32xf32, #tpu.memory_space<vmem>>, vector<1x32xf32>
    %c24 = arith.constant 24 : index
    %c0_244 = arith.constant 0 : index
    %397 = vector.load %arg6[%c24, %c0_244] : memref<128x32xf32, #tpu.memory_space<vmem>>, vector<1x32xf32>
    tpu.vector_store %arg6[%c24, %c0_244], %396 {strides = array<i32>} : memref<128x32xf32, #tpu.memory_space<vmem>>, vector<1x32xf32>,
    %398 = arith.index_cast %394 : i32 to index
    %c0_245 = arith.constant 0 : index
    %399 = vector.load %arg4[%398, %c0_245] : memref<40x32xf32, #tpu.memory_space<vmem>>, vector<1x32xf32>
    %c24_246 = arith.constant 24 : index
    %c0_247 = arith.constant 0 : index
    %400 = vector.load %arg7[%c24_246, %c0_247] : memref<128x32xf32, #tpu.memory_space<vmem>>, vector<1x32xf32>
    tpu.vector_store %arg7[%c24_246, %c0_247], %399 {strides = array<i32>} : memref<128x32xf32, #tpu.memory_space<vmem>>, vector<1x32xf32>,
    %c25_i32 = arith.constant 25 : i32
    %401 = arith.addi %0, %c25_i32 : i32
    %402 = arith.index_cast %401 : i32 to index
    %403 = memref.load %arg1[%402] : memref<256xi32, #tpu.memory_space<smem>>
    %c0_i32_248 = arith.constant 0 : i32
    %c49_i32_249 = arith.constant 49 : i32
    %404 = arith.maxsi %c0_i32_248, %403 : i32
    %405 = arith.minsi %c49_i32_249, %404 : i32
    %c25_i32_250 = arith.constant 25 : i32
    %406 = arith.addi %0, %c25_i32_250 : i32
    %407 = arith.index_cast %406 : i32 to index
    %408 = memref.load %arg2[%407] : memref<256xi32, #tpu.memory_space<smem>>
    %c0_i32_251 = arith.constant 0 : i32
    %c39_i32_252 = arith.constant 39 : i32
    %409 = arith.maxsi %c0_i32_251, %408 : i32
    %410 = arith.minsi %c39_i32_252, %409 : i32
    %411 = arith.index_cast %405 : i32 to index
    %c0_253 = arith.constant 0 : index
    %412 = vector.load %arg3[%411, %c0_253] : memref<50x32xf32, #tpu.memory_space<vmem>>, vector<1x32xf32>
    %c25 = arith.constant 25 : index
    %c0_254 = arith.constant 0 : index
    %413 = vector.load %arg6[%c25, %c0_254] : memref<128x32xf32, #tpu.memory_space<vmem>>, vector<1x32xf32>
    tpu.vector_store %arg6[%c25, %c0_254], %412 {strides = array<i32>} : memref<128x32xf32, #tpu.memory_space<vmem>>, vector<1x32xf32>,
    %414 = arith.index_cast %410 : i32 to index
    %c0_255 = arith.constant 0 : index
    %415 = vector.load %arg4[%414, %c0_255] : memref<40x32xf32, #tpu.memory_space<vmem>>, vector<1x32xf32>
    %c25_256 = arith.constant 25 : index
    %c0_257 = arith.constant 0 : index
    %416 = vector.load %arg7[%c25_256, %c0_257] : memref<128x32xf32, #tpu.memory_space<vmem>>, vector<1x32xf32>
    tpu.vector_store %arg7[%c25_256, %c0_257], %415 {strides = array<i32>} : memref<128x32xf32, #tpu.memory_space<vmem>>, vector<1x32xf32>,
    %c26_i32 = arith.constant 26 : i32
    %417 = arith.addi %0, %c26_i32 : i32
    %418 = arith.index_cast %417 : i32 to index
    %419 = memref.load %arg1[%418] : memref<256xi32, #tpu.memory_space<smem>>
    %c0_i32_258 = arith.constant 0 : i32
    %c49_i32_259 = arith.constant 49 : i32
    %420 = arith.maxsi %c0_i32_258, %419 : i32
    %421 = arith.minsi %c49_i32_259, %420 : i32
    %c26_i32_260 = arith.constant 26 : i32
    %422 = arith.addi %0, %c26_i32_260 : i32
    %423 = arith.index_cast %422 : i32 to index
    %424 = memref.load %arg2[%423] : memref<256xi32, #tpu.memory_space<smem>>
    %c0_i32_261 = arith.constant 0 : i32
    %c39_i32_262 = arith.constant 39 : i32
    %425 = arith.maxsi %c0_i32_261, %424 : i32
    %426 = arith.minsi %c39_i32_262, %425 : i32
    %427 = arith.index_cast %421 : i32 to index
    %c0_263 = arith.constant 0 : index
    %428 = vector.load %arg3[%427, %c0_263] : memref<50x32xf32, #tpu.memory_space<vmem>>, vector<1x32xf32>
    %c26 = arith.constant 26 : index
    %c0_264 = arith.constant 0 : index
    %429 = vector.load %arg6[%c26, %c0_264] : memref<128x32xf32, #tpu.memory_space<vmem>>, vector<1x32xf32>
    tpu.vector_store %arg6[%c26, %c0_264], %428 {strides = array<i32>} : memref<128x32xf32, #tpu.memory_space<vmem>>, vector<1x32xf32>,
    %430 = arith.index_cast %426 : i32 to index
    %c0_265 = arith.constant 0 : index
    %431 = vector.load %arg4[%430, %c0_265] : memref<40x32xf32, #tpu.memory_space<vmem>>, vector<1x32xf32>
    %c26_266 = arith.constant 26 : index
    %c0_267 = arith.constant 0 : index
    %432 = vector.load %arg7[%c26_266, %c0_267] : memref<128x32xf32, #tpu.memory_space<vmem>>, vector<1x32xf32>
    tpu.vector_store %arg7[%c26_266, %c0_267], %431 {strides = array<i32>} : memref<128x32xf32, #tpu.memory_space<vmem>>, vector<1x32xf32>,
    %c27_i32 = arith.constant 27 : i32
    %433 = arith.addi %0, %c27_i32 : i32
    %434 = arith.index_cast %433 : i32 to index
    %435 = memref.load %arg1[%434] : memref<256xi32, #tpu.memory_space<smem>>
    %c0_i32_268 = arith.constant 0 : i32
    %c49_i32_269 = arith.constant 49 : i32
    %436 = arith.maxsi %c0_i32_268, %435 : i32
    %437 = arith.minsi %c49_i32_269, %436 : i32
    %c27_i32_270 = arith.constant 27 : i32
    %438 = arith.addi %0, %c27_i32_270 : i32
    %439 = arith.index_cast %438 : i32 to index
    %440 = memref.load %arg2[%439] : memref<256xi32, #tpu.memory_space<smem>>
    %c0_i32_271 = arith.constant 0 : i32
    %c39_i32_272 = arith.constant 39 : i32
    %441 = arith.maxsi %c0_i32_271, %440 : i32
    %442 = arith.minsi %c39_i32_272, %441 : i32
    %443 = arith.index_cast %437 : i32 to index
    %c0_273 = arith.constant 0 : index
    %444 = vector.load %arg3[%443, %c0_273] : memref<50x32xf32, #tpu.memory_space<vmem>>, vector<1x32xf32>
    %c27 = arith.constant 27 : index
    %c0_274 = arith.constant 0 : index
    %445 = vector.load %arg6[%c27, %c0_274] : memref<128x32xf32, #tpu.memory_space<vmem>>, vector<1x32xf32>
    tpu.vector_store %arg6[%c27, %c0_274], %444 {strides = array<i32>} : memref<128x32xf32, #tpu.memory_space<vmem>>, vector<1x32xf32>,
    %446 = arith.index_cast %442 : i32 to index
    %c0_275 = arith.constant 0 : index
    %447 = vector.load %arg4[%446, %c0_275] : memref<40x32xf32, #tpu.memory_space<vmem>>, vector<1x32xf32>
    %c27_276 = arith.constant 27 : index
    %c0_277 = arith.constant 0 : index
    %448 = vector.load %arg7[%c27_276, %c0_277] : memref<128x32xf32, #tpu.memory_space<vmem>>, vector<1x32xf32>
    tpu.vector_store %arg7[%c27_276, %c0_277], %447 {strides = array<i32>} : memref<128x32xf32, #tpu.memory_space<vmem>>, vector<1x32xf32>,
    %c28_i32 = arith.constant 28 : i32
    %449 = arith.addi %0, %c28_i32 : i32
    %450 = arith.index_cast %449 : i32 to index
    %451 = memref.load %arg1[%450] : memref<256xi32, #tpu.memory_space<smem>>
    %c0_i32_278 = arith.constant 0 : i32
    %c49_i32_279 = arith.constant 49 : i32
    %452 = arith.maxsi %c0_i32_278, %451 : i32
    %453 = arith.minsi %c49_i32_279, %452 : i32
    %c28_i32_280 = arith.constant 28 : i32
    %454 = arith.addi %0, %c28_i32_280 : i32
    %455 = arith.index_cast %454 : i32 to index
    %456 = memref.load %arg2[%455] : memref<256xi32, #tpu.memory_space<smem>>
    %c0_i32_281 = arith.constant 0 : i32
    %c39_i32_282 = arith.constant 39 : i32
    %457 = arith.maxsi %c0_i32_281, %456 : i32
    %458 = arith.minsi %c39_i32_282, %457 : i32
    %459 = arith.index_cast %453 : i32 to index
    %c0_283 = arith.constant 0 : index
    %460 = vector.load %arg3[%459, %c0_283] : memref<50x32xf32, #tpu.memory_space<vmem>>, vector<1x32xf32>
    %c28 = arith.constant 28 : index
    %c0_284 = arith.constant 0 : index
    %461 = vector.load %arg6[%c28, %c0_284] : memref<128x32xf32, #tpu.memory_space<vmem>>, vector<1x32xf32>
    tpu.vector_store %arg6[%c28, %c0_284], %460 {strides = array<i32>} : memref<128x32xf32, #tpu.memory_space<vmem>>, vector<1x32xf32>,
    %462 = arith.index_cast %458 : i32 to index
    %c0_285 = arith.constant 0 : index
    %463 = vector.load %arg4[%462, %c0_285] : memref<40x32xf32, #tpu.memory_space<vmem>>, vector<1x32xf32>
    %c28_286 = arith.constant 28 : index
    %c0_287 = arith.constant 0 : index
    %464 = vector.load %arg7[%c28_286, %c0_287] : memref<128x32xf32, #tpu.memory_space<vmem>>, vector<1x32xf32>
    tpu.vector_store %arg7[%c28_286, %c0_287], %463 {strides = array<i32>} : memref<128x32xf32, #tpu.memory_space<vmem>>, vector<1x32xf32>,
    %c29_i32 = arith.constant 29 : i32
    %465 = arith.addi %0, %c29_i32 : i32
    %466 = arith.index_cast %465 : i32 to index
    %467 = memref.load %arg1[%466] : memref<256xi32, #tpu.memory_space<smem>>
    %c0_i32_288 = arith.constant 0 : i32
    %c49_i32_289 = arith.constant 49 : i32
    %468 = arith.maxsi %c0_i32_288, %467 : i32
    %469 = arith.minsi %c49_i32_289, %468 : i32
    %c29_i32_290 = arith.constant 29 : i32
    %470 = arith.addi %0, %c29_i32_290 : i32
    %471 = arith.index_cast %470 : i32 to index
    %472 = memref.load %arg2[%471] : memref<256xi32, #tpu.memory_space<smem>>
    %c0_i32_291 = arith.constant 0 : i32
    %c39_i32_292 = arith.constant 39 : i32
    %473 = arith.maxsi %c0_i32_291, %472 : i32
    %474 = arith.minsi %c39_i32_292, %473 : i32
    %475 = arith.index_cast %469 : i32 to index
    %c0_293 = arith.constant 0 : index
    %476 = vector.load %arg3[%475, %c0_293] : memref<50x32xf32, #tpu.memory_space<vmem>>, vector<1x32xf32>
    %c29 = arith.constant 29 : index
    %c0_294 = arith.constant 0 : index
    %477 = vector.load %arg6[%c29, %c0_294] : memref<128x32xf32, #tpu.memory_space<vmem>>, vector<1x32xf32>
    tpu.vector_store %arg6[%c29, %c0_294], %476 {strides = array<i32>} : memref<128x32xf32, #tpu.memory_space<vmem>>, vector<1x32xf32>,
    %478 = arith.index_cast %474 : i32 to index
    %c0_295 = arith.constant 0 : index
    %479 = vector.load %arg4[%478, %c0_295] : memref<40x32xf32, #tpu.memory_space<vmem>>, vector<1x32xf32>
    %c29_296 = arith.constant 29 : index
    %c0_297 = arith.constant 0 : index
    %480 = vector.load %arg7[%c29_296, %c0_297] : memref<128x32xf32, #tpu.memory_space<vmem>>, vector<1x32xf32>
    tpu.vector_store %arg7[%c29_296, %c0_297], %479 {strides = array<i32>} : memref<128x32xf32, #tpu.memory_space<vmem>>, vector<1x32xf32>,
    %c30_i32 = arith.constant 30 : i32
    %481 = arith.addi %0, %c30_i32 : i32
    %482 = arith.index_cast %481 : i32 to index
    %483 = memref.load %arg1[%482] : memref<256xi32, #tpu.memory_space<smem>>
    %c0_i32_298 = arith.constant 0 : i32
    %c49_i32_299 = arith.constant 49 : i32
    %484 = arith.maxsi %c0_i32_298, %483 : i32
    %485 = arith.minsi %c49_i32_299, %484 : i32
    %c30_i32_300 = arith.constant 30 : i32
    %486 = arith.addi %0, %c30_i32_300 : i32
    %487 = arith.index_cast %486 : i32 to index
    %488 = memref.load %arg2[%487] : memref<256xi32, #tpu.memory_space<smem>>
    %c0_i32_301 = arith.constant 0 : i32
    %c39_i32_302 = arith.constant 39 : i32
    %489 = arith.maxsi %c0_i32_301, %488 : i32
    %490 = arith.minsi %c39_i32_302, %489 : i32
    %491 = arith.index_cast %485 : i32 to index
    %c0_303 = arith.constant 0 : index
    %492 = vector.load %arg3[%491, %c0_303] : memref<50x32xf32, #tpu.memory_space<vmem>>, vector<1x32xf32>
    %c30 = arith.constant 30 : index
    %c0_304 = arith.constant 0 : index
    %493 = vector.load %arg6[%c30, %c0_304] : memref<128x32xf32, #tpu.memory_space<vmem>>, vector<1x32xf32>
    tpu.vector_store %arg6[%c30, %c0_304], %492 {strides = array<i32>} : memref<128x32xf32, #tpu.memory_space<vmem>>, vector<1x32xf32>,
    %494 = arith.index_cast %490 : i32 to index
    %c0_305 = arith.constant 0 : index
    %495 = vector.load %arg4[%494, %c0_305] : memref<40x32xf32, #tpu.memory_space<vmem>>, vector<1x32xf32>
    %c30_306 = arith.constant 30 : index
    %c0_307 = arith.constant 0 : index
    %496 = vector.load %arg7[%c30_306, %c0_307] : memref<128x32xf32, #tpu.memory_space<vmem>>, vector<1x32xf32>
    tpu.vector_store %arg7[%c30_306, %c0_307], %495 {strides = array<i32>} : memref<128x32xf32, #tpu.memory_space<vmem>>, vector<1x32xf32>,
    %c31_i32 = arith.constant 31 : i32
    %497 = arith.addi %0, %c31_i32 : i32
    %498 = arith.index_cast %497 : i32 to index
    %499 = memref.load %arg1[%498] : memref<256xi32, #tpu.memory_space<smem>>
    %c0_i32_308 = arith.constant 0 : i32
    %c49_i32_309 = arith.constant 49 : i32
    %500 = arith.maxsi %c0_i32_308, %499 : i32
    %501 = arith.minsi %c49_i32_309, %500 : i32
    %c31_i32_310 = arith.constant 31 : i32
    %502 = arith.addi %0, %c31_i32_310 : i32
    %503 = arith.index_cast %502 : i32 to index
    %504 = memref.load %arg2[%503] : memref<256xi32, #tpu.memory_space<smem>>
    %c0_i32_311 = arith.constant 0 : i32
    %c39_i32_312 = arith.constant 39 : i32
    %505 = arith.maxsi %c0_i32_311, %504 : i32
    %506 = arith.minsi %c39_i32_312, %505 : i32
    %507 = arith.index_cast %501 : i32 to index
    %c0_313 = arith.constant 0 : index
    %508 = vector.load %arg3[%507, %c0_313] : memref<50x32xf32, #tpu.memory_space<vmem>>, vector<1x32xf32>
    %c31 = arith.constant 31 : index
    %c0_314 = arith.constant 0 : index
    %509 = vector.load %arg6[%c31, %c0_314] : memref<128x32xf32, #tpu.memory_space<vmem>>, vector<1x32xf32>
    tpu.vector_store %arg6[%c31, %c0_314], %508 {strides = array<i32>} : memref<128x32xf32, #tpu.memory_space<vmem>>, vector<1x32xf32>,
    %510 = arith.index_cast %506 : i32 to index
    %c0_315 = arith.constant 0 : index
    %511 = vector.load %arg4[%510, %c0_315] : memref<40x32xf32, #tpu.memory_space<vmem>>, vector<1x32xf32>
    %c31_316 = arith.constant 31 : index
    %c0_317 = arith.constant 0 : index
    %512 = vector.load %arg7[%c31_316, %c0_317] : memref<128x32xf32, #tpu.memory_space<vmem>>, vector<1x32xf32>
    tpu.vector_store %arg7[%c31_316, %c0_317], %511 {strides = array<i32>} : memref<128x32xf32, #tpu.memory_space<vmem>>, vector<1x32xf32>,
    %c32_i32 = arith.constant 32 : i32
    %513 = arith.addi %0, %c32_i32 : i32
    %514 = arith.index_cast %513 : i32 to index
    %515 = memref.load %arg1[%514] : memref<256xi32, #tpu.memory_space<smem>>
    %c0_i32_318 = arith.constant 0 : i32
    %c49_i32_319 = arith.constant 49 : i32
    %516 = arith.maxsi %c0_i32_318, %515 : i32
    %517 = arith.minsi %c49_i32_319, %516 : i32
    %c32_i32_320 = arith.constant 32 : i32
    %518 = arith.addi %0, %c32_i32_320 : i32
    %519 = arith.index_cast %518 : i32 to index
    %520 = memref.load %arg2[%519] : memref<256xi32, #tpu.memory_space<smem>>
    %c0_i32_321 = arith.constant 0 : i32
    %c39_i32_322 = arith.constant 39 : i32
    %521 = arith.maxsi %c0_i32_321, %520 : i32
    %522 = arith.minsi %c39_i32_322, %521 : i32
    %523 = arith.index_cast %517 : i32 to index
    %c0_323 = arith.constant 0 : index
    %524 = vector.load %arg3[%523, %c0_323] : memref<50x32xf32, #tpu.memory_space<vmem>>, vector<1x32xf32>
    %c32 = arith.constant 32 : index
    %c0_324 = arith.constant 0 : index
    %525 = vector.load %arg6[%c32, %c0_324] : memref<128x32xf32, #tpu.memory_space<vmem>>, vector<1x32xf32>
    tpu.vector_store %arg6[%c32, %c0_324], %524 {strides = array<i32>} : memref<128x32xf32, #tpu.memory_space<vmem>>, vector<1x32xf32>,
    %526 = arith.index_cast %522 : i32 to index
    %c0_325 = arith.constant 0 : index
    %527 = vector.load %arg4[%526, %c0_325] : memref<40x32xf32, #tpu.memory_space<vmem>>, vector<1x32xf32>
    %c32_326 = arith.constant 32 : index
    %c0_327 = arith.constant 0 : index
    %528 = vector.load %arg7[%c32_326, %c0_327] : memref<128x32xf32, #tpu.memory_space<vmem>>, vector<1x32xf32>
    tpu.vector_store %arg7[%c32_326, %c0_327], %527 {strides = array<i32>} : memref<128x32xf32, #tpu.memory_space<vmem>>, vector<1x32xf32>,
    %c33_i32 = arith.constant 33 : i32
    %529 = arith.addi %0, %c33_i32 : i32
    %530 = arith.index_cast %529 : i32 to index
    %531 = memref.load %arg1[%530] : memref<256xi32, #tpu.memory_space<smem>>
    %c0_i32_328 = arith.constant 0 : i32
    %c49_i32_329 = arith.constant 49 : i32
    %532 = arith.maxsi %c0_i32_328, %531 : i32
    %533 = arith.minsi %c49_i32_329, %532 : i32
    %c33_i32_330 = arith.constant 33 : i32
    %534 = arith.addi %0, %c33_i32_330 : i32
    %535 = arith.index_cast %534 : i32 to index
    %536 = memref.load %arg2[%535] : memref<256xi32, #tpu.memory_space<smem>>
    %c0_i32_331 = arith.constant 0 : i32
    %c39_i32_332 = arith.constant 39 : i32
    %537 = arith.maxsi %c0_i32_331, %536 : i32
    %538 = arith.minsi %c39_i32_332, %537 : i32
    %539 = arith.index_cast %533 : i32 to index
    %c0_333 = arith.constant 0 : index
    %540 = vector.load %arg3[%539, %c0_333] : memref<50x32xf32, #tpu.memory_space<vmem>>, vector<1x32xf32>
    %c33 = arith.constant 33 : index
    %c0_334 = arith.constant 0 : index
    %541 = vector.load %arg6[%c33, %c0_334] : memref<128x32xf32, #tpu.memory_space<vmem>>, vector<1x32xf32>
    tpu.vector_store %arg6[%c33, %c0_334], %540 {strides = array<i32>} : memref<128x32xf32, #tpu.memory_space<vmem>>, vector<1x32xf32>,
    %542 = arith.index_cast %538 : i32 to index
    %c0_335 = arith.constant 0 : index
    %543 = vector.load %arg4[%542, %c0_335] : memref<40x32xf32, #tpu.memory_space<vmem>>, vector<1x32xf32>
    %c33_336 = arith.constant 33 : index
    %c0_337 = arith.constant 0 : index
    %544 = vector.load %arg7[%c33_336, %c0_337] : memref<128x32xf32, #tpu.memory_space<vmem>>, vector<1x32xf32>
    tpu.vector_store %arg7[%c33_336, %c0_337], %543 {strides = array<i32>} : memref<128x32xf32, #tpu.memory_space<vmem>>, vector<1x32xf32>,
    %c34_i32 = arith.constant 34 : i32
    %545 = arith.addi %0, %c34_i32 : i32
    %546 = arith.index_cast %545 : i32 to index
    %547 = memref.load %arg1[%546] : memref<256xi32, #tpu.memory_space<smem>>
    %c0_i32_338 = arith.constant 0 : i32
    %c49_i32_339 = arith.constant 49 : i32
    %548 = arith.maxsi %c0_i32_338, %547 : i32
    %549 = arith.minsi %c49_i32_339, %548 : i32
    %c34_i32_340 = arith.constant 34 : i32
    %550 = arith.addi %0, %c34_i32_340 : i32
    %551 = arith.index_cast %550 : i32 to index
    %552 = memref.load %arg2[%551] : memref<256xi32, #tpu.memory_space<smem>>
    %c0_i32_341 = arith.constant 0 : i32
    %c39_i32_342 = arith.constant 39 : i32
    %553 = arith.maxsi %c0_i32_341, %552 : i32
    %554 = arith.minsi %c39_i32_342, %553 : i32
    %555 = arith.index_cast %549 : i32 to index
    %c0_343 = arith.constant 0 : index
    %556 = vector.load %arg3[%555, %c0_343] : memref<50x32xf32, #tpu.memory_space<vmem>>, vector<1x32xf32>
    %c34 = arith.constant 34 : index
    %c0_344 = arith.constant 0 : index
    %557 = vector.load %arg6[%c34, %c0_344] : memref<128x32xf32, #tpu.memory_space<vmem>>, vector<1x32xf32>
    tpu.vector_store %arg6[%c34, %c0_344], %556 {strides = array<i32>} : memref<128x32xf32, #tpu.memory_space<vmem>>, vector<1x32xf32>,
    %558 = arith.index_cast %554 : i32 to index
    %c0_345 = arith.constant 0 : index
    %559 = vector.load %arg4[%558, %c0_345] : memref<40x32xf32, #tpu.memory_space<vmem>>, vector<1x32xf32>
    %c34_346 = arith.constant 34 : index
    %c0_347 = arith.constant 0 : index
    %560 = vector.load %arg7[%c34_346, %c0_347] : memref<128x32xf32, #tpu.memory_space<vmem>>, vector<1x32xf32>
    tpu.vector_store %arg7[%c34_346, %c0_347], %559 {strides = array<i32>} : memref<128x32xf32, #tpu.memory_space<vmem>>, vector<1x32xf32>,
    %c35_i32 = arith.constant 35 : i32
    %561 = arith.addi %0, %c35_i32 : i32
    %562 = arith.index_cast %561 : i32 to index
    %563 = memref.load %arg1[%562] : memref<256xi32, #tpu.memory_space<smem>>
    %c0_i32_348 = arith.constant 0 : i32
    %c49_i32_349 = arith.constant 49 : i32
    %564 = arith.maxsi %c0_i32_348, %563 : i32
    %565 = arith.minsi %c49_i32_349, %564 : i32
    %c35_i32_350 = arith.constant 35 : i32
    %566 = arith.addi %0, %c35_i32_350 : i32
    %567 = arith.index_cast %566 : i32 to index
    %568 = memref.load %arg2[%567] : memref<256xi32, #tpu.memory_space<smem>>
    %c0_i32_351 = arith.constant 0 : i32
    %c39_i32_352 = arith.constant 39 : i32
    %569 = arith.maxsi %c0_i32_351, %568 : i32
    %570 = arith.minsi %c39_i32_352, %569 : i32
    %571 = arith.index_cast %565 : i32 to index
    %c0_353 = arith.constant 0 : index
    %572 = vector.load %arg3[%571, %c0_353] : memref<50x32xf32, #tpu.memory_space<vmem>>, vector<1x32xf32>
    %c35 = arith.constant 35 : index
    %c0_354 = arith.constant 0 : index
    %573 = vector.load %arg6[%c35, %c0_354] : memref<128x32xf32, #tpu.memory_space<vmem>>, vector<1x32xf32>
    tpu.vector_store %arg6[%c35, %c0_354], %572 {strides = array<i32>} : memref<128x32xf32, #tpu.memory_space<vmem>>, vector<1x32xf32>,
    %574 = arith.index_cast %570 : i32 to index
    %c0_355 = arith.constant 0 : index
    %575 = vector.load %arg4[%574, %c0_355] : memref<40x32xf32, #tpu.memory_space<vmem>>, vector<1x32xf32>
    %c35_356 = arith.constant 35 : index
    %c0_357 = arith.constant 0 : index
    %576 = vector.load %arg7[%c35_356, %c0_357] : memref<128x32xf32, #tpu.memory_space<vmem>>, vector<1x32xf32>
    tpu.vector_store %arg7[%c35_356, %c0_357], %575 {strides = array<i32>} : memref<128x32xf32, #tpu.memory_space<vmem>>, vector<1x32xf32>,
    %c36_i32 = arith.constant 36 : i32
    %577 = arith.addi %0, %c36_i32 : i32
    %578 = arith.index_cast %577 : i32 to index
    %579 = memref.load %arg1[%578] : memref<256xi32, #tpu.memory_space<smem>>
    %c0_i32_358 = arith.constant 0 : i32
    %c49_i32_359 = arith.constant 49 : i32
    %580 = arith.maxsi %c0_i32_358, %579 : i32
    %581 = arith.minsi %c49_i32_359, %580 : i32
    %c36_i32_360 = arith.constant 36 : i32
    %582 = arith.addi %0, %c36_i32_360 : i32
    %583 = arith.index_cast %582 : i32 to index
    %584 = memref.load %arg2[%583] : memref<256xi32, #tpu.memory_space<smem>>
    %c0_i32_361 = arith.constant 0 : i32
    %c39_i32_362 = arith.constant 39 : i32
    %585 = arith.maxsi %c0_i32_361, %584 : i32
    %586 = arith.minsi %c39_i32_362, %585 : i32
    %587 = arith.index_cast %581 : i32 to index
    %c0_363 = arith.constant 0 : index
    %588 = vector.load %arg3[%587, %c0_363] : memref<50x32xf32, #tpu.memory_space<vmem>>, vector<1x32xf32>
    %c36 = arith.constant 36 : index
    %c0_364 = arith.constant 0 : index
    %589 = vector.load %arg6[%c36, %c0_364] : memref<128x32xf32, #tpu.memory_space<vmem>>, vector<1x32xf32>
    tpu.vector_store %arg6[%c36, %c0_364], %588 {strides = array<i32>} : memref<128x32xf32, #tpu.memory_space<vmem>>, vector<1x32xf32>,
    %590 = arith.index_cast %586 : i32 to index
    %c0_365 = arith.constant 0 : index
    %591 = vector.load %arg4[%590, %c0_365] : memref<40x32xf32, #tpu.memory_space<vmem>>, vector<1x32xf32>
    %c36_366 = arith.constant 36 : index
    %c0_367 = arith.constant 0 : index
    %592 = vector.load %arg7[%c36_366, %c0_367] : memref<128x32xf32, #tpu.memory_space<vmem>>, vector<1x32xf32>
    tpu.vector_store %arg7[%c36_366, %c0_367], %591 {strides = array<i32>} : memref<128x32xf32, #tpu.memory_space<vmem>>, vector<1x32xf32>,
    %c37_i32 = arith.constant 37 : i32
    %593 = arith.addi %0, %c37_i32 : i32
    %594 = arith.index_cast %593 : i32 to index
    %595 = memref.load %arg1[%594] : memref<256xi32, #tpu.memory_space<smem>>
    %c0_i32_368 = arith.constant 0 : i32
    %c49_i32_369 = arith.constant 49 : i32
    %596 = arith.maxsi %c0_i32_368, %595 : i32
    %597 = arith.minsi %c49_i32_369, %596 : i32
    %c37_i32_370 = arith.constant 37 : i32
    %598 = arith.addi %0, %c37_i32_370 : i32
    %599 = arith.index_cast %598 : i32 to index
    %600 = memref.load %arg2[%599] : memref<256xi32, #tpu.memory_space<smem>>
    %c0_i32_371 = arith.constant 0 : i32
    %c39_i32_372 = arith.constant 39 : i32
    %601 = arith.maxsi %c0_i32_371, %600 : i32
    %602 = arith.minsi %c39_i32_372, %601 : i32
    %603 = arith.index_cast %597 : i32 to index
    %c0_373 = arith.constant 0 : index
    %604 = vector.load %arg3[%603, %c0_373] : memref<50x32xf32, #tpu.memory_space<vmem>>, vector<1x32xf32>
    %c37 = arith.constant 37 : index
    %c0_374 = arith.constant 0 : index
    %605 = vector.load %arg6[%c37, %c0_374] : memref<128x32xf32, #tpu.memory_space<vmem>>, vector<1x32xf32>
    tpu.vector_store %arg6[%c37, %c0_374], %604 {strides = array<i32>} : memref<128x32xf32, #tpu.memory_space<vmem>>, vector<1x32xf32>,
    %606 = arith.index_cast %602 : i32 to index
    %c0_375 = arith.constant 0 : index
    %607 = vector.load %arg4[%606, %c0_375] : memref<40x32xf32, #tpu.memory_space<vmem>>, vector<1x32xf32>
    %c37_376 = arith.constant 37 : index
    %c0_377 = arith.constant 0 : index
    %608 = vector.load %arg7[%c37_376, %c0_377] : memref<128x32xf32, #tpu.memory_space<vmem>>, vector<1x32xf32>
    tpu.vector_store %arg7[%c37_376, %c0_377], %607 {strides = array<i32>} : memref<128x32xf32, #tpu.memory_space<vmem>>, vector<1x32xf32>,
    %c38_i32 = arith.constant 38 : i32
    %609 = arith.addi %0, %c38_i32 : i32
    %610 = arith.index_cast %609 : i32 to index
    %611 = memref.load %arg1[%610] : memref<256xi32, #tpu.memory_space<smem>>
    %c0_i32_378 = arith.constant 0 : i32
    %c49_i32_379 = arith.constant 49 : i32
    %612 = arith.maxsi %c0_i32_378, %611 : i32
    %613 = arith.minsi %c49_i32_379, %612 : i32
    %c38_i32_380 = arith.constant 38 : i32
    %614 = arith.addi %0, %c38_i32_380 : i32
    %615 = arith.index_cast %614 : i32 to index
    %616 = memref.load %arg2[%615] : memref<256xi32, #tpu.memory_space<smem>>
    %c0_i32_381 = arith.constant 0 : i32
    %c39_i32_382 = arith.constant 39 : i32
    %617 = arith.maxsi %c0_i32_381, %616 : i32
    %618 = arith.minsi %c39_i32_382, %617 : i32
    %619 = arith.index_cast %613 : i32 to index
    %c0_383 = arith.constant 0 : index
    %620 = vector.load %arg3[%619, %c0_383] : memref<50x32xf32, #tpu.memory_space<vmem>>, vector<1x32xf32>
    %c38 = arith.constant 38 : index
    %c0_384 = arith.constant 0 : index
    %621 = vector.load %arg6[%c38, %c0_384] : memref<128x32xf32, #tpu.memory_space<vmem>>, vector<1x32xf32>
    tpu.vector_store %arg6[%c38, %c0_384], %620 {strides = array<i32>} : memref<128x32xf32, #tpu.memory_space<vmem>>, vector<1x32xf32>,
    %622 = arith.index_cast %618 : i32 to index
    %c0_385 = arith.constant 0 : index
    %623 = vector.load %arg4[%622, %c0_385] : memref<40x32xf32, #tpu.memory_space<vmem>>, vector<1x32xf32>
    %c38_386 = arith.constant 38 : index
    %c0_387 = arith.constant 0 : index
    %624 = vector.load %arg7[%c38_386, %c0_387] : memref<128x32xf32, #tpu.memory_space<vmem>>, vector<1x32xf32>
    tpu.vector_store %arg7[%c38_386, %c0_387], %623 {strides = array<i32>} : memref<128x32xf32, #tpu.memory_space<vmem>>, vector<1x32xf32>,
    %c39_i32_388 = arith.constant 39 : i32
    %625 = arith.addi %0, %c39_i32_388 : i32
    %626 = arith.index_cast %625 : i32 to index
    %627 = memref.load %arg1[%626] : memref<256xi32, #tpu.memory_space<smem>>
    %c0_i32_389 = arith.constant 0 : i32
    %c49_i32_390 = arith.constant 49 : i32
    %628 = arith.maxsi %c0_i32_389, %627 : i32
    %629 = arith.minsi %c49_i32_390, %628 : i32
    %c39_i32_391 = arith.constant 39 : i32
    %630 = arith.addi %0, %c39_i32_391 : i32
    %631 = arith.index_cast %630 : i32 to index
    %632 = memref.load %arg2[%631] : memref<256xi32, #tpu.memory_space<smem>>
    %c0_i32_392 = arith.constant 0 : i32
    %c39_i32_393 = arith.constant 39 : i32
    %633 = arith.maxsi %c0_i32_392, %632 : i32
    %634 = arith.minsi %c39_i32_393, %633 : i32
    %635 = arith.index_cast %629 : i32 to index
    %c0_394 = arith.constant 0 : index
    %636 = vector.load %arg3[%635, %c0_394] : memref<50x32xf32, #tpu.memory_space<vmem>>, vector<1x32xf32>
    %c39 = arith.constant 39 : index
    %c0_395 = arith.constant 0 : index
    %637 = vector.load %arg6[%c39, %c0_395] : memref<128x32xf32, #tpu.memory_space<vmem>>, vector<1x32xf32>
    tpu.vector_store %arg6[%c39, %c0_395], %636 {strides = array<i32>} : memref<128x32xf32, #tpu.memory_space<vmem>>, vector<1x32xf32>,
    %638 = arith.index_cast %634 : i32 to index
    %c0_396 = arith.constant 0 : index
    %639 = vector.load %arg4[%638, %c0_396] : memref<40x32xf32, #tpu.memory_space<vmem>>, vector<1x32xf32>
    %c39_397 = arith.constant 39 : index
    %c0_398 = arith.constant 0 : index
    %640 = vector.load %arg7[%c39_397, %c0_398] : memref<128x32xf32, #tpu.memory_space<vmem>>, vector<1x32xf32>
    tpu.vector_store %arg7[%c39_397, %c0_398], %639 {strides = array<i32>} : memref<128x32xf32, #tpu.memory_space<vmem>>, vector<1x32xf32>,
    %c40_i32 = arith.constant 40 : i32
    %641 = arith.addi %0, %c40_i32 : i32
    %642 = arith.index_cast %641 : i32 to index
    %643 = memref.load %arg1[%642] : memref<256xi32, #tpu.memory_space<smem>>
    %c0_i32_399 = arith.constant 0 : i32
    %c49_i32_400 = arith.constant 49 : i32
    %644 = arith.maxsi %c0_i32_399, %643 : i32
    %645 = arith.minsi %c49_i32_400, %644 : i32
    %c40_i32_401 = arith.constant 40 : i32
    %646 = arith.addi %0, %c40_i32_401 : i32
    %647 = arith.index_cast %646 : i32 to index
    %648 = memref.load %arg2[%647] : memref<256xi32, #tpu.memory_space<smem>>
    %c0_i32_402 = arith.constant 0 : i32
    %c39_i32_403 = arith.constant 39 : i32
    %649 = arith.maxsi %c0_i32_402, %648 : i32
    %650 = arith.minsi %c39_i32_403, %649 : i32
    %651 = arith.index_cast %645 : i32 to index
    %c0_404 = arith.constant 0 : index
    %652 = vector.load %arg3[%651, %c0_404] : memref<50x32xf32, #tpu.memory_space<vmem>>, vector<1x32xf32>
    %c40 = arith.constant 40 : index
    %c0_405 = arith.constant 0 : index
    %653 = vector.load %arg6[%c40, %c0_405] : memref<128x32xf32, #tpu.memory_space<vmem>>, vector<1x32xf32>
    tpu.vector_store %arg6[%c40, %c0_405], %652 {strides = array<i32>} : memref<128x32xf32, #tpu.memory_space<vmem>>, vector<1x32xf32>,
    %654 = arith.index_cast %650 : i32 to index
    %c0_406 = arith.constant 0 : index
    %655 = vector.load %arg4[%654, %c0_406] : memref<40x32xf32, #tpu.memory_space<vmem>>, vector<1x32xf32>
    %c40_407 = arith.constant 40 : index
    %c0_408 = arith.constant 0 : index
    %656 = vector.load %arg7[%c40_407, %c0_408] : memref<128x32xf32, #tpu.memory_space<vmem>>, vector<1x32xf32>
    tpu.vector_store %arg7[%c40_407, %c0_408], %655 {strides = array<i32>} : memref<128x32xf32, #tpu.memory_space<vmem>>, vector<1x32xf32>,
    %c41_i32 = arith.constant 41 : i32
    %657 = arith.addi %0, %c41_i32 : i32
    %658 = arith.index_cast %657 : i32 to index
    %659 = memref.load %arg1[%658] : memref<256xi32, #tpu.memory_space<smem>>
    %c0_i32_409 = arith.constant 0 : i32
    %c49_i32_410 = arith.constant 49 : i32
    %660 = arith.maxsi %c0_i32_409, %659 : i32
    %661 = arith.minsi %c49_i32_410, %660 : i32
    %c41_i32_411 = arith.constant 41 : i32
    %662 = arith.addi %0, %c41_i32_411 : i32
    %663 = arith.index_cast %662 : i32 to index
    %664 = memref.load %arg2[%663] : memref<256xi32, #tpu.memory_space<smem>>
    %c0_i32_412 = arith.constant 0 : i32
    %c39_i32_413 = arith.constant 39 : i32
    %665 = arith.maxsi %c0_i32_412, %664 : i32
    %666 = arith.minsi %c39_i32_413, %665 : i32
    %667 = arith.index_cast %661 : i32 to index
    %c0_414 = arith.constant 0 : index
    %668 = vector.load %arg3[%667, %c0_414] : memref<50x32xf32, #tpu.memory_space<vmem>>, vector<1x32xf32>
    %c41 = arith.constant 41 : index
    %c0_415 = arith.constant 0 : index
    %669 = vector.load %arg6[%c41, %c0_415] : memref<128x32xf32, #tpu.memory_space<vmem>>, vector<1x32xf32>
    tpu.vector_store %arg6[%c41, %c0_415], %668 {strides = array<i32>} : memref<128x32xf32, #tpu.memory_space<vmem>>, vector<1x32xf32>,
    %670 = arith.index_cast %666 : i32 to index
    %c0_416 = arith.constant 0 : index
    %671 = vector.load %arg4[%670, %c0_416] : memref<40x32xf32, #tpu.memory_space<vmem>>, vector<1x32xf32>
    %c41_417 = arith.constant 41 : index
    %c0_418 = arith.constant 0 : index
    %672 = vector.load %arg7[%c41_417, %c0_418] : memref<128x32xf32, #tpu.memory_space<vmem>>, vector<1x32xf32>
    tpu.vector_store %arg7[%c41_417, %c0_418], %671 {strides = array<i32>} : memref<128x32xf32, #tpu.memory_space<vmem>>, vector<1x32xf32>,
    %c42_i32 = arith.constant 42 : i32
    %673 = arith.addi %0, %c42_i32 : i32
    %674 = arith.index_cast %673 : i32 to index
    %675 = memref.load %arg1[%674] : memref<256xi32, #tpu.memory_space<smem>>
    %c0_i32_419 = arith.constant 0 : i32
    %c49_i32_420 = arith.constant 49 : i32
    %676 = arith.maxsi %c0_i32_419, %675 : i32
    %677 = arith.minsi %c49_i32_420, %676 : i32
    %c42_i32_421 = arith.constant 42 : i32
    %678 = arith.addi %0, %c42_i32_421 : i32
    %679 = arith.index_cast %678 : i32 to index
    %680 = memref.load %arg2[%679] : memref<256xi32, #tpu.memory_space<smem>>
    %c0_i32_422 = arith.constant 0 : i32
    %c39_i32_423 = arith.constant 39 : i32
    %681 = arith.maxsi %c0_i32_422, %680 : i32
    %682 = arith.minsi %c39_i32_423, %681 : i32
    %683 = arith.index_cast %677 : i32 to index
    %c0_424 = arith.constant 0 : index
    %684 = vector.load %arg3[%683, %c0_424] : memref<50x32xf32, #tpu.memory_space<vmem>>, vector<1x32xf32>
    %c42 = arith.constant 42 : index
    %c0_425 = arith.constant 0 : index
    %685 = vector.load %arg6[%c42, %c0_425] : memref<128x32xf32, #tpu.memory_space<vmem>>, vector<1x32xf32>
    tpu.vector_store %arg6[%c42, %c0_425], %684 {strides = array<i32>} : memref<128x32xf32, #tpu.memory_space<vmem>>, vector<1x32xf32>,
    %686 = arith.index_cast %682 : i32 to index
    %c0_426 = arith.constant 0 : index
    %687 = vector.load %arg4[%686, %c0_426] : memref<40x32xf32, #tpu.memory_space<vmem>>, vector<1x32xf32>
    %c42_427 = arith.constant 42 : index
    %c0_428 = arith.constant 0 : index
    %688 = vector.load %arg7[%c42_427, %c0_428] : memref<128x32xf32, #tpu.memory_space<vmem>>, vector<1x32xf32>
    tpu.vector_store %arg7[%c42_427, %c0_428], %687 {strides = array<i32>} : memref<128x32xf32, #tpu.memory_space<vmem>>, vector<1x32xf32>,
    %c43_i32 = arith.constant 43 : i32
    %689 = arith.addi %0, %c43_i32 : i32
    %690 = arith.index_cast %689 : i32 to index
    %691 = memref.load %arg1[%690] : memref<256xi32, #tpu.memory_space<smem>>
    %c0_i32_429 = arith.constant 0 : i32
    %c49_i32_430 = arith.constant 49 : i32
    %692 = arith.maxsi %c0_i32_429, %691 : i32
    %693 = arith.minsi %c49_i32_430, %692 : i32
    %c43_i32_431 = arith.constant 43 : i32
    %694 = arith.addi %0, %c43_i32_431 : i32
    %695 = arith.index_cast %694 : i32 to index
    %696 = memref.load %arg2[%695] : memref<256xi32, #tpu.memory_space<smem>>
    %c0_i32_432 = arith.constant 0 : i32
    %c39_i32_433 = arith.constant 39 : i32
    %697 = arith.maxsi %c0_i32_432, %696 : i32
    %698 = arith.minsi %c39_i32_433, %697 : i32
    %699 = arith.index_cast %693 : i32 to index
    %c0_434 = arith.constant 0 : index
    %700 = vector.load %arg3[%699, %c0_434] : memref<50x32xf32, #tpu.memory_space<vmem>>, vector<1x32xf32>
    %c43 = arith.constant 43 : index
    %c0_435 = arith.constant 0 : index
    %701 = vector.load %arg6[%c43, %c0_435] : memref<128x32xf32, #tpu.memory_space<vmem>>, vector<1x32xf32>
    tpu.vector_store %arg6[%c43, %c0_435], %700 {strides = array<i32>} : memref<128x32xf32, #tpu.memory_space<vmem>>, vector<1x32xf32>,
    %702 = arith.index_cast %698 : i32 to index
    %c0_436 = arith.constant 0 : index
    %703 = vector.load %arg4[%702, %c0_436] : memref<40x32xf32, #tpu.memory_space<vmem>>, vector<1x32xf32>
    %c43_437 = arith.constant 43 : index
    %c0_438 = arith.constant 0 : index
    %704 = vector.load %arg7[%c43_437, %c0_438] : memref<128x32xf32, #tpu.memory_space<vmem>>, vector<1x32xf32>
    tpu.vector_store %arg7[%c43_437, %c0_438], %703 {strides = array<i32>} : memref<128x32xf32, #tpu.memory_space<vmem>>, vector<1x32xf32>,
    %c44_i32 = arith.constant 44 : i32
    %705 = arith.addi %0, %c44_i32 : i32
    %706 = arith.index_cast %705 : i32 to index
    %707 = memref.load %arg1[%706] : memref<256xi32, #tpu.memory_space<smem>>
    %c0_i32_439 = arith.constant 0 : i32
    %c49_i32_440 = arith.constant 49 : i32
    %708 = arith.maxsi %c0_i32_439, %707 : i32
    %709 = arith.minsi %c49_i32_440, %708 : i32
    %c44_i32_441 = arith.constant 44 : i32
    %710 = arith.addi %0, %c44_i32_441 : i32
    %711 = arith.index_cast %710 : i32 to index
    %712 = memref.load %arg2[%711] : memref<256xi32, #tpu.memory_space<smem>>
    %c0_i32_442 = arith.constant 0 : i32
    %c39_i32_443 = arith.constant 39 : i32
    %713 = arith.maxsi %c0_i32_442, %712 : i32
    %714 = arith.minsi %c39_i32_443, %713 : i32
    %715 = arith.index_cast %709 : i32 to index
    %c0_444 = arith.constant 0 : index
    %716 = vector.load %arg3[%715, %c0_444] : memref<50x32xf32, #tpu.memory_space<vmem>>, vector<1x32xf32>
    %c44 = arith.constant 44 : index
    %c0_445 = arith.constant 0 : index
    %717 = vector.load %arg6[%c44, %c0_445] : memref<128x32xf32, #tpu.memory_space<vmem>>, vector<1x32xf32>
    tpu.vector_store %arg6[%c44, %c0_445], %716 {strides = array<i32>} : memref<128x32xf32, #tpu.memory_space<vmem>>, vector<1x32xf32>,
    %718 = arith.index_cast %714 : i32 to index
    %c0_446 = arith.constant 0 : index
    %719 = vector.load %arg4[%718, %c0_446] : memref<40x32xf32, #tpu.memory_space<vmem>>, vector<1x32xf32>
    %c44_447 = arith.constant 44 : index
    %c0_448 = arith.constant 0 : index
    %720 = vector.load %arg7[%c44_447, %c0_448] : memref<128x32xf32, #tpu.memory_space<vmem>>, vector<1x32xf32>
    tpu.vector_store %arg7[%c44_447, %c0_448], %719 {strides = array<i32>} : memref<128x32xf32, #tpu.memory_space<vmem>>, vector<1x32xf32>,
    %c45_i32 = arith.constant 45 : i32
    %721 = arith.addi %0, %c45_i32 : i32
    %722 = arith.index_cast %721 : i32 to index
    %723 = memref.load %arg1[%722] : memref<256xi32, #tpu.memory_space<smem>>
    %c0_i32_449 = arith.constant 0 : i32
    %c49_i32_450 = arith.constant 49 : i32
    %724 = arith.maxsi %c0_i32_449, %723 : i32
    %725 = arith.minsi %c49_i32_450, %724 : i32
    %c45_i32_451 = arith.constant 45 : i32
    %726 = arith.addi %0, %c45_i32_451 : i32
    %727 = arith.index_cast %726 : i32 to index
    %728 = memref.load %arg2[%727] : memref<256xi32, #tpu.memory_space<smem>>
    %c0_i32_452 = arith.constant 0 : i32
    %c39_i32_453 = arith.constant 39 : i32
    %729 = arith.maxsi %c0_i32_452, %728 : i32
    %730 = arith.minsi %c39_i32_453, %729 : i32
    %731 = arith.index_cast %725 : i32 to index
    %c0_454 = arith.constant 0 : index
    %732 = vector.load %arg3[%731, %c0_454] : memref<50x32xf32, #tpu.memory_space<vmem>>, vector<1x32xf32>
    %c45 = arith.constant 45 : index
    %c0_455 = arith.constant 0 : index
    %733 = vector.load %arg6[%c45, %c0_455] : memref<128x32xf32, #tpu.memory_space<vmem>>, vector<1x32xf32>
    tpu.vector_store %arg6[%c45, %c0_455], %732 {strides = array<i32>} : memref<128x32xf32, #tpu.memory_space<vmem>>, vector<1x32xf32>,
    %734 = arith.index_cast %730 : i32 to index
    %c0_456 = arith.constant 0 : index
    %735 = vector.load %arg4[%734, %c0_456] : memref<40x32xf32, #tpu.memory_space<vmem>>, vector<1x32xf32>
    %c45_457 = arith.constant 45 : index
    %c0_458 = arith.constant 0 : index
    %736 = vector.load %arg7[%c45_457, %c0_458] : memref<128x32xf32, #tpu.memory_space<vmem>>, vector<1x32xf32>
    tpu.vector_store %arg7[%c45_457, %c0_458], %735 {strides = array<i32>} : memref<128x32xf32, #tpu.memory_space<vmem>>, vector<1x32xf32>,
    %c46_i32 = arith.constant 46 : i32
    %737 = arith.addi %0, %c46_i32 : i32
    %738 = arith.index_cast %737 : i32 to index
    %739 = memref.load %arg1[%738] : memref<256xi32, #tpu.memory_space<smem>>
    %c0_i32_459 = arith.constant 0 : i32
    %c49_i32_460 = arith.constant 49 : i32
    %740 = arith.maxsi %c0_i32_459, %739 : i32
    %741 = arith.minsi %c49_i32_460, %740 : i32
    %c46_i32_461 = arith.constant 46 : i32
    %742 = arith.addi %0, %c46_i32_461 : i32
    %743 = arith.index_cast %742 : i32 to index
    %744 = memref.load %arg2[%743] : memref<256xi32, #tpu.memory_space<smem>>
    %c0_i32_462 = arith.constant 0 : i32
    %c39_i32_463 = arith.constant 39 : i32
    %745 = arith.maxsi %c0_i32_462, %744 : i32
    %746 = arith.minsi %c39_i32_463, %745 : i32
    %747 = arith.index_cast %741 : i32 to index
    %c0_464 = arith.constant 0 : index
    %748 = vector.load %arg3[%747, %c0_464] : memref<50x32xf32, #tpu.memory_space<vmem>>, vector<1x32xf32>
    %c46 = arith.constant 46 : index
    %c0_465 = arith.constant 0 : index
    %749 = vector.load %arg6[%c46, %c0_465] : memref<128x32xf32, #tpu.memory_space<vmem>>, vector<1x32xf32>
    tpu.vector_store %arg6[%c46, %c0_465], %748 {strides = array<i32>} : memref<128x32xf32, #tpu.memory_space<vmem>>, vector<1x32xf32>,
    %750 = arith.index_cast %746 : i32 to index
    %c0_466 = arith.constant 0 : index
    %751 = vector.load %arg4[%750, %c0_466] : memref<40x32xf32, #tpu.memory_space<vmem>>, vector<1x32xf32>
    %c46_467 = arith.constant 46 : index
    %c0_468 = arith.constant 0 : index
    %752 = vector.load %arg7[%c46_467, %c0_468] : memref<128x32xf32, #tpu.memory_space<vmem>>, vector<1x32xf32>
    tpu.vector_store %arg7[%c46_467, %c0_468], %751 {strides = array<i32>} : memref<128x32xf32, #tpu.memory_space<vmem>>, vector<1x32xf32>,
    %c47_i32 = arith.constant 47 : i32
    %753 = arith.addi %0, %c47_i32 : i32
    %754 = arith.index_cast %753 : i32 to index
    %755 = memref.load %arg1[%754] : memref<256xi32, #tpu.memory_space<smem>>
    %c0_i32_469 = arith.constant 0 : i32
    %c49_i32_470 = arith.constant 49 : i32
    %756 = arith.maxsi %c0_i32_469, %755 : i32
    %757 = arith.minsi %c49_i32_470, %756 : i32
    %c47_i32_471 = arith.constant 47 : i32
    %758 = arith.addi %0, %c47_i32_471 : i32
    %759 = arith.index_cast %758 : i32 to index
    %760 = memref.load %arg2[%759] : memref<256xi32, #tpu.memory_space<smem>>
    %c0_i32_472 = arith.constant 0 : i32
    %c39_i32_473 = arith.constant 39 : i32
    %761 = arith.maxsi %c0_i32_472, %760 : i32
    %762 = arith.minsi %c39_i32_473, %761 : i32
    %763 = arith.index_cast %757 : i32 to index
    %c0_474 = arith.constant 0 : index
    %764 = vector.load %arg3[%763, %c0_474] : memref<50x32xf32, #tpu.memory_space<vmem>>, vector<1x32xf32>
    %c47 = arith.constant 47 : index
    %c0_475 = arith.constant 0 : index
    %765 = vector.load %arg6[%c47, %c0_475] : memref<128x32xf32, #tpu.memory_space<vmem>>, vector<1x32xf32>
    tpu.vector_store %arg6[%c47, %c0_475], %764 {strides = array<i32>} : memref<128x32xf32, #tpu.memory_space<vmem>>, vector<1x32xf32>,
    %766 = arith.index_cast %762 : i32 to index
    %c0_476 = arith.constant 0 : index
    %767 = vector.load %arg4[%766, %c0_476] : memref<40x32xf32, #tpu.memory_space<vmem>>, vector<1x32xf32>
    %c47_477 = arith.constant 47 : index
    %c0_478 = arith.constant 0 : index
    %768 = vector.load %arg7[%c47_477, %c0_478] : memref<128x32xf32, #tpu.memory_space<vmem>>, vector<1x32xf32>
    tpu.vector_store %arg7[%c47_477, %c0_478], %767 {strides = array<i32>} : memref<128x32xf32, #tpu.memory_space<vmem>>, vector<1x32xf32>,
    %c48_i32 = arith.constant 48 : i32
    %769 = arith.addi %0, %c48_i32 : i32
    %770 = arith.index_cast %769 : i32 to index
    %771 = memref.load %arg1[%770] : memref<256xi32, #tpu.memory_space<smem>>
    %c0_i32_479 = arith.constant 0 : i32
    %c49_i32_480 = arith.constant 49 : i32
    %772 = arith.maxsi %c0_i32_479, %771 : i32
    %773 = arith.minsi %c49_i32_480, %772 : i32
    %c48_i32_481 = arith.constant 48 : i32
    %774 = arith.addi %0, %c48_i32_481 : i32
    %775 = arith.index_cast %774 : i32 to index
    %776 = memref.load %arg2[%775] : memref<256xi32, #tpu.memory_space<smem>>
    %c0_i32_482 = arith.constant 0 : i32
    %c39_i32_483 = arith.constant 39 : i32
    %777 = arith.maxsi %c0_i32_482, %776 : i32
    %778 = arith.minsi %c39_i32_483, %777 : i32
    %779 = arith.index_cast %773 : i32 to index
    %c0_484 = arith.constant 0 : index
    %780 = vector.load %arg3[%779, %c0_484] : memref<50x32xf32, #tpu.memory_space<vmem>>, vector<1x32xf32>
    %c48 = arith.constant 48 : index
    %c0_485 = arith.constant 0 : index
    %781 = vector.load %arg6[%c48, %c0_485] : memref<128x32xf32, #tpu.memory_space<vmem>>, vector<1x32xf32>
    tpu.vector_store %arg6[%c48, %c0_485], %780 {strides = array<i32>} : memref<128x32xf32, #tpu.memory_space<vmem>>, vector<1x32xf32>,
    %782 = arith.index_cast %778 : i32 to index
    %c0_486 = arith.constant 0 : index
    %783 = vector.load %arg4[%782, %c0_486] : memref<40x32xf32, #tpu.memory_space<vmem>>, vector<1x32xf32>
    %c48_487 = arith.constant 48 : index
    %c0_488 = arith.constant 0 : index
    %784 = vector.load %arg7[%c48_487, %c0_488] : memref<128x32xf32, #tpu.memory_space<vmem>>, vector<1x32xf32>
    tpu.vector_store %arg7[%c48_487, %c0_488], %783 {strides = array<i32>} : memref<128x32xf32, #tpu.memory_space<vmem>>, vector<1x32xf32>,
    %c49_i32_489 = arith.constant 49 : i32
    %785 = arith.addi %0, %c49_i32_489 : i32
    %786 = arith.index_cast %785 : i32 to index
    %787 = memref.load %arg1[%786] : memref<256xi32, #tpu.memory_space<smem>>
    %c0_i32_490 = arith.constant 0 : i32
    %c49_i32_491 = arith.constant 49 : i32
    %788 = arith.maxsi %c0_i32_490, %787 : i32
    %789 = arith.minsi %c49_i32_491, %788 : i32
    %c49_i32_492 = arith.constant 49 : i32
    %790 = arith.addi %0, %c49_i32_492 : i32
    %791 = arith.index_cast %790 : i32 to index
    %792 = memref.load %arg2[%791] : memref<256xi32, #tpu.memory_space<smem>>
    %c0_i32_493 = arith.constant 0 : i32
    %c39_i32_494 = arith.constant 39 : i32
    %793 = arith.maxsi %c0_i32_493, %792 : i32
    %794 = arith.minsi %c39_i32_494, %793 : i32
    %795 = arith.index_cast %789 : i32 to index
    %c0_495 = arith.constant 0 : index
    %796 = vector.load %arg3[%795, %c0_495] : memref<50x32xf32, #tpu.memory_space<vmem>>, vector<1x32xf32>
    %c49 = arith.constant 49 : index
    %c0_496 = arith.constant 0 : index
    %797 = vector.load %arg6[%c49, %c0_496] : memref<128x32xf32, #tpu.memory_space<vmem>>, vector<1x32xf32>
    tpu.vector_store %arg6[%c49, %c0_496], %796 {strides = array<i32>} : memref<128x32xf32, #tpu.memory_space<vmem>>, vector<1x32xf32>,
    %798 = arith.index_cast %794 : i32 to index
    %c0_497 = arith.constant 0 : index
    %799 = vector.load %arg4[%798, %c0_497] : memref<40x32xf32, #tpu.memory_space<vmem>>, vector<1x32xf32>
    %c49_498 = arith.constant 49 : index
    %c0_499 = arith.constant 0 : index
    %800 = vector.load %arg7[%c49_498, %c0_499] : memref<128x32xf32, #tpu.memory_space<vmem>>, vector<1x32xf32>
    tpu.vector_store %arg7[%c49_498, %c0_499], %799 {strides = array<i32>} : memref<128x32xf32, #tpu.memory_space<vmem>>, vector<1x32xf32>,
    %c50_i32 = arith.constant 50 : i32
    %801 = arith.addi %0, %c50_i32 : i32
    %802 = arith.index_cast %801 : i32 to index
    %803 = memref.load %arg1[%802] : memref<256xi32, #tpu.memory_space<smem>>
    %c0_i32_500 = arith.constant 0 : i32
    %c49_i32_501 = arith.constant 49 : i32
    %804 = arith.maxsi %c0_i32_500, %803 : i32
    %805 = arith.minsi %c49_i32_501, %804 : i32
    %c50_i32_502 = arith.constant 50 : i32
    %806 = arith.addi %0, %c50_i32_502 : i32
    %807 = arith.index_cast %806 : i32 to index
    %808 = memref.load %arg2[%807] : memref<256xi32, #tpu.memory_space<smem>>
    %c0_i32_503 = arith.constant 0 : i32
    %c39_i32_504 = arith.constant 39 : i32
    %809 = arith.maxsi %c0_i32_503, %808 : i32
    %810 = arith.minsi %c39_i32_504, %809 : i32
    %811 = arith.index_cast %805 : i32 to index
    %c0_505 = arith.constant 0 : index
    %812 = vector.load %arg3[%811, %c0_505] : memref<50x32xf32, #tpu.memory_space<vmem>>, vector<1x32xf32>
    %c50 = arith.constant 50 : index
    %c0_506 = arith.constant 0 : index
    %813 = vector.load %arg6[%c50, %c0_506] : memref<128x32xf32, #tpu.memory_space<vmem>>, vector<1x32xf32>
    tpu.vector_store %arg6[%c50, %c0_506], %812 {strides = array<i32>} : memref<128x32xf32, #tpu.memory_space<vmem>>, vector<1x32xf32>,
    %814 = arith.index_cast %810 : i32 to index
    %c0_507 = arith.constant 0 : index
    %815 = vector.load %arg4[%814, %c0_507] : memref<40x32xf32, #tpu.memory_space<vmem>>, vector<1x32xf32>
    %c50_508 = arith.constant 50 : index
    %c0_509 = arith.constant 0 : index
    %816 = vector.load %arg7[%c50_508, %c0_509] : memref<128x32xf32, #tpu.memory_space<vmem>>, vector<1x32xf32>
    tpu.vector_store %arg7[%c50_508, %c0_509], %815 {strides = array<i32>} : memref<128x32xf32, #tpu.memory_space<vmem>>, vector<1x32xf32>,
    %c51_i32 = arith.constant 51 : i32
    %817 = arith.addi %0, %c51_i32 : i32
    %818 = arith.index_cast %817 : i32 to index
    %819 = memref.load %arg1[%818] : memref<256xi32, #tpu.memory_space<smem>>
    %c0_i32_510 = arith.constant 0 : i32
    %c49_i32_511 = arith.constant 49 : i32
    %820 = arith.maxsi %c0_i32_510, %819 : i32
    %821 = arith.minsi %c49_i32_511, %820 : i32
    %c51_i32_512 = arith.constant 51 : i32
    %822 = arith.addi %0, %c51_i32_512 : i32
    %823 = arith.index_cast %822 : i32 to index
    %824 = memref.load %arg2[%823] : memref<256xi32, #tpu.memory_space<smem>>
    %c0_i32_513 = arith.constant 0 : i32
    %c39_i32_514 = arith.constant 39 : i32
    %825 = arith.maxsi %c0_i32_513, %824 : i32
    %826 = arith.minsi %c39_i32_514, %825 : i32
    %827 = arith.index_cast %821 : i32 to index
    %c0_515 = arith.constant 0 : index
    %828 = vector.load %arg3[%827, %c0_515] : memref<50x32xf32, #tpu.memory_space<vmem>>, vector<1x32xf32>
    %c51 = arith.constant 51 : index
    %c0_516 = arith.constant 0 : index
    %829 = vector.load %arg6[%c51, %c0_516] : memref<128x32xf32, #tpu.memory_space<vmem>>, vector<1x32xf32>
    tpu.vector_store %arg6[%c51, %c0_516], %828 {strides = array<i32>} : memref<128x32xf32, #tpu.memory_space<vmem>>, vector<1x32xf32>,
    %830 = arith.index_cast %826 : i32 to index
    %c0_517 = arith.constant 0 : index
    %831 = vector.load %arg4[%830, %c0_517] : memref<40x32xf32, #tpu.memory_space<vmem>>, vector<1x32xf32>
    %c51_518 = arith.constant 51 : index
    %c0_519 = arith.constant 0 : index
    %832 = vector.load %arg7[%c51_518, %c0_519] : memref<128x32xf32, #tpu.memory_space<vmem>>, vector<1x32xf32>
    tpu.vector_store %arg7[%c51_518, %c0_519], %831 {strides = array<i32>} : memref<128x32xf32, #tpu.memory_space<vmem>>, vector<1x32xf32>,
    %c52_i32 = arith.constant 52 : i32
    %833 = arith.addi %0, %c52_i32 : i32
    %834 = arith.index_cast %833 : i32 to index
    %835 = memref.load %arg1[%834] : memref<256xi32, #tpu.memory_space<smem>>
    %c0_i32_520 = arith.constant 0 : i32
    %c49_i32_521 = arith.constant 49 : i32
    %836 = arith.maxsi %c0_i32_520, %835 : i32
    %837 = arith.minsi %c49_i32_521, %836 : i32
    %c52_i32_522 = arith.constant 52 : i32
    %838 = arith.addi %0, %c52_i32_522 : i32
    %839 = arith.index_cast %838 : i32 to index
    %840 = memref.load %arg2[%839] : memref<256xi32, #tpu.memory_space<smem>>
    %c0_i32_523 = arith.constant 0 : i32
    %c39_i32_524 = arith.constant 39 : i32
    %841 = arith.maxsi %c0_i32_523, %840 : i32
    %842 = arith.minsi %c39_i32_524, %841 : i32
    %843 = arith.index_cast %837 : i32 to index
    %c0_525 = arith.constant 0 : index
    %844 = vector.load %arg3[%843, %c0_525] : memref<50x32xf32, #tpu.memory_space<vmem>>, vector<1x32xf32>
    %c52 = arith.constant 52 : index
    %c0_526 = arith.constant 0 : index
    %845 = vector.load %arg6[%c52, %c0_526] : memref<128x32xf32, #tpu.memory_space<vmem>>, vector<1x32xf32>
    tpu.vector_store %arg6[%c52, %c0_526], %844 {strides = array<i32>} : memref<128x32xf32, #tpu.memory_space<vmem>>, vector<1x32xf32>,
    %846 = arith.index_cast %842 : i32 to index
    %c0_527 = arith.constant 0 : index
    %847 = vector.load %arg4[%846, %c0_527] : memref<40x32xf32, #tpu.memory_space<vmem>>, vector<1x32xf32>
    %c52_528 = arith.constant 52 : index
    %c0_529 = arith.constant 0 : index
    %848 = vector.load %arg7[%c52_528, %c0_529] : memref<128x32xf32, #tpu.memory_space<vmem>>, vector<1x32xf32>
    tpu.vector_store %arg7[%c52_528, %c0_529], %847 {strides = array<i32>} : memref<128x32xf32, #tpu.memory_space<vmem>>, vector<1x32xf32>,
    %c53_i32 = arith.constant 53 : i32
    %849 = arith.addi %0, %c53_i32 : i32
    %850 = arith.index_cast %849 : i32 to index
    %851 = memref.load %arg1[%850] : memref<256xi32, #tpu.memory_space<smem>>
    %c0_i32_530 = arith.constant 0 : i32
    %c49_i32_531 = arith.constant 49 : i32
    %852 = arith.maxsi %c0_i32_530, %851 : i32
    %853 = arith.minsi %c49_i32_531, %852 : i32
    %c53_i32_532 = arith.constant 53 : i32
    %854 = arith.addi %0, %c53_i32_532 : i32
    %855 = arith.index_cast %854 : i32 to index
    %856 = memref.load %arg2[%855] : memref<256xi32, #tpu.memory_space<smem>>
    %c0_i32_533 = arith.constant 0 : i32
    %c39_i32_534 = arith.constant 39 : i32
    %857 = arith.maxsi %c0_i32_533, %856 : i32
    %858 = arith.minsi %c39_i32_534, %857 : i32
    %859 = arith.index_cast %853 : i32 to index
    %c0_535 = arith.constant 0 : index
    %860 = vector.load %arg3[%859, %c0_535] : memref<50x32xf32, #tpu.memory_space<vmem>>, vector<1x32xf32>
    %c53 = arith.constant 53 : index
    %c0_536 = arith.constant 0 : index
    %861 = vector.load %arg6[%c53, %c0_536] : memref<128x32xf32, #tpu.memory_space<vmem>>, vector<1x32xf32>
    tpu.vector_store %arg6[%c53, %c0_536], %860 {strides = array<i32>} : memref<128x32xf32, #tpu.memory_space<vmem>>, vector<1x32xf32>,
    %862 = arith.index_cast %858 : i32 to index
    %c0_537 = arith.constant 0 : index
    %863 = vector.load %arg4[%862, %c0_537] : memref<40x32xf32, #tpu.memory_space<vmem>>, vector<1x32xf32>
    %c53_538 = arith.constant 53 : index
    %c0_539 = arith.constant 0 : index
    %864 = vector.load %arg7[%c53_538, %c0_539] : memref<128x32xf32, #tpu.memory_space<vmem>>, vector<1x32xf32>
    tpu.vector_store %arg7[%c53_538, %c0_539], %863 {strides = array<i32>} : memref<128x32xf32, #tpu.memory_space<vmem>>, vector<1x32xf32>,
    %c54_i32 = arith.constant 54 : i32
    %865 = arith.addi %0, %c54_i32 : i32
    %866 = arith.index_cast %865 : i32 to index
    %867 = memref.load %arg1[%866] : memref<256xi32, #tpu.memory_space<smem>>
    %c0_i32_540 = arith.constant 0 : i32
    %c49_i32_541 = arith.constant 49 : i32
    %868 = arith.maxsi %c0_i32_540, %867 : i32
    %869 = arith.minsi %c49_i32_541, %868 : i32
    %c54_i32_542 = arith.constant 54 : i32
    %870 = arith.addi %0, %c54_i32_542 : i32
    %871 = arith.index_cast %870 : i32 to index
    %872 = memref.load %arg2[%871] : memref<256xi32, #tpu.memory_space<smem>>
    %c0_i32_543 = arith.constant 0 : i32
    %c39_i32_544 = arith.constant 39 : i32
    %873 = arith.maxsi %c0_i32_543, %872 : i32
    %874 = arith.minsi %c39_i32_544, %873 : i32
    %875 = arith.index_cast %869 : i32 to index
    %c0_545 = arith.constant 0 : index
    %876 = vector.load %arg3[%875, %c0_545] : memref<50x32xf32, #tpu.memory_space<vmem>>, vector<1x32xf32>
    %c54 = arith.constant 54 : index
    %c0_546 = arith.constant 0 : index
    %877 = vector.load %arg6[%c54, %c0_546] : memref<128x32xf32, #tpu.memory_space<vmem>>, vector<1x32xf32>
    tpu.vector_store %arg6[%c54, %c0_546], %876 {strides = array<i32>} : memref<128x32xf32, #tpu.memory_space<vmem>>, vector<1x32xf32>,
    %878 = arith.index_cast %874 : i32 to index
    %c0_547 = arith.constant 0 : index
    %879 = vector.load %arg4[%878, %c0_547] : memref<40x32xf32, #tpu.memory_space<vmem>>, vector<1x32xf32>
    %c54_548 = arith.constant 54 : index
    %c0_549 = arith.constant 0 : index
    %880 = vector.load %arg7[%c54_548, %c0_549] : memref<128x32xf32, #tpu.memory_space<vmem>>, vector<1x32xf32>
    tpu.vector_store %arg7[%c54_548, %c0_549], %879 {strides = array<i32>} : memref<128x32xf32, #tpu.memory_space<vmem>>, vector<1x32xf32>,
    %c55_i32 = arith.constant 55 : i32
    %881 = arith.addi %0, %c55_i32 : i32
    %882 = arith.index_cast %881 : i32 to index
    %883 = memref.load %arg1[%882] : memref<256xi32, #tpu.memory_space<smem>>
    %c0_i32_550 = arith.constant 0 : i32
    %c49_i32_551 = arith.constant 49 : i32
    %884 = arith.maxsi %c0_i32_550, %883 : i32
    %885 = arith.minsi %c49_i32_551, %884 : i32
    %c55_i32_552 = arith.constant 55 : i32
    %886 = arith.addi %0, %c55_i32_552 : i32
    %887 = arith.index_cast %886 : i32 to index
    %888 = memref.load %arg2[%887] : memref<256xi32, #tpu.memory_space<smem>>
    %c0_i32_553 = arith.constant 0 : i32
    %c39_i32_554 = arith.constant 39 : i32
    %889 = arith.maxsi %c0_i32_553, %888 : i32
    %890 = arith.minsi %c39_i32_554, %889 : i32
    %891 = arith.index_cast %885 : i32 to index
    %c0_555 = arith.constant 0 : index
    %892 = vector.load %arg3[%891, %c0_555] : memref<50x32xf32, #tpu.memory_space<vmem>>, vector<1x32xf32>
    %c55 = arith.constant 55 : index
    %c0_556 = arith.constant 0 : index
    %893 = vector.load %arg6[%c55, %c0_556] : memref<128x32xf32, #tpu.memory_space<vmem>>, vector<1x32xf32>
    tpu.vector_store %arg6[%c55, %c0_556], %892 {strides = array<i32>} : memref<128x32xf32, #tpu.memory_space<vmem>>, vector<1x32xf32>,
    %894 = arith.index_cast %890 : i32 to index
    %c0_557 = arith.constant 0 : index
    %895 = vector.load %arg4[%894, %c0_557] : memref<40x32xf32, #tpu.memory_space<vmem>>, vector<1x32xf32>
    %c55_558 = arith.constant 55 : index
    %c0_559 = arith.constant 0 : index
    %896 = vector.load %arg7[%c55_558, %c0_559] : memref<128x32xf32, #tpu.memory_space<vmem>>, vector<1x32xf32>
    tpu.vector_store %arg7[%c55_558, %c0_559], %895 {strides = array<i32>} : memref<128x32xf32, #tpu.memory_space<vmem>>, vector<1x32xf32>,
    %c56_i32 = arith.constant 56 : i32
    %897 = arith.addi %0, %c56_i32 : i32
    %898 = arith.index_cast %897 : i32 to index
    %899 = memref.load %arg1[%898] : memref<256xi32, #tpu.memory_space<smem>>
    %c0_i32_560 = arith.constant 0 : i32
    %c49_i32_561 = arith.constant 49 : i32
    %900 = arith.maxsi %c0_i32_560, %899 : i32
    %901 = arith.minsi %c49_i32_561, %900 : i32
    %c56_i32_562 = arith.constant 56 : i32
    %902 = arith.addi %0, %c56_i32_562 : i32
    %903 = arith.index_cast %902 : i32 to index
    %904 = memref.load %arg2[%903] : memref<256xi32, #tpu.memory_space<smem>>
    %c0_i32_563 = arith.constant 0 : i32
    %c39_i32_564 = arith.constant 39 : i32
    %905 = arith.maxsi %c0_i32_563, %904 : i32
    %906 = arith.minsi %c39_i32_564, %905 : i32
    %907 = arith.index_cast %901 : i32 to index
    %c0_565 = arith.constant 0 : index
    %908 = vector.load %arg3[%907, %c0_565] : memref<50x32xf32, #tpu.memory_space<vmem>>, vector<1x32xf32>
    %c56 = arith.constant 56 : index
    %c0_566 = arith.constant 0 : index
    %909 = vector.load %arg6[%c56, %c0_566] : memref<128x32xf32, #tpu.memory_space<vmem>>, vector<1x32xf32>
    tpu.vector_store %arg6[%c56, %c0_566], %908 {strides = array<i32>} : memref<128x32xf32, #tpu.memory_space<vmem>>, vector<1x32xf32>,
    %910 = arith.index_cast %906 : i32 to index
    %c0_567 = arith.constant 0 : index
    %911 = vector.load %arg4[%910, %c0_567] : memref<40x32xf32, #tpu.memory_space<vmem>>, vector<1x32xf32>
    %c56_568 = arith.constant 56 : index
    %c0_569 = arith.constant 0 : index
    %912 = vector.load %arg7[%c56_568, %c0_569] : memref<128x32xf32, #tpu.memory_space<vmem>>, vector<1x32xf32>
    tpu.vector_store %arg7[%c56_568, %c0_569], %911 {strides = array<i32>} : memref<128x32xf32, #tpu.memory_space<vmem>>, vector<1x32xf32>,
    %c57_i32 = arith.constant 57 : i32
    %913 = arith.addi %0, %c57_i32 : i32
    %914 = arith.index_cast %913 : i32 to index
    %915 = memref.load %arg1[%914] : memref<256xi32, #tpu.memory_space<smem>>
    %c0_i32_570 = arith.constant 0 : i32
    %c49_i32_571 = arith.constant 49 : i32
    %916 = arith.maxsi %c0_i32_570, %915 : i32
    %917 = arith.minsi %c49_i32_571, %916 : i32
    %c57_i32_572 = arith.constant 57 : i32
    %918 = arith.addi %0, %c57_i32_572 : i32
    %919 = arith.index_cast %918 : i32 to index
    %920 = memref.load %arg2[%919] : memref<256xi32, #tpu.memory_space<smem>>
    %c0_i32_573 = arith.constant 0 : i32
    %c39_i32_574 = arith.constant 39 : i32
    %921 = arith.maxsi %c0_i32_573, %920 : i32
    %922 = arith.minsi %c39_i32_574, %921 : i32
    %923 = arith.index_cast %917 : i32 to index
    %c0_575 = arith.constant 0 : index
    %924 = vector.load %arg3[%923, %c0_575] : memref<50x32xf32, #tpu.memory_space<vmem>>, vector<1x32xf32>
    %c57 = arith.constant 57 : index
    %c0_576 = arith.constant 0 : index
    %925 = vector.load %arg6[%c57, %c0_576] : memref<128x32xf32, #tpu.memory_space<vmem>>, vector<1x32xf32>
    tpu.vector_store %arg6[%c57, %c0_576], %924 {strides = array<i32>} : memref<128x32xf32, #tpu.memory_space<vmem>>, vector<1x32xf32>,
    %926 = arith.index_cast %922 : i32 to index
    %c0_577 = arith.constant 0 : index
    %927 = vector.load %arg4[%926, %c0_577] : memref<40x32xf32, #tpu.memory_space<vmem>>, vector<1x32xf32>
    %c57_578 = arith.constant 57 : index
    %c0_579 = arith.constant 0 : index
    %928 = vector.load %arg7[%c57_578, %c0_579] : memref<128x32xf32, #tpu.memory_space<vmem>>, vector<1x32xf32>
    tpu.vector_store %arg7[%c57_578, %c0_579], %927 {strides = array<i32>} : memref<128x32xf32, #tpu.memory_space<vmem>>, vector<1x32xf32>,
    %c58_i32 = arith.constant 58 : i32
    %929 = arith.addi %0, %c58_i32 : i32
    %930 = arith.index_cast %929 : i32 to index
    %931 = memref.load %arg1[%930] : memref<256xi32, #tpu.memory_space<smem>>
    %c0_i32_580 = arith.constant 0 : i32
    %c49_i32_581 = arith.constant 49 : i32
    %932 = arith.maxsi %c0_i32_580, %931 : i32
    %933 = arith.minsi %c49_i32_581, %932 : i32
    %c58_i32_582 = arith.constant 58 : i32
    %934 = arith.addi %0, %c58_i32_582 : i32
    %935 = arith.index_cast %934 : i32 to index
    %936 = memref.load %arg2[%935] : memref<256xi32, #tpu.memory_space<smem>>
    %c0_i32_583 = arith.constant 0 : i32
    %c39_i32_584 = arith.constant 39 : i32
    %937 = arith.maxsi %c0_i32_583, %936 : i32
    %938 = arith.minsi %c39_i32_584, %937 : i32
    %939 = arith.index_cast %933 : i32 to index
    %c0_585 = arith.constant 0 : index
    %940 = vector.load %arg3[%939, %c0_585] : memref<50x32xf32, #tpu.memory_space<vmem>>, vector<1x32xf32>
    %c58 = arith.constant 58 : index
    %c0_586 = arith.constant 0 : index
    %941 = vector.load %arg6[%c58, %c0_586] : memref<128x32xf32, #tpu.memory_space<vmem>>, vector<1x32xf32>
    tpu.vector_store %arg6[%c58, %c0_586], %940 {strides = array<i32>} : memref<128x32xf32, #tpu.memory_space<vmem>>, vector<1x32xf32>,
    %942 = arith.index_cast %938 : i32 to index
    %c0_587 = arith.constant 0 : index
    %943 = vector.load %arg4[%942, %c0_587] : memref<40x32xf32, #tpu.memory_space<vmem>>, vector<1x32xf32>
    %c58_588 = arith.constant 58 : index
    %c0_589 = arith.constant 0 : index
    %944 = vector.load %arg7[%c58_588, %c0_589] : memref<128x32xf32, #tpu.memory_space<vmem>>, vector<1x32xf32>
    tpu.vector_store %arg7[%c58_588, %c0_589], %943 {strides = array<i32>} : memref<128x32xf32, #tpu.memory_space<vmem>>, vector<1x32xf32>,
    %c59_i32 = arith.constant 59 : i32
    %945 = arith.addi %0, %c59_i32 : i32
    %946 = arith.index_cast %945 : i32 to index
    %947 = memref.load %arg1[%946] : memref<256xi32, #tpu.memory_space<smem>>
    %c0_i32_590 = arith.constant 0 : i32
    %c49_i32_591 = arith.constant 49 : i32
    %948 = arith.maxsi %c0_i32_590, %947 : i32
    %949 = arith.minsi %c49_i32_591, %948 : i32
    %c59_i32_592 = arith.constant 59 : i32
    %950 = arith.addi %0, %c59_i32_592 : i32
    %951 = arith.index_cast %950 : i32 to index
    %952 = memref.load %arg2[%951] : memref<256xi32, #tpu.memory_space<smem>>
    %c0_i32_593 = arith.constant 0 : i32
    %c39_i32_594 = arith.constant 39 : i32
    %953 = arith.maxsi %c0_i32_593, %952 : i32
    %954 = arith.minsi %c39_i32_594, %953 : i32
    %955 = arith.index_cast %949 : i32 to index
    %c0_595 = arith.constant 0 : index
    %956 = vector.load %arg3[%955, %c0_595] : memref<50x32xf32, #tpu.memory_space<vmem>>, vector<1x32xf32>
    %c59 = arith.constant 59 : index
    %c0_596 = arith.constant 0 : index
    %957 = vector.load %arg6[%c59, %c0_596] : memref<128x32xf32, #tpu.memory_space<vmem>>, vector<1x32xf32>
    tpu.vector_store %arg6[%c59, %c0_596], %956 {strides = array<i32>} : memref<128x32xf32, #tpu.memory_space<vmem>>, vector<1x32xf32>,
    %958 = arith.index_cast %954 : i32 to index
    %c0_597 = arith.constant 0 : index
    %959 = vector.load %arg4[%958, %c0_597] : memref<40x32xf32, #tpu.memory_space<vmem>>, vector<1x32xf32>
    %c59_598 = arith.constant 59 : index
    %c0_599 = arith.constant 0 : index
    %960 = vector.load %arg7[%c59_598, %c0_599] : memref<128x32xf32, #tpu.memory_space<vmem>>, vector<1x32xf32>
    tpu.vector_store %arg7[%c59_598, %c0_599], %959 {strides = array<i32>} : memref<128x32xf32, #tpu.memory_space<vmem>>, vector<1x32xf32>,
    %c60_i32 = arith.constant 60 : i32
    %961 = arith.addi %0, %c60_i32 : i32
    %962 = arith.index_cast %961 : i32 to index
    %963 = memref.load %arg1[%962] : memref<256xi32, #tpu.memory_space<smem>>
    %c0_i32_600 = arith.constant 0 : i32
    %c49_i32_601 = arith.constant 49 : i32
    %964 = arith.maxsi %c0_i32_600, %963 : i32
    %965 = arith.minsi %c49_i32_601, %964 : i32
    %c60_i32_602 = arith.constant 60 : i32
    %966 = arith.addi %0, %c60_i32_602 : i32
    %967 = arith.index_cast %966 : i32 to index
    %968 = memref.load %arg2[%967] : memref<256xi32, #tpu.memory_space<smem>>
    %c0_i32_603 = arith.constant 0 : i32
    %c39_i32_604 = arith.constant 39 : i32
    %969 = arith.maxsi %c0_i32_603, %968 : i32
    %970 = arith.minsi %c39_i32_604, %969 : i32
    %971 = arith.index_cast %965 : i32 to index
    %c0_605 = arith.constant 0 : index
    %972 = vector.load %arg3[%971, %c0_605] : memref<50x32xf32, #tpu.memory_space<vmem>>, vector<1x32xf32>
    %c60 = arith.constant 60 : index
    %c0_606 = arith.constant 0 : index
    %973 = vector.load %arg6[%c60, %c0_606] : memref<128x32xf32, #tpu.memory_space<vmem>>, vector<1x32xf32>
    tpu.vector_store %arg6[%c60, %c0_606], %972 {strides = array<i32>} : memref<128x32xf32, #tpu.memory_space<vmem>>, vector<1x32xf32>,
    %974 = arith.index_cast %970 : i32 to index
    %c0_607 = arith.constant 0 : index
    %975 = vector.load %arg4[%974, %c0_607] : memref<40x32xf32, #tpu.memory_space<vmem>>, vector<1x32xf32>
    %c60_608 = arith.constant 60 : index
    %c0_609 = arith.constant 0 : index
    %976 = vector.load %arg7[%c60_608, %c0_609] : memref<128x32xf32, #tpu.memory_space<vmem>>, vector<1x32xf32>
    tpu.vector_store %arg7[%c60_608, %c0_609], %975 {strides = array<i32>} : memref<128x32xf32, #tpu.memory_space<vmem>>, vector<1x32xf32>,
    %c61_i32 = arith.constant 61 : i32
    %977 = arith.addi %0, %c61_i32 : i32
    %978 = arith.index_cast %977 : i32 to index
    %979 = memref.load %arg1[%978] : memref<256xi32, #tpu.memory_space<smem>>
    %c0_i32_610 = arith.constant 0 : i32
    %c49_i32_611 = arith.constant 49 : i32
    %980 = arith.maxsi %c0_i32_610, %979 : i32
    %981 = arith.minsi %c49_i32_611, %980 : i32
    %c61_i32_612 = arith.constant 61 : i32
    %982 = arith.addi %0, %c61_i32_612 : i32
    %983 = arith.index_cast %982 : i32 to index
    %984 = memref.load %arg2[%983] : memref<256xi32, #tpu.memory_space<smem>>
    %c0_i32_613 = arith.constant 0 : i32
    %c39_i32_614 = arith.constant 39 : i32
    %985 = arith.maxsi %c0_i32_613, %984 : i32
    %986 = arith.minsi %c39_i32_614, %985 : i32
    %987 = arith.index_cast %981 : i32 to index
    %c0_615 = arith.constant 0 : index
    %988 = vector.load %arg3[%987, %c0_615] : memref<50x32xf32, #tpu.memory_space<vmem>>, vector<1x32xf32>
    %c61 = arith.constant 61 : index
    %c0_616 = arith.constant 0 : index
    %989 = vector.load %arg6[%c61, %c0_616] : memref<128x32xf32, #tpu.memory_space<vmem>>, vector<1x32xf32>
    tpu.vector_store %arg6[%c61, %c0_616], %988 {strides = array<i32>} : memref<128x32xf32, #tpu.memory_space<vmem>>, vector<1x32xf32>,
    %990 = arith.index_cast %986 : i32 to index
    %c0_617 = arith.constant 0 : index
    %991 = vector.load %arg4[%990, %c0_617] : memref<40x32xf32, #tpu.memory_space<vmem>>, vector<1x32xf32>
    %c61_618 = arith.constant 61 : index
    %c0_619 = arith.constant 0 : index
    %992 = vector.load %arg7[%c61_618, %c0_619] : memref<128x32xf32, #tpu.memory_space<vmem>>, vector<1x32xf32>
    tpu.vector_store %arg7[%c61_618, %c0_619], %991 {strides = array<i32>} : memref<128x32xf32, #tpu.memory_space<vmem>>, vector<1x32xf32>,
    %c62_i32 = arith.constant 62 : i32
    %993 = arith.addi %0, %c62_i32 : i32
    %994 = arith.index_cast %993 : i32 to index
    %995 = memref.load %arg1[%994] : memref<256xi32, #tpu.memory_space<smem>>
    %c0_i32_620 = arith.constant 0 : i32
    %c49_i32_621 = arith.constant 49 : i32
    %996 = arith.maxsi %c0_i32_620, %995 : i32
    %997 = arith.minsi %c49_i32_621, %996 : i32
    %c62_i32_622 = arith.constant 62 : i32
    %998 = arith.addi %0, %c62_i32_622 : i32
    %999 = arith.index_cast %998 : i32 to index
    %1000 = memref.load %arg2[%999] : memref<256xi32, #tpu.memory_space<smem>>
    %c0_i32_623 = arith.constant 0 : i32
    %c39_i32_624 = arith.constant 39 : i32
    %1001 = arith.maxsi %c0_i32_623, %1000 : i32
    %1002 = arith.minsi %c39_i32_624, %1001 : i32
    %1003 = arith.index_cast %997 : i32 to index
    %c0_625 = arith.constant 0 : index
    %1004 = vector.load %arg3[%1003, %c0_625] : memref<50x32xf32, #tpu.memory_space<vmem>>, vector<1x32xf32>
    %c62 = arith.constant 62 : index
    %c0_626 = arith.constant 0 : index
    %1005 = vector.load %arg6[%c62, %c0_626] : memref<128x32xf32, #tpu.memory_space<vmem>>, vector<1x32xf32>
    tpu.vector_store %arg6[%c62, %c0_626], %1004 {strides = array<i32>} : memref<128x32xf32, #tpu.memory_space<vmem>>, vector<1x32xf32>,
    %1006 = arith.index_cast %1002 : i32 to index
    %c0_627 = arith.constant 0 : index
    %1007 = vector.load %arg4[%1006, %c0_627] : memref<40x32xf32, #tpu.memory_space<vmem>>, vector<1x32xf32>
    %c62_628 = arith.constant 62 : index
    %c0_629 = arith.constant 0 : index
    %1008 = vector.load %arg7[%c62_628, %c0_629] : memref<128x32xf32, #tpu.memory_space<vmem>>, vector<1x32xf32>
    tpu.vector_store %arg7[%c62_628, %c0_629], %1007 {strides = array<i32>} : memref<128x32xf32, #tpu.memory_space<vmem>>, vector<1x32xf32>,
    %c63_i32 = arith.constant 63 : i32
    %1009 = arith.addi %0, %c63_i32 : i32
    %1010 = arith.index_cast %1009 : i32 to index
    %1011 = memref.load %arg1[%1010] : memref<256xi32, #tpu.memory_space<smem>>
    %c0_i32_630 = arith.constant 0 : i32
    %c49_i32_631 = arith.constant 49 : i32
    %1012 = arith.maxsi %c0_i32_630, %1011 : i32
    %1013 = arith.minsi %c49_i32_631, %1012 : i32
    %c63_i32_632 = arith.constant 63 : i32
    %1014 = arith.addi %0, %c63_i32_632 : i32
    %1015 = arith.index_cast %1014 : i32 to index
    %1016 = memref.load %arg2[%1015] : memref<256xi32, #tpu.memory_space<smem>>
    %c0_i32_633 = arith.constant 0 : i32
    %c39_i32_634 = arith.constant 39 : i32
    %1017 = arith.maxsi %c0_i32_633, %1016 : i32
    %1018 = arith.minsi %c39_i32_634, %1017 : i32
    %1019 = arith.index_cast %1013 : i32 to index
    %c0_635 = arith.constant 0 : index
    %1020 = vector.load %arg3[%1019, %c0_635] : memref<50x32xf32, #tpu.memory_space<vmem>>, vector<1x32xf32>
    %c63 = arith.constant 63 : index
    %c0_636 = arith.constant 0 : index
    %1021 = vector.load %arg6[%c63, %c0_636] : memref<128x32xf32, #tpu.memory_space<vmem>>, vector<1x32xf32>
    tpu.vector_store %arg6[%c63, %c0_636], %1020 {strides = array<i32>} : memref<128x32xf32, #tpu.memory_space<vmem>>, vector<1x32xf32>,
    %1022 = arith.index_cast %1018 : i32 to index
    %c0_637 = arith.constant 0 : index
    %1023 = vector.load %arg4[%1022, %c0_637] : memref<40x32xf32, #tpu.memory_space<vmem>>, vector<1x32xf32>
    %c63_638 = arith.constant 63 : index
    %c0_639 = arith.constant 0 : index
    %1024 = vector.load %arg7[%c63_638, %c0_639] : memref<128x32xf32, #tpu.memory_space<vmem>>, vector<1x32xf32>
    tpu.vector_store %arg7[%c63_638, %c0_639], %1023 {strides = array<i32>} : memref<128x32xf32, #tpu.memory_space<vmem>>, vector<1x32xf32>,
    %c64_i32 = arith.constant 64 : i32
    %1025 = arith.addi %0, %c64_i32 : i32
    %1026 = arith.index_cast %1025 : i32 to index
    %1027 = memref.load %arg1[%1026] : memref<256xi32, #tpu.memory_space<smem>>
    %c0_i32_640 = arith.constant 0 : i32
    %c49_i32_641 = arith.constant 49 : i32
    %1028 = arith.maxsi %c0_i32_640, %1027 : i32
    %1029 = arith.minsi %c49_i32_641, %1028 : i32
    %c64_i32_642 = arith.constant 64 : i32
    %1030 = arith.addi %0, %c64_i32_642 : i32
    %1031 = arith.index_cast %1030 : i32 to index
    %1032 = memref.load %arg2[%1031] : memref<256xi32, #tpu.memory_space<smem>>
    %c0_i32_643 = arith.constant 0 : i32
    %c39_i32_644 = arith.constant 39 : i32
    %1033 = arith.maxsi %c0_i32_643, %1032 : i32
    %1034 = arith.minsi %c39_i32_644, %1033 : i32
    %1035 = arith.index_cast %1029 : i32 to index
    %c0_645 = arith.constant 0 : index
    %1036 = vector.load %arg3[%1035, %c0_645] : memref<50x32xf32, #tpu.memory_space<vmem>>, vector<1x32xf32>
    %c64 = arith.constant 64 : index
    %c0_646 = arith.constant 0 : index
    %1037 = vector.load %arg6[%c64, %c0_646] : memref<128x32xf32, #tpu.memory_space<vmem>>, vector<1x32xf32>
    tpu.vector_store %arg6[%c64, %c0_646], %1036 {strides = array<i32>} : memref<128x32xf32, #tpu.memory_space<vmem>>, vector<1x32xf32>,
    %1038 = arith.index_cast %1034 : i32 to index
    %c0_647 = arith.constant 0 : index
    %1039 = vector.load %arg4[%1038, %c0_647] : memref<40x32xf32, #tpu.memory_space<vmem>>, vector<1x32xf32>
    %c64_648 = arith.constant 64 : index
    %c0_649 = arith.constant 0 : index
    %1040 = vector.load %arg7[%c64_648, %c0_649] : memref<128x32xf32, #tpu.memory_space<vmem>>, vector<1x32xf32>
    tpu.vector_store %arg7[%c64_648, %c0_649], %1039 {strides = array<i32>} : memref<128x32xf32, #tpu.memory_space<vmem>>, vector<1x32xf32>,
    %c65_i32 = arith.constant 65 : i32
    %1041 = arith.addi %0, %c65_i32 : i32
    %1042 = arith.index_cast %1041 : i32 to index
    %1043 = memref.load %arg1[%1042] : memref<256xi32, #tpu.memory_space<smem>>
    %c0_i32_650 = arith.constant 0 : i32
    %c49_i32_651 = arith.constant 49 : i32
    %1044 = arith.maxsi %c0_i32_650, %1043 : i32
    %1045 = arith.minsi %c49_i32_651, %1044 : i32
    %c65_i32_652 = arith.constant 65 : i32
    %1046 = arith.addi %0, %c65_i32_652 : i32
    %1047 = arith.index_cast %1046 : i32 to index
    %1048 = memref.load %arg2[%1047] : memref<256xi32, #tpu.memory_space<smem>>
    %c0_i32_653 = arith.constant 0 : i32
    %c39_i32_654 = arith.constant 39 : i32
    %1049 = arith.maxsi %c0_i32_653, %1048 : i32
    %1050 = arith.minsi %c39_i32_654, %1049 : i32
    %1051 = arith.index_cast %1045 : i32 to index
    %c0_655 = arith.constant 0 : index
    %1052 = vector.load %arg3[%1051, %c0_655] : memref<50x32xf32, #tpu.memory_space<vmem>>, vector<1x32xf32>
    %c65 = arith.constant 65 : index
    %c0_656 = arith.constant 0 : index
    %1053 = vector.load %arg6[%c65, %c0_656] : memref<128x32xf32, #tpu.memory_space<vmem>>, vector<1x32xf32>
    tpu.vector_store %arg6[%c65, %c0_656], %1052 {strides = array<i32>} : memref<128x32xf32, #tpu.memory_space<vmem>>, vector<1x32xf32>,
    %1054 = arith.index_cast %1050 : i32 to index
    %c0_657 = arith.constant 0 : index
    %1055 = vector.load %arg4[%1054, %c0_657] : memref<40x32xf32, #tpu.memory_space<vmem>>, vector<1x32xf32>
    %c65_658 = arith.constant 65 : index
    %c0_659 = arith.constant 0 : index
    %1056 = vector.load %arg7[%c65_658, %c0_659] : memref<128x32xf32, #tpu.memory_space<vmem>>, vector<1x32xf32>
    tpu.vector_store %arg7[%c65_658, %c0_659], %1055 {strides = array<i32>} : memref<128x32xf32, #tpu.memory_space<vmem>>, vector<1x32xf32>,
    %c66_i32 = arith.constant 66 : i32
    %1057 = arith.addi %0, %c66_i32 : i32
    %1058 = arith.index_cast %1057 : i32 to index
    %1059 = memref.load %arg1[%1058] : memref<256xi32, #tpu.memory_space<smem>>
    %c0_i32_660 = arith.constant 0 : i32
    %c49_i32_661 = arith.constant 49 : i32
    %1060 = arith.maxsi %c0_i32_660, %1059 : i32
    %1061 = arith.minsi %c49_i32_661, %1060 : i32
    %c66_i32_662 = arith.constant 66 : i32
    %1062 = arith.addi %0, %c66_i32_662 : i32
    %1063 = arith.index_cast %1062 : i32 to index
    %1064 = memref.load %arg2[%1063] : memref<256xi32, #tpu.memory_space<smem>>
    %c0_i32_663 = arith.constant 0 : i32
    %c39_i32_664 = arith.constant 39 : i32
    %1065 = arith.maxsi %c0_i32_663, %1064 : i32
    %1066 = arith.minsi %c39_i32_664, %1065 : i32
    %1067 = arith.index_cast %1061 : i32 to index
    %c0_665 = arith.constant 0 : index
    %1068 = vector.load %arg3[%1067, %c0_665] : memref<50x32xf32, #tpu.memory_space<vmem>>, vector<1x32xf32>
    %c66 = arith.constant 66 : index
    %c0_666 = arith.constant 0 : index
    %1069 = vector.load %arg6[%c66, %c0_666] : memref<128x32xf32, #tpu.memory_space<vmem>>, vector<1x32xf32>
    tpu.vector_store %arg6[%c66, %c0_666], %1068 {strides = array<i32>} : memref<128x32xf32, #tpu.memory_space<vmem>>, vector<1x32xf32>,
    %1070 = arith.index_cast %1066 : i32 to index
    %c0_667 = arith.constant 0 : index
    %1071 = vector.load %arg4[%1070, %c0_667] : memref<40x32xf32, #tpu.memory_space<vmem>>, vector<1x32xf32>
    %c66_668 = arith.constant 66 : index
    %c0_669 = arith.constant 0 : index
    %1072 = vector.load %arg7[%c66_668, %c0_669] : memref<128x32xf32, #tpu.memory_space<vmem>>, vector<1x32xf32>
    tpu.vector_store %arg7[%c66_668, %c0_669], %1071 {strides = array<i32>} : memref<128x32xf32, #tpu.memory_space<vmem>>, vector<1x32xf32>,
    %c67_i32 = arith.constant 67 : i32
    %1073 = arith.addi %0, %c67_i32 : i32
    %1074 = arith.index_cast %1073 : i32 to index
    %1075 = memref.load %arg1[%1074] : memref<256xi32, #tpu.memory_space<smem>>
    %c0_i32_670 = arith.constant 0 : i32
    %c49_i32_671 = arith.constant 49 : i32
    %1076 = arith.maxsi %c0_i32_670, %1075 : i32
    %1077 = arith.minsi %c49_i32_671, %1076 : i32
    %c67_i32_672 = arith.constant 67 : i32
    %1078 = arith.addi %0, %c67_i32_672 : i32
    %1079 = arith.index_cast %1078 : i32 to index
    %1080 = memref.load %arg2[%1079] : memref<256xi32, #tpu.memory_space<smem>>
    %c0_i32_673 = arith.constant 0 : i32
    %c39_i32_674 = arith.constant 39 : i32
    %1081 = arith.maxsi %c0_i32_673, %1080 : i32
    %1082 = arith.minsi %c39_i32_674, %1081 : i32
    %1083 = arith.index_cast %1077 : i32 to index
    %c0_675 = arith.constant 0 : index
    %1084 = vector.load %arg3[%1083, %c0_675] : memref<50x32xf32, #tpu.memory_space<vmem>>, vector<1x32xf32>
    %c67 = arith.constant 67 : index
    %c0_676 = arith.constant 0 : index
    %1085 = vector.load %arg6[%c67, %c0_676] : memref<128x32xf32, #tpu.memory_space<vmem>>, vector<1x32xf32>
    tpu.vector_store %arg6[%c67, %c0_676], %1084 {strides = array<i32>} : memref<128x32xf32, #tpu.memory_space<vmem>>, vector<1x32xf32>,
    %1086 = arith.index_cast %1082 : i32 to index
    %c0_677 = arith.constant 0 : index
    %1087 = vector.load %arg4[%1086, %c0_677] : memref<40x32xf32, #tpu.memory_space<vmem>>, vector<1x32xf32>
    %c67_678 = arith.constant 67 : index
    %c0_679 = arith.constant 0 : index
    %1088 = vector.load %arg7[%c67_678, %c0_679] : memref<128x32xf32, #tpu.memory_space<vmem>>, vector<1x32xf32>
    tpu.vector_store %arg7[%c67_678, %c0_679], %1087 {strides = array<i32>} : memref<128x32xf32, #tpu.memory_space<vmem>>, vector<1x32xf32>,
    %c68_i32 = arith.constant 68 : i32
    %1089 = arith.addi %0, %c68_i32 : i32
    %1090 = arith.index_cast %1089 : i32 to index
    %1091 = memref.load %arg1[%1090] : memref<256xi32, #tpu.memory_space<smem>>
    %c0_i32_680 = arith.constant 0 : i32
    %c49_i32_681 = arith.constant 49 : i32
    %1092 = arith.maxsi %c0_i32_680, %1091 : i32
    %1093 = arith.minsi %c49_i32_681, %1092 : i32
    %c68_i32_682 = arith.constant 68 : i32
    %1094 = arith.addi %0, %c68_i32_682 : i32
    %1095 = arith.index_cast %1094 : i32 to index
    %1096 = memref.load %arg2[%1095] : memref<256xi32, #tpu.memory_space<smem>>
    %c0_i32_683 = arith.constant 0 : i32
    %c39_i32_684 = arith.constant 39 : i32
    %1097 = arith.maxsi %c0_i32_683, %1096 : i32
    %1098 = arith.minsi %c39_i32_684, %1097 : i32
    %1099 = arith.index_cast %1093 : i32 to index
    %c0_685 = arith.constant 0 : index
    %1100 = vector.load %arg3[%1099, %c0_685] : memref<50x32xf32, #tpu.memory_space<vmem>>, vector<1x32xf32>
    %c68 = arith.constant 68 : index
    %c0_686 = arith.constant 0 : index
    %1101 = vector.load %arg6[%c68, %c0_686] : memref<128x32xf32, #tpu.memory_space<vmem>>, vector<1x32xf32>
    tpu.vector_store %arg6[%c68, %c0_686], %1100 {strides = array<i32>} : memref<128x32xf32, #tpu.memory_space<vmem>>, vector<1x32xf32>,
    %1102 = arith.index_cast %1098 : i32 to index
    %c0_687 = arith.constant 0 : index
    %1103 = vector.load %arg4[%1102, %c0_687] : memref<40x32xf32, #tpu.memory_space<vmem>>, vector<1x32xf32>
    %c68_688 = arith.constant 68 : index
    %c0_689 = arith.constant 0 : index
    %1104 = vector.load %arg7[%c68_688, %c0_689] : memref<128x32xf32, #tpu.memory_space<vmem>>, vector<1x32xf32>
    tpu.vector_store %arg7[%c68_688, %c0_689], %1103 {strides = array<i32>} : memref<128x32xf32, #tpu.memory_space<vmem>>, vector<1x32xf32>,
    %c69_i32 = arith.constant 69 : i32
    %1105 = arith.addi %0, %c69_i32 : i32
    %1106 = arith.index_cast %1105 : i32 to index
    %1107 = memref.load %arg1[%1106] : memref<256xi32, #tpu.memory_space<smem>>
    %c0_i32_690 = arith.constant 0 : i32
    %c49_i32_691 = arith.constant 49 : i32
    %1108 = arith.maxsi %c0_i32_690, %1107 : i32
    %1109 = arith.minsi %c49_i32_691, %1108 : i32
    %c69_i32_692 = arith.constant 69 : i32
    %1110 = arith.addi %0, %c69_i32_692 : i32
    %1111 = arith.index_cast %1110 : i32 to index
    %1112 = memref.load %arg2[%1111] : memref<256xi32, #tpu.memory_space<smem>>
    %c0_i32_693 = arith.constant 0 : i32
    %c39_i32_694 = arith.constant 39 : i32
    %1113 = arith.maxsi %c0_i32_693, %1112 : i32
    %1114 = arith.minsi %c39_i32_694, %1113 : i32
    %1115 = arith.index_cast %1109 : i32 to index
    %c0_695 = arith.constant 0 : index
    %1116 = vector.load %arg3[%1115, %c0_695] : memref<50x32xf32, #tpu.memory_space<vmem>>, vector<1x32xf32>
    %c69 = arith.constant 69 : index
    %c0_696 = arith.constant 0 : index
    %1117 = vector.load %arg6[%c69, %c0_696] : memref<128x32xf32, #tpu.memory_space<vmem>>, vector<1x32xf32>
    tpu.vector_store %arg6[%c69, %c0_696], %1116 {strides = array<i32>} : memref<128x32xf32, #tpu.memory_space<vmem>>, vector<1x32xf32>,
    %1118 = arith.index_cast %1114 : i32 to index
    %c0_697 = arith.constant 0 : index
    %1119 = vector.load %arg4[%1118, %c0_697] : memref<40x32xf32, #tpu.memory_space<vmem>>, vector<1x32xf32>
    %c69_698 = arith.constant 69 : index
    %c0_699 = arith.constant 0 : index
    %1120 = vector.load %arg7[%c69_698, %c0_699] : memref<128x32xf32, #tpu.memory_space<vmem>>, vector<1x32xf32>
    tpu.vector_store %arg7[%c69_698, %c0_699], %1119 {strides = array<i32>} : memref<128x32xf32, #tpu.memory_space<vmem>>, vector<1x32xf32>,
    %c70_i32 = arith.constant 70 : i32
    %1121 = arith.addi %0, %c70_i32 : i32
    %1122 = arith.index_cast %1121 : i32 to index
    %1123 = memref.load %arg1[%1122] : memref<256xi32, #tpu.memory_space<smem>>
    %c0_i32_700 = arith.constant 0 : i32
    %c49_i32_701 = arith.constant 49 : i32
    %1124 = arith.maxsi %c0_i32_700, %1123 : i32
    %1125 = arith.minsi %c49_i32_701, %1124 : i32
    %c70_i32_702 = arith.constant 70 : i32
    %1126 = arith.addi %0, %c70_i32_702 : i32
    %1127 = arith.index_cast %1126 : i32 to index
    %1128 = memref.load %arg2[%1127] : memref<256xi32, #tpu.memory_space<smem>>
    %c0_i32_703 = arith.constant 0 : i32
    %c39_i32_704 = arith.constant 39 : i32
    %1129 = arith.maxsi %c0_i32_703, %1128 : i32
    %1130 = arith.minsi %c39_i32_704, %1129 : i32
    %1131 = arith.index_cast %1125 : i32 to index
    %c0_705 = arith.constant 0 : index
    %1132 = vector.load %arg3[%1131, %c0_705] : memref<50x32xf32, #tpu.memory_space<vmem>>, vector<1x32xf32>
    %c70 = arith.constant 70 : index
    %c0_706 = arith.constant 0 : index
    %1133 = vector.load %arg6[%c70, %c0_706] : memref<128x32xf32, #tpu.memory_space<vmem>>, vector<1x32xf32>
    tpu.vector_store %arg6[%c70, %c0_706], %1132 {strides = array<i32>} : memref<128x32xf32, #tpu.memory_space<vmem>>, vector<1x32xf32>,
    %1134 = arith.index_cast %1130 : i32 to index
    %c0_707 = arith.constant 0 : index
    %1135 = vector.load %arg4[%1134, %c0_707] : memref<40x32xf32, #tpu.memory_space<vmem>>, vector<1x32xf32>
    %c70_708 = arith.constant 70 : index
    %c0_709 = arith.constant 0 : index
    %1136 = vector.load %arg7[%c70_708, %c0_709] : memref<128x32xf32, #tpu.memory_space<vmem>>, vector<1x32xf32>
    tpu.vector_store %arg7[%c70_708, %c0_709], %1135 {strides = array<i32>} : memref<128x32xf32, #tpu.memory_space<vmem>>, vector<1x32xf32>,
    %c71_i32 = arith.constant 71 : i32
    %1137 = arith.addi %0, %c71_i32 : i32
    %1138 = arith.index_cast %1137 : i32 to index
    %1139 = memref.load %arg1[%1138] : memref<256xi32, #tpu.memory_space<smem>>
    %c0_i32_710 = arith.constant 0 : i32
    %c49_i32_711 = arith.constant 49 : i32
    %1140 = arith.maxsi %c0_i32_710, %1139 : i32
    %1141 = arith.minsi %c49_i32_711, %1140 : i32
    %c71_i32_712 = arith.constant 71 : i32
    %1142 = arith.addi %0, %c71_i32_712 : i32
    %1143 = arith.index_cast %1142 : i32 to index
    %1144 = memref.load %arg2[%1143] : memref<256xi32, #tpu.memory_space<smem>>
    %c0_i32_713 = arith.constant 0 : i32
    %c39_i32_714 = arith.constant 39 : i32
    %1145 = arith.maxsi %c0_i32_713, %1144 : i32
    %1146 = arith.minsi %c39_i32_714, %1145 : i32
    %1147 = arith.index_cast %1141 : i32 to index
    %c0_715 = arith.constant 0 : index
    %1148 = vector.load %arg3[%1147, %c0_715] : memref<50x32xf32, #tpu.memory_space<vmem>>, vector<1x32xf32>
    %c71 = arith.constant 71 : index
    %c0_716 = arith.constant 0 : index
    %1149 = vector.load %arg6[%c71, %c0_716] : memref<128x32xf32, #tpu.memory_space<vmem>>, vector<1x32xf32>
    tpu.vector_store %arg6[%c71, %c0_716], %1148 {strides = array<i32>} : memref<128x32xf32, #tpu.memory_space<vmem>>, vector<1x32xf32>,
    %1150 = arith.index_cast %1146 : i32 to index
    %c0_717 = arith.constant 0 : index
    %1151 = vector.load %arg4[%1150, %c0_717] : memref<40x32xf32, #tpu.memory_space<vmem>>, vector<1x32xf32>
    %c71_718 = arith.constant 71 : index
    %c0_719 = arith.constant 0 : index
    %1152 = vector.load %arg7[%c71_718, %c0_719] : memref<128x32xf32, #tpu.memory_space<vmem>>, vector<1x32xf32>
    tpu.vector_store %arg7[%c71_718, %c0_719], %1151 {strides = array<i32>} : memref<128x32xf32, #tpu.memory_space<vmem>>, vector<1x32xf32>,
    %c72_i32 = arith.constant 72 : i32
    %1153 = arith.addi %0, %c72_i32 : i32
    %1154 = arith.index_cast %1153 : i32 to index
    %1155 = memref.load %arg1[%1154] : memref<256xi32, #tpu.memory_space<smem>>
    %c0_i32_720 = arith.constant 0 : i32
    %c49_i32_721 = arith.constant 49 : i32
    %1156 = arith.maxsi %c0_i32_720, %1155 : i32
    %1157 = arith.minsi %c49_i32_721, %1156 : i32
    %c72_i32_722 = arith.constant 72 : i32
    %1158 = arith.addi %0, %c72_i32_722 : i32
    %1159 = arith.index_cast %1158 : i32 to index
    %1160 = memref.load %arg2[%1159] : memref<256xi32, #tpu.memory_space<smem>>
    %c0_i32_723 = arith.constant 0 : i32
    %c39_i32_724 = arith.constant 39 : i32
    %1161 = arith.maxsi %c0_i32_723, %1160 : i32
    %1162 = arith.minsi %c39_i32_724, %1161 : i32
    %1163 = arith.index_cast %1157 : i32 to index
    %c0_725 = arith.constant 0 : index
    %1164 = vector.load %arg3[%1163, %c0_725] : memref<50x32xf32, #tpu.memory_space<vmem>>, vector<1x32xf32>
    %c72 = arith.constant 72 : index
    %c0_726 = arith.constant 0 : index
    %1165 = vector.load %arg6[%c72, %c0_726] : memref<128x32xf32, #tpu.memory_space<vmem>>, vector<1x32xf32>
    tpu.vector_store %arg6[%c72, %c0_726], %1164 {strides = array<i32>} : memref<128x32xf32, #tpu.memory_space<vmem>>, vector<1x32xf32>,
    %1166 = arith.index_cast %1162 : i32 to index
    %c0_727 = arith.constant 0 : index
    %1167 = vector.load %arg4[%1166, %c0_727] : memref<40x32xf32, #tpu.memory_space<vmem>>, vector<1x32xf32>
    %c72_728 = arith.constant 72 : index
    %c0_729 = arith.constant 0 : index
    %1168 = vector.load %arg7[%c72_728, %c0_729] : memref<128x32xf32, #tpu.memory_space<vmem>>, vector<1x32xf32>
    tpu.vector_store %arg7[%c72_728, %c0_729], %1167 {strides = array<i32>} : memref<128x32xf32, #tpu.memory_space<vmem>>, vector<1x32xf32>,
    %c73_i32 = arith.constant 73 : i32
    %1169 = arith.addi %0, %c73_i32 : i32
    %1170 = arith.index_cast %1169 : i32 to index
    %1171 = memref.load %arg1[%1170] : memref<256xi32, #tpu.memory_space<smem>>
    %c0_i32_730 = arith.constant 0 : i32
    %c49_i32_731 = arith.constant 49 : i32
    %1172 = arith.maxsi %c0_i32_730, %1171 : i32
    %1173 = arith.minsi %c49_i32_731, %1172 : i32
    %c73_i32_732 = arith.constant 73 : i32
    %1174 = arith.addi %0, %c73_i32_732 : i32
    %1175 = arith.index_cast %1174 : i32 to index
    %1176 = memref.load %arg2[%1175] : memref<256xi32, #tpu.memory_space<smem>>
    %c0_i32_733 = arith.constant 0 : i32
    %c39_i32_734 = arith.constant 39 : i32
    %1177 = arith.maxsi %c0_i32_733, %1176 : i32
    %1178 = arith.minsi %c39_i32_734, %1177 : i32
    %1179 = arith.index_cast %1173 : i32 to index
    %c0_735 = arith.constant 0 : index
    %1180 = vector.load %arg3[%1179, %c0_735] : memref<50x32xf32, #tpu.memory_space<vmem>>, vector<1x32xf32>
    %c73 = arith.constant 73 : index
    %c0_736 = arith.constant 0 : index
    %1181 = vector.load %arg6[%c73, %c0_736] : memref<128x32xf32, #tpu.memory_space<vmem>>, vector<1x32xf32>
    tpu.vector_store %arg6[%c73, %c0_736], %1180 {strides = array<i32>} : memref<128x32xf32, #tpu.memory_space<vmem>>, vector<1x32xf32>,
    %1182 = arith.index_cast %1178 : i32 to index
    %c0_737 = arith.constant 0 : index
    %1183 = vector.load %arg4[%1182, %c0_737] : memref<40x32xf32, #tpu.memory_space<vmem>>, vector<1x32xf32>
    %c73_738 = arith.constant 73 : index
    %c0_739 = arith.constant 0 : index
    %1184 = vector.load %arg7[%c73_738, %c0_739] : memref<128x32xf32, #tpu.memory_space<vmem>>, vector<1x32xf32>
    tpu.vector_store %arg7[%c73_738, %c0_739], %1183 {strides = array<i32>} : memref<128x32xf32, #tpu.memory_space<vmem>>, vector<1x32xf32>,
    %c74_i32 = arith.constant 74 : i32
    %1185 = arith.addi %0, %c74_i32 : i32
    %1186 = arith.index_cast %1185 : i32 to index
    %1187 = memref.load %arg1[%1186] : memref<256xi32, #tpu.memory_space<smem>>
    %c0_i32_740 = arith.constant 0 : i32
    %c49_i32_741 = arith.constant 49 : i32
    %1188 = arith.maxsi %c0_i32_740, %1187 : i32
    %1189 = arith.minsi %c49_i32_741, %1188 : i32
    %c74_i32_742 = arith.constant 74 : i32
    %1190 = arith.addi %0, %c74_i32_742 : i32
    %1191 = arith.index_cast %1190 : i32 to index
    %1192 = memref.load %arg2[%1191] : memref<256xi32, #tpu.memory_space<smem>>
    %c0_i32_743 = arith.constant 0 : i32
    %c39_i32_744 = arith.constant 39 : i32
    %1193 = arith.maxsi %c0_i32_743, %1192 : i32
    %1194 = arith.minsi %c39_i32_744, %1193 : i32
    %1195 = arith.index_cast %1189 : i32 to index
    %c0_745 = arith.constant 0 : index
    %1196 = vector.load %arg3[%1195, %c0_745] : memref<50x32xf32, #tpu.memory_space<vmem>>, vector<1x32xf32>
    %c74 = arith.constant 74 : index
    %c0_746 = arith.constant 0 : index
    %1197 = vector.load %arg6[%c74, %c0_746] : memref<128x32xf32, #tpu.memory_space<vmem>>, vector<1x32xf32>
    tpu.vector_store %arg6[%c74, %c0_746], %1196 {strides = array<i32>} : memref<128x32xf32, #tpu.memory_space<vmem>>, vector<1x32xf32>,
    %1198 = arith.index_cast %1194 : i32 to index
    %c0_747 = arith.constant 0 : index
    %1199 = vector.load %arg4[%1198, %c0_747] : memref<40x32xf32, #tpu.memory_space<vmem>>, vector<1x32xf32>
    %c74_748 = arith.constant 74 : index
    %c0_749 = arith.constant 0 : index
    %1200 = vector.load %arg7[%c74_748, %c0_749] : memref<128x32xf32, #tpu.memory_space<vmem>>, vector<1x32xf32>
    tpu.vector_store %arg7[%c74_748, %c0_749], %1199 {strides = array<i32>} : memref<128x32xf32, #tpu.memory_space<vmem>>, vector<1x32xf32>,
    %c75_i32 = arith.constant 75 : i32
    %1201 = arith.addi %0, %c75_i32 : i32
    %1202 = arith.index_cast %1201 : i32 to index
    %1203 = memref.load %arg1[%1202] : memref<256xi32, #tpu.memory_space<smem>>
    %c0_i32_750 = arith.constant 0 : i32
    %c49_i32_751 = arith.constant 49 : i32
    %1204 = arith.maxsi %c0_i32_750, %1203 : i32
    %1205 = arith.minsi %c49_i32_751, %1204 : i32
    %c75_i32_752 = arith.constant 75 : i32
    %1206 = arith.addi %0, %c75_i32_752 : i32
    %1207 = arith.index_cast %1206 : i32 to index
    %1208 = memref.load %arg2[%1207] : memref<256xi32, #tpu.memory_space<smem>>
    %c0_i32_753 = arith.constant 0 : i32
    %c39_i32_754 = arith.constant 39 : i32
    %1209 = arith.maxsi %c0_i32_753, %1208 : i32
    %1210 = arith.minsi %c39_i32_754, %1209 : i32
    %1211 = arith.index_cast %1205 : i32 to index
    %c0_755 = arith.constant 0 : index
    %1212 = vector.load %arg3[%1211, %c0_755] : memref<50x32xf32, #tpu.memory_space<vmem>>, vector<1x32xf32>
    %c75 = arith.constant 75 : index
    %c0_756 = arith.constant 0 : index
    %1213 = vector.load %arg6[%c75, %c0_756] : memref<128x32xf32, #tpu.memory_space<vmem>>, vector<1x32xf32>
    tpu.vector_store %arg6[%c75, %c0_756], %1212 {strides = array<i32>} : memref<128x32xf32, #tpu.memory_space<vmem>>, vector<1x32xf32>,
    %1214 = arith.index_cast %1210 : i32 to index
    %c0_757 = arith.constant 0 : index
    %1215 = vector.load %arg4[%1214, %c0_757] : memref<40x32xf32, #tpu.memory_space<vmem>>, vector<1x32xf32>
    %c75_758 = arith.constant 75 : index
    %c0_759 = arith.constant 0 : index
    %1216 = vector.load %arg7[%c75_758, %c0_759] : memref<128x32xf32, #tpu.memory_space<vmem>>, vector<1x32xf32>
    tpu.vector_store %arg7[%c75_758, %c0_759], %1215 {strides = array<i32>} : memref<128x32xf32, #tpu.memory_space<vmem>>, vector<1x32xf32>,
    %c76_i32 = arith.constant 76 : i32
    %1217 = arith.addi %0, %c76_i32 : i32
    %1218 = arith.index_cast %1217 : i32 to index
    %1219 = memref.load %arg1[%1218] : memref<256xi32, #tpu.memory_space<smem>>
    %c0_i32_760 = arith.constant 0 : i32
    %c49_i32_761 = arith.constant 49 : i32
    %1220 = arith.maxsi %c0_i32_760, %1219 : i32
    %1221 = arith.minsi %c49_i32_761, %1220 : i32
    %c76_i32_762 = arith.constant 76 : i32
    %1222 = arith.addi %0, %c76_i32_762 : i32
    %1223 = arith.index_cast %1222 : i32 to index
    %1224 = memref.load %arg2[%1223] : memref<256xi32, #tpu.memory_space<smem>>
    %c0_i32_763 = arith.constant 0 : i32
    %c39_i32_764 = arith.constant 39 : i32
    %1225 = arith.maxsi %c0_i32_763, %1224 : i32
    %1226 = arith.minsi %c39_i32_764, %1225 : i32
    %1227 = arith.index_cast %1221 : i32 to index
    %c0_765 = arith.constant 0 : index
    %1228 = vector.load %arg3[%1227, %c0_765] : memref<50x32xf32, #tpu.memory_space<vmem>>, vector<1x32xf32>
    %c76 = arith.constant 76 : index
    %c0_766 = arith.constant 0 : index
    %1229 = vector.load %arg6[%c76, %c0_766] : memref<128x32xf32, #tpu.memory_space<vmem>>, vector<1x32xf32>
    tpu.vector_store %arg6[%c76, %c0_766], %1228 {strides = array<i32>} : memref<128x32xf32, #tpu.memory_space<vmem>>, vector<1x32xf32>,
    %1230 = arith.index_cast %1226 : i32 to index
    %c0_767 = arith.constant 0 : index
    %1231 = vector.load %arg4[%1230, %c0_767] : memref<40x32xf32, #tpu.memory_space<vmem>>, vector<1x32xf32>
    %c76_768 = arith.constant 76 : index
    %c0_769 = arith.constant 0 : index
    %1232 = vector.load %arg7[%c76_768, %c0_769] : memref<128x32xf32, #tpu.memory_space<vmem>>, vector<1x32xf32>
    tpu.vector_store %arg7[%c76_768, %c0_769], %1231 {strides = array<i32>} : memref<128x32xf32, #tpu.memory_space<vmem>>, vector<1x32xf32>,
    %c77_i32 = arith.constant 77 : i32
    %1233 = arith.addi %0, %c77_i32 : i32
    %1234 = arith.index_cast %1233 : i32 to index
    %1235 = memref.load %arg1[%1234] : memref<256xi32, #tpu.memory_space<smem>>
    %c0_i32_770 = arith.constant 0 : i32
    %c49_i32_771 = arith.constant 49 : i32
    %1236 = arith.maxsi %c0_i32_770, %1235 : i32
    %1237 = arith.minsi %c49_i32_771, %1236 : i32
    %c77_i32_772 = arith.constant 77 : i32
    %1238 = arith.addi %0, %c77_i32_772 : i32
    %1239 = arith.index_cast %1238 : i32 to index
    %1240 = memref.load %arg2[%1239] : memref<256xi32, #tpu.memory_space<smem>>
    %c0_i32_773 = arith.constant 0 : i32
    %c39_i32_774 = arith.constant 39 : i32
    %1241 = arith.maxsi %c0_i32_773, %1240 : i32
    %1242 = arith.minsi %c39_i32_774, %1241 : i32
    %1243 = arith.index_cast %1237 : i32 to index
    %c0_775 = arith.constant 0 : index
    %1244 = vector.load %arg3[%1243, %c0_775] : memref<50x32xf32, #tpu.memory_space<vmem>>, vector<1x32xf32>
    %c77 = arith.constant 77 : index
    %c0_776 = arith.constant 0 : index
    %1245 = vector.load %arg6[%c77, %c0_776] : memref<128x32xf32, #tpu.memory_space<vmem>>, vector<1x32xf32>
    tpu.vector_store %arg6[%c77, %c0_776], %1244 {strides = array<i32>} : memref<128x32xf32, #tpu.memory_space<vmem>>, vector<1x32xf32>,
    %1246 = arith.index_cast %1242 : i32 to index
    %c0_777 = arith.constant 0 : index
    %1247 = vector.load %arg4[%1246, %c0_777] : memref<40x32xf32, #tpu.memory_space<vmem>>, vector<1x32xf32>
    %c77_778 = arith.constant 77 : index
    %c0_779 = arith.constant 0 : index
    %1248 = vector.load %arg7[%c77_778, %c0_779] : memref<128x32xf32, #tpu.memory_space<vmem>>, vector<1x32xf32>
    tpu.vector_store %arg7[%c77_778, %c0_779], %1247 {strides = array<i32>} : memref<128x32xf32, #tpu.memory_space<vmem>>, vector<1x32xf32>,
    %c78_i32 = arith.constant 78 : i32
    %1249 = arith.addi %0, %c78_i32 : i32
    %1250 = arith.index_cast %1249 : i32 to index
    %1251 = memref.load %arg1[%1250] : memref<256xi32, #tpu.memory_space<smem>>
    %c0_i32_780 = arith.constant 0 : i32
    %c49_i32_781 = arith.constant 49 : i32
    %1252 = arith.maxsi %c0_i32_780, %1251 : i32
    %1253 = arith.minsi %c49_i32_781, %1252 : i32
    %c78_i32_782 = arith.constant 78 : i32
    %1254 = arith.addi %0, %c78_i32_782 : i32
    %1255 = arith.index_cast %1254 : i32 to index
    %1256 = memref.load %arg2[%1255] : memref<256xi32, #tpu.memory_space<smem>>
    %c0_i32_783 = arith.constant 0 : i32
    %c39_i32_784 = arith.constant 39 : i32
    %1257 = arith.maxsi %c0_i32_783, %1256 : i32
    %1258 = arith.minsi %c39_i32_784, %1257 : i32
    %1259 = arith.index_cast %1253 : i32 to index
    %c0_785 = arith.constant 0 : index
    %1260 = vector.load %arg3[%1259, %c0_785] : memref<50x32xf32, #tpu.memory_space<vmem>>, vector<1x32xf32>
    %c78 = arith.constant 78 : index
    %c0_786 = arith.constant 0 : index
    %1261 = vector.load %arg6[%c78, %c0_786] : memref<128x32xf32, #tpu.memory_space<vmem>>, vector<1x32xf32>
    tpu.vector_store %arg6[%c78, %c0_786], %1260 {strides = array<i32>} : memref<128x32xf32, #tpu.memory_space<vmem>>, vector<1x32xf32>,
    %1262 = arith.index_cast %1258 : i32 to index
    %c0_787 = arith.constant 0 : index
    %1263 = vector.load %arg4[%1262, %c0_787] : memref<40x32xf32, #tpu.memory_space<vmem>>, vector<1x32xf32>
    %c78_788 = arith.constant 78 : index
    %c0_789 = arith.constant 0 : index
    %1264 = vector.load %arg7[%c78_788, %c0_789] : memref<128x32xf32, #tpu.memory_space<vmem>>, vector<1x32xf32>
    tpu.vector_store %arg7[%c78_788, %c0_789], %1263 {strides = array<i32>} : memref<128x32xf32, #tpu.memory_space<vmem>>, vector<1x32xf32>,
    %c79_i32 = arith.constant 79 : i32
    %1265 = arith.addi %0, %c79_i32 : i32
    %1266 = arith.index_cast %1265 : i32 to index
    %1267 = memref.load %arg1[%1266] : memref<256xi32, #tpu.memory_space<smem>>
    %c0_i32_790 = arith.constant 0 : i32
    %c49_i32_791 = arith.constant 49 : i32
    %1268 = arith.maxsi %c0_i32_790, %1267 : i32
    %1269 = arith.minsi %c49_i32_791, %1268 : i32
    %c79_i32_792 = arith.constant 79 : i32
    %1270 = arith.addi %0, %c79_i32_792 : i32
    %1271 = arith.index_cast %1270 : i32 to index
    %1272 = memref.load %arg2[%1271] : memref<256xi32, #tpu.memory_space<smem>>
    %c0_i32_793 = arith.constant 0 : i32
    %c39_i32_794 = arith.constant 39 : i32
    %1273 = arith.maxsi %c0_i32_793, %1272 : i32
    %1274 = arith.minsi %c39_i32_794, %1273 : i32
    %1275 = arith.index_cast %1269 : i32 to index
    %c0_795 = arith.constant 0 : index
    %1276 = vector.load %arg3[%1275, %c0_795] : memref<50x32xf32, #tpu.memory_space<vmem>>, vector<1x32xf32>
    %c79 = arith.constant 79 : index
    %c0_796 = arith.constant 0 : index
    %1277 = vector.load %arg6[%c79, %c0_796] : memref<128x32xf32, #tpu.memory_space<vmem>>, vector<1x32xf32>
    tpu.vector_store %arg6[%c79, %c0_796], %1276 {strides = array<i32>} : memref<128x32xf32, #tpu.memory_space<vmem>>, vector<1x32xf32>,
    %1278 = arith.index_cast %1274 : i32 to index
    %c0_797 = arith.constant 0 : index
    %1279 = vector.load %arg4[%1278, %c0_797] : memref<40x32xf32, #tpu.memory_space<vmem>>, vector<1x32xf32>
    %c79_798 = arith.constant 79 : index
    %c0_799 = arith.constant 0 : index
    %1280 = vector.load %arg7[%c79_798, %c0_799] : memref<128x32xf32, #tpu.memory_space<vmem>>, vector<1x32xf32>
    tpu.vector_store %arg7[%c79_798, %c0_799], %1279 {strides = array<i32>} : memref<128x32xf32, #tpu.memory_space<vmem>>, vector<1x32xf32>,
    %c80_i32 = arith.constant 80 : i32
    %1281 = arith.addi %0, %c80_i32 : i32
    %1282 = arith.index_cast %1281 : i32 to index
    %1283 = memref.load %arg1[%1282] : memref<256xi32, #tpu.memory_space<smem>>
    %c0_i32_800 = arith.constant 0 : i32
    %c49_i32_801 = arith.constant 49 : i32
    %1284 = arith.maxsi %c0_i32_800, %1283 : i32
    %1285 = arith.minsi %c49_i32_801, %1284 : i32
    %c80_i32_802 = arith.constant 80 : i32
    %1286 = arith.addi %0, %c80_i32_802 : i32
    %1287 = arith.index_cast %1286 : i32 to index
    %1288 = memref.load %arg2[%1287] : memref<256xi32, #tpu.memory_space<smem>>
    %c0_i32_803 = arith.constant 0 : i32
    %c39_i32_804 = arith.constant 39 : i32
    %1289 = arith.maxsi %c0_i32_803, %1288 : i32
    %1290 = arith.minsi %c39_i32_804, %1289 : i32
    %1291 = arith.index_cast %1285 : i32 to index
    %c0_805 = arith.constant 0 : index
    %1292 = vector.load %arg3[%1291, %c0_805] : memref<50x32xf32, #tpu.memory_space<vmem>>, vector<1x32xf32>
    %c80 = arith.constant 80 : index
    %c0_806 = arith.constant 0 : index
    %1293 = vector.load %arg6[%c80, %c0_806] : memref<128x32xf32, #tpu.memory_space<vmem>>, vector<1x32xf32>
    tpu.vector_store %arg6[%c80, %c0_806], %1292 {strides = array<i32>} : memref<128x32xf32, #tpu.memory_space<vmem>>, vector<1x32xf32>,
    %1294 = arith.index_cast %1290 : i32 to index
    %c0_807 = arith.constant 0 : index
    %1295 = vector.load %arg4[%1294, %c0_807] : memref<40x32xf32, #tpu.memory_space<vmem>>, vector<1x32xf32>
    %c80_808 = arith.constant 80 : index
    %c0_809 = arith.constant 0 : index
    %1296 = vector.load %arg7[%c80_808, %c0_809] : memref<128x32xf32, #tpu.memory_space<vmem>>, vector<1x32xf32>
    tpu.vector_store %arg7[%c80_808, %c0_809], %1295 {strides = array<i32>} : memref<128x32xf32, #tpu.memory_space<vmem>>, vector<1x32xf32>,
    %c81_i32 = arith.constant 81 : i32
    %1297 = arith.addi %0, %c81_i32 : i32
    %1298 = arith.index_cast %1297 : i32 to index
    %1299 = memref.load %arg1[%1298] : memref<256xi32, #tpu.memory_space<smem>>
    %c0_i32_810 = arith.constant 0 : i32
    %c49_i32_811 = arith.constant 49 : i32
    %1300 = arith.maxsi %c0_i32_810, %1299 : i32
    %1301 = arith.minsi %c49_i32_811, %1300 : i32
    %c81_i32_812 = arith.constant 81 : i32
    %1302 = arith.addi %0, %c81_i32_812 : i32
    %1303 = arith.index_cast %1302 : i32 to index
    %1304 = memref.load %arg2[%1303] : memref<256xi32, #tpu.memory_space<smem>>
    %c0_i32_813 = arith.constant 0 : i32
    %c39_i32_814 = arith.constant 39 : i32
    %1305 = arith.maxsi %c0_i32_813, %1304 : i32
    %1306 = arith.minsi %c39_i32_814, %1305 : i32
    %1307 = arith.index_cast %1301 : i32 to index
    %c0_815 = arith.constant 0 : index
    %1308 = vector.load %arg3[%1307, %c0_815] : memref<50x32xf32, #tpu.memory_space<vmem>>, vector<1x32xf32>
    %c81 = arith.constant 81 : index
    %c0_816 = arith.constant 0 : index
    %1309 = vector.load %arg6[%c81, %c0_816] : memref<128x32xf32, #tpu.memory_space<vmem>>, vector<1x32xf32>
    tpu.vector_store %arg6[%c81, %c0_816], %1308 {strides = array<i32>} : memref<128x32xf32, #tpu.memory_space<vmem>>, vector<1x32xf32>,
    %1310 = arith.index_cast %1306 : i32 to index
    %c0_817 = arith.constant 0 : index
    %1311 = vector.load %arg4[%1310, %c0_817] : memref<40x32xf32, #tpu.memory_space<vmem>>, vector<1x32xf32>
    %c81_818 = arith.constant 81 : index
    %c0_819 = arith.constant 0 : index
    %1312 = vector.load %arg7[%c81_818, %c0_819] : memref<128x32xf32, #tpu.memory_space<vmem>>, vector<1x32xf32>
    tpu.vector_store %arg7[%c81_818, %c0_819], %1311 {strides = array<i32>} : memref<128x32xf32, #tpu.memory_space<vmem>>, vector<1x32xf32>,
    %c82_i32 = arith.constant 82 : i32
    %1313 = arith.addi %0, %c82_i32 : i32
    %1314 = arith.index_cast %1313 : i32 to index
    %1315 = memref.load %arg1[%1314] : memref<256xi32, #tpu.memory_space<smem>>
    %c0_i32_820 = arith.constant 0 : i32
    %c49_i32_821 = arith.constant 49 : i32
    %1316 = arith.maxsi %c0_i32_820, %1315 : i32
    %1317 = arith.minsi %c49_i32_821, %1316 : i32
    %c82_i32_822 = arith.constant 82 : i32
    %1318 = arith.addi %0, %c82_i32_822 : i32
    %1319 = arith.index_cast %1318 : i32 to index
    %1320 = memref.load %arg2[%1319] : memref<256xi32, #tpu.memory_space<smem>>
    %c0_i32_823 = arith.constant 0 : i32
    %c39_i32_824 = arith.constant 39 : i32
    %1321 = arith.maxsi %c0_i32_823, %1320 : i32
    %1322 = arith.minsi %c39_i32_824, %1321 : i32
    %1323 = arith.index_cast %1317 : i32 to index
    %c0_825 = arith.constant 0 : index
    %1324 = vector.load %arg3[%1323, %c0_825] : memref<50x32xf32, #tpu.memory_space<vmem>>, vector<1x32xf32>
    %c82 = arith.constant 82 : index
    %c0_826 = arith.constant 0 : index
    %1325 = vector.load %arg6[%c82, %c0_826] : memref<128x32xf32, #tpu.memory_space<vmem>>, vector<1x32xf32>
    tpu.vector_store %arg6[%c82, %c0_826], %1324 {strides = array<i32>} : memref<128x32xf32, #tpu.memory_space<vmem>>, vector<1x32xf32>,
    %1326 = arith.index_cast %1322 : i32 to index
    %c0_827 = arith.constant 0 : index
    %1327 = vector.load %arg4[%1326, %c0_827] : memref<40x32xf32, #tpu.memory_space<vmem>>, vector<1x32xf32>
    %c82_828 = arith.constant 82 : index
    %c0_829 = arith.constant 0 : index
    %1328 = vector.load %arg7[%c82_828, %c0_829] : memref<128x32xf32, #tpu.memory_space<vmem>>, vector<1x32xf32>
    tpu.vector_store %arg7[%c82_828, %c0_829], %1327 {strides = array<i32>} : memref<128x32xf32, #tpu.memory_space<vmem>>, vector<1x32xf32>,
    %c83_i32 = arith.constant 83 : i32
    %1329 = arith.addi %0, %c83_i32 : i32
    %1330 = arith.index_cast %1329 : i32 to index
    %1331 = memref.load %arg1[%1330] : memref<256xi32, #tpu.memory_space<smem>>
    %c0_i32_830 = arith.constant 0 : i32
    %c49_i32_831 = arith.constant 49 : i32
    %1332 = arith.maxsi %c0_i32_830, %1331 : i32
    %1333 = arith.minsi %c49_i32_831, %1332 : i32
    %c83_i32_832 = arith.constant 83 : i32
    %1334 = arith.addi %0, %c83_i32_832 : i32
    %1335 = arith.index_cast %1334 : i32 to index
    %1336 = memref.load %arg2[%1335] : memref<256xi32, #tpu.memory_space<smem>>
    %c0_i32_833 = arith.constant 0 : i32
    %c39_i32_834 = arith.constant 39 : i32
    %1337 = arith.maxsi %c0_i32_833, %1336 : i32
    %1338 = arith.minsi %c39_i32_834, %1337 : i32
    %1339 = arith.index_cast %1333 : i32 to index
    %c0_835 = arith.constant 0 : index
    %1340 = vector.load %arg3[%1339, %c0_835] : memref<50x32xf32, #tpu.memory_space<vmem>>, vector<1x32xf32>
    %c83 = arith.constant 83 : index
    %c0_836 = arith.constant 0 : index
    %1341 = vector.load %arg6[%c83, %c0_836] : memref<128x32xf32, #tpu.memory_space<vmem>>, vector<1x32xf32>
    tpu.vector_store %arg6[%c83, %c0_836], %1340 {strides = array<i32>} : memref<128x32xf32, #tpu.memory_space<vmem>>, vector<1x32xf32>,
    %1342 = arith.index_cast %1338 : i32 to index
    %c0_837 = arith.constant 0 : index
    %1343 = vector.load %arg4[%1342, %c0_837] : memref<40x32xf32, #tpu.memory_space<vmem>>, vector<1x32xf32>
    %c83_838 = arith.constant 83 : index
    %c0_839 = arith.constant 0 : index
    %1344 = vector.load %arg7[%c83_838, %c0_839] : memref<128x32xf32, #tpu.memory_space<vmem>>, vector<1x32xf32>
    tpu.vector_store %arg7[%c83_838, %c0_839], %1343 {strides = array<i32>} : memref<128x32xf32, #tpu.memory_space<vmem>>, vector<1x32xf32>,
    %c84_i32 = arith.constant 84 : i32
    %1345 = arith.addi %0, %c84_i32 : i32
    %1346 = arith.index_cast %1345 : i32 to index
    %1347 = memref.load %arg1[%1346] : memref<256xi32, #tpu.memory_space<smem>>
    %c0_i32_840 = arith.constant 0 : i32
    %c49_i32_841 = arith.constant 49 : i32
    %1348 = arith.maxsi %c0_i32_840, %1347 : i32
    %1349 = arith.minsi %c49_i32_841, %1348 : i32
    %c84_i32_842 = arith.constant 84 : i32
    %1350 = arith.addi %0, %c84_i32_842 : i32
    %1351 = arith.index_cast %1350 : i32 to index
    %1352 = memref.load %arg2[%1351] : memref<256xi32, #tpu.memory_space<smem>>
    %c0_i32_843 = arith.constant 0 : i32
    %c39_i32_844 = arith.constant 39 : i32
    %1353 = arith.maxsi %c0_i32_843, %1352 : i32
    %1354 = arith.minsi %c39_i32_844, %1353 : i32
    %1355 = arith.index_cast %1349 : i32 to index
    %c0_845 = arith.constant 0 : index
    %1356 = vector.load %arg3[%1355, %c0_845] : memref<50x32xf32, #tpu.memory_space<vmem>>, vector<1x32xf32>
    %c84 = arith.constant 84 : index
    %c0_846 = arith.constant 0 : index
    %1357 = vector.load %arg6[%c84, %c0_846] : memref<128x32xf32, #tpu.memory_space<vmem>>, vector<1x32xf32>
    tpu.vector_store %arg6[%c84, %c0_846], %1356 {strides = array<i32>} : memref<128x32xf32, #tpu.memory_space<vmem>>, vector<1x32xf32>,
    %1358 = arith.index_cast %1354 : i32 to index
    %c0_847 = arith.constant 0 : index
    %1359 = vector.load %arg4[%1358, %c0_847] : memref<40x32xf32, #tpu.memory_space<vmem>>, vector<1x32xf32>
    %c84_848 = arith.constant 84 : index
    %c0_849 = arith.constant 0 : index
    %1360 = vector.load %arg7[%c84_848, %c0_849] : memref<128x32xf32, #tpu.memory_space<vmem>>, vector<1x32xf32>
    tpu.vector_store %arg7[%c84_848, %c0_849], %1359 {strides = array<i32>} : memref<128x32xf32, #tpu.memory_space<vmem>>, vector<1x32xf32>,
    %c85_i32 = arith.constant 85 : i32
    %1361 = arith.addi %0, %c85_i32 : i32
    %1362 = arith.index_cast %1361 : i32 to index
    %1363 = memref.load %arg1[%1362] : memref<256xi32, #tpu.memory_space<smem>>
    %c0_i32_850 = arith.constant 0 : i32
    %c49_i32_851 = arith.constant 49 : i32
    %1364 = arith.maxsi %c0_i32_850, %1363 : i32
    %1365 = arith.minsi %c49_i32_851, %1364 : i32
    %c85_i32_852 = arith.constant 85 : i32
    %1366 = arith.addi %0, %c85_i32_852 : i32
    %1367 = arith.index_cast %1366 : i32 to index
    %1368 = memref.load %arg2[%1367] : memref<256xi32, #tpu.memory_space<smem>>
    %c0_i32_853 = arith.constant 0 : i32
    %c39_i32_854 = arith.constant 39 : i32
    %1369 = arith.maxsi %c0_i32_853, %1368 : i32
    %1370 = arith.minsi %c39_i32_854, %1369 : i32
    %1371 = arith.index_cast %1365 : i32 to index
    %c0_855 = arith.constant 0 : index
    %1372 = vector.load %arg3[%1371, %c0_855] : memref<50x32xf32, #tpu.memory_space<vmem>>, vector<1x32xf32>
    %c85 = arith.constant 85 : index
    %c0_856 = arith.constant 0 : index
    %1373 = vector.load %arg6[%c85, %c0_856] : memref<128x32xf32, #tpu.memory_space<vmem>>, vector<1x32xf32>
    tpu.vector_store %arg6[%c85, %c0_856], %1372 {strides = array<i32>} : memref<128x32xf32, #tpu.memory_space<vmem>>, vector<1x32xf32>,
    %1374 = arith.index_cast %1370 : i32 to index
    %c0_857 = arith.constant 0 : index
    %1375 = vector.load %arg4[%1374, %c0_857] : memref<40x32xf32, #tpu.memory_space<vmem>>, vector<1x32xf32>
    %c85_858 = arith.constant 85 : index
    %c0_859 = arith.constant 0 : index
    %1376 = vector.load %arg7[%c85_858, %c0_859] : memref<128x32xf32, #tpu.memory_space<vmem>>, vector<1x32xf32>
    tpu.vector_store %arg7[%c85_858, %c0_859], %1375 {strides = array<i32>} : memref<128x32xf32, #tpu.memory_space<vmem>>, vector<1x32xf32>,
    %c86_i32 = arith.constant 86 : i32
    %1377 = arith.addi %0, %c86_i32 : i32
    %1378 = arith.index_cast %1377 : i32 to index
    %1379 = memref.load %arg1[%1378] : memref<256xi32, #tpu.memory_space<smem>>
    %c0_i32_860 = arith.constant 0 : i32
    %c49_i32_861 = arith.constant 49 : i32
    %1380 = arith.maxsi %c0_i32_860, %1379 : i32
    %1381 = arith.minsi %c49_i32_861, %1380 : i32
    %c86_i32_862 = arith.constant 86 : i32
    %1382 = arith.addi %0, %c86_i32_862 : i32
    %1383 = arith.index_cast %1382 : i32 to index
    %1384 = memref.load %arg2[%1383] : memref<256xi32, #tpu.memory_space<smem>>
    %c0_i32_863 = arith.constant 0 : i32
    %c39_i32_864 = arith.constant 39 : i32
    %1385 = arith.maxsi %c0_i32_863, %1384 : i32
    %1386 = arith.minsi %c39_i32_864, %1385 : i32
    %1387 = arith.index_cast %1381 : i32 to index
    %c0_865 = arith.constant 0 : index
    %1388 = vector.load %arg3[%1387, %c0_865] : memref<50x32xf32, #tpu.memory_space<vmem>>, vector<1x32xf32>
    %c86 = arith.constant 86 : index
    %c0_866 = arith.constant 0 : index
    %1389 = vector.load %arg6[%c86, %c0_866] : memref<128x32xf32, #tpu.memory_space<vmem>>, vector<1x32xf32>
    tpu.vector_store %arg6[%c86, %c0_866], %1388 {strides = array<i32>} : memref<128x32xf32, #tpu.memory_space<vmem>>, vector<1x32xf32>,
    %1390 = arith.index_cast %1386 : i32 to index
    %c0_867 = arith.constant 0 : index
    %1391 = vector.load %arg4[%1390, %c0_867] : memref<40x32xf32, #tpu.memory_space<vmem>>, vector<1x32xf32>
    %c86_868 = arith.constant 86 : index
    %c0_869 = arith.constant 0 : index
    %1392 = vector.load %arg7[%c86_868, %c0_869] : memref<128x32xf32, #tpu.memory_space<vmem>>, vector<1x32xf32>
    tpu.vector_store %arg7[%c86_868, %c0_869], %1391 {strides = array<i32>} : memref<128x32xf32, #tpu.memory_space<vmem>>, vector<1x32xf32>,
    %c87_i32 = arith.constant 87 : i32
    %1393 = arith.addi %0, %c87_i32 : i32
    %1394 = arith.index_cast %1393 : i32 to index
    %1395 = memref.load %arg1[%1394] : memref<256xi32, #tpu.memory_space<smem>>
    %c0_i32_870 = arith.constant 0 : i32
    %c49_i32_871 = arith.constant 49 : i32
    %1396 = arith.maxsi %c0_i32_870, %1395 : i32
    %1397 = arith.minsi %c49_i32_871, %1396 : i32
    %c87_i32_872 = arith.constant 87 : i32
    %1398 = arith.addi %0, %c87_i32_872 : i32
    %1399 = arith.index_cast %1398 : i32 to index
    %1400 = memref.load %arg2[%1399] : memref<256xi32, #tpu.memory_space<smem>>
    %c0_i32_873 = arith.constant 0 : i32
    %c39_i32_874 = arith.constant 39 : i32
    %1401 = arith.maxsi %c0_i32_873, %1400 : i32
    %1402 = arith.minsi %c39_i32_874, %1401 : i32
    %1403 = arith.index_cast %1397 : i32 to index
    %c0_875 = arith.constant 0 : index
    %1404 = vector.load %arg3[%1403, %c0_875] : memref<50x32xf32, #tpu.memory_space<vmem>>, vector<1x32xf32>
    %c87 = arith.constant 87 : index
    %c0_876 = arith.constant 0 : index
    %1405 = vector.load %arg6[%c87, %c0_876] : memref<128x32xf32, #tpu.memory_space<vmem>>, vector<1x32xf32>
    tpu.vector_store %arg6[%c87, %c0_876], %1404 {strides = array<i32>} : memref<128x32xf32, #tpu.memory_space<vmem>>, vector<1x32xf32>,
    %1406 = arith.index_cast %1402 : i32 to index
    %c0_877 = arith.constant 0 : index
    %1407 = vector.load %arg4[%1406, %c0_877] : memref<40x32xf32, #tpu.memory_space<vmem>>, vector<1x32xf32>
    %c87_878 = arith.constant 87 : index
    %c0_879 = arith.constant 0 : index
    %1408 = vector.load %arg7[%c87_878, %c0_879] : memref<128x32xf32, #tpu.memory_space<vmem>>, vector<1x32xf32>
    tpu.vector_store %arg7[%c87_878, %c0_879], %1407 {strides = array<i32>} : memref<128x32xf32, #tpu.memory_space<vmem>>, vector<1x32xf32>,
    %c88_i32 = arith.constant 88 : i32
    %1409 = arith.addi %0, %c88_i32 : i32
    %1410 = arith.index_cast %1409 : i32 to index
    %1411 = memref.load %arg1[%1410] : memref<256xi32, #tpu.memory_space<smem>>
    %c0_i32_880 = arith.constant 0 : i32
    %c49_i32_881 = arith.constant 49 : i32
    %1412 = arith.maxsi %c0_i32_880, %1411 : i32
    %1413 = arith.minsi %c49_i32_881, %1412 : i32
    %c88_i32_882 = arith.constant 88 : i32
    %1414 = arith.addi %0, %c88_i32_882 : i32
    %1415 = arith.index_cast %1414 : i32 to index
    %1416 = memref.load %arg2[%1415] : memref<256xi32, #tpu.memory_space<smem>>
    %c0_i32_883 = arith.constant 0 : i32
    %c39_i32_884 = arith.constant 39 : i32
    %1417 = arith.maxsi %c0_i32_883, %1416 : i32
    %1418 = arith.minsi %c39_i32_884, %1417 : i32
    %1419 = arith.index_cast %1413 : i32 to index
    %c0_885 = arith.constant 0 : index
    %1420 = vector.load %arg3[%1419, %c0_885] : memref<50x32xf32, #tpu.memory_space<vmem>>, vector<1x32xf32>
    %c88 = arith.constant 88 : index
    %c0_886 = arith.constant 0 : index
    %1421 = vector.load %arg6[%c88, %c0_886] : memref<128x32xf32, #tpu.memory_space<vmem>>, vector<1x32xf32>
    tpu.vector_store %arg6[%c88, %c0_886], %1420 {strides = array<i32>} : memref<128x32xf32, #tpu.memory_space<vmem>>, vector<1x32xf32>,
    %1422 = arith.index_cast %1418 : i32 to index
    %c0_887 = arith.constant 0 : index
    %1423 = vector.load %arg4[%1422, %c0_887] : memref<40x32xf32, #tpu.memory_space<vmem>>, vector<1x32xf32>
    %c88_888 = arith.constant 88 : index
    %c0_889 = arith.constant 0 : index
    %1424 = vector.load %arg7[%c88_888, %c0_889] : memref<128x32xf32, #tpu.memory_space<vmem>>, vector<1x32xf32>
    tpu.vector_store %arg7[%c88_888, %c0_889], %1423 {strides = array<i32>} : memref<128x32xf32, #tpu.memory_space<vmem>>, vector<1x32xf32>,
    %c89_i32 = arith.constant 89 : i32
    %1425 = arith.addi %0, %c89_i32 : i32
    %1426 = arith.index_cast %1425 : i32 to index
    %1427 = memref.load %arg1[%1426] : memref<256xi32, #tpu.memory_space<smem>>
    %c0_i32_890 = arith.constant 0 : i32
    %c49_i32_891 = arith.constant 49 : i32
    %1428 = arith.maxsi %c0_i32_890, %1427 : i32
    %1429 = arith.minsi %c49_i32_891, %1428 : i32
    %c89_i32_892 = arith.constant 89 : i32
    %1430 = arith.addi %0, %c89_i32_892 : i32
    %1431 = arith.index_cast %1430 : i32 to index
    %1432 = memref.load %arg2[%1431] : memref<256xi32, #tpu.memory_space<smem>>
    %c0_i32_893 = arith.constant 0 : i32
    %c39_i32_894 = arith.constant 39 : i32
    %1433 = arith.maxsi %c0_i32_893, %1432 : i32
    %1434 = arith.minsi %c39_i32_894, %1433 : i32
    %1435 = arith.index_cast %1429 : i32 to index
    %c0_895 = arith.constant 0 : index
    %1436 = vector.load %arg3[%1435, %c0_895] : memref<50x32xf32, #tpu.memory_space<vmem>>, vector<1x32xf32>
    %c89 = arith.constant 89 : index
    %c0_896 = arith.constant 0 : index
    %1437 = vector.load %arg6[%c89, %c0_896] : memref<128x32xf32, #tpu.memory_space<vmem>>, vector<1x32xf32>
    tpu.vector_store %arg6[%c89, %c0_896], %1436 {strides = array<i32>} : memref<128x32xf32, #tpu.memory_space<vmem>>, vector<1x32xf32>,
    %1438 = arith.index_cast %1434 : i32 to index
    %c0_897 = arith.constant 0 : index
    %1439 = vector.load %arg4[%1438, %c0_897] : memref<40x32xf32, #tpu.memory_space<vmem>>, vector<1x32xf32>
    %c89_898 = arith.constant 89 : index
    %c0_899 = arith.constant 0 : index
    %1440 = vector.load %arg7[%c89_898, %c0_899] : memref<128x32xf32, #tpu.memory_space<vmem>>, vector<1x32xf32>
    tpu.vector_store %arg7[%c89_898, %c0_899], %1439 {strides = array<i32>} : memref<128x32xf32, #tpu.memory_space<vmem>>, vector<1x32xf32>,
    %c90_i32 = arith.constant 90 : i32
    %1441 = arith.addi %0, %c90_i32 : i32
    %1442 = arith.index_cast %1441 : i32 to index
    %1443 = memref.load %arg1[%1442] : memref<256xi32, #tpu.memory_space<smem>>
    %c0_i32_900 = arith.constant 0 : i32
    %c49_i32_901 = arith.constant 49 : i32
    %1444 = arith.maxsi %c0_i32_900, %1443 : i32
    %1445 = arith.minsi %c49_i32_901, %1444 : i32
    %c90_i32_902 = arith.constant 90 : i32
    %1446 = arith.addi %0, %c90_i32_902 : i32
    %1447 = arith.index_cast %1446 : i32 to index
    %1448 = memref.load %arg2[%1447] : memref<256xi32, #tpu.memory_space<smem>>
    %c0_i32_903 = arith.constant 0 : i32
    %c39_i32_904 = arith.constant 39 : i32
    %1449 = arith.maxsi %c0_i32_903, %1448 : i32
    %1450 = arith.minsi %c39_i32_904, %1449 : i32
    %1451 = arith.index_cast %1445 : i32 to index
    %c0_905 = arith.constant 0 : index
    %1452 = vector.load %arg3[%1451, %c0_905] : memref<50x32xf32, #tpu.memory_space<vmem>>, vector<1x32xf32>
    %c90 = arith.constant 90 : index
    %c0_906 = arith.constant 0 : index
    %1453 = vector.load %arg6[%c90, %c0_906] : memref<128x32xf32, #tpu.memory_space<vmem>>, vector<1x32xf32>
    tpu.vector_store %arg6[%c90, %c0_906], %1452 {strides = array<i32>} : memref<128x32xf32, #tpu.memory_space<vmem>>, vector<1x32xf32>,
    %1454 = arith.index_cast %1450 : i32 to index
    %c0_907 = arith.constant 0 : index
    %1455 = vector.load %arg4[%1454, %c0_907] : memref<40x32xf32, #tpu.memory_space<vmem>>, vector<1x32xf32>
    %c90_908 = arith.constant 90 : index
    %c0_909 = arith.constant 0 : index
    %1456 = vector.load %arg7[%c90_908, %c0_909] : memref<128x32xf32, #tpu.memory_space<vmem>>, vector<1x32xf32>
    tpu.vector_store %arg7[%c90_908, %c0_909], %1455 {strides = array<i32>} : memref<128x32xf32, #tpu.memory_space<vmem>>, vector<1x32xf32>,
    %c91_i32 = arith.constant 91 : i32
    %1457 = arith.addi %0, %c91_i32 : i32
    %1458 = arith.index_cast %1457 : i32 to index
    %1459 = memref.load %arg1[%1458] : memref<256xi32, #tpu.memory_space<smem>>
    %c0_i32_910 = arith.constant 0 : i32
    %c49_i32_911 = arith.constant 49 : i32
    %1460 = arith.maxsi %c0_i32_910, %1459 : i32
    %1461 = arith.minsi %c49_i32_911, %1460 : i32
    %c91_i32_912 = arith.constant 91 : i32
    %1462 = arith.addi %0, %c91_i32_912 : i32
    %1463 = arith.index_cast %1462 : i32 to index
    %1464 = memref.load %arg2[%1463] : memref<256xi32, #tpu.memory_space<smem>>
    %c0_i32_913 = arith.constant 0 : i32
    %c39_i32_914 = arith.constant 39 : i32
    %1465 = arith.maxsi %c0_i32_913, %1464 : i32
    %1466 = arith.minsi %c39_i32_914, %1465 : i32
    %1467 = arith.index_cast %1461 : i32 to index
    %c0_915 = arith.constant 0 : index
    %1468 = vector.load %arg3[%1467, %c0_915] : memref<50x32xf32, #tpu.memory_space<vmem>>, vector<1x32xf32>
    %c91 = arith.constant 91 : index
    %c0_916 = arith.constant 0 : index
    %1469 = vector.load %arg6[%c91, %c0_916] : memref<128x32xf32, #tpu.memory_space<vmem>>, vector<1x32xf32>
    tpu.vector_store %arg6[%c91, %c0_916], %1468 {strides = array<i32>} : memref<128x32xf32, #tpu.memory_space<vmem>>, vector<1x32xf32>,
    %1470 = arith.index_cast %1466 : i32 to index
    %c0_917 = arith.constant 0 : index
    %1471 = vector.load %arg4[%1470, %c0_917] : memref<40x32xf32, #tpu.memory_space<vmem>>, vector<1x32xf32>
    %c91_918 = arith.constant 91 : index
    %c0_919 = arith.constant 0 : index
    %1472 = vector.load %arg7[%c91_918, %c0_919] : memref<128x32xf32, #tpu.memory_space<vmem>>, vector<1x32xf32>
    tpu.vector_store %arg7[%c91_918, %c0_919], %1471 {strides = array<i32>} : memref<128x32xf32, #tpu.memory_space<vmem>>, vector<1x32xf32>,
    %c92_i32 = arith.constant 92 : i32
    %1473 = arith.addi %0, %c92_i32 : i32
    %1474 = arith.index_cast %1473 : i32 to index
    %1475 = memref.load %arg1[%1474] : memref<256xi32, #tpu.memory_space<smem>>
    %c0_i32_920 = arith.constant 0 : i32
    %c49_i32_921 = arith.constant 49 : i32
    %1476 = arith.maxsi %c0_i32_920, %1475 : i32
    %1477 = arith.minsi %c49_i32_921, %1476 : i32
    %c92_i32_922 = arith.constant 92 : i32
    %1478 = arith.addi %0, %c92_i32_922 : i32
    %1479 = arith.index_cast %1478 : i32 to index
    %1480 = memref.load %arg2[%1479] : memref<256xi32, #tpu.memory_space<smem>>
    %c0_i32_923 = arith.constant 0 : i32
    %c39_i32_924 = arith.constant 39 : i32
    %1481 = arith.maxsi %c0_i32_923, %1480 : i32
    %1482 = arith.minsi %c39_i32_924, %1481 : i32
    %1483 = arith.index_cast %1477 : i32 to index
    %c0_925 = arith.constant 0 : index
    %1484 = vector.load %arg3[%1483, %c0_925] : memref<50x32xf32, #tpu.memory_space<vmem>>, vector<1x32xf32>
    %c92 = arith.constant 92 : index
    %c0_926 = arith.constant 0 : index
    %1485 = vector.load %arg6[%c92, %c0_926] : memref<128x32xf32, #tpu.memory_space<vmem>>, vector<1x32xf32>
    tpu.vector_store %arg6[%c92, %c0_926], %1484 {strides = array<i32>} : memref<128x32xf32, #tpu.memory_space<vmem>>, vector<1x32xf32>,
    %1486 = arith.index_cast %1482 : i32 to index
    %c0_927 = arith.constant 0 : index
    %1487 = vector.load %arg4[%1486, %c0_927] : memref<40x32xf32, #tpu.memory_space<vmem>>, vector<1x32xf32>
    %c92_928 = arith.constant 92 : index
    %c0_929 = arith.constant 0 : index
    %1488 = vector.load %arg7[%c92_928, %c0_929] : memref<128x32xf32, #tpu.memory_space<vmem>>, vector<1x32xf32>
    tpu.vector_store %arg7[%c92_928, %c0_929], %1487 {strides = array<i32>} : memref<128x32xf32, #tpu.memory_space<vmem>>, vector<1x32xf32>,
    %c93_i32 = arith.constant 93 : i32
    %1489 = arith.addi %0, %c93_i32 : i32
    %1490 = arith.index_cast %1489 : i32 to index
    %1491 = memref.load %arg1[%1490] : memref<256xi32, #tpu.memory_space<smem>>
    %c0_i32_930 = arith.constant 0 : i32
    %c49_i32_931 = arith.constant 49 : i32
    %1492 = arith.maxsi %c0_i32_930, %1491 : i32
    %1493 = arith.minsi %c49_i32_931, %1492 : i32
    %c93_i32_932 = arith.constant 93 : i32
    %1494 = arith.addi %0, %c93_i32_932 : i32
    %1495 = arith.index_cast %1494 : i32 to index
    %1496 = memref.load %arg2[%1495] : memref<256xi32, #tpu.memory_space<smem>>
    %c0_i32_933 = arith.constant 0 : i32
    %c39_i32_934 = arith.constant 39 : i32
    %1497 = arith.maxsi %c0_i32_933, %1496 : i32
    %1498 = arith.minsi %c39_i32_934, %1497 : i32
    %1499 = arith.index_cast %1493 : i32 to index
    %c0_935 = arith.constant 0 : index
    %1500 = vector.load %arg3[%1499, %c0_935] : memref<50x32xf32, #tpu.memory_space<vmem>>, vector<1x32xf32>
    %c93 = arith.constant 93 : index
    %c0_936 = arith.constant 0 : index
    %1501 = vector.load %arg6[%c93, %c0_936] : memref<128x32xf32, #tpu.memory_space<vmem>>, vector<1x32xf32>
    tpu.vector_store %arg6[%c93, %c0_936], %1500 {strides = array<i32>} : memref<128x32xf32, #tpu.memory_space<vmem>>, vector<1x32xf32>,
    %1502 = arith.index_cast %1498 : i32 to index
    %c0_937 = arith.constant 0 : index
    %1503 = vector.load %arg4[%1502, %c0_937] : memref<40x32xf32, #tpu.memory_space<vmem>>, vector<1x32xf32>
    %c93_938 = arith.constant 93 : index
    %c0_939 = arith.constant 0 : index
    %1504 = vector.load %arg7[%c93_938, %c0_939] : memref<128x32xf32, #tpu.memory_space<vmem>>, vector<1x32xf32>
    tpu.vector_store %arg7[%c93_938, %c0_939], %1503 {strides = array<i32>} : memref<128x32xf32, #tpu.memory_space<vmem>>, vector<1x32xf32>,
    %c94_i32 = arith.constant 94 : i32
    %1505 = arith.addi %0, %c94_i32 : i32
    %1506 = arith.index_cast %1505 : i32 to index
    %1507 = memref.load %arg1[%1506] : memref<256xi32, #tpu.memory_space<smem>>
    %c0_i32_940 = arith.constant 0 : i32
    %c49_i32_941 = arith.constant 49 : i32
    %1508 = arith.maxsi %c0_i32_940, %1507 : i32
    %1509 = arith.minsi %c49_i32_941, %1508 : i32
    %c94_i32_942 = arith.constant 94 : i32
    %1510 = arith.addi %0, %c94_i32_942 : i32
    %1511 = arith.index_cast %1510 : i32 to index
    %1512 = memref.load %arg2[%1511] : memref<256xi32, #tpu.memory_space<smem>>
    %c0_i32_943 = arith.constant 0 : i32
    %c39_i32_944 = arith.constant 39 : i32
    %1513 = arith.maxsi %c0_i32_943, %1512 : i32
    %1514 = arith.minsi %c39_i32_944, %1513 : i32
    %1515 = arith.index_cast %1509 : i32 to index
    %c0_945 = arith.constant 0 : index
    %1516 = vector.load %arg3[%1515, %c0_945] : memref<50x32xf32, #tpu.memory_space<vmem>>, vector<1x32xf32>
    %c94 = arith.constant 94 : index
    %c0_946 = arith.constant 0 : index
    %1517 = vector.load %arg6[%c94, %c0_946] : memref<128x32xf32, #tpu.memory_space<vmem>>, vector<1x32xf32>
    tpu.vector_store %arg6[%c94, %c0_946], %1516 {strides = array<i32>} : memref<128x32xf32, #tpu.memory_space<vmem>>, vector<1x32xf32>,
    %1518 = arith.index_cast %1514 : i32 to index
    %c0_947 = arith.constant 0 : index
    %1519 = vector.load %arg4[%1518, %c0_947] : memref<40x32xf32, #tpu.memory_space<vmem>>, vector<1x32xf32>
    %c94_948 = arith.constant 94 : index
    %c0_949 = arith.constant 0 : index
    %1520 = vector.load %arg7[%c94_948, %c0_949] : memref<128x32xf32, #tpu.memory_space<vmem>>, vector<1x32xf32>
    tpu.vector_store %arg7[%c94_948, %c0_949], %1519 {strides = array<i32>} : memref<128x32xf32, #tpu.memory_space<vmem>>, vector<1x32xf32>,
    %c95_i32 = arith.constant 95 : i32
    %1521 = arith.addi %0, %c95_i32 : i32
    %1522 = arith.index_cast %1521 : i32 to index
    %1523 = memref.load %arg1[%1522] : memref<256xi32, #tpu.memory_space<smem>>
    %c0_i32_950 = arith.constant 0 : i32
    %c49_i32_951 = arith.constant 49 : i32
    %1524 = arith.maxsi %c0_i32_950, %1523 : i32
    %1525 = arith.minsi %c49_i32_951, %1524 : i32
    %c95_i32_952 = arith.constant 95 : i32
    %1526 = arith.addi %0, %c95_i32_952 : i32
    %1527 = arith.index_cast %1526 : i32 to index
    %1528 = memref.load %arg2[%1527] : memref<256xi32, #tpu.memory_space<smem>>
    %c0_i32_953 = arith.constant 0 : i32
    %c39_i32_954 = arith.constant 39 : i32
    %1529 = arith.maxsi %c0_i32_953, %1528 : i32
    %1530 = arith.minsi %c39_i32_954, %1529 : i32
    %1531 = arith.index_cast %1525 : i32 to index
    %c0_955 = arith.constant 0 : index
    %1532 = vector.load %arg3[%1531, %c0_955] : memref<50x32xf32, #tpu.memory_space<vmem>>, vector<1x32xf32>
    %c95 = arith.constant 95 : index
    %c0_956 = arith.constant 0 : index
    %1533 = vector.load %arg6[%c95, %c0_956] : memref<128x32xf32, #tpu.memory_space<vmem>>, vector<1x32xf32>
    tpu.vector_store %arg6[%c95, %c0_956], %1532 {strides = array<i32>} : memref<128x32xf32, #tpu.memory_space<vmem>>, vector<1x32xf32>,
    %1534 = arith.index_cast %1530 : i32 to index
    %c0_957 = arith.constant 0 : index
    %1535 = vector.load %arg4[%1534, %c0_957] : memref<40x32xf32, #tpu.memory_space<vmem>>, vector<1x32xf32>
    %c95_958 = arith.constant 95 : index
    %c0_959 = arith.constant 0 : index
    %1536 = vector.load %arg7[%c95_958, %c0_959] : memref<128x32xf32, #tpu.memory_space<vmem>>, vector<1x32xf32>
    tpu.vector_store %arg7[%c95_958, %c0_959], %1535 {strides = array<i32>} : memref<128x32xf32, #tpu.memory_space<vmem>>, vector<1x32xf32>,
    %c96_i32 = arith.constant 96 : i32
    %1537 = arith.addi %0, %c96_i32 : i32
    %1538 = arith.index_cast %1537 : i32 to index
    %1539 = memref.load %arg1[%1538] : memref<256xi32, #tpu.memory_space<smem>>
    %c0_i32_960 = arith.constant 0 : i32
    %c49_i32_961 = arith.constant 49 : i32
    %1540 = arith.maxsi %c0_i32_960, %1539 : i32
    %1541 = arith.minsi %c49_i32_961, %1540 : i32
    %c96_i32_962 = arith.constant 96 : i32
    %1542 = arith.addi %0, %c96_i32_962 : i32
    %1543 = arith.index_cast %1542 : i32 to index
    %1544 = memref.load %arg2[%1543] : memref<256xi32, #tpu.memory_space<smem>>
    %c0_i32_963 = arith.constant 0 : i32
    %c39_i32_964 = arith.constant 39 : i32
    %1545 = arith.maxsi %c0_i32_963, %1544 : i32
    %1546 = arith.minsi %c39_i32_964, %1545 : i32
    %1547 = arith.index_cast %1541 : i32 to index
    %c0_965 = arith.constant 0 : index
    %1548 = vector.load %arg3[%1547, %c0_965] : memref<50x32xf32, #tpu.memory_space<vmem>>, vector<1x32xf32>
    %c96 = arith.constant 96 : index
    %c0_966 = arith.constant 0 : index
    %1549 = vector.load %arg6[%c96, %c0_966] : memref<128x32xf32, #tpu.memory_space<vmem>>, vector<1x32xf32>
    tpu.vector_store %arg6[%c96, %c0_966], %1548 {strides = array<i32>} : memref<128x32xf32, #tpu.memory_space<vmem>>, vector<1x32xf32>,
    %1550 = arith.index_cast %1546 : i32 to index
    %c0_967 = arith.constant 0 : index
    %1551 = vector.load %arg4[%1550, %c0_967] : memref<40x32xf32, #tpu.memory_space<vmem>>, vector<1x32xf32>
    %c96_968 = arith.constant 96 : index
    %c0_969 = arith.constant 0 : index
    %1552 = vector.load %arg7[%c96_968, %c0_969] : memref<128x32xf32, #tpu.memory_space<vmem>>, vector<1x32xf32>
    tpu.vector_store %arg7[%c96_968, %c0_969], %1551 {strides = array<i32>} : memref<128x32xf32, #tpu.memory_space<vmem>>, vector<1x32xf32>,
    %c97_i32 = arith.constant 97 : i32
    %1553 = arith.addi %0, %c97_i32 : i32
    %1554 = arith.index_cast %1553 : i32 to index
    %1555 = memref.load %arg1[%1554] : memref<256xi32, #tpu.memory_space<smem>>
    %c0_i32_970 = arith.constant 0 : i32
    %c49_i32_971 = arith.constant 49 : i32
    %1556 = arith.maxsi %c0_i32_970, %1555 : i32
    %1557 = arith.minsi %c49_i32_971, %1556 : i32
    %c97_i32_972 = arith.constant 97 : i32
    %1558 = arith.addi %0, %c97_i32_972 : i32
    %1559 = arith.index_cast %1558 : i32 to index
    %1560 = memref.load %arg2[%1559] : memref<256xi32, #tpu.memory_space<smem>>
    %c0_i32_973 = arith.constant 0 : i32
    %c39_i32_974 = arith.constant 39 : i32
    %1561 = arith.maxsi %c0_i32_973, %1560 : i32
    %1562 = arith.minsi %c39_i32_974, %1561 : i32
    %1563 = arith.index_cast %1557 : i32 to index
    %c0_975 = arith.constant 0 : index
    %1564 = vector.load %arg3[%1563, %c0_975] : memref<50x32xf32, #tpu.memory_space<vmem>>, vector<1x32xf32>
    %c97 = arith.constant 97 : index
    %c0_976 = arith.constant 0 : index
    %1565 = vector.load %arg6[%c97, %c0_976] : memref<128x32xf32, #tpu.memory_space<vmem>>, vector<1x32xf32>
    tpu.vector_store %arg6[%c97, %c0_976], %1564 {strides = array<i32>} : memref<128x32xf32, #tpu.memory_space<vmem>>, vector<1x32xf32>,
    %1566 = arith.index_cast %1562 : i32 to index
    %c0_977 = arith.constant 0 : index
    %1567 = vector.load %arg4[%1566, %c0_977] : memref<40x32xf32, #tpu.memory_space<vmem>>, vector<1x32xf32>
    %c97_978 = arith.constant 97 : index
    %c0_979 = arith.constant 0 : index
    %1568 = vector.load %arg7[%c97_978, %c0_979] : memref<128x32xf32, #tpu.memory_space<vmem>>, vector<1x32xf32>
    tpu.vector_store %arg7[%c97_978, %c0_979], %1567 {strides = array<i32>} : memref<128x32xf32, #tpu.memory_space<vmem>>, vector<1x32xf32>,
    %c98_i32 = arith.constant 98 : i32
    %1569 = arith.addi %0, %c98_i32 : i32
    %1570 = arith.index_cast %1569 : i32 to index
    %1571 = memref.load %arg1[%1570] : memref<256xi32, #tpu.memory_space<smem>>
    %c0_i32_980 = arith.constant 0 : i32
    %c49_i32_981 = arith.constant 49 : i32
    %1572 = arith.maxsi %c0_i32_980, %1571 : i32
    %1573 = arith.minsi %c49_i32_981, %1572 : i32
    %c98_i32_982 = arith.constant 98 : i32
    %1574 = arith.addi %0, %c98_i32_982 : i32
    %1575 = arith.index_cast %1574 : i32 to index
    %1576 = memref.load %arg2[%1575] : memref<256xi32, #tpu.memory_space<smem>>
    %c0_i32_983 = arith.constant 0 : i32
    %c39_i32_984 = arith.constant 39 : i32
    %1577 = arith.maxsi %c0_i32_983, %1576 : i32
    %1578 = arith.minsi %c39_i32_984, %1577 : i32
    %1579 = arith.index_cast %1573 : i32 to index
    %c0_985 = arith.constant 0 : index
    %1580 = vector.load %arg3[%1579, %c0_985] : memref<50x32xf32, #tpu.memory_space<vmem>>, vector<1x32xf32>
    %c98 = arith.constant 98 : index
    %c0_986 = arith.constant 0 : index
    %1581 = vector.load %arg6[%c98, %c0_986] : memref<128x32xf32, #tpu.memory_space<vmem>>, vector<1x32xf32>
    tpu.vector_store %arg6[%c98, %c0_986], %1580 {strides = array<i32>} : memref<128x32xf32, #tpu.memory_space<vmem>>, vector<1x32xf32>,
    %1582 = arith.index_cast %1578 : i32 to index
    %c0_987 = arith.constant 0 : index
    %1583 = vector.load %arg4[%1582, %c0_987] : memref<40x32xf32, #tpu.memory_space<vmem>>, vector<1x32xf32>
    %c98_988 = arith.constant 98 : index
    %c0_989 = arith.constant 0 : index
    %1584 = vector.load %arg7[%c98_988, %c0_989] : memref<128x32xf32, #tpu.memory_space<vmem>>, vector<1x32xf32>
    tpu.vector_store %arg7[%c98_988, %c0_989], %1583 {strides = array<i32>} : memref<128x32xf32, #tpu.memory_space<vmem>>, vector<1x32xf32>,
    %c99_i32 = arith.constant 99 : i32
    %1585 = arith.addi %0, %c99_i32 : i32
    %1586 = arith.index_cast %1585 : i32 to index
    %1587 = memref.load %arg1[%1586] : memref<256xi32, #tpu.memory_space<smem>>
    %c0_i32_990 = arith.constant 0 : i32
    %c49_i32_991 = arith.constant 49 : i32
    %1588 = arith.maxsi %c0_i32_990, %1587 : i32
    %1589 = arith.minsi %c49_i32_991, %1588 : i32
    %c99_i32_992 = arith.constant 99 : i32
    %1590 = arith.addi %0, %c99_i32_992 : i32
    %1591 = arith.index_cast %1590 : i32 to index
    %1592 = memref.load %arg2[%1591] : memref<256xi32, #tpu.memory_space<smem>>
    %c0_i32_993 = arith.constant 0 : i32
    %c39_i32_994 = arith.constant 39 : i32
    %1593 = arith.maxsi %c0_i32_993, %1592 : i32
    %1594 = arith.minsi %c39_i32_994, %1593 : i32
    %1595 = arith.index_cast %1589 : i32 to index
    %c0_995 = arith.constant 0 : index
    %1596 = vector.load %arg3[%1595, %c0_995] : memref<50x32xf32, #tpu.memory_space<vmem>>, vector<1x32xf32>
    %c99 = arith.constant 99 : index
    %c0_996 = arith.constant 0 : index
    %1597 = vector.load %arg6[%c99, %c0_996] : memref<128x32xf32, #tpu.memory_space<vmem>>, vector<1x32xf32>
    tpu.vector_store %arg6[%c99, %c0_996], %1596 {strides = array<i32>} : memref<128x32xf32, #tpu.memory_space<vmem>>, vector<1x32xf32>,
    %1598 = arith.index_cast %1594 : i32 to index
    %c0_997 = arith.constant 0 : index
    %1599 = vector.load %arg4[%1598, %c0_997] : memref<40x32xf32, #tpu.memory_space<vmem>>, vector<1x32xf32>
    %c99_998 = arith.constant 99 : index
    %c0_999 = arith.constant 0 : index
    %1600 = vector.load %arg7[%c99_998, %c0_999] : memref<128x32xf32, #tpu.memory_space<vmem>>, vector<1x32xf32>
    tpu.vector_store %arg7[%c99_998, %c0_999], %1599 {strides = array<i32>} : memref<128x32xf32, #tpu.memory_space<vmem>>, vector<1x32xf32>,
    %c100_i32 = arith.constant 100 : i32
    %1601 = arith.addi %0, %c100_i32 : i32
    %1602 = arith.index_cast %1601 : i32 to index
    %1603 = memref.load %arg1[%1602] : memref<256xi32, #tpu.memory_space<smem>>
    %c0_i32_1000 = arith.constant 0 : i32
    %c49_i32_1001 = arith.constant 49 : i32
    %1604 = arith.maxsi %c0_i32_1000, %1603 : i32
    %1605 = arith.minsi %c49_i32_1001, %1604 : i32
    %c100_i32_1002 = arith.constant 100 : i32
    %1606 = arith.addi %0, %c100_i32_1002 : i32
    %1607 = arith.index_cast %1606 : i32 to index
    %1608 = memref.load %arg2[%1607] : memref<256xi32, #tpu.memory_space<smem>>
    %c0_i32_1003 = arith.constant 0 : i32
    %c39_i32_1004 = arith.constant 39 : i32
    %1609 = arith.maxsi %c0_i32_1003, %1608 : i32
    %1610 = arith.minsi %c39_i32_1004, %1609 : i32
    %1611 = arith.index_cast %1605 : i32 to index
    %c0_1005 = arith.constant 0 : index
    %1612 = vector.load %arg3[%1611, %c0_1005] : memref<50x32xf32, #tpu.memory_space<vmem>>, vector<1x32xf32>
    %c100 = arith.constant 100 : index
    %c0_1006 = arith.constant 0 : index
    %1613 = vector.load %arg6[%c100, %c0_1006] : memref<128x32xf32, #tpu.memory_space<vmem>>, vector<1x32xf32>
    tpu.vector_store %arg6[%c100, %c0_1006], %1612 {strides = array<i32>} : memref<128x32xf32, #tpu.memory_space<vmem>>, vector<1x32xf32>,
    %1614 = arith.index_cast %1610 : i32 to index
    %c0_1007 = arith.constant 0 : index
    %1615 = vector.load %arg4[%1614, %c0_1007] : memref<40x32xf32, #tpu.memory_space<vmem>>, vector<1x32xf32>
    %c100_1008 = arith.constant 100 : index
    %c0_1009 = arith.constant 0 : index
    %1616 = vector.load %arg7[%c100_1008, %c0_1009] : memref<128x32xf32, #tpu.memory_space<vmem>>, vector<1x32xf32>
    tpu.vector_store %arg7[%c100_1008, %c0_1009], %1615 {strides = array<i32>} : memref<128x32xf32, #tpu.memory_space<vmem>>, vector<1x32xf32>,
    %c101_i32 = arith.constant 101 : i32
    %1617 = arith.addi %0, %c101_i32 : i32
    %1618 = arith.index_cast %1617 : i32 to index
    %1619 = memref.load %arg1[%1618] : memref<256xi32, #tpu.memory_space<smem>>
    %c0_i32_1010 = arith.constant 0 : i32
    %c49_i32_1011 = arith.constant 49 : i32
    %1620 = arith.maxsi %c0_i32_1010, %1619 : i32
    %1621 = arith.minsi %c49_i32_1011, %1620 : i32
    %c101_i32_1012 = arith.constant 101 : i32
    %1622 = arith.addi %0, %c101_i32_1012 : i32
    %1623 = arith.index_cast %1622 : i32 to index
    %1624 = memref.load %arg2[%1623] : memref<256xi32, #tpu.memory_space<smem>>
    %c0_i32_1013 = arith.constant 0 : i32
    %c39_i32_1014 = arith.constant 39 : i32
    %1625 = arith.maxsi %c0_i32_1013, %1624 : i32
    %1626 = arith.minsi %c39_i32_1014, %1625 : i32
    %1627 = arith.index_cast %1621 : i32 to index
    %c0_1015 = arith.constant 0 : index
    %1628 = vector.load %arg3[%1627, %c0_1015] : memref<50x32xf32, #tpu.memory_space<vmem>>, vector<1x32xf32>
    %c101 = arith.constant 101 : index
    %c0_1016 = arith.constant 0 : index
    %1629 = vector.load %arg6[%c101, %c0_1016] : memref<128x32xf32, #tpu.memory_space<vmem>>, vector<1x32xf32>
    tpu.vector_store %arg6[%c101, %c0_1016], %1628 {strides = array<i32>} : memref<128x32xf32, #tpu.memory_space<vmem>>, vector<1x32xf32>,
    %1630 = arith.index_cast %1626 : i32 to index
    %c0_1017 = arith.constant 0 : index
    %1631 = vector.load %arg4[%1630, %c0_1017] : memref<40x32xf32, #tpu.memory_space<vmem>>, vector<1x32xf32>
    %c101_1018 = arith.constant 101 : index
    %c0_1019 = arith.constant 0 : index
    %1632 = vector.load %arg7[%c101_1018, %c0_1019] : memref<128x32xf32, #tpu.memory_space<vmem>>, vector<1x32xf32>
    tpu.vector_store %arg7[%c101_1018, %c0_1019], %1631 {strides = array<i32>} : memref<128x32xf32, #tpu.memory_space<vmem>>, vector<1x32xf32>,
    %c102_i32 = arith.constant 102 : i32
    %1633 = arith.addi %0, %c102_i32 : i32
    %1634 = arith.index_cast %1633 : i32 to index
    %1635 = memref.load %arg1[%1634] : memref<256xi32, #tpu.memory_space<smem>>
    %c0_i32_1020 = arith.constant 0 : i32
    %c49_i32_1021 = arith.constant 49 : i32
    %1636 = arith.maxsi %c0_i32_1020, %1635 : i32
    %1637 = arith.minsi %c49_i32_1021, %1636 : i32
    %c102_i32_1022 = arith.constant 102 : i32
    %1638 = arith.addi %0, %c102_i32_1022 : i32
    %1639 = arith.index_cast %1638 : i32 to index
    %1640 = memref.load %arg2[%1639] : memref<256xi32, #tpu.memory_space<smem>>
    %c0_i32_1023 = arith.constant 0 : i32
    %c39_i32_1024 = arith.constant 39 : i32
    %1641 = arith.maxsi %c0_i32_1023, %1640 : i32
    %1642 = arith.minsi %c39_i32_1024, %1641 : i32
    %1643 = arith.index_cast %1637 : i32 to index
    %c0_1025 = arith.constant 0 : index
    %1644 = vector.load %arg3[%1643, %c0_1025] : memref<50x32xf32, #tpu.memory_space<vmem>>, vector<1x32xf32>
    %c102 = arith.constant 102 : index
    %c0_1026 = arith.constant 0 : index
    %1645 = vector.load %arg6[%c102, %c0_1026] : memref<128x32xf32, #tpu.memory_space<vmem>>, vector<1x32xf32>
    tpu.vector_store %arg6[%c102, %c0_1026], %1644 {strides = array<i32>} : memref<128x32xf32, #tpu.memory_space<vmem>>, vector<1x32xf32>,
    %1646 = arith.index_cast %1642 : i32 to index
    %c0_1027 = arith.constant 0 : index
    %1647 = vector.load %arg4[%1646, %c0_1027] : memref<40x32xf32, #tpu.memory_space<vmem>>, vector<1x32xf32>
    %c102_1028 = arith.constant 102 : index
    %c0_1029 = arith.constant 0 : index
    %1648 = vector.load %arg7[%c102_1028, %c0_1029] : memref<128x32xf32, #tpu.memory_space<vmem>>, vector<1x32xf32>
    tpu.vector_store %arg7[%c102_1028, %c0_1029], %1647 {strides = array<i32>} : memref<128x32xf32, #tpu.memory_space<vmem>>, vector<1x32xf32>,
    %c103_i32 = arith.constant 103 : i32
    %1649 = arith.addi %0, %c103_i32 : i32
    %1650 = arith.index_cast %1649 : i32 to index
    %1651 = memref.load %arg1[%1650] : memref<256xi32, #tpu.memory_space<smem>>
    %c0_i32_1030 = arith.constant 0 : i32
    %c49_i32_1031 = arith.constant 49 : i32
    %1652 = arith.maxsi %c0_i32_1030, %1651 : i32
    %1653 = arith.minsi %c49_i32_1031, %1652 : i32
    %c103_i32_1032 = arith.constant 103 : i32
    %1654 = arith.addi %0, %c103_i32_1032 : i32
    %1655 = arith.index_cast %1654 : i32 to index
    %1656 = memref.load %arg2[%1655] : memref<256xi32, #tpu.memory_space<smem>>
    %c0_i32_1033 = arith.constant 0 : i32
    %c39_i32_1034 = arith.constant 39 : i32
    %1657 = arith.maxsi %c0_i32_1033, %1656 : i32
    %1658 = arith.minsi %c39_i32_1034, %1657 : i32
    %1659 = arith.index_cast %1653 : i32 to index
    %c0_1035 = arith.constant 0 : index
    %1660 = vector.load %arg3[%1659, %c0_1035] : memref<50x32xf32, #tpu.memory_space<vmem>>, vector<1x32xf32>
    %c103 = arith.constant 103 : index
    %c0_1036 = arith.constant 0 : index
    %1661 = vector.load %arg6[%c103, %c0_1036] : memref<128x32xf32, #tpu.memory_space<vmem>>, vector<1x32xf32>
    tpu.vector_store %arg6[%c103, %c0_1036], %1660 {strides = array<i32>} : memref<128x32xf32, #tpu.memory_space<vmem>>, vector<1x32xf32>,
    %1662 = arith.index_cast %1658 : i32 to index
    %c0_1037 = arith.constant 0 : index
    %1663 = vector.load %arg4[%1662, %c0_1037] : memref<40x32xf32, #tpu.memory_space<vmem>>, vector<1x32xf32>
    %c103_1038 = arith.constant 103 : index
    %c0_1039 = arith.constant 0 : index
    %1664 = vector.load %arg7[%c103_1038, %c0_1039] : memref<128x32xf32, #tpu.memory_space<vmem>>, vector<1x32xf32>
    tpu.vector_store %arg7[%c103_1038, %c0_1039], %1663 {strides = array<i32>} : memref<128x32xf32, #tpu.memory_space<vmem>>, vector<1x32xf32>,
    %c104_i32 = arith.constant 104 : i32
    %1665 = arith.addi %0, %c104_i32 : i32
    %1666 = arith.index_cast %1665 : i32 to index
    %1667 = memref.load %arg1[%1666] : memref<256xi32, #tpu.memory_space<smem>>
    %c0_i32_1040 = arith.constant 0 : i32
    %c49_i32_1041 = arith.constant 49 : i32
    %1668 = arith.maxsi %c0_i32_1040, %1667 : i32
    %1669 = arith.minsi %c49_i32_1041, %1668 : i32
    %c104_i32_1042 = arith.constant 104 : i32
    %1670 = arith.addi %0, %c104_i32_1042 : i32
    %1671 = arith.index_cast %1670 : i32 to index
    %1672 = memref.load %arg2[%1671] : memref<256xi32, #tpu.memory_space<smem>>
    %c0_i32_1043 = arith.constant 0 : i32
    %c39_i32_1044 = arith.constant 39 : i32
    %1673 = arith.maxsi %c0_i32_1043, %1672 : i32
    %1674 = arith.minsi %c39_i32_1044, %1673 : i32
    %1675 = arith.index_cast %1669 : i32 to index
    %c0_1045 = arith.constant 0 : index
    %1676 = vector.load %arg3[%1675, %c0_1045] : memref<50x32xf32, #tpu.memory_space<vmem>>, vector<1x32xf32>
    %c104 = arith.constant 104 : index
    %c0_1046 = arith.constant 0 : index
    %1677 = vector.load %arg6[%c104, %c0_1046] : memref<128x32xf32, #tpu.memory_space<vmem>>, vector<1x32xf32>
    tpu.vector_store %arg6[%c104, %c0_1046], %1676 {strides = array<i32>} : memref<128x32xf32, #tpu.memory_space<vmem>>, vector<1x32xf32>,
    %1678 = arith.index_cast %1674 : i32 to index
    %c0_1047 = arith.constant 0 : index
    %1679 = vector.load %arg4[%1678, %c0_1047] : memref<40x32xf32, #tpu.memory_space<vmem>>, vector<1x32xf32>
    %c104_1048 = arith.constant 104 : index
    %c0_1049 = arith.constant 0 : index
    %1680 = vector.load %arg7[%c104_1048, %c0_1049] : memref<128x32xf32, #tpu.memory_space<vmem>>, vector<1x32xf32>
    tpu.vector_store %arg7[%c104_1048, %c0_1049], %1679 {strides = array<i32>} : memref<128x32xf32, #tpu.memory_space<vmem>>, vector<1x32xf32>,
    %c105_i32 = arith.constant 105 : i32
    %1681 = arith.addi %0, %c105_i32 : i32
    %1682 = arith.index_cast %1681 : i32 to index
    %1683 = memref.load %arg1[%1682] : memref<256xi32, #tpu.memory_space<smem>>
    %c0_i32_1050 = arith.constant 0 : i32
    %c49_i32_1051 = arith.constant 49 : i32
    %1684 = arith.maxsi %c0_i32_1050, %1683 : i32
    %1685 = arith.minsi %c49_i32_1051, %1684 : i32
    %c105_i32_1052 = arith.constant 105 : i32
    %1686 = arith.addi %0, %c105_i32_1052 : i32
    %1687 = arith.index_cast %1686 : i32 to index
    %1688 = memref.load %arg2[%1687] : memref<256xi32, #tpu.memory_space<smem>>
    %c0_i32_1053 = arith.constant 0 : i32
    %c39_i32_1054 = arith.constant 39 : i32
    %1689 = arith.maxsi %c0_i32_1053, %1688 : i32
    %1690 = arith.minsi %c39_i32_1054, %1689 : i32
    %1691 = arith.index_cast %1685 : i32 to index
    %c0_1055 = arith.constant 0 : index
    %1692 = vector.load %arg3[%1691, %c0_1055] : memref<50x32xf32, #tpu.memory_space<vmem>>, vector<1x32xf32>
    %c105 = arith.constant 105 : index
    %c0_1056 = arith.constant 0 : index
    %1693 = vector.load %arg6[%c105, %c0_1056] : memref<128x32xf32, #tpu.memory_space<vmem>>, vector<1x32xf32>
    tpu.vector_store %arg6[%c105, %c0_1056], %1692 {strides = array<i32>} : memref<128x32xf32, #tpu.memory_space<vmem>>, vector<1x32xf32>,
    %1694 = arith.index_cast %1690 : i32 to index
    %c0_1057 = arith.constant 0 : index
    %1695 = vector.load %arg4[%1694, %c0_1057] : memref<40x32xf32, #tpu.memory_space<vmem>>, vector<1x32xf32>
    %c105_1058 = arith.constant 105 : index
    %c0_1059 = arith.constant 0 : index
    %1696 = vector.load %arg7[%c105_1058, %c0_1059] : memref<128x32xf32, #tpu.memory_space<vmem>>, vector<1x32xf32>
    tpu.vector_store %arg7[%c105_1058, %c0_1059], %1695 {strides = array<i32>} : memref<128x32xf32, #tpu.memory_space<vmem>>, vector<1x32xf32>,
    %c106_i32 = arith.constant 106 : i32
    %1697 = arith.addi %0, %c106_i32 : i32
    %1698 = arith.index_cast %1697 : i32 to index
    %1699 = memref.load %arg1[%1698] : memref<256xi32, #tpu.memory_space<smem>>
    %c0_i32_1060 = arith.constant 0 : i32
    %c49_i32_1061 = arith.constant 49 : i32
    %1700 = arith.maxsi %c0_i32_1060, %1699 : i32
    %1701 = arith.minsi %c49_i32_1061, %1700 : i32
    %c106_i32_1062 = arith.constant 106 : i32
    %1702 = arith.addi %0, %c106_i32_1062 : i32
    %1703 = arith.index_cast %1702 : i32 to index
    %1704 = memref.load %arg2[%1703] : memref<256xi32, #tpu.memory_space<smem>>
    %c0_i32_1063 = arith.constant 0 : i32
    %c39_i32_1064 = arith.constant 39 : i32
    %1705 = arith.maxsi %c0_i32_1063, %1704 : i32
    %1706 = arith.minsi %c39_i32_1064, %1705 : i32
    %1707 = arith.index_cast %1701 : i32 to index
    %c0_1065 = arith.constant 0 : index
    %1708 = vector.load %arg3[%1707, %c0_1065] : memref<50x32xf32, #tpu.memory_space<vmem>>, vector<1x32xf32>
    %c106 = arith.constant 106 : index
    %c0_1066 = arith.constant 0 : index
    %1709 = vector.load %arg6[%c106, %c0_1066] : memref<128x32xf32, #tpu.memory_space<vmem>>, vector<1x32xf32>
    tpu.vector_store %arg6[%c106, %c0_1066], %1708 {strides = array<i32>} : memref<128x32xf32, #tpu.memory_space<vmem>>, vector<1x32xf32>,
    %1710 = arith.index_cast %1706 : i32 to index
    %c0_1067 = arith.constant 0 : index
    %1711 = vector.load %arg4[%1710, %c0_1067] : memref<40x32xf32, #tpu.memory_space<vmem>>, vector<1x32xf32>
    %c106_1068 = arith.constant 106 : index
    %c0_1069 = arith.constant 0 : index
    %1712 = vector.load %arg7[%c106_1068, %c0_1069] : memref<128x32xf32, #tpu.memory_space<vmem>>, vector<1x32xf32>
    tpu.vector_store %arg7[%c106_1068, %c0_1069], %1711 {strides = array<i32>} : memref<128x32xf32, #tpu.memory_space<vmem>>, vector<1x32xf32>,
    %c107_i32 = arith.constant 107 : i32
    %1713 = arith.addi %0, %c107_i32 : i32
    %1714 = arith.index_cast %1713 : i32 to index
    %1715 = memref.load %arg1[%1714] : memref<256xi32, #tpu.memory_space<smem>>
    %c0_i32_1070 = arith.constant 0 : i32
    %c49_i32_1071 = arith.constant 49 : i32
    %1716 = arith.maxsi %c0_i32_1070, %1715 : i32
    %1717 = arith.minsi %c49_i32_1071, %1716 : i32
    %c107_i32_1072 = arith.constant 107 : i32
    %1718 = arith.addi %0, %c107_i32_1072 : i32
    %1719 = arith.index_cast %1718 : i32 to index
    %1720 = memref.load %arg2[%1719] : memref<256xi32, #tpu.memory_space<smem>>
    %c0_i32_1073 = arith.constant 0 : i32
    %c39_i32_1074 = arith.constant 39 : i32
    %1721 = arith.maxsi %c0_i32_1073, %1720 : i32
    %1722 = arith.minsi %c39_i32_1074, %1721 : i32
    %1723 = arith.index_cast %1717 : i32 to index
    %c0_1075 = arith.constant 0 : index
    %1724 = vector.load %arg3[%1723, %c0_1075] : memref<50x32xf32, #tpu.memory_space<vmem>>, vector<1x32xf32>
    %c107 = arith.constant 107 : index
    %c0_1076 = arith.constant 0 : index
    %1725 = vector.load %arg6[%c107, %c0_1076] : memref<128x32xf32, #tpu.memory_space<vmem>>, vector<1x32xf32>
    tpu.vector_store %arg6[%c107, %c0_1076], %1724 {strides = array<i32>} : memref<128x32xf32, #tpu.memory_space<vmem>>, vector<1x32xf32>,
    %1726 = arith.index_cast %1722 : i32 to index
    %c0_1077 = arith.constant 0 : index
    %1727 = vector.load %arg4[%1726, %c0_1077] : memref<40x32xf32, #tpu.memory_space<vmem>>, vector<1x32xf32>
    %c107_1078 = arith.constant 107 : index
    %c0_1079 = arith.constant 0 : index
    %1728 = vector.load %arg7[%c107_1078, %c0_1079] : memref<128x32xf32, #tpu.memory_space<vmem>>, vector<1x32xf32>
    tpu.vector_store %arg7[%c107_1078, %c0_1079], %1727 {strides = array<i32>} : memref<128x32xf32, #tpu.memory_space<vmem>>, vector<1x32xf32>,
    %c108_i32 = arith.constant 108 : i32
    %1729 = arith.addi %0, %c108_i32 : i32
    %1730 = arith.index_cast %1729 : i32 to index
    %1731 = memref.load %arg1[%1730] : memref<256xi32, #tpu.memory_space<smem>>
    %c0_i32_1080 = arith.constant 0 : i32
    %c49_i32_1081 = arith.constant 49 : i32
    %1732 = arith.maxsi %c0_i32_1080, %1731 : i32
    %1733 = arith.minsi %c49_i32_1081, %1732 : i32
    %c108_i32_1082 = arith.constant 108 : i32
    %1734 = arith.addi %0, %c108_i32_1082 : i32
    %1735 = arith.index_cast %1734 : i32 to index
    %1736 = memref.load %arg2[%1735] : memref<256xi32, #tpu.memory_space<smem>>
    %c0_i32_1083 = arith.constant 0 : i32
    %c39_i32_1084 = arith.constant 39 : i32
    %1737 = arith.maxsi %c0_i32_1083, %1736 : i32
    %1738 = arith.minsi %c39_i32_1084, %1737 : i32
    %1739 = arith.index_cast %1733 : i32 to index
    %c0_1085 = arith.constant 0 : index
    %1740 = vector.load %arg3[%1739, %c0_1085] : memref<50x32xf32, #tpu.memory_space<vmem>>, vector<1x32xf32>
    %c108 = arith.constant 108 : index
    %c0_1086 = arith.constant 0 : index
    %1741 = vector.load %arg6[%c108, %c0_1086] : memref<128x32xf32, #tpu.memory_space<vmem>>, vector<1x32xf32>
    tpu.vector_store %arg6[%c108, %c0_1086], %1740 {strides = array<i32>} : memref<128x32xf32, #tpu.memory_space<vmem>>, vector<1x32xf32>,
    %1742 = arith.index_cast %1738 : i32 to index
    %c0_1087 = arith.constant 0 : index
    %1743 = vector.load %arg4[%1742, %c0_1087] : memref<40x32xf32, #tpu.memory_space<vmem>>, vector<1x32xf32>
    %c108_1088 = arith.constant 108 : index
    %c0_1089 = arith.constant 0 : index
    %1744 = vector.load %arg7[%c108_1088, %c0_1089] : memref<128x32xf32, #tpu.memory_space<vmem>>, vector<1x32xf32>
    tpu.vector_store %arg7[%c108_1088, %c0_1089], %1743 {strides = array<i32>} : memref<128x32xf32, #tpu.memory_space<vmem>>, vector<1x32xf32>,
    %c109_i32 = arith.constant 109 : i32
    %1745 = arith.addi %0, %c109_i32 : i32
    %1746 = arith.index_cast %1745 : i32 to index
    %1747 = memref.load %arg1[%1746] : memref<256xi32, #tpu.memory_space<smem>>
    %c0_i32_1090 = arith.constant 0 : i32
    %c49_i32_1091 = arith.constant 49 : i32
    %1748 = arith.maxsi %c0_i32_1090, %1747 : i32
    %1749 = arith.minsi %c49_i32_1091, %1748 : i32
    %c109_i32_1092 = arith.constant 109 : i32
    %1750 = arith.addi %0, %c109_i32_1092 : i32
    %1751 = arith.index_cast %1750 : i32 to index
    %1752 = memref.load %arg2[%1751] : memref<256xi32, #tpu.memory_space<smem>>
    %c0_i32_1093 = arith.constant 0 : i32
    %c39_i32_1094 = arith.constant 39 : i32
    %1753 = arith.maxsi %c0_i32_1093, %1752 : i32
    %1754 = arith.minsi %c39_i32_1094, %1753 : i32
    %1755 = arith.index_cast %1749 : i32 to index
    %c0_1095 = arith.constant 0 : index
    %1756 = vector.load %arg3[%1755, %c0_1095] : memref<50x32xf32, #tpu.memory_space<vmem>>, vector<1x32xf32>
    %c109 = arith.constant 109 : index
    %c0_1096 = arith.constant 0 : index
    %1757 = vector.load %arg6[%c109, %c0_1096] : memref<128x32xf32, #tpu.memory_space<vmem>>, vector<1x32xf32>
    tpu.vector_store %arg6[%c109, %c0_1096], %1756 {strides = array<i32>} : memref<128x32xf32, #tpu.memory_space<vmem>>, vector<1x32xf32>,
    %1758 = arith.index_cast %1754 : i32 to index
    %c0_1097 = arith.constant 0 : index
    %1759 = vector.load %arg4[%1758, %c0_1097] : memref<40x32xf32, #tpu.memory_space<vmem>>, vector<1x32xf32>
    %c109_1098 = arith.constant 109 : index
    %c0_1099 = arith.constant 0 : index
    %1760 = vector.load %arg7[%c109_1098, %c0_1099] : memref<128x32xf32, #tpu.memory_space<vmem>>, vector<1x32xf32>
    tpu.vector_store %arg7[%c109_1098, %c0_1099], %1759 {strides = array<i32>} : memref<128x32xf32, #tpu.memory_space<vmem>>, vector<1x32xf32>,
    %c110_i32 = arith.constant 110 : i32
    %1761 = arith.addi %0, %c110_i32 : i32
    %1762 = arith.index_cast %1761 : i32 to index
    %1763 = memref.load %arg1[%1762] : memref<256xi32, #tpu.memory_space<smem>>
    %c0_i32_1100 = arith.constant 0 : i32
    %c49_i32_1101 = arith.constant 49 : i32
    %1764 = arith.maxsi %c0_i32_1100, %1763 : i32
    %1765 = arith.minsi %c49_i32_1101, %1764 : i32
    %c110_i32_1102 = arith.constant 110 : i32
    %1766 = arith.addi %0, %c110_i32_1102 : i32
    %1767 = arith.index_cast %1766 : i32 to index
    %1768 = memref.load %arg2[%1767] : memref<256xi32, #tpu.memory_space<smem>>
    %c0_i32_1103 = arith.constant 0 : i32
    %c39_i32_1104 = arith.constant 39 : i32
    %1769 = arith.maxsi %c0_i32_1103, %1768 : i32
    %1770 = arith.minsi %c39_i32_1104, %1769 : i32
    %1771 = arith.index_cast %1765 : i32 to index
    %c0_1105 = arith.constant 0 : index
    %1772 = vector.load %arg3[%1771, %c0_1105] : memref<50x32xf32, #tpu.memory_space<vmem>>, vector<1x32xf32>
    %c110 = arith.constant 110 : index
    %c0_1106 = arith.constant 0 : index
    %1773 = vector.load %arg6[%c110, %c0_1106] : memref<128x32xf32, #tpu.memory_space<vmem>>, vector<1x32xf32>
    tpu.vector_store %arg6[%c110, %c0_1106], %1772 {strides = array<i32>} : memref<128x32xf32, #tpu.memory_space<vmem>>, vector<1x32xf32>,
    %1774 = arith.index_cast %1770 : i32 to index
    %c0_1107 = arith.constant 0 : index
    %1775 = vector.load %arg4[%1774, %c0_1107] : memref<40x32xf32, #tpu.memory_space<vmem>>, vector<1x32xf32>
    %c110_1108 = arith.constant 110 : index
    %c0_1109 = arith.constant 0 : index
    %1776 = vector.load %arg7[%c110_1108, %c0_1109] : memref<128x32xf32, #tpu.memory_space<vmem>>, vector<1x32xf32>
    tpu.vector_store %arg7[%c110_1108, %c0_1109], %1775 {strides = array<i32>} : memref<128x32xf32, #tpu.memory_space<vmem>>, vector<1x32xf32>,
    %c111_i32 = arith.constant 111 : i32
    %1777 = arith.addi %0, %c111_i32 : i32
    %1778 = arith.index_cast %1777 : i32 to index
    %1779 = memref.load %arg1[%1778] : memref<256xi32, #tpu.memory_space<smem>>
    %c0_i32_1110 = arith.constant 0 : i32
    %c49_i32_1111 = arith.constant 49 : i32
    %1780 = arith.maxsi %c0_i32_1110, %1779 : i32
    %1781 = arith.minsi %c49_i32_1111, %1780 : i32
    %c111_i32_1112 = arith.constant 111 : i32
    %1782 = arith.addi %0, %c111_i32_1112 : i32
    %1783 = arith.index_cast %1782 : i32 to index
    %1784 = memref.load %arg2[%1783] : memref<256xi32, #tpu.memory_space<smem>>
    %c0_i32_1113 = arith.constant 0 : i32
    %c39_i32_1114 = arith.constant 39 : i32
    %1785 = arith.maxsi %c0_i32_1113, %1784 : i32
    %1786 = arith.minsi %c39_i32_1114, %1785 : i32
    %1787 = arith.index_cast %1781 : i32 to index
    %c0_1115 = arith.constant 0 : index
    %1788 = vector.load %arg3[%1787, %c0_1115] : memref<50x32xf32, #tpu.memory_space<vmem>>, vector<1x32xf32>
    %c111 = arith.constant 111 : index
    %c0_1116 = arith.constant 0 : index
    %1789 = vector.load %arg6[%c111, %c0_1116] : memref<128x32xf32, #tpu.memory_space<vmem>>, vector<1x32xf32>
    tpu.vector_store %arg6[%c111, %c0_1116], %1788 {strides = array<i32>} : memref<128x32xf32, #tpu.memory_space<vmem>>, vector<1x32xf32>,
    %1790 = arith.index_cast %1786 : i32 to index
    %c0_1117 = arith.constant 0 : index
    %1791 = vector.load %arg4[%1790, %c0_1117] : memref<40x32xf32, #tpu.memory_space<vmem>>, vector<1x32xf32>
    %c111_1118 = arith.constant 111 : index
    %c0_1119 = arith.constant 0 : index
    %1792 = vector.load %arg7[%c111_1118, %c0_1119] : memref<128x32xf32, #tpu.memory_space<vmem>>, vector<1x32xf32>
    tpu.vector_store %arg7[%c111_1118, %c0_1119], %1791 {strides = array<i32>} : memref<128x32xf32, #tpu.memory_space<vmem>>, vector<1x32xf32>,
    %c112_i32 = arith.constant 112 : i32
    %1793 = arith.addi %0, %c112_i32 : i32
    %1794 = arith.index_cast %1793 : i32 to index
    %1795 = memref.load %arg1[%1794] : memref<256xi32, #tpu.memory_space<smem>>
    %c0_i32_1120 = arith.constant 0 : i32
    %c49_i32_1121 = arith.constant 49 : i32
    %1796 = arith.maxsi %c0_i32_1120, %1795 : i32
    %1797 = arith.minsi %c49_i32_1121, %1796 : i32
    %c112_i32_1122 = arith.constant 112 : i32
    %1798 = arith.addi %0, %c112_i32_1122 : i32
    %1799 = arith.index_cast %1798 : i32 to index
    %1800 = memref.load %arg2[%1799] : memref<256xi32, #tpu.memory_space<smem>>
    %c0_i32_1123 = arith.constant 0 : i32
    %c39_i32_1124 = arith.constant 39 : i32
    %1801 = arith.maxsi %c0_i32_1123, %1800 : i32
    %1802 = arith.minsi %c39_i32_1124, %1801 : i32
    %1803 = arith.index_cast %1797 : i32 to index
    %c0_1125 = arith.constant 0 : index
    %1804 = vector.load %arg3[%1803, %c0_1125] : memref<50x32xf32, #tpu.memory_space<vmem>>, vector<1x32xf32>
    %c112 = arith.constant 112 : index
    %c0_1126 = arith.constant 0 : index
    %1805 = vector.load %arg6[%c112, %c0_1126] : memref<128x32xf32, #tpu.memory_space<vmem>>, vector<1x32xf32>
    tpu.vector_store %arg6[%c112, %c0_1126], %1804 {strides = array<i32>} : memref<128x32xf32, #tpu.memory_space<vmem>>, vector<1x32xf32>,
    %1806 = arith.index_cast %1802 : i32 to index
    %c0_1127 = arith.constant 0 : index
    %1807 = vector.load %arg4[%1806, %c0_1127] : memref<40x32xf32, #tpu.memory_space<vmem>>, vector<1x32xf32>
    %c112_1128 = arith.constant 112 : index
    %c0_1129 = arith.constant 0 : index
    %1808 = vector.load %arg7[%c112_1128, %c0_1129] : memref<128x32xf32, #tpu.memory_space<vmem>>, vector<1x32xf32>
    tpu.vector_store %arg7[%c112_1128, %c0_1129], %1807 {strides = array<i32>} : memref<128x32xf32, #tpu.memory_space<vmem>>, vector<1x32xf32>,
    %c113_i32 = arith.constant 113 : i32
    %1809 = arith.addi %0, %c113_i32 : i32
    %1810 = arith.index_cast %1809 : i32 to index
    %1811 = memref.load %arg1[%1810] : memref<256xi32, #tpu.memory_space<smem>>
    %c0_i32_1130 = arith.constant 0 : i32
    %c49_i32_1131 = arith.constant 49 : i32
    %1812 = arith.maxsi %c0_i32_1130, %1811 : i32
    %1813 = arith.minsi %c49_i32_1131, %1812 : i32
    %c113_i32_1132 = arith.constant 113 : i32
    %1814 = arith.addi %0, %c113_i32_1132 : i32
    %1815 = arith.index_cast %1814 : i32 to index
    %1816 = memref.load %arg2[%1815] : memref<256xi32, #tpu.memory_space<smem>>
    %c0_i32_1133 = arith.constant 0 : i32
    %c39_i32_1134 = arith.constant 39 : i32
    %1817 = arith.maxsi %c0_i32_1133, %1816 : i32
    %1818 = arith.minsi %c39_i32_1134, %1817 : i32
    %1819 = arith.index_cast %1813 : i32 to index
    %c0_1135 = arith.constant 0 : index
    %1820 = vector.load %arg3[%1819, %c0_1135] : memref<50x32xf32, #tpu.memory_space<vmem>>, vector<1x32xf32>
    %c113 = arith.constant 113 : index
    %c0_1136 = arith.constant 0 : index
    %1821 = vector.load %arg6[%c113, %c0_1136] : memref<128x32xf32, #tpu.memory_space<vmem>>, vector<1x32xf32>
    tpu.vector_store %arg6[%c113, %c0_1136], %1820 {strides = array<i32>} : memref<128x32xf32, #tpu.memory_space<vmem>>, vector<1x32xf32>,
    %1822 = arith.index_cast %1818 : i32 to index
    %c0_1137 = arith.constant 0 : index
    %1823 = vector.load %arg4[%1822, %c0_1137] : memref<40x32xf32, #tpu.memory_space<vmem>>, vector<1x32xf32>
    %c113_1138 = arith.constant 113 : index
    %c0_1139 = arith.constant 0 : index
    %1824 = vector.load %arg7[%c113_1138, %c0_1139] : memref<128x32xf32, #tpu.memory_space<vmem>>, vector<1x32xf32>
    tpu.vector_store %arg7[%c113_1138, %c0_1139], %1823 {strides = array<i32>} : memref<128x32xf32, #tpu.memory_space<vmem>>, vector<1x32xf32>,
    %c114_i32 = arith.constant 114 : i32
    %1825 = arith.addi %0, %c114_i32 : i32
    %1826 = arith.index_cast %1825 : i32 to index
    %1827 = memref.load %arg1[%1826] : memref<256xi32, #tpu.memory_space<smem>>
    %c0_i32_1140 = arith.constant 0 : i32
    %c49_i32_1141 = arith.constant 49 : i32
    %1828 = arith.maxsi %c0_i32_1140, %1827 : i32
    %1829 = arith.minsi %c49_i32_1141, %1828 : i32
    %c114_i32_1142 = arith.constant 114 : i32
    %1830 = arith.addi %0, %c114_i32_1142 : i32
    %1831 = arith.index_cast %1830 : i32 to index
    %1832 = memref.load %arg2[%1831] : memref<256xi32, #tpu.memory_space<smem>>
    %c0_i32_1143 = arith.constant 0 : i32
    %c39_i32_1144 = arith.constant 39 : i32
    %1833 = arith.maxsi %c0_i32_1143, %1832 : i32
    %1834 = arith.minsi %c39_i32_1144, %1833 : i32
    %1835 = arith.index_cast %1829 : i32 to index
    %c0_1145 = arith.constant 0 : index
    %1836 = vector.load %arg3[%1835, %c0_1145] : memref<50x32xf32, #tpu.memory_space<vmem>>, vector<1x32xf32>
    %c114 = arith.constant 114 : index
    %c0_1146 = arith.constant 0 : index
    %1837 = vector.load %arg6[%c114, %c0_1146] : memref<128x32xf32, #tpu.memory_space<vmem>>, vector<1x32xf32>
    tpu.vector_store %arg6[%c114, %c0_1146], %1836 {strides = array<i32>} : memref<128x32xf32, #tpu.memory_space<vmem>>, vector<1x32xf32>,
    %1838 = arith.index_cast %1834 : i32 to index
    %c0_1147 = arith.constant 0 : index
    %1839 = vector.load %arg4[%1838, %c0_1147] : memref<40x32xf32, #tpu.memory_space<vmem>>, vector<1x32xf32>
    %c114_1148 = arith.constant 114 : index
    %c0_1149 = arith.constant 0 : index
    %1840 = vector.load %arg7[%c114_1148, %c0_1149] : memref<128x32xf32, #tpu.memory_space<vmem>>, vector<1x32xf32>
    tpu.vector_store %arg7[%c114_1148, %c0_1149], %1839 {strides = array<i32>} : memref<128x32xf32, #tpu.memory_space<vmem>>, vector<1x32xf32>,
    %c115_i32 = arith.constant 115 : i32
    %1841 = arith.addi %0, %c115_i32 : i32
    %1842 = arith.index_cast %1841 : i32 to index
    %1843 = memref.load %arg1[%1842] : memref<256xi32, #tpu.memory_space<smem>>
    %c0_i32_1150 = arith.constant 0 : i32
    %c49_i32_1151 = arith.constant 49 : i32
    %1844 = arith.maxsi %c0_i32_1150, %1843 : i32
    %1845 = arith.minsi %c49_i32_1151, %1844 : i32
    %c115_i32_1152 = arith.constant 115 : i32
    %1846 = arith.addi %0, %c115_i32_1152 : i32
    %1847 = arith.index_cast %1846 : i32 to index
    %1848 = memref.load %arg2[%1847] : memref<256xi32, #tpu.memory_space<smem>>
    %c0_i32_1153 = arith.constant 0 : i32
    %c39_i32_1154 = arith.constant 39 : i32
    %1849 = arith.maxsi %c0_i32_1153, %1848 : i32
    %1850 = arith.minsi %c39_i32_1154, %1849 : i32
    %1851 = arith.index_cast %1845 : i32 to index
    %c0_1155 = arith.constant 0 : index
    %1852 = vector.load %arg3[%1851, %c0_1155] : memref<50x32xf32, #tpu.memory_space<vmem>>, vector<1x32xf32>
    %c115 = arith.constant 115 : index
    %c0_1156 = arith.constant 0 : index
    %1853 = vector.load %arg6[%c115, %c0_1156] : memref<128x32xf32, #tpu.memory_space<vmem>>, vector<1x32xf32>
    tpu.vector_store %arg6[%c115, %c0_1156], %1852 {strides = array<i32>} : memref<128x32xf32, #tpu.memory_space<vmem>>, vector<1x32xf32>,
    %1854 = arith.index_cast %1850 : i32 to index
    %c0_1157 = arith.constant 0 : index
    %1855 = vector.load %arg4[%1854, %c0_1157] : memref<40x32xf32, #tpu.memory_space<vmem>>, vector<1x32xf32>
    %c115_1158 = arith.constant 115 : index
    %c0_1159 = arith.constant 0 : index
    %1856 = vector.load %arg7[%c115_1158, %c0_1159] : memref<128x32xf32, #tpu.memory_space<vmem>>, vector<1x32xf32>
    tpu.vector_store %arg7[%c115_1158, %c0_1159], %1855 {strides = array<i32>} : memref<128x32xf32, #tpu.memory_space<vmem>>, vector<1x32xf32>,
    %c116_i32 = arith.constant 116 : i32
    %1857 = arith.addi %0, %c116_i32 : i32
    %1858 = arith.index_cast %1857 : i32 to index
    %1859 = memref.load %arg1[%1858] : memref<256xi32, #tpu.memory_space<smem>>
    %c0_i32_1160 = arith.constant 0 : i32
    %c49_i32_1161 = arith.constant 49 : i32
    %1860 = arith.maxsi %c0_i32_1160, %1859 : i32
    %1861 = arith.minsi %c49_i32_1161, %1860 : i32
    %c116_i32_1162 = arith.constant 116 : i32
    %1862 = arith.addi %0, %c116_i32_1162 : i32
    %1863 = arith.index_cast %1862 : i32 to index
    %1864 = memref.load %arg2[%1863] : memref<256xi32, #tpu.memory_space<smem>>
    %c0_i32_1163 = arith.constant 0 : i32
    %c39_i32_1164 = arith.constant 39 : i32
    %1865 = arith.maxsi %c0_i32_1163, %1864 : i32
    %1866 = arith.minsi %c39_i32_1164, %1865 : i32
    %1867 = arith.index_cast %1861 : i32 to index
    %c0_1165 = arith.constant 0 : index
    %1868 = vector.load %arg3[%1867, %c0_1165] : memref<50x32xf32, #tpu.memory_space<vmem>>, vector<1x32xf32>
    %c116 = arith.constant 116 : index
    %c0_1166 = arith.constant 0 : index
    %1869 = vector.load %arg6[%c116, %c0_1166] : memref<128x32xf32, #tpu.memory_space<vmem>>, vector<1x32xf32>
    tpu.vector_store %arg6[%c116, %c0_1166], %1868 {strides = array<i32>} : memref<128x32xf32, #tpu.memory_space<vmem>>, vector<1x32xf32>,
    %1870 = arith.index_cast %1866 : i32 to index
    %c0_1167 = arith.constant 0 : index
    %1871 = vector.load %arg4[%1870, %c0_1167] : memref<40x32xf32, #tpu.memory_space<vmem>>, vector<1x32xf32>
    %c116_1168 = arith.constant 116 : index
    %c0_1169 = arith.constant 0 : index
    %1872 = vector.load %arg7[%c116_1168, %c0_1169] : memref<128x32xf32, #tpu.memory_space<vmem>>, vector<1x32xf32>
    tpu.vector_store %arg7[%c116_1168, %c0_1169], %1871 {strides = array<i32>} : memref<128x32xf32, #tpu.memory_space<vmem>>, vector<1x32xf32>,
    %c117_i32 = arith.constant 117 : i32
    %1873 = arith.addi %0, %c117_i32 : i32
    %1874 = arith.index_cast %1873 : i32 to index
    %1875 = memref.load %arg1[%1874] : memref<256xi32, #tpu.memory_space<smem>>
    %c0_i32_1170 = arith.constant 0 : i32
    %c49_i32_1171 = arith.constant 49 : i32
    %1876 = arith.maxsi %c0_i32_1170, %1875 : i32
    %1877 = arith.minsi %c49_i32_1171, %1876 : i32
    %c117_i32_1172 = arith.constant 117 : i32
    %1878 = arith.addi %0, %c117_i32_1172 : i32
    %1879 = arith.index_cast %1878 : i32 to index
    %1880 = memref.load %arg2[%1879] : memref<256xi32, #tpu.memory_space<smem>>
    %c0_i32_1173 = arith.constant 0 : i32
    %c39_i32_1174 = arith.constant 39 : i32
    %1881 = arith.maxsi %c0_i32_1173, %1880 : i32
    %1882 = arith.minsi %c39_i32_1174, %1881 : i32
    %1883 = arith.index_cast %1877 : i32 to index
    %c0_1175 = arith.constant 0 : index
    %1884 = vector.load %arg3[%1883, %c0_1175] : memref<50x32xf32, #tpu.memory_space<vmem>>, vector<1x32xf32>
    %c117 = arith.constant 117 : index
    %c0_1176 = arith.constant 0 : index
    %1885 = vector.load %arg6[%c117, %c0_1176] : memref<128x32xf32, #tpu.memory_space<vmem>>, vector<1x32xf32>
    tpu.vector_store %arg6[%c117, %c0_1176], %1884 {strides = array<i32>} : memref<128x32xf32, #tpu.memory_space<vmem>>, vector<1x32xf32>,
    %1886 = arith.index_cast %1882 : i32 to index
    %c0_1177 = arith.constant 0 : index
    %1887 = vector.load %arg4[%1886, %c0_1177] : memref<40x32xf32, #tpu.memory_space<vmem>>, vector<1x32xf32>
    %c117_1178 = arith.constant 117 : index
    %c0_1179 = arith.constant 0 : index
    %1888 = vector.load %arg7[%c117_1178, %c0_1179] : memref<128x32xf32, #tpu.memory_space<vmem>>, vector<1x32xf32>
    tpu.vector_store %arg7[%c117_1178, %c0_1179], %1887 {strides = array<i32>} : memref<128x32xf32, #tpu.memory_space<vmem>>, vector<1x32xf32>,
    %c118_i32 = arith.constant 118 : i32
    %1889 = arith.addi %0, %c118_i32 : i32
    %1890 = arith.index_cast %1889 : i32 to index
    %1891 = memref.load %arg1[%1890] : memref<256xi32, #tpu.memory_space<smem>>
    %c0_i32_1180 = arith.constant 0 : i32
    %c49_i32_1181 = arith.constant 49 : i32
    %1892 = arith.maxsi %c0_i32_1180, %1891 : i32
    %1893 = arith.minsi %c49_i32_1181, %1892 : i32
    %c118_i32_1182 = arith.constant 118 : i32
    %1894 = arith.addi %0, %c118_i32_1182 : i32
    %1895 = arith.index_cast %1894 : i32 to index
    %1896 = memref.load %arg2[%1895] : memref<256xi32, #tpu.memory_space<smem>>
    %c0_i32_1183 = arith.constant 0 : i32
    %c39_i32_1184 = arith.constant 39 : i32
    %1897 = arith.maxsi %c0_i32_1183, %1896 : i32
    %1898 = arith.minsi %c39_i32_1184, %1897 : i32
    %1899 = arith.index_cast %1893 : i32 to index
    %c0_1185 = arith.constant 0 : index
    %1900 = vector.load %arg3[%1899, %c0_1185] : memref<50x32xf32, #tpu.memory_space<vmem>>, vector<1x32xf32>
    %c118 = arith.constant 118 : index
    %c0_1186 = arith.constant 0 : index
    %1901 = vector.load %arg6[%c118, %c0_1186] : memref<128x32xf32, #tpu.memory_space<vmem>>, vector<1x32xf32>
    tpu.vector_store %arg6[%c118, %c0_1186], %1900 {strides = array<i32>} : memref<128x32xf32, #tpu.memory_space<vmem>>, vector<1x32xf32>,
    %1902 = arith.index_cast %1898 : i32 to index
    %c0_1187 = arith.constant 0 : index
    %1903 = vector.load %arg4[%1902, %c0_1187] : memref<40x32xf32, #tpu.memory_space<vmem>>, vector<1x32xf32>
    %c118_1188 = arith.constant 118 : index
    %c0_1189 = arith.constant 0 : index
    %1904 = vector.load %arg7[%c118_1188, %c0_1189] : memref<128x32xf32, #tpu.memory_space<vmem>>, vector<1x32xf32>
    tpu.vector_store %arg7[%c118_1188, %c0_1189], %1903 {strides = array<i32>} : memref<128x32xf32, #tpu.memory_space<vmem>>, vector<1x32xf32>,
    %c119_i32 = arith.constant 119 : i32
    %1905 = arith.addi %0, %c119_i32 : i32
    %1906 = arith.index_cast %1905 : i32 to index
    %1907 = memref.load %arg1[%1906] : memref<256xi32, #tpu.memory_space<smem>>
    %c0_i32_1190 = arith.constant 0 : i32
    %c49_i32_1191 = arith.constant 49 : i32
    %1908 = arith.maxsi %c0_i32_1190, %1907 : i32
    %1909 = arith.minsi %c49_i32_1191, %1908 : i32
    %c119_i32_1192 = arith.constant 119 : i32
    %1910 = arith.addi %0, %c119_i32_1192 : i32
    %1911 = arith.index_cast %1910 : i32 to index
    %1912 = memref.load %arg2[%1911] : memref<256xi32, #tpu.memory_space<smem>>
    %c0_i32_1193 = arith.constant 0 : i32
    %c39_i32_1194 = arith.constant 39 : i32
    %1913 = arith.maxsi %c0_i32_1193, %1912 : i32
    %1914 = arith.minsi %c39_i32_1194, %1913 : i32
    %1915 = arith.index_cast %1909 : i32 to index
    %c0_1195 = arith.constant 0 : index
    %1916 = vector.load %arg3[%1915, %c0_1195] : memref<50x32xf32, #tpu.memory_space<vmem>>, vector<1x32xf32>
    %c119 = arith.constant 119 : index
    %c0_1196 = arith.constant 0 : index
    %1917 = vector.load %arg6[%c119, %c0_1196] : memref<128x32xf32, #tpu.memory_space<vmem>>, vector<1x32xf32>
    tpu.vector_store %arg6[%c119, %c0_1196], %1916 {strides = array<i32>} : memref<128x32xf32, #tpu.memory_space<vmem>>, vector<1x32xf32>,
    %1918 = arith.index_cast %1914 : i32 to index
    %c0_1197 = arith.constant 0 : index
    %1919 = vector.load %arg4[%1918, %c0_1197] : memref<40x32xf32, #tpu.memory_space<vmem>>, vector<1x32xf32>
    %c119_1198 = arith.constant 119 : index
    %c0_1199 = arith.constant 0 : index
    %1920 = vector.load %arg7[%c119_1198, %c0_1199] : memref<128x32xf32, #tpu.memory_space<vmem>>, vector<1x32xf32>
    tpu.vector_store %arg7[%c119_1198, %c0_1199], %1919 {strides = array<i32>} : memref<128x32xf32, #tpu.memory_space<vmem>>, vector<1x32xf32>,
    %c120_i32 = arith.constant 120 : i32
    %1921 = arith.addi %0, %c120_i32 : i32
    %1922 = arith.index_cast %1921 : i32 to index
    %1923 = memref.load %arg1[%1922] : memref<256xi32, #tpu.memory_space<smem>>
    %c0_i32_1200 = arith.constant 0 : i32
    %c49_i32_1201 = arith.constant 49 : i32
    %1924 = arith.maxsi %c0_i32_1200, %1923 : i32
    %1925 = arith.minsi %c49_i32_1201, %1924 : i32
    %c120_i32_1202 = arith.constant 120 : i32
    %1926 = arith.addi %0, %c120_i32_1202 : i32
    %1927 = arith.index_cast %1926 : i32 to index
    %1928 = memref.load %arg2[%1927] : memref<256xi32, #tpu.memory_space<smem>>
    %c0_i32_1203 = arith.constant 0 : i32
    %c39_i32_1204 = arith.constant 39 : i32
    %1929 = arith.maxsi %c0_i32_1203, %1928 : i32
    %1930 = arith.minsi %c39_i32_1204, %1929 : i32
    %1931 = arith.index_cast %1925 : i32 to index
    %c0_1205 = arith.constant 0 : index
    %1932 = vector.load %arg3[%1931, %c0_1205] : memref<50x32xf32, #tpu.memory_space<vmem>>, vector<1x32xf32>
    %c120 = arith.constant 120 : index
    %c0_1206 = arith.constant 0 : index
    %1933 = vector.load %arg6[%c120, %c0_1206] : memref<128x32xf32, #tpu.memory_space<vmem>>, vector<1x32xf32>
    tpu.vector_store %arg6[%c120, %c0_1206], %1932 {strides = array<i32>} : memref<128x32xf32, #tpu.memory_space<vmem>>, vector<1x32xf32>,
    %1934 = arith.index_cast %1930 : i32 to index
    %c0_1207 = arith.constant 0 : index
    %1935 = vector.load %arg4[%1934, %c0_1207] : memref<40x32xf32, #tpu.memory_space<vmem>>, vector<1x32xf32>
    %c120_1208 = arith.constant 120 : index
    %c0_1209 = arith.constant 0 : index
    %1936 = vector.load %arg7[%c120_1208, %c0_1209] : memref<128x32xf32, #tpu.memory_space<vmem>>, vector<1x32xf32>
    tpu.vector_store %arg7[%c120_1208, %c0_1209], %1935 {strides = array<i32>} : memref<128x32xf32, #tpu.memory_space<vmem>>, vector<1x32xf32>,
    %c121_i32 = arith.constant 121 : i32
    %1937 = arith.addi %0, %c121_i32 : i32
    %1938 = arith.index_cast %1937 : i32 to index
    %1939 = memref.load %arg1[%1938] : memref<256xi32, #tpu.memory_space<smem>>
    %c0_i32_1210 = arith.constant 0 : i32
    %c49_i32_1211 = arith.constant 49 : i32
    %1940 = arith.maxsi %c0_i32_1210, %1939 : i32
    %1941 = arith.minsi %c49_i32_1211, %1940 : i32
    %c121_i32_1212 = arith.constant 121 : i32
    %1942 = arith.addi %0, %c121_i32_1212 : i32
    %1943 = arith.index_cast %1942 : i32 to index
    %1944 = memref.load %arg2[%1943] : memref<256xi32, #tpu.memory_space<smem>>
    %c0_i32_1213 = arith.constant 0 : i32
    %c39_i32_1214 = arith.constant 39 : i32
    %1945 = arith.maxsi %c0_i32_1213, %1944 : i32
    %1946 = arith.minsi %c39_i32_1214, %1945 : i32
    %1947 = arith.index_cast %1941 : i32 to index
    %c0_1215 = arith.constant 0 : index
    %1948 = vector.load %arg3[%1947, %c0_1215] : memref<50x32xf32, #tpu.memory_space<vmem>>, vector<1x32xf32>
    %c121 = arith.constant 121 : index
    %c0_1216 = arith.constant 0 : index
    %1949 = vector.load %arg6[%c121, %c0_1216] : memref<128x32xf32, #tpu.memory_space<vmem>>, vector<1x32xf32>
    tpu.vector_store %arg6[%c121, %c0_1216], %1948 {strides = array<i32>} : memref<128x32xf32, #tpu.memory_space<vmem>>, vector<1x32xf32>,
    %1950 = arith.index_cast %1946 : i32 to index
    %c0_1217 = arith.constant 0 : index
    %1951 = vector.load %arg4[%1950, %c0_1217] : memref<40x32xf32, #tpu.memory_space<vmem>>, vector<1x32xf32>
    %c121_1218 = arith.constant 121 : index
    %c0_1219 = arith.constant 0 : index
    %1952 = vector.load %arg7[%c121_1218, %c0_1219] : memref<128x32xf32, #tpu.memory_space<vmem>>, vector<1x32xf32>
    tpu.vector_store %arg7[%c121_1218, %c0_1219], %1951 {strides = array<i32>} : memref<128x32xf32, #tpu.memory_space<vmem>>, vector<1x32xf32>,
    %c122_i32 = arith.constant 122 : i32
    %1953 = arith.addi %0, %c122_i32 : i32
    %1954 = arith.index_cast %1953 : i32 to index
    %1955 = memref.load %arg1[%1954] : memref<256xi32, #tpu.memory_space<smem>>
    %c0_i32_1220 = arith.constant 0 : i32
    %c49_i32_1221 = arith.constant 49 : i32
    %1956 = arith.maxsi %c0_i32_1220, %1955 : i32
    %1957 = arith.minsi %c49_i32_1221, %1956 : i32
    %c122_i32_1222 = arith.constant 122 : i32
    %1958 = arith.addi %0, %c122_i32_1222 : i32
    %1959 = arith.index_cast %1958 : i32 to index
    %1960 = memref.load %arg2[%1959] : memref<256xi32, #tpu.memory_space<smem>>
    %c0_i32_1223 = arith.constant 0 : i32
    %c39_i32_1224 = arith.constant 39 : i32
    %1961 = arith.maxsi %c0_i32_1223, %1960 : i32
    %1962 = arith.minsi %c39_i32_1224, %1961 : i32
    %1963 = arith.index_cast %1957 : i32 to index
    %c0_1225 = arith.constant 0 : index
    %1964 = vector.load %arg3[%1963, %c0_1225] : memref<50x32xf32, #tpu.memory_space<vmem>>, vector<1x32xf32>
    %c122 = arith.constant 122 : index
    %c0_1226 = arith.constant 0 : index
    %1965 = vector.load %arg6[%c122, %c0_1226] : memref<128x32xf32, #tpu.memory_space<vmem>>, vector<1x32xf32>
    tpu.vector_store %arg6[%c122, %c0_1226], %1964 {strides = array<i32>} : memref<128x32xf32, #tpu.memory_space<vmem>>, vector<1x32xf32>,
    %1966 = arith.index_cast %1962 : i32 to index
    %c0_1227 = arith.constant 0 : index
    %1967 = vector.load %arg4[%1966, %c0_1227] : memref<40x32xf32, #tpu.memory_space<vmem>>, vector<1x32xf32>
    %c122_1228 = arith.constant 122 : index
    %c0_1229 = arith.constant 0 : index
    %1968 = vector.load %arg7[%c122_1228, %c0_1229] : memref<128x32xf32, #tpu.memory_space<vmem>>, vector<1x32xf32>
    tpu.vector_store %arg7[%c122_1228, %c0_1229], %1967 {strides = array<i32>} : memref<128x32xf32, #tpu.memory_space<vmem>>, vector<1x32xf32>,
    %c123_i32 = arith.constant 123 : i32
    %1969 = arith.addi %0, %c123_i32 : i32
    %1970 = arith.index_cast %1969 : i32 to index
    %1971 = memref.load %arg1[%1970] : memref<256xi32, #tpu.memory_space<smem>>
    %c0_i32_1230 = arith.constant 0 : i32
    %c49_i32_1231 = arith.constant 49 : i32
    %1972 = arith.maxsi %c0_i32_1230, %1971 : i32
    %1973 = arith.minsi %c49_i32_1231, %1972 : i32
    %c123_i32_1232 = arith.constant 123 : i32
    %1974 = arith.addi %0, %c123_i32_1232 : i32
    %1975 = arith.index_cast %1974 : i32 to index
    %1976 = memref.load %arg2[%1975] : memref<256xi32, #tpu.memory_space<smem>>
    %c0_i32_1233 = arith.constant 0 : i32
    %c39_i32_1234 = arith.constant 39 : i32
    %1977 = arith.maxsi %c0_i32_1233, %1976 : i32
    %1978 = arith.minsi %c39_i32_1234, %1977 : i32
    %1979 = arith.index_cast %1973 : i32 to index
    %c0_1235 = arith.constant 0 : index
    %1980 = vector.load %arg3[%1979, %c0_1235] : memref<50x32xf32, #tpu.memory_space<vmem>>, vector<1x32xf32>
    %c123 = arith.constant 123 : index
    %c0_1236 = arith.constant 0 : index
    %1981 = vector.load %arg6[%c123, %c0_1236] : memref<128x32xf32, #tpu.memory_space<vmem>>, vector<1x32xf32>
    tpu.vector_store %arg6[%c123, %c0_1236], %1980 {strides = array<i32>} : memref<128x32xf32, #tpu.memory_space<vmem>>, vector<1x32xf32>,
    %1982 = arith.index_cast %1978 : i32 to index
    %c0_1237 = arith.constant 0 : index
    %1983 = vector.load %arg4[%1982, %c0_1237] : memref<40x32xf32, #tpu.memory_space<vmem>>, vector<1x32xf32>
    %c123_1238 = arith.constant 123 : index
    %c0_1239 = arith.constant 0 : index
    %1984 = vector.load %arg7[%c123_1238, %c0_1239] : memref<128x32xf32, #tpu.memory_space<vmem>>, vector<1x32xf32>
    tpu.vector_store %arg7[%c123_1238, %c0_1239], %1983 {strides = array<i32>} : memref<128x32xf32, #tpu.memory_space<vmem>>, vector<1x32xf32>,
    %c124_i32 = arith.constant 124 : i32
    %1985 = arith.addi %0, %c124_i32 : i32
    %1986 = arith.index_cast %1985 : i32 to index
    %1987 = memref.load %arg1[%1986] : memref<256xi32, #tpu.memory_space<smem>>
    %c0_i32_1240 = arith.constant 0 : i32
    %c49_i32_1241 = arith.constant 49 : i32
    %1988 = arith.maxsi %c0_i32_1240, %1987 : i32
    %1989 = arith.minsi %c49_i32_1241, %1988 : i32
    %c124_i32_1242 = arith.constant 124 : i32
    %1990 = arith.addi %0, %c124_i32_1242 : i32
    %1991 = arith.index_cast %1990 : i32 to index
    %1992 = memref.load %arg2[%1991] : memref<256xi32, #tpu.memory_space<smem>>
    %c0_i32_1243 = arith.constant 0 : i32
    %c39_i32_1244 = arith.constant 39 : i32
    %1993 = arith.maxsi %c0_i32_1243, %1992 : i32
    %1994 = arith.minsi %c39_i32_1244, %1993 : i32
    %1995 = arith.index_cast %1989 : i32 to index
    %c0_1245 = arith.constant 0 : index
    %1996 = vector.load %arg3[%1995, %c0_1245] : memref<50x32xf32, #tpu.memory_space<vmem>>, vector<1x32xf32>
    %c124 = arith.constant 124 : index
    %c0_1246 = arith.constant 0 : index
    %1997 = vector.load %arg6[%c124, %c0_1246] : memref<128x32xf32, #tpu.memory_space<vmem>>, vector<1x32xf32>
    tpu.vector_store %arg6[%c124, %c0_1246], %1996 {strides = array<i32>} : memref<128x32xf32, #tpu.memory_space<vmem>>, vector<1x32xf32>,
    %1998 = arith.index_cast %1994 : i32 to index
    %c0_1247 = arith.constant 0 : index
    %1999 = vector.load %arg4[%1998, %c0_1247] : memref<40x32xf32, #tpu.memory_space<vmem>>, vector<1x32xf32>
    %c124_1248 = arith.constant 124 : index
    %c0_1249 = arith.constant 0 : index
    %2000 = vector.load %arg7[%c124_1248, %c0_1249] : memref<128x32xf32, #tpu.memory_space<vmem>>, vector<1x32xf32>
    tpu.vector_store %arg7[%c124_1248, %c0_1249], %1999 {strides = array<i32>} : memref<128x32xf32, #tpu.memory_space<vmem>>, vector<1x32xf32>,
    %c125_i32 = arith.constant 125 : i32
    %2001 = arith.addi %0, %c125_i32 : i32
    %2002 = arith.index_cast %2001 : i32 to index
    %2003 = memref.load %arg1[%2002] : memref<256xi32, #tpu.memory_space<smem>>
    %c0_i32_1250 = arith.constant 0 : i32
    %c49_i32_1251 = arith.constant 49 : i32
    %2004 = arith.maxsi %c0_i32_1250, %2003 : i32
    %2005 = arith.minsi %c49_i32_1251, %2004 : i32
    %c125_i32_1252 = arith.constant 125 : i32
    %2006 = arith.addi %0, %c125_i32_1252 : i32
    %2007 = arith.index_cast %2006 : i32 to index
    %2008 = memref.load %arg2[%2007] : memref<256xi32, #tpu.memory_space<smem>>
    %c0_i32_1253 = arith.constant 0 : i32
    %c39_i32_1254 = arith.constant 39 : i32
    %2009 = arith.maxsi %c0_i32_1253, %2008 : i32
    %2010 = arith.minsi %c39_i32_1254, %2009 : i32
    %2011 = arith.index_cast %2005 : i32 to index
    %c0_1255 = arith.constant 0 : index
    %2012 = vector.load %arg3[%2011, %c0_1255] : memref<50x32xf32, #tpu.memory_space<vmem>>, vector<1x32xf32>
    %c125 = arith.constant 125 : index
    %c0_1256 = arith.constant 0 : index
    %2013 = vector.load %arg6[%c125, %c0_1256] : memref<128x32xf32, #tpu.memory_space<vmem>>, vector<1x32xf32>
    tpu.vector_store %arg6[%c125, %c0_1256], %2012 {strides = array<i32>} : memref<128x32xf32, #tpu.memory_space<vmem>>, vector<1x32xf32>,
    %2014 = arith.index_cast %2010 : i32 to index
    %c0_1257 = arith.constant 0 : index
    %2015 = vector.load %arg4[%2014, %c0_1257] : memref<40x32xf32, #tpu.memory_space<vmem>>, vector<1x32xf32>
    %c125_1258 = arith.constant 125 : index
    %c0_1259 = arith.constant 0 : index
    %2016 = vector.load %arg7[%c125_1258, %c0_1259] : memref<128x32xf32, #tpu.memory_space<vmem>>, vector<1x32xf32>
    tpu.vector_store %arg7[%c125_1258, %c0_1259], %2015 {strides = array<i32>} : memref<128x32xf32, #tpu.memory_space<vmem>>, vector<1x32xf32>,
    %c126_i32 = arith.constant 126 : i32
    %2017 = arith.addi %0, %c126_i32 : i32
    %2018 = arith.index_cast %2017 : i32 to index
    %2019 = memref.load %arg1[%2018] : memref<256xi32, #tpu.memory_space<smem>>
    %c0_i32_1260 = arith.constant 0 : i32
    %c49_i32_1261 = arith.constant 49 : i32
    %2020 = arith.maxsi %c0_i32_1260, %2019 : i32
    %2021 = arith.minsi %c49_i32_1261, %2020 : i32
    %c126_i32_1262 = arith.constant 126 : i32
    %2022 = arith.addi %0, %c126_i32_1262 : i32
    %2023 = arith.index_cast %2022 : i32 to index
    %2024 = memref.load %arg2[%2023] : memref<256xi32, #tpu.memory_space<smem>>
    %c0_i32_1263 = arith.constant 0 : i32
    %c39_i32_1264 = arith.constant 39 : i32
    %2025 = arith.maxsi %c0_i32_1263, %2024 : i32
    %2026 = arith.minsi %c39_i32_1264, %2025 : i32
    %2027 = arith.index_cast %2021 : i32 to index
    %c0_1265 = arith.constant 0 : index
    %2028 = vector.load %arg3[%2027, %c0_1265] : memref<50x32xf32, #tpu.memory_space<vmem>>, vector<1x32xf32>
    %c126 = arith.constant 126 : index
    %c0_1266 = arith.constant 0 : index
    %2029 = vector.load %arg6[%c126, %c0_1266] : memref<128x32xf32, #tpu.memory_space<vmem>>, vector<1x32xf32>
    tpu.vector_store %arg6[%c126, %c0_1266], %2028 {strides = array<i32>} : memref<128x32xf32, #tpu.memory_space<vmem>>, vector<1x32xf32>,
    %2030 = arith.index_cast %2026 : i32 to index
    %c0_1267 = arith.constant 0 : index
    %2031 = vector.load %arg4[%2030, %c0_1267] : memref<40x32xf32, #tpu.memory_space<vmem>>, vector<1x32xf32>
    %c126_1268 = arith.constant 126 : index
    %c0_1269 = arith.constant 0 : index
    %2032 = vector.load %arg7[%c126_1268, %c0_1269] : memref<128x32xf32, #tpu.memory_space<vmem>>, vector<1x32xf32>
    tpu.vector_store %arg7[%c126_1268, %c0_1269], %2031 {strides = array<i32>} : memref<128x32xf32, #tpu.memory_space<vmem>>, vector<1x32xf32>,
    %c127_i32 = arith.constant 127 : i32
    %2033 = arith.addi %0, %c127_i32 : i32
    %2034 = arith.index_cast %2033 : i32 to index
    %2035 = memref.load %arg1[%2034] : memref<256xi32, #tpu.memory_space<smem>>
    %c0_i32_1270 = arith.constant 0 : i32
    %c49_i32_1271 = arith.constant 49 : i32
    %2036 = arith.maxsi %c0_i32_1270, %2035 : i32
    %2037 = arith.minsi %c49_i32_1271, %2036 : i32
    %c127_i32_1272 = arith.constant 127 : i32
    %2038 = arith.addi %0, %c127_i32_1272 : i32
    %2039 = arith.index_cast %2038 : i32 to index
    %2040 = memref.load %arg2[%2039] : memref<256xi32, #tpu.memory_space<smem>>
    %c0_i32_1273 = arith.constant 0 : i32
    %c39_i32_1274 = arith.constant 39 : i32
    %2041 = arith.maxsi %c0_i32_1273, %2040 : i32
    %2042 = arith.minsi %c39_i32_1274, %2041 : i32
    %2043 = arith.index_cast %2037 : i32 to index
    %c0_1275 = arith.constant 0 : index
    %2044 = vector.load %arg3[%2043, %c0_1275] : memref<50x32xf32, #tpu.memory_space<vmem>>, vector<1x32xf32>
    %c127 = arith.constant 127 : index
    %c0_1276 = arith.constant 0 : index
    %2045 = vector.load %arg6[%c127, %c0_1276] : memref<128x32xf32, #tpu.memory_space<vmem>>, vector<1x32xf32>
    tpu.vector_store %arg6[%c127, %c0_1276], %2044 {strides = array<i32>} : memref<128x32xf32, #tpu.memory_space<vmem>>, vector<1x32xf32>,
    %2046 = arith.index_cast %2042 : i32 to index
    %c0_1277 = arith.constant 0 : index
    %2047 = vector.load %arg4[%2046, %c0_1277] : memref<40x32xf32, #tpu.memory_space<vmem>>, vector<1x32xf32>
    %c127_1278 = arith.constant 127 : index
    %c0_1279 = arith.constant 0 : index
    %2048 = vector.load %arg7[%c127_1278, %c0_1279] : memref<128x32xf32, #tpu.memory_space<vmem>>, vector<1x32xf32>
    tpu.vector_store %arg7[%c127_1278, %c0_1279], %2047 {strides = array<i32>} : memref<128x32xf32, #tpu.memory_space<vmem>>, vector<1x32xf32>,
    %c0_1280 = arith.constant 0 : index
    %c0_1281 = arith.constant 0 : index
    %2049 = vector.load %arg6[%c0_1280, %c0_1281] : memref<128x32xf32, #tpu.memory_space<vmem>>, vector<128x32xf32>
    %c0_1282 = arith.constant 0 : index
    %c0_1283 = arith.constant 0 : index
    %2050 = vector.load %arg7[%c0_1282, %c0_1283] : memref<128x32xf32, #tpu.memory_space<vmem>>, vector<128x32xf32>
    %2051 = arith.mulf %2049, %2050 : vector<128x32xf32>
    %cst = arith.constant dense<0.000000e+00> : vector<128xf32>
    %2052 = vector.multi_reduction <add>, %2051, %cst [1] : vector<128x32xf32> to vector<128xf32>
    %2053 = arith.negf %2052 : vector<128xf32>
    %2054 = math.exp %2053 : vector<128xf32>
    %cst_1284 = arith.constant 1.000000e+00 : f32
    %2055 = vector.broadcast %cst_1284 : f32 to vector<128xf32>
    %2056 = arith.addf %2055, %2054 : vector<128xf32>
    %2057 = arith.divf %2055, %2056 : vector<128xf32>
    %2058 = vector.shape_cast %2057 : vector<128xf32> to vector<1x128xf32>
    %c0_1285 = arith.constant 0 : index
    %c0_1286 = arith.constant 0 : index
    %2059 = vector.load %arg5[%c0_1285, %c0_1286] : memref<1x128xf32, #tpu.memory_space<vmem>>, vector<1x128xf32>
    tpu.vector_store %arg5[%c0_1285, %c0_1286], %2058 {strides = array<i32>} : memref<1x128xf32, #tpu.memory_space<vmem>>, vector<1x128xf32>,
    return
  }
  func.func @transform_0(%arg0: i32, %arg1: memref<256xi32, #tpu.memory_space<smem>>, %arg2: memref<256xi32, #tpu.memory_space<smem>>) -> (i32, i32) {
    %c0_i32 = arith.constant 0 : i32
    %c0_i32_0 = arith.constant 0 : i32
    %c0_i32_1 = arith.constant 0 : i32
    return %c0_i32, %c0_i32_0 : i32, i32
  }
  func.func @transform_1(%arg0: i32, %arg1: memref<256xi32, #tpu.memory_space<smem>>, %arg2: memref<256xi32, #tpu.memory_space<smem>>) -> (i32, i32) {
    %c0_i32 = arith.constant 0 : i32
    %c0_i32_0 = arith.constant 0 : i32
    %c0_i32_1 = arith.constant 0 : i32
    return %c0_i32, %c0_i32_0 : i32, i32
  }
  func.func @transform_2(%arg0: i32, %arg1: memref<256xi32, #tpu.memory_space<smem>>, %arg2: memref<256xi32, #tpu.memory_space<smem>>) -> (i32, i32) {
    %c0_i32 = arith.constant 0 : i32
    %c0_i32_0 = arith.constant 0 : i32
    return %c0_i32, %arg0 : i32, i32
  }
}

</mosaic_0001>

<bundles_post_ra>
// kernel: gmf_forward.1
= control target key start
LH: loop header
LB: loop body
LE: loop exit
PB: predicated region body
PF: predicated region fallthrough
CT: control target
= control target key end

     0   :  { %s7298_s0 = inlined_call_operand.vmem [shape: s32[256], index: 0, kind: input, shape index: {}]   ;;  %s7299_s2 = inlined_call_operand.vmem [shape: f32[50,32], index: 2, kind: input, shape index: {}]   ;;  %s7300_s3 = inlined_call_operand.vmem [shape: f32[40,32], index: 3, kind: input, shape index: {}]   ;;  %s7301_s4 = inlined_call_operand.hbm [shape: f32[1,256], index: 4, kind: output, shape index: {}]   ;;  %s7302_s1 = inlined_call_operand.vmem [shape: s32[256], index: 1, kind: input, shape index: {}]  }
   0x1   :  { %s9_s17 = sshll.u32 %s7298_s0, 4  ;;  %s13_s20 = sshll.u32 %s7302_s1, 4  ;;  %s10_s17 = int_to_ptr.vmem [resolvable:$true] %s9_s17  ;;  %s14_s20 = int_to_ptr.vmem [resolvable:$true] %s13_s20 }
   0x2   :  { %s4864_s21 = scalar_lea.vmem %s10_s17, 32  ;;  %p4869_p1 = scmp.lt.s32.totalorder %s10_s17, %s10_s17 }
   0x3   :  { %p4865_p0 = scmp.ne.s32.totalorder %s10_s17, %s4864_s21  ;;  %p4870_p2 = scmp.lt.s32.totalorder %s4864_s21, %s4864_s21 }
   0x5   :  { %p4871_p3 = por %p4870_p2, %p4869_p1 }
   0x7   :  { %p4872_p4 = pnand %p4871_p3, %p4865_p0 }
   0x9   :  { %4875 = shalt.err (!%p4872_p4)  }
   0xa   :  { %s4952_s22 = smov [#allocation5]   ;;  %s4876_s23 = scalar_lea.vmem %s14_s20, 32 }
   0xb   :  { %12 = dma.vmem_to_smem %s10_s17, 32, %s4952_s22, [#allocation4] }
   0xc   :  { %p4877_p5 = scmp.ne.s32.totalorder %s14_s20, %s4876_s23  ;;  %p4881_p6 = scmp.lt.s32.totalorder %s14_s20, %s14_s20 }
   0xd   :  { %p4882_p7 = scmp.lt.s32.totalorder %s4876_s23, %s4876_s23 }
   0xf   :  { %p4883_p8 = por %p4882_p7, %p4881_p6 }
  0x11   :  { %p4884_p9 = pnand %p4883_p8, %p4877_p5 }
  0x13   :  { %4887 = shalt.err (!%p4884_p9)  }
  0x14   :  { %s4953_s0 = smov [#allocation6]  }
  0x15   :  { %16 = dma.vmem_to_smem %s14_s20, 32, %s4953_s0, [#allocation4] }
  0x16   :  { %4930 = dma.done.wait [#allocation4], 64 }
  0x17   :  { %4931 = vsyncadd [#allocation4], 4294967232 }
  0x18   :  { %18 = sfence }
  0x19   :  { %19 = vsyncpa [#allocation8], 0 }
  0x1a   :  { %21 = vsyncpa [#allocation8 + $0x1], 0  ;;  %s4986_s1 = smov 0   ;;  %s4988_s24 = smov 0  }
  0x1b   :  { %s4990_s25 = smov 0   ;;  %s4992_s26 = smov 0  }
  0x1c LB: > { %s5007_s27 = sadd.s32 4294967295, %s4950_s26   ;;  %s2944_s28 = sadd.s32 4294967294, %s4950_s26   ;;  %s4950_s26 = sphi %s4992_s26, %s7308_s26   ;;  %s4946_s25 = sphi %s4990_s25, %s7307_s25   ;;  %s4942_s24 = sphi %s4988_s24, %s7306_s24   ;;  %s4938_s1 = sphi %s4986_s1, %s7305_s1  }
  0x1d   : > { %s5011_s29 = sadd.s32 1, %s4950_s26   ;;  %s76_s30 = sadd.s32 1, %s4946_s25 }
  0x1e   : > { %s73_s5 = ssub.s32 %s4950_s26, %s5011_s29  ;;  %p86_p10 = scmp.ne.s32.totalorder %s4946_s25, %s4942_s24 }
  0x1f   : > { %p74_p11 = scmp.eq.s32.totalorder %s73_s5, 0  ;;  %p87_p12 = scmp.eq.s32.totalorder %s5007_s27, 1 }
  0x20   : > { %p92_p13 = scmp.ne.s32.totalorder %s4942_s24, %s4938_s1  ;;  %p93_p0 = scmp.eq.s32.totalorder %s2944_s28, 1 }
  0x21   : > { %s5022_s6 = scalar_select %p74_p11, %s4946_s25, %s76_s30  }
  0x22   : > { %p5024_p1 = por %p87_p12, %p86_p10  ;;  %p5028_p2 = por %p93_p0, %p92_p13 }
  0x23   : > { %p2946_p3 = scmp.ge.s32.totalorder %s4950_s26, 1  ;;  %p117_p4 = scmp.lt.s32.totalorder %s4950_s26, 3 }
  0x25   : > { %p118_p5 = pnand %p2946_p3, %p117_p4 }
  0x26   : > { %s5035_s9 = sshll.u32 (!%p118_p5), %s5007_s27, 7 }
  0x27   : > { %121 = sbr.rel (%p118_p5) target bundleno = 1136 (0x470), region = 28  ;;  %s134_s10 = sld [smem:[#allocation5 + %s5035_s9]] (!%p118_p5) }
  0x28   : > { %s151_s11 = sadd.s32 (!%p118_p5), 1, %s5035_s9  ;;  %s139_s12 = sld [smem:[#allocation6 + %s5035_s9]] (!%p118_p5) }
  0x29   : > { %s168_s13 = sadd.s32 (!%p118_p5), 2, %s5035_s9  ;;  %s152_s14 = sld [smem:[#allocation5 + %s151_s11]] (!%p118_p5) }
  0x2a   : > { %s5041_s15 = sld [smem:[#allocation6 + %s151_s11]] (!%p118_p5)  ;;  %s185_s17 = sadd.s32 (!%p118_p5), 3, %s5035_s9 }
  0x2b   : > { %s5043_s16 = sld [smem:[#allocation5 + %s168_s13]] (!%p118_p5)  ;;  %s202_s19 = sadd.s32 (!%p118_p5), 4, %s5035_s9 }
  0x2c   : > { %s5046_s18 = sld [smem:[#allocation6 + %s168_s13]]  ;;  %vm146_vm0 = vcmask 253952   ;;  %vm2358_vm1 = vcmask 261120   ;;  %vm2530_vm2 = vcmask 130112   ;;  %vm2537_vm3 = vcmask 195712  }
  0x2d   : > { %p135_p6 = scmp.gt.s32.totalorder %s134_s10, 0  ;;  %p2948_p7 = scmp.lt.s32.totalorder %s134_s10, 49  ;;  %vm2544_vm4 = vcmask 261312   ;;  %vm2551_vm5 = vcmask 326912   ;;  %vm2558_vm6 = vcmask 392512   ;;  %vm2565_vm7 = vcmask 458112  }
  0x2e   : > { %p140_p8 = scmp.gt.s32.totalorder %s139_s12, 0  ;;  %p2953_p9 = scmp.lt.s32.totalorder %s139_s12, 39  ;;  %vm2572_vm8 = vcmask 523712   ;;  %vm2579_vm9 = vcmask 589312   ;;  %vm2586_vm10 = vcmask 654912   ;;  %vm2593_vm11 = vcmask 720512  }
  0x2f   : > { %s7310_s10 = smov (!%p135_p6, %s134_s10), 0  ;;  %p153_p10 = scmp.gt.s32.totalorder %s152_s14, 0  ;;  %vm2600_vm12 = vcmask 786112   ;;  %vm2607_vm13 = vcmask 851712   ;;  %vm2614_vm14 = vcmask 917312   ;;  %vm2621_vm15 = vcmask 982912  }
  0x30   : > { %s7312_s12 = smov (!%p140_p8, %s139_s12), 0  ;;  %s7314_s10 = smov (!%p2948_p7, %s7310_s10), 49 }
  0x31   : > { %s7316_s12 = smov (!%p2953_p9, %s7312_s12), 39  ;;  %s144_s22 = scalar_lea.vmem %s7299_s2, %s7314_s10 }
  0x32   : > { %v145_v0 = vld [vmem:[%s144_s22] sm:$0x1]  ;;  %s148_s28 = scalar_lea.vmem %s7300_s3, %s7316_s12  ;;  %p2958_p11 = scmp.lt.s32.totalorder %s152_s14, 49 }
  0x33   : > { %147 = vst.msk [vmem:[#allocation2] sm:$0x1] %vm146_vm0, %v145_v0  ;;  %v149_v1 = vld [vmem:[%s148_s28] sm:$0x1]  ;;  %s7318_s14 = smov (!%p153_p10, %s152_s14), 0  ;;  %p158_p12 = scmp.gt.s32.totalorder %s5041_s15, 0 }
  0x34   : > { %150 = vst.msk [vmem:[#allocation3] sm:$0x1] %vm146_vm0, %v149_v1  ;;  %p2963_p13 = scmp.lt.s32.totalorder %s5041_s15, 39  ;;  %s7320_s14 = smov (!%p2958_p11, %s7318_s14), 49 }
  0x35   : > { %s7322_s15 = smov (!%p158_p12, %s5041_s15), 0  ;;  %s162_s10 = scalar_lea.vmem %s7299_s2, %s7320_s14 }
  0x36   : > { %p170_p0 = scmp.gt.s32.totalorder %s5043_s16, 0  ;;  %s7324_s15 = smov (!%p2963_p13, %s7322_s15), 39  ;;  %v163_v2 = vld [vmem:[%s162_s10] sm:$0x1] }
  0x37   : > { %164 = vst.msk [vmem:[#allocation2 + $0x1] sm:$0x1] %vm146_vm0, %v163_v2  ;;  %s165_s20 = scalar_lea.vmem %s7300_s3, %s7324_s15  ;;  %p2968_p3 = scmp.lt.s32.totalorder %s5043_s16, 49 }
  0x38   : > { %s171_s11 = scalar_select %p170_p0, %s5043_s16, 0  ;;  %v166_v3 = vld [vmem:[%s165_s20] sm:$0x1] }
  0x39   : > { %p175_p4 = scmp.gt.s32.totalorder %s5046_s18, 0  ;;  %p2973_p5 = scmp.lt.s32.totalorder %s5046_s18, 39  ;;  %167 = vst.msk [vmem:[#allocation3 + $0x1] sm:$0x1] %vm146_vm0, %v166_v3 }
  0x3a   : > { %s7326_s11 = smov (!%p2968_p3, %s171_s11), 49  ;;  %s186_s23 = sld [smem:[#allocation5 + %s185_s17]] }
  0x3b   : > { %s7328_s18 = smov (!%p175_p4, %s5046_s18), 0  ;;  %s179_s22 = scalar_lea.vmem %s7299_s2, %s7326_s11 }
  0x3c   : > { %s7330_s18 = smov (!%p2973_p5, %s7328_s18), 39  ;;  %v180_v4 = vld [vmem:[%s179_s22] sm:$0x1]  ;;  %s191_s15 = sld [smem:[#allocation6 + %s185_s17]] }
  0x3d   : > { %181 = vst.msk [vmem:[#allocation2 + $0x2] sm:$0x1] %vm146_vm0, %v180_v4  ;;  %s219_s16 = sadd.s32 5, %s5035_s9  ;;  %s182_s30 = scalar_lea.vmem %s7300_s3, %s7330_s18 }
  0x3e   : > { %s203_s5 = sld [smem:[#allocation5 + %s202_s19]]  ;;  %v183_v5 = vld [vmem:[%s182_s30] sm:$0x1]  ;;  %s236_s12 = sadd.s32 6, %s5035_s9 }
  0x3f   : > { %s5090_s10 = sld [smem:[#allocation6 + %s202_s19]]  ;;  %184 = vst.msk [vmem:[#allocation3 + $0x2] sm:$0x1] %vm146_vm0, %v183_v5  ;;  %s253_s17 = sadd.s32 7, %s5035_s9 }
  0x40   : > { %s5093_s11 = sld [smem:[#allocation5 + %s219_s16]]  ;;  %p187_p6 = scmp.gt.s32.totalorder %s186_s23, 0 }
  0x41   : > { %p2978_p7 = scmp.lt.s32.totalorder %s186_s23, 49  ;;  %s5096_s13 = sld [smem:[#allocation6 + %s219_s16]] }
  0x42   : > { %s7332_s23 = smov (!%p187_p6, %s186_s23), 0  ;;  %p192_p8 = scmp.gt.s32.totalorder %s191_s15, 0 }
  0x43   : > { %p2983_p9 = scmp.lt.s32.totalorder %s191_s15, 39  ;;  %s7334_s23 = smov (!%p2978_p7, %s7332_s23), 49 }
  0x44   : > { %s7336_s15 = smov (!%p192_p8, %s191_s15), 0  ;;  %s196_s20 = scalar_lea.vmem %s7299_s2, %s7334_s23 }
  0x45   : > { %p204_p10 = scmp.gt.s32.totalorder %s203_s5, 0  ;;  %s7338_s15 = smov (!%p2983_p9, %s7336_s15), 39  ;;  %v197_v6 = vld [vmem:[%s196_s20] sm:$0x1] }
  0x46   : > { %198 = vst.msk [vmem:[#allocation2 + $0x3] sm:$0x1] %vm146_vm0, %v197_v6  ;;  %s199_s16 = scalar_lea.vmem %s7300_s3, %s7338_s15  ;;  %p2988_p11 = scmp.lt.s32.totalorder %s203_s5, 49 }
  0x47   : > { %s205_s14 = scalar_select %p204_p10, %s203_s5, 0  ;;  %v200_v7 = vld [vmem:[%s199_s16] sm:$0x1] }
  0x48   : > { %p209_p12 = scmp.gt.s32.totalorder %s5090_s10, 0  ;;  %p2993_p13 = scmp.lt.s32.totalorder %s5090_s10, 39  ;;  %201 = vst.msk [vmem:[#allocation3 + $0x3] sm:$0x1] %vm146_vm0, %v200_v7 }
  0x49   : > { %s7340_s14 = smov (!%p2988_p11, %s205_s14), 49  ;;  %p221_p0 = scmp.gt.s32.totalorder %s5093_s11, 0 }
  0x4a   : > { %s7342_s10 = smov (!%p209_p12, %s5090_s10), 0  ;;  %s213_s28 = scalar_lea.vmem %s7299_s2, %s7340_s14 }
  0x4b   : > { %s7344_s10 = smov (!%p2993_p13, %s7342_s10), 39  ;;  %v214_v8 = vld [vmem:[%s213_s28] sm:$0x1]  ;;  %p2998_p3 = scmp.lt.s32.totalorder %s5093_s11, 49 }
  0x4c   : > { %215 = vst.msk [vmem:[#allocation2 + $0x4] sm:$0x1] %vm146_vm0, %v214_v8  ;;  %s222_s15 = scalar_select %p221_p0, %s5093_s11, 0 }
  0x4d   : > { %s216_s18 = scalar_lea.vmem %s7300_s3, %s7344_s10  ;;  %p226_p4 = scmp.gt.s32.totalorder %s5096_s13, 0 }
  0x4e   : > { %v217_v9 = vld [vmem:[%s216_s18] sm:$0x1]  ;;  %p3003_p5 = scmp.lt.s32.totalorder %s5096_s13, 39  ;;  %s7346_s15 = smov (!%p2998_p3, %s222_s15), 49 }
  0x4f   : > { %218 = vst.msk [vmem:[#allocation3 + $0x4] sm:$0x1] %vm146_vm0, %v217_v9  ;;  %s7348_s13 = smov (!%p226_p4, %s5096_s13), 0  ;;  %s230_s14 = scalar_lea.vmem %s7299_s2, %s7346_s15 }
  0x50   : > { %s237_s21 = sld [smem:[#allocation5 + %s236_s12]]  ;;  %s7350_s13 = smov (!%p3003_p5, %s7348_s13), 39  ;;  %v231_v10 = vld [vmem:[%s230_s14] sm:$0x1] }
  0x51   : > { %232 = vst.msk [vmem:[#allocation2 + $0x5] sm:$0x1] %vm146_vm0, %v231_v10  ;;  %s242_s10 = sld [smem:[#allocation6 + %s236_s12]]  ;;  %s406_s11 = sadd.s32 16, %s5035_s9 }
  0x52   : > { %s233_s23 = scalar_lea.vmem %s7300_s3, %s7350_s13  ;;  %s254_s0 = sld [smem:[#allocation5 + %s253_s17]] }
  0x53   : > { %v234_v11 = vld [vmem:[%s233_s23] sm:$0x1]  ;;  %s5140_s28 = sld [smem:[#allocation6 + %s253_s17]]  ;;  %s423_s30 = sadd.s32 17, %s5035_s9 }
  0x54   : > { %235 = vst.msk [vmem:[#allocation3 + $0x5] sm:$0x1] %vm146_vm0, %v234_v11  ;;  %s5143_s15 = sld [smem:[#allocation5 + %s406_s11]]  ;;  %s440_s12 = sadd.s32 18, %s5035_s9 }
  0x55   : > { %s5146_s5 = sld [smem:[#allocation6 + %s406_s11]]  ;;  %s491_s23 = sadd.s32 21, %s5035_s9 }
  0x56   : > { %p238_p6 = scmp.gt.s32.totalorder %s237_s21, 0  ;;  %p3008_p7 = scmp.lt.s32.totalorder %s237_s21, 49 }
  0x57   : > { %p243_p8 = scmp.gt.s32.totalorder %s242_s10, 0  ;;  %p3013_p9 = scmp.lt.s32.totalorder %s242_s10, 39 }
  0x58   : > { %s7352_s21 = smov (!%p238_p6, %s237_s21), 0  ;;  %p255_p10 = scmp.gt.s32.totalorder %s254_s0, 0 }
  0x59   : > { %s7354_s21 = smov (!%p3008_p7, %s7352_s21), 49  ;;  %s7356_s10 = smov (!%p243_p8, %s242_s10), 0 }
  0x5a   : > { %s247_s18 = scalar_lea.vmem %s7299_s2, %s7354_s21  ;;  %s7358_s10 = smov (!%p3013_p9, %s7356_s10), 39 }
  0x5b   : > { %v248_v12 = vld [vmem:[%s247_s18] sm:$0x1]  ;;  %s256_s19 = scalar_select %p255_p10, %s254_s0, 0 }
  0x5c   : > { %249 = vst.msk [vmem:[#allocation2 + $0x6] sm:$0x1] %vm146_vm0, %v248_v12  ;;  %s250_s11 = scalar_lea.vmem %s7300_s3, %s7358_s10  ;;  %p3018_p11 = scmp.lt.s32.totalorder %s254_s0, 49 }
  0x5d   : > { %v251_v13 = vld [vmem:[%s250_s11] sm:$0x1]  ;;  %p260_p12 = scmp.gt.s32.totalorder %s5140_s28, 0  ;;  %p3023_p13 = scmp.lt.s32.totalorder %s5140_s28, 39 }
  0x5e   : > { %252 = vst.msk [vmem:[#allocation3 + $0x6] sm:$0x1] %vm146_vm0, %v251_v13  ;;  %s7360_s19 = smov (!%p3018_p11, %s256_s19), 49  ;;  %p408_p0 = scmp.gt.s32.totalorder %s5143_s15, 0 }
  0x5f   : > { %s7362_s28 = smov (!%p260_p12, %s5140_s28), 0  ;;  %s264_s16 = scalar_lea.vmem %s7299_s2, %s7360_s19 }
  0x60   : > { %s7364_s28 = smov (!%p3023_p13, %s7362_s28), 39  ;;  %v265_v14 = vld [vmem:[%s264_s16] sm:$0x1]  ;;  %p3108_p3 = scmp.lt.s32.totalorder %s5143_s15, 49 }
  0x61   : > { %266 = vst.msk [vmem:[#allocation2 + $0x7] sm:$0x1] %vm146_vm0, %v265_v14  ;;  %s409_s10 = scalar_select %p408_p0, %s5143_s15, 0 }
  0x62   : > { %s267_s13 = scalar_lea.vmem %s7300_s3, %s7364_s28  ;;  %p413_p4 = scmp.gt.s32.totalorder %s5146_s5, 0 }
  0x63   : > { %v268_v15 = vld [vmem:[%s267_s13] sm:$0x1]  ;;  %p3113_p5 = scmp.lt.s32.totalorder %s5146_s5, 39  ;;  %s7366_s10 = smov (!%p3108_p3, %s409_s10), 49 }
  0x64   : > { %269 = vst.msk [vmem:[#allocation3 + $0x7] sm:$0x1] %vm146_vm0, %v268_v15  ;;  %s7368_s5 = smov (!%p413_p4, %s5146_s5), 0  ;;  %s417_s19 = scalar_lea.vmem %s7299_s2, %s7366_s10 }
  0x65   : > { %s424_s20 = sld [smem:[#allocation5 + %s423_s30]]  ;;  %s7370_s5 = smov (!%p3113_p5, %s7368_s5), 39  ;;  %v418_v16 = vld [vmem:[%s417_s19] sm:$0x1] }
  0x66   : > { %419 = vst.msk [vmem:[#allocation2 + $0x10] sm:$0x1] %vm146_vm0, %v418_v16  ;;  %s429_s28 = sld [smem:[#allocation6 + %s423_s30]]  ;;  %s457_s15 = sadd.s32 19, %s5035_s9 }
  0x67   : > { %s420_s21 = scalar_lea.vmem %s7300_s3, %s7370_s5  ;;  %s5188_s22 = sld [smem:[#allocation5 + %s440_s12]] }
  0x68   : > { %v2310_v17 = vld [vmem:[#allocation2] sm:$0xff]  ;;  %s5192_s16 = sld [smem:[#allocation6 + %s440_s12]]  ;;  %s474_s10 = sadd.s32 20, %s5035_s9 }
  0x69   : > { %v421_v18 = vld [vmem:[%s420_s21] sm:$0x1]  ;;  %s5195_s30 = sld [smem:[#allocation5 + %s457_s15]]  ;;  %s525_s21 = sadd.s32 23, %s5035_s9 }
  0x6a   : > { %422 = vst.msk [vmem:[#allocation3 + $0x10] sm:$0x1] %vm146_vm0, %v421_v18  ;;  %s5198_s5 = sld [smem:[#allocation6 + %s457_s15]] }
  0x6b   : > { %v2326_v19 = vld [vmem:[#allocation3] sm:$0xff]  ;;  %p425_p6 = scmp.gt.s32.totalorder %s424_s20, 0  ;;  %p3118_p7 = scmp.lt.s32.totalorder %s424_s20, 49 }
  0x6c   : > { %v2342_v20 = vmul.f32 %v2326_v19, %v2310_v17  ;;  %p430_p8 = scmp.gt.s32.totalorder %s429_s28, 0  ;;  %p3123_p9 = scmp.lt.s32.totalorder %s429_s28, 39 }
  0x6d   : > { %s7372_s20 = smov (!%p425_p6, %s424_s20), 0  ;;  %p442_p10 = scmp.gt.s32.totalorder %s5188_s22, 0 }
  0x6e   : > { %v2359_v21 = vsel %vm2358_vm1, %v2342_v20, 0.0  ;;  %s7374_s20 = smov (!%p3118_p7, %s7372_s20), 49  ;;  %s7376_s28 = smov (!%p430_p8, %s429_s28), 0 }
  0x6f   : > { %2360 = vadd.xlane.f32.xlu0 %v2359_v21  ;;  %s434_s13 = scalar_lea.vmem %s7299_s2, %s7374_s20  ;;  %s7378_s28 = smov (!%p3123_p9, %s7376_s28), 39 }
  0x70   : > { %v435_v22 = vld [vmem:[%s434_s13] sm:$0x1]  ;;  %s443_s17 = scalar_select %p442_p10, %s5188_s22, 0 }
  0x71   : > { %436 = vst.msk [vmem:[#allocation2 + $0x11] sm:$0x1] %vm146_vm0, %v435_v22  ;;  %s437_s15 = scalar_lea.vmem %s7300_s3, %s7378_s28  ;;  %p3128_p11 = scmp.lt.s32.totalorder %s5188_s22, 49 }
  0x72   : > { %v438_v23 = vld [vmem:[%s437_s15] sm:$0x1]  ;;  %p447_p12 = scmp.gt.s32.totalorder %s5192_s16, 0  ;;  %p3133_p13 = scmp.lt.s32.totalorder %s5192_s16, 39 }
  0x73   : > { %439 = vst.msk [vmem:[#allocation3 + $0x11] sm:$0x1] %vm146_vm0, %v438_v23  ;;  %s7380_s17 = smov (!%p3128_p11, %s443_s17), 49  ;;  %p459_p0 = scmp.gt.s32.totalorder %s5195_s30, 0 }
  0x74   : > { %s7382_s16 = smov (!%p447_p12, %s5192_s16), 0  ;;  %s451_s11 = scalar_lea.vmem %s7299_s2, %s7380_s17 }
  0x75   : > { %s7384_s16 = smov (!%p3133_p13, %s7382_s16), 39  ;;  %v452_v24 = vld [vmem:[%s451_s11] sm:$0x1]  ;;  %p3138_p3 = scmp.lt.s32.totalorder %s5195_s30, 49 }
  0x76   : > { %453 = vst.msk [vmem:[#allocation2 + $0x12] sm:$0x1] %vm146_vm0, %v452_v24  ;;  %s460_s28 = scalar_select %p459_p0, %s5195_s30, 0 }
  0x77   : > { %s454_s12 = scalar_lea.vmem %s7300_s3, %s7384_s16  ;;  %p464_p4 = scmp.gt.s32.totalorder %s5198_s5, 0 }
  0x78   : > { %v455_v25 = vld [vmem:[%s454_s12] sm:$0x1]  ;;  %p3143_p5 = scmp.lt.s32.totalorder %s5198_s5, 39  ;;  %s7386_s28 = smov (!%p3138_p3, %s460_s28), 49 }
  0x79   : > { %456 = vst.msk [vmem:[#allocation3 + $0x12] sm:$0x1] %vm146_vm0, %v455_v25  ;;  %s7388_s5 = smov (!%p464_p4, %s5198_s5), 0  ;;  %s468_s17 = scalar_lea.vmem %s7299_s2, %s7386_s28 }
  0x7a   : > { %s475_s18 = sld [smem:[#allocation5 + %s474_s10]]  ;;  %s7390_s5 = smov (!%p3143_p5, %s7388_s5), 39  ;;  %v469_v26 = vld [vmem:[%s468_s17] sm:$0x1] }
  0x7b   : > { %470 = vst.msk [vmem:[#allocation2 + $0x13] sm:$0x1] %vm146_vm0, %v469_v26  ;;  %s480_s16 = sld [smem:[#allocation6 + %s474_s10]]  ;;  %s508_s30 = sadd.s32 22, %s5035_s9 }
  0x7c   : > { %s471_s20 = scalar_lea.vmem %s7300_s3, %s7390_s5  ;;  %s492_s14 = sld [smem:[#allocation5 + %s491_s23]] }
  0x7d   : > { %v472_v27 = vld [vmem:[%s471_s20] sm:$0x1]  ;;  %s5246_s11 = sld [smem:[#allocation6 + %s491_s23]]  ;;  %s270_s10 = sadd.s32 8, %s5035_s9 }
  0x7e   : > { %473 = vst.msk [vmem:[#allocation3 + $0x13] sm:$0x1] %vm146_vm0, %v472_v27  ;;  %s5249_s28 = sld [smem:[#allocation5 + %s508_s30]]  ;;  %s304_s20 = sadd.s32 10, %s5035_s9 }
  0x7f   : > { %s5252_s22 = sld [smem:[#allocation6 + %s508_s30]] }
  0x80   : > { %p476_p6 = scmp.gt.s32.totalorder %s475_s18, 0  ;;  %p3148_p7 = scmp.lt.s32.totalorder %s475_s18, 49 }
  0x81   : > { %p481_p8 = scmp.gt.s32.totalorder %s480_s16, 0  ;;  %p3153_p9 = scmp.lt.s32.totalorder %s480_s16, 39 }
  0x82   : > { %s7392_s18 = smov (!%p476_p6, %s475_s18), 0  ;;  %p493_p10 = scmp.gt.s32.totalorder %s492_s14, 0 }
  0x83   : > { %s7394_s18 = smov (!%p3148_p7, %s7392_s18), 49  ;;  %s7396_s16 = smov (!%p481_p8, %s480_s16), 0 }
  0x84   : > { %s485_s12 = scalar_lea.vmem %s7299_s2, %s7394_s18  ;;  %s7398_s16 = smov (!%p3153_p9, %s7396_s16), 39 }
  0x85   : > { %v486_v28 = vld [vmem:[%s485_s12] sm:$0x1]  ;;  %s494_s0 = scalar_select %p493_p10, %s492_s14, 0 }
  0x86   : > { %487 = vst.msk [vmem:[#allocation2 + $0x14] sm:$0x1] %vm146_vm0, %v486_v28  ;;  %s488_s30 = scalar_lea.vmem %s7300_s3, %s7398_s16  ;;  %p3158_p11 = scmp.lt.s32.totalorder %s492_s14, 49 }
  0x87   : > { %v489_v29 = vld [vmem:[%s488_s30] sm:$0x1]  ;;  %p498_p12 = scmp.gt.s32.totalorder %s5246_s11, 0  ;;  %p3163_p13 = scmp.lt.s32.totalorder %s5246_s11, 39 }
  0x88   : > { %490 = vst.msk [vmem:[#allocation3 + $0x14] sm:$0x1] %vm146_vm0, %v489_v29  ;;  %s7400_s0 = smov (!%p3158_p11, %s494_s0), 49  ;;  %p510_p0 = scmp.gt.s32.totalorder %s5249_s28, 0 }
  0x89   : > { %s7402_s11 = smov (!%p498_p12, %s5246_s11), 0  ;;  %s502_s15 = scalar_lea.vmem %s7299_s2, %s7400_s0 }
  0x8a   : > { %s7404_s11 = smov (!%p3163_p13, %s7402_s11), 39  ;;  %v503_v30 = vld [vmem:[%s502_s15] sm:$0x1]  ;;  %p3168_p3 = scmp.lt.s32.totalorder %s5249_s28, 49 }
  0x8b   : > { %504 = vst.msk [vmem:[#allocation2 + $0x15] sm:$0x1] %vm146_vm0, %v503_v30  ;;  %s511_s16 = scalar_select %p510_p0, %s5249_s28, 0 }
  0x8c   : > { %s505_s5 = scalar_lea.vmem %s7300_s3, %s7404_s11  ;;  %p515_p4 = scmp.gt.s32.totalorder %s5252_s22, 0 }
  0x8d   : > { %v506_v31 = vld [vmem:[%s505_s5] sm:$0x1]  ;;  %p3173_p5 = scmp.lt.s32.totalorder %s5252_s22, 39  ;;  %s7406_s16 = smov (!%p3168_p3, %s511_s16), 49 }
  0x8e   : > { %507 = vst.msk [vmem:[#allocation3 + $0x15] sm:$0x1] %vm146_vm0, %v506_v31  ;;  %s7408_s22 = smov (!%p515_p4, %s5252_s22), 0  ;;  %s519_s0 = scalar_lea.vmem %s7299_s2, %s7406_s16 }
  0x8f   : > { %s526_s13 = sld [smem:[#allocation5 + %s525_s21]]  ;;  %s7410_s22 = smov (!%p3173_p5, %s7408_s22), 39  ;;  %v520_v32 = vld [vmem:[%s519_s0] sm:$0x1] }
  0x90   : > { %521 = vst.msk [vmem:[#allocation2 + $0x16] sm:$0x1] %vm146_vm0, %v520_v32  ;;  %s531_s11 = sld [smem:[#allocation6 + %s525_s21]]  ;;  %s287_s28 = sadd.s32 9, %s5035_s9 }
  0x91   : > { %s522_s18 = scalar_lea.vmem %s7300_s3, %s7410_s22  ;;  %s271_s19 = sld [smem:[#allocation5 + %s270_s10]] }
  0x92   : > { %v523_v33 = vld [vmem:[%s522_s18] sm:$0x1]  ;;  %s5296_s15 = sld [smem:[#allocation6 + %s270_s10]]  ;;  %s321_s21 = sadd.s32 11, %s5035_s9 }
  0x93   : > { %524 = vst.msk [vmem:[#allocation3 + $0x16] sm:$0x1] %vm146_vm0, %v523_v33  ;;  %s5299_s16 = sld [smem:[#allocation5 + %s287_s28]]  ;;  %s338_s12 = sadd.s32 12, %s5035_s9 }
  0x94   : > { %s5302_s14 = sld [smem:[#allocation6 + %s287_s28]]  ;;  %s355_s18 = sadd.s32 13, %s5035_s9 }
  0x95   : > { %p527_p6 = scmp.gt.s32.totalorder %s526_s13, 0  ;;  %p3178_p7 = scmp.lt.s32.totalorder %s526_s13, 49 }
  0x96   : > { %p532_p8 = scmp.gt.s32.totalorder %s531_s11, 0  ;;  %p3183_p9 = scmp.lt.s32.totalorder %s531_s11, 39 }
  0x97   : > { %s7412_s13 = smov (!%p527_p6, %s526_s13), 0  ;;  %p272_p10 = scmp.gt.s32.totalorder %s271_s19, 0 }
  0x98   : > { %s7414_s13 = smov (!%p3178_p7, %s7412_s13), 49  ;;  %s7416_s11 = smov (!%p532_p8, %s531_s11), 0 }
  0x99   : > { %s536_s5 = scalar_lea.vmem %s7299_s2, %s7414_s13  ;;  %s7418_s11 = smov (!%p3183_p9, %s7416_s11), 39 }
  0x9a   : > { %v537_v34 = vld [vmem:[%s536_s5] sm:$0x1]  ;;  %s273_s23 = scalar_select %p272_p10, %s271_s19, 0 }
  0x9b   : > { %538 = vst.msk [vmem:[#allocation2 + $0x17] sm:$0x1] %vm146_vm0, %v537_v34  ;;  %s539_s28 = scalar_lea.vmem %s7300_s3, %s7418_s11  ;;  %p3028_p11 = scmp.lt.s32.totalorder %s271_s19, 49 }
  0x9c   : > { %v540_v35 = vld [vmem:[%s539_s28] sm:$0x1]  ;;  %p277_p12 = scmp.gt.s32.totalorder %s5296_s15, 0  ;;  %p3033_p13 = scmp.lt.s32.totalorder %s5296_s15, 39 }
  0x9d   : > { %541 = vst.msk [vmem:[#allocation3 + $0x17] sm:$0x1] %vm146_vm0, %v540_v35  ;;  %s7420_s23 = smov (!%p3028_p11, %s273_s23), 49  ;;  %p289_p0 = scmp.gt.s32.totalorder %s5299_s16, 0 }
  0x9e   : > { %s7422_s15 = smov (!%p277_p12, %s5296_s15), 0  ;;  %s281_s30 = scalar_lea.vmem %s7299_s2, %s7420_s23 }
  0x9f   : > { %s7424_s15 = smov (!%p3033_p13, %s7422_s15), 39  ;;  %v282_v36 = vld [vmem:[%s281_s30] sm:$0x1]  ;;  %p3038_p3 = scmp.lt.s32.totalorder %s5299_s16, 49 }
  0xa0   : > { %283 = vst.msk [vmem:[#allocation2 + $0x8] sm:$0x1] %vm146_vm0, %v282_v36  ;;  %s290_s11 = scalar_select %p289_p0, %s5299_s16, 0 }
  0xa1   : > { %s284_s22 = scalar_lea.vmem %s7300_s3, %s7424_s15  ;;  %p294_p4 = scmp.gt.s32.totalorder %s5302_s14, 0 }
  0xa2   : > { %v2312_v37 = vld [vmem:[#allocation2 + $0x10] sm:$0xff]  ;;  %v285_v38 = vld [vmem:[%s284_s22] sm:$0x1]  ;;  %p3043_p5 = scmp.lt.s32.totalorder %s5302_s14, 39  ;;  %s7426_s11 = smov (!%p3038_p3, %s290_s11), 49 }
  0xa3   : > { %286 = vst.msk [vmem:[#allocation3 + $0x8] sm:$0x1] %vm146_vm0, %v285_v38  ;;  %s7428_s14 = smov (!%p294_p4, %s5302_s14), 0  ;;  %s298_s23 = scalar_lea.vmem %s7299_s2, %s7426_s11 }
  0xa4   : > { %v2328_v39 = vld [vmem:[#allocation3 + $0x10] sm:$0xff]  ;;  %s305_s15 = sld [smem:[#allocation5 + %s304_s20]]  ;;  %s7430_s14 = smov (!%p3043_p5, %s7428_s14), 39  ;;  %v299_v42 = vld [vmem:[%s298_s23] sm:$0x1] }
  0xa5   : > { %v2344_v40 = vmul.f32 %v2328_v39, %v2312_v37  ;;  %300 = vst.msk [vmem:[#allocation2 + $0x9] sm:$0x1] %vm146_vm0, %v299_v42  ;;  %s310_s16 = sld [smem:[#allocation6 + %s304_s20]]  ;;  %s301_s13 = scalar_lea.vmem %s7300_s3, %s7430_s14 }
  0xa6   : > { %s322_s17 = sld [smem:[#allocation5 + %s321_s21]]  ;;  %v302_v43 = vld [vmem:[%s301_s13] sm:$0x1]  ;;  %s372_s20 = sadd.s32 14, %s5035_s9 }
  0xa7   : > { %v2365_v41 = vsel %vm2358_vm1, %v2344_v40, 0.0  ;;  %s5347_s30 = sld [smem:[#allocation6 + %s321_s21]]  ;;  %303 = vst.msk [vmem:[#allocation3 + $0x9] sm:$0x1] %vm146_vm0, %v302_v43  ;;  %s542_s13 = sadd.s32 24, %s5035_s9 }
  0xa8   : > { %2366 = vadd.xlane.f32.xlu1 %v2365_v41  ;;  %s5350_s11 = sld [smem:[#allocation5 + %s338_s12]] }
  0xa9   : > { %s5353_s19 = sld [smem:[#allocation6 + %s338_s12]] }
  0xaa   : > { %p306_p6 = scmp.gt.s32.totalorder %s305_s15, 0  ;;  %p3048_p7 = scmp.lt.s32.totalorder %s305_s15, 49 }
  0xab   : > { %p311_p8 = scmp.gt.s32.totalorder %s310_s16, 0  ;;  %p3053_p9 = scmp.lt.s32.totalorder %s310_s16, 39 }
  0xac   : > { %s7432_s15 = smov (!%p306_p6, %s305_s15), 0  ;;  %p323_p10 = scmp.gt.s32.totalorder %s322_s17, 0 }
  0xad   : > { %s7434_s15 = smov (!%p3048_p7, %s7432_s15), 49  ;;  %s7436_s16 = smov (!%p311_p8, %s310_s16), 0 }
  0xae   : > { %s315_s22 = scalar_lea.vmem %s7299_s2, %s7434_s15  ;;  %s7438_s16 = smov (!%p3053_p9, %s7436_s16), 39 }
  0xaf   : > { %v316_v44 = vld [vmem:[%s315_s22] sm:$0x1]  ;;  %s324_s10 = scalar_select %p323_p10, %s322_s17, 0 }
  0xb0   : > { %317 = vst.msk [vmem:[#allocation2 + $0xa] sm:$0x1] %vm146_vm0, %v316_v44  ;;  %s318_s12 = scalar_lea.vmem %s7300_s3, %s7438_s16  ;;  %p3058_p11 = scmp.lt.s32.totalorder %s322_s17, 49 }
  0xb1   : > { %v319_v45 = vld [vmem:[%s318_s12] sm:$0x1]  ;;  %p328_p12 = scmp.gt.s32.totalorder %s5347_s30, 0  ;;  %p3063_p13 = scmp.lt.s32.totalorder %s5347_s30, 39 }
  0xb2   : > { %320 = vst.msk [vmem:[#allocation3 + $0xa] sm:$0x1] %vm146_vm0, %v319_v45  ;;  %s7440_s10 = smov (!%p3058_p11, %s324_s10), 49  ;;  %p340_p0 = scmp.gt.s32.totalorder %s5350_s11, 0 }
  0xb3   : > { %s7442_s30 = smov (!%p328_p12, %s5347_s30), 0  ;;  %s332_s28 = scalar_lea.vmem %s7299_s2, %s7440_s10 }
  0xb4   : > { %s7444_s30 = smov (!%p3063_p13, %s7442_s30), 39  ;;  %v333_v46 = vld [vmem:[%s332_s28] sm:$0x1]  ;;  %p3068_p3 = scmp.lt.s32.totalorder %s5350_s11, 49 }
  0xb5   : > { %334 = vst.msk [vmem:[#allocation2 + $0xb] sm:$0x1] %vm146_vm0, %v333_v46  ;;  %s341_s16 = scalar_select %p340_p0, %s5350_s11, 0 }
  0xb6   : > { %s335_s14 = scalar_lea.vmem %s7300_s3, %s7444_s30  ;;  %p345_p4 = scmp.gt.s32.totalorder %s5353_s19, 0 }
  0xb7   : > { %v336_v47 = vld [vmem:[%s335_s14] sm:$0x1]  ;;  %p3073_p5 = scmp.lt.s32.totalorder %s5353_s19, 39  ;;  %s7446_s16 = smov (!%p3068_p3, %s341_s16), 49 }
  0xb8   : > { %337 = vst.msk [vmem:[#allocation3 + $0xb] sm:$0x1] %vm146_vm0, %v336_v47  ;;  %s7448_s19 = smov (!%p345_p4, %s5353_s19), 0  ;;  %s349_s10 = scalar_lea.vmem %s7299_s2, %s7446_s16 }
  0xb9   : > { %s356_s5 = sld [smem:[#allocation5 + %s355_s18]]  ;;  %s7450_s19 = smov (!%p3073_p5, %s7448_s19), 39  ;;  %v350_v48 = vld [vmem:[%s349_s10] sm:$0x1] }
  0xba   : > { %351 = vst.msk [vmem:[#allocation2 + $0xc] sm:$0x1] %vm146_vm0, %v350_v48  ;;  %s361_s30 = sld [smem:[#allocation6 + %s355_s18]]  ;;  %s389_s11 = sadd.s32 15, %s5035_s9 }
  0xbb   : > { %s352_s15 = scalar_lea.vmem %s7300_s3, %s7450_s19  ;;  %s373_s0 = sld [smem:[#allocation5 + %s372_s20]] }
  0xbc   : > { %v353_v49 = vld [vmem:[%s352_s15] sm:$0x1]  ;;  %s5397_s28 = sld [smem:[#allocation6 + %s372_s20]]  ;;  %s559_s18 = sadd.s32 25, %s5035_s9 }
  0xbd   : > { %354 = vst.msk [vmem:[#allocation3 + $0xc] sm:$0x1] %vm146_vm0, %v353_v49  ;;  %s5400_s16 = sld [smem:[#allocation5 + %s389_s11]]  ;;  %s593_s15 = sadd.s32 27, %s5035_s9 }
  0xbe   : > { %s5403_s17 = sld [smem:[#allocation6 + %s389_s11]] }
  0xbf   : > { %p357_p6 = scmp.gt.s32.totalorder %s356_s5, 0  ;;  %p3078_p7 = scmp.lt.s32.totalorder %s356_s5, 49 }
  0xc0   : > { %p362_p8 = scmp.gt.s32.totalorder %s361_s30, 0  ;;  %p3083_p9 = scmp.lt.s32.totalorder %s361_s30, 39 }
  0xc1   : > { %s7452_s5 = smov (!%p357_p6, %s356_s5), 0  ;;  %p374_p10 = scmp.gt.s32.totalorder %s373_s0, 0 }
  0xc2   : > { %s7454_s5 = smov (!%p3078_p7, %s7452_s5), 49  ;;  %s7456_s30 = smov (!%p362_p8, %s361_s30), 0 }
  0xc3   : > { %s366_s14 = scalar_lea.vmem %s7299_s2, %s7454_s5  ;;  %s7458_s30 = smov (!%p3083_p9, %s7456_s30), 39 }
  0xc4   : > { %v367_v50 = vld [vmem:[%s366_s14] sm:$0x1]  ;;  %s375_s21 = scalar_select %p374_p10, %s373_s0, 0 }
  0xc5   : > { %368 = vst.msk [vmem:[#allocation2 + $0xd] sm:$0x1] %vm146_vm0, %v367_v50  ;;  %s369_s11 = scalar_lea.vmem %s7300_s3, %s7458_s30  ;;  %p3088_p11 = scmp.lt.s32.totalorder %s373_s0, 49 }
  0xc6   : > { %v370_v51 = vld [vmem:[%s369_s11] sm:$0x1]  ;;  %p379_p12 = scmp.gt.s32.totalorder %s5397_s28, 0  ;;  %p3093_p13 = scmp.lt.s32.totalorder %s5397_s28, 39 }
  0xc7   : > { %371 = vst.msk [vmem:[#allocation3 + $0xd] sm:$0x1] %vm146_vm0, %v370_v51  ;;  %s7460_s21 = smov (!%p3088_p11, %s375_s21), 49  ;;  %p391_p0 = scmp.gt.s32.totalorder %s5400_s16, 0 }
  0xc8   : > { %s7462_s28 = smov (!%p379_p12, %s5397_s28), 0  ;;  %s383_s12 = scalar_lea.vmem %s7299_s2, %s7460_s21 }
  0xc9   : > { %s7464_s28 = smov (!%p3093_p13, %s7462_s28), 39  ;;  %v384_v52 = vld [vmem:[%s383_s12] sm:$0x1]  ;;  %p3098_p3 = scmp.lt.s32.totalorder %s5400_s16, 49 }
  0xca   : > { %385 = vst.msk [vmem:[#allocation2 + $0xe] sm:$0x1] %vm146_vm0, %v384_v52  ;;  %s392_s30 = scalar_select %p391_p0, %s5400_s16, 0 }
  0xcb   : > { %s386_s19 = scalar_lea.vmem %s7300_s3, %s7464_s28  ;;  %p396_p4 = scmp.gt.s32.totalorder %s5403_s17, 0 }
  0xcc   : > { %v387_v53 = vld [vmem:[%s386_s19] sm:$0x1]  ;;  %p3103_p5 = scmp.lt.s32.totalorder %s5403_s17, 39  ;;  %s7466_s30 = smov (!%p3098_p3, %s392_s30), 49 }
  0xcd   : > { %388 = vst.msk [vmem:[#allocation3 + $0xe] sm:$0x1] %vm146_vm0, %v387_v53  ;;  %s7468_s17 = smov (!%p396_p4, %s5403_s17), 0  ;;  %s400_s21 = scalar_lea.vmem %s7299_s2, %s7466_s30 }
  0xce   : > { %s543_s22 = sld [smem:[#allocation5 + %s542_s13]]  ;;  %s7470_s17 = smov (!%p3103_p5, %s7468_s17), 39  ;;  %v401_v54 = vld [vmem:[%s400_s21] sm:$0x1] }
  0xcf   : > { %402 = vst.msk [vmem:[#allocation2 + $0xf] sm:$0x1] %vm146_vm0, %v401_v54  ;;  %s548_s28 = sld [smem:[#allocation6 + %s542_s13]]  ;;  %s576_s16 = sadd.s32 26, %s5035_s9 }
  0xd0   : > { %s403_s5 = scalar_lea.vmem %s7300_s3, %s7470_s17  ;;  %s5445_s23 = sld [smem:[#allocation5 + %s559_s18]] }
  0xd1   : > { %v404_v55 = vld [vmem:[%s403_s5] sm:$0x1]  ;;  %s5449_s12 = sld [smem:[#allocation6 + %s559_s18]]  ;;  %s610_s0 = sadd.s32 28, %s5035_s9 }
  0xd2   : > { %405 = vst.msk [vmem:[#allocation3 + $0xf] sm:$0x1] %vm146_vm0, %v404_v55  ;;  %s5452_s30 = sld [smem:[#allocation5 + %s576_s16]]  ;;  %s644_s5 = sadd.s32 30, %s5035_s9 }
  0xd3   : > { %s5455_s13 = sld [smem:[#allocation6 + %s576_s16]] }
  0xd4   : > { %p544_p6 = scmp.gt.s32.totalorder %s543_s22, 0  ;;  %p3188_p7 = scmp.lt.s32.totalorder %s543_s22, 49 }
  0xd5   : > { %p549_p8 = scmp.gt.s32.totalorder %s548_s28, 0  ;;  %p3193_p9 = scmp.lt.s32.totalorder %s548_s28, 39 }
  0xd6   : > { %s7472_s22 = smov (!%p544_p6, %s543_s22), 0  ;;  %v2311_v56 = vld [vmem:[#allocation2 + $0x8] sm:$0xff]  ;;  %p561_p10 = scmp.gt.s32.totalorder %s5445_s23, 0 }
  0xd7   : > { %s7474_s22 = smov (!%p3188_p7, %s7472_s22), 49  ;;  %s7476_s28 = smov (!%p549_p8, %s548_s28), 0 }
  0xd8   : > { %s553_s19 = scalar_lea.vmem %s7299_s2, %s7474_s22  ;;  %s7478_s28 = smov (!%p3193_p9, %s7476_s28), 39 }
  0xd9   : > { %v2327_v57 = vld [vmem:[#allocation3 + $0x8] sm:$0xff]  ;;  %v554_v59 = vld [vmem:[%s553_s19] sm:$0x1]  ;;  %s562_s20 = scalar_select %p561_p10, %s5445_s23, 0 }
  0xda   : > { %v2343_v58 = vmul.f32 %v2327_v57, %v2311_v56  ;;  %555 = vst.msk [vmem:[#allocation2 + $0x18] sm:$0x1] %vm146_vm0, %v554_v59  ;;  %s556_s16 = scalar_lea.vmem %s7300_s3, %s7478_s28  ;;  %p3198_p11 = scmp.lt.s32.totalorder %s5445_s23, 49 }
  0xdb   : > { %v557_v61 = vld [vmem:[%s556_s16] sm:$0x1]  ;;  %p566_p12 = scmp.gt.s32.totalorder %s5449_s12, 0  ;;  %p3203_p13 = scmp.lt.s32.totalorder %s5449_s12, 39 }
  0xdc   : > { %v2362_v60 = vsel %vm2358_vm1, %v2343_v58, 0.0  ;;  %558 = vst.msk [vmem:[#allocation3 + $0x18] sm:$0x1] %vm146_vm0, %v557_v61  ;;  %s7480_s20 = smov (!%p3198_p11, %s562_s20), 49  ;;  %p578_p0 = scmp.gt.s32.totalorder %s5452_s30, 0 }
  0xdd   : > { %2363 = vadd.xlane.f32.xlu0 %v2362_v60  ;;  %s7482_s12 = smov (!%p566_p12, %s5449_s12), 0  ;;  %s570_s11 = scalar_lea.vmem %s7299_s2, %s7480_s20 }
  0xde   : > { %s7484_s12 = smov (!%p3203_p13, %s7482_s12), 39  ;;  %v571_v62 = vld [vmem:[%s570_s11] sm:$0x1]  ;;  %p3208_p3 = scmp.lt.s32.totalorder %s5452_s30, 49 }
  0xdf   : > { %572 = vst.msk [vmem:[#allocation2 + $0x19] sm:$0x1] %vm146_vm0, %v571_v62  ;;  %s579_s28 = scalar_select %p578_p0, %s5452_s30, 0 }
  0xe0   : > { %s573_s17 = scalar_lea.vmem %s7300_s3, %s7484_s12  ;;  %p583_p4 = scmp.gt.s32.totalorder %s5455_s13, 0 }
  0xe1   : > { %v574_v63 = vld [vmem:[%s573_s17] sm:$0x1]  ;;  %p3213_p5 = scmp.lt.s32.totalorder %s5455_s13, 39  ;;  %s7486_s28 = smov (!%p3208_p3, %s579_s28), 49 }
  0xe2   : > { %575 = vst.msk [vmem:[#allocation3 + $0x19] sm:$0x1] %vm146_vm0, %v574_v63  ;;  %s7488_s13 = smov (!%p583_p4, %s5455_s13), 0  ;;  %s587_s20 = scalar_lea.vmem %s7299_s2, %s7486_s28 }
  0xe3   : > { %s594_s14 = sld [smem:[#allocation5 + %s593_s15]]  ;;  %s7490_s13 = smov (!%p3213_p5, %s7488_s13), 39  ;;  %v588_v0 = vld [vmem:[%s587_s20] sm:$0x1] }
  0xe4   : > { %589 = vst.msk [vmem:[#allocation2 + $0x1a] sm:$0x1] %vm146_vm0, %v588_v0  ;;  %s599_s12 = sld [smem:[#allocation6 + %s593_s15]]  ;;  %s627_s30 = sadd.s32 29, %s5035_s9 }
  0xe5   : > { %s590_s22 = scalar_lea.vmem %s7300_s3, %s7490_s13  ;;  %s611_s10 = sld [smem:[#allocation5 + %s610_s0]] }
  0xe6   : > { %v591_v1 = vld [vmem:[%s590_s22] sm:$0x1]  ;;  %s5503_s11 = sld [smem:[#allocation6 + %s610_s0]]  ;;  %s661_s15 = sadd.s32 31, %s5035_s9 }
  0xe7   : > { %592 = vst.msk [vmem:[#allocation3 + $0x1a] sm:$0x1] %vm146_vm0, %v591_v1  ;;  %s5506_s28 = sld [smem:[#allocation5 + %s627_s30]]  ;;  %s695_s22 = sadd.s32 33, %s5035_s9 }
  0xe8   : > { %s5509_s23 = sld [smem:[#allocation6 + %s627_s30]] }
  0xe9   : > { %p595_p6 = scmp.gt.s32.totalorder %s594_s14, 0  ;;  %p3218_p7 = scmp.lt.s32.totalorder %s594_s14, 49 }
  0xea   : > { %p600_p8 = scmp.gt.s32.totalorder %s599_s12, 0  ;;  %p3223_p9 = scmp.lt.s32.totalorder %s599_s12, 39 }
  0xeb   : > { %s7492_s14 = smov (!%p595_p6, %s594_s14), 0  ;;  %p612_p10 = scmp.gt.s32.totalorder %s611_s10, 0 }
  0xec   : > { %s7494_s14 = smov (!%p3218_p7, %s7492_s14), 49  ;;  %s7496_s12 = smov (!%p600_p8, %s599_s12), 0 }
  0xed   : > { %s604_s17 = scalar_lea.vmem %s7299_s2, %s7494_s14  ;;  %s7498_s12 = smov (!%p3223_p9, %s7496_s12), 39 }
  0xee   : > { %v605_v2 = vld [vmem:[%s604_s17] sm:$0x1]  ;;  %s613_s18 = scalar_select %p612_p10, %s611_s10, 0 }
  0xef   : > { %606 = vst.msk [vmem:[#allocation2 + $0x1b] sm:$0x1] %vm146_vm0, %v605_v2  ;;  %s607_s30 = scalar_lea.vmem %s7300_s3, %s7498_s12  ;;  %p3228_p11 = scmp.lt.s32.totalorder %s611_s10, 49 }
  0xf0   : > { %v608_v3 = vld [vmem:[%s607_s30] sm:$0x1]  ;;  %p617_p12 = scmp.gt.s32.totalorder %s5503_s11, 0  ;;  %p3233_p13 = scmp.lt.s32.totalorder %s5503_s11, 39 }
  0xf1   : > { %609 = vst.msk [vmem:[#allocation3 + $0x1b] sm:$0x1] %vm146_vm0, %v608_v3  ;;  %s7500_s18 = smov (!%p3228_p11, %s613_s18), 49  ;;  %p629_p0 = scmp.gt.s32.totalorder %s5506_s28, 0 }
  0xf2   : > { %s7502_s11 = smov (!%p617_p12, %s5503_s11), 0  ;;  %s621_s16 = scalar_lea.vmem %s7299_s2, %s7500_s18 }
  0xf3   : > { %s7504_s11 = smov (!%p3233_p13, %s7502_s11), 39  ;;  %v622_v4 = vld [vmem:[%s621_s16] sm:$0x1]  ;;  %p3238_p3 = scmp.lt.s32.totalorder %s5506_s28, 49 }
  0xf4   : > { %623 = vst.msk [vmem:[#allocation2 + $0x1c] sm:$0x1] %vm146_vm0, %v622_v4  ;;  %s630_s12 = scalar_select %p629_p0, %s5506_s28, 0 }
  0xf5   : > { %s624_s13 = scalar_lea.vmem %s7300_s3, %s7504_s11  ;;  %p634_p4 = scmp.gt.s32.totalorder %s5509_s23, 0 }
  0xf6   : > { %v625_v5 = vld [vmem:[%s624_s13] sm:$0x1]  ;;  %p3243_p5 = scmp.lt.s32.totalorder %s5509_s23, 39  ;;  %s7506_s12 = smov (!%p3238_p3, %s630_s12), 49 }
  0xf7   : > { %626 = vst.msk [vmem:[#allocation3 + $0x1c] sm:$0x1] %vm146_vm0, %v625_v5  ;;  %s7508_s23 = smov (!%p634_p4, %s5509_s23), 0  ;;  %s638_s18 = scalar_lea.vmem %s7299_s2, %s7506_s12 }
  0xf8   : > { %s645_s19 = sld [smem:[#allocation5 + %s644_s5]]  ;;  %s7510_s23 = smov (!%p3243_p5, %s7508_s23), 39  ;;  %v639_v6 = vld [vmem:[%s638_s18] sm:$0x1] }
  0xf9   : > { %640 = vst.msk [vmem:[#allocation2 + $0x1d] sm:$0x1] %vm146_vm0, %v639_v6  ;;  %s650_s11 = sld [smem:[#allocation6 + %s644_s5]]  ;;  %s678_s28 = sadd.s32 32, %s5035_s9 }
  0xfa   : > { %s641_s14 = scalar_lea.vmem %s7300_s3, %s7510_s23  ;;  %s662_s21 = sld [smem:[#allocation5 + %s661_s15]] }
  0xfb   : > { %v642_v7 = vld [vmem:[%s641_s14] sm:$0x1]  ;;  %s5553_s16 = sld [smem:[#allocation6 + %s661_s15]]  ;;  %s712_s5 = sadd.s32 34, %s5035_s9 }
  0xfc   : > { %643 = vst.msk [vmem:[#allocation3 + $0x1d] sm:$0x1] %vm146_vm0, %v642_v7  ;;  %s5556_s12 = sld [smem:[#allocation5 + %s678_s28]] }
  0xfd   : > { %s5559_s10 = sld [smem:[#allocation6 + %s678_s28]] }
  0xfe   : > { %p646_p6 = scmp.gt.s32.totalorder %s645_s19, 0  ;;  %p3248_p7 = scmp.lt.s32.totalorder %s645_s19, 49 }
  0xff   : > { %p651_p8 = scmp.gt.s32.totalorder %s650_s11, 0  ;;  %p3253_p9 = scmp.lt.s32.totalorder %s650_s11, 39 }
 0x100   : > { %s7512_s19 = smov (!%p646_p6, %s645_s19), 0  ;;  %p663_p10 = scmp.gt.s32.totalorder %s662_s21, 0 }
 0x101   : > { %s7514_s19 = smov (!%p3248_p7, %s7512_s19), 49  ;;  %s7516_s11 = smov (!%p651_p8, %s650_s11), 0 }
 0x102   : > { %s655_s13 = scalar_lea.vmem %s7299_s2, %s7514_s19  ;;  %s7518_s11 = smov (!%p3253_p9, %s7516_s11), 39 }
 0x103   : > { %v656_v8 = vld [vmem:[%s655_s13] sm:$0x1]  ;;  %s664_s0 = scalar_select %p663_p10, %s662_s21, 0 }
 0x104   : > { %657 = vst.msk [vmem:[#allocation2 + $0x1e] sm:$0x1] %vm146_vm0, %v656_v8  ;;  %s658_s28 = scalar_lea.vmem %s7300_s3, %s7518_s11  ;;  %p3258_p11 = scmp.lt.s32.totalorder %s662_s21, 49 }
 0x105   : > { %v659_v9 = vld [vmem:[%s658_s28] sm:$0x1]  ;;  %p668_p12 = scmp.gt.s32.totalorder %s5553_s16, 0  ;;  %p3263_p13 = scmp.lt.s32.totalorder %s5553_s16, 39 }
 0x106   : > { %660 = vst.msk [vmem:[#allocation3 + $0x1e] sm:$0x1] %vm146_vm0, %v659_v9  ;;  %s7520_s0 = smov (!%p3258_p11, %s664_s0), 49  ;;  %p680_p0 = scmp.gt.s32.totalorder %s5556_s12, 0 }
 0x107   : > { %s7522_s16 = smov (!%p668_p12, %s5553_s16), 0  ;;  %s672_s30 = scalar_lea.vmem %s7299_s2, %s7520_s0 }
 0x108   : > { %s7524_s16 = smov (!%p3263_p13, %s7522_s16), 39  ;;  %v673_v10 = vld [vmem:[%s672_s30] sm:$0x1]  ;;  %p3268_p3 = scmp.lt.s32.totalorder %s5556_s12, 49 }
 0x109   : > { %674 = vst.msk [vmem:[#allocation2 + $0x1f] sm:$0x1] %vm146_vm0, %v673_v10  ;;  %s681_s11 = scalar_select %p680_p0, %s5556_s12, 0 }
 0x10a   : > { %s675_s23 = scalar_lea.vmem %s7300_s3, %s7524_s16  ;;  %p685_p4 = scmp.gt.s32.totalorder %s5559_s10, 0 }
 0x10b   : > { %v676_v11 = vld [vmem:[%s675_s23] sm:$0x1]  ;;  %p3273_p5 = scmp.lt.s32.totalorder %s5559_s10, 39  ;;  %s7526_s11 = smov (!%p3268_p3, %s681_s11), 49 }
 0x10c   : > { %677 = vst.msk [vmem:[#allocation3 + $0x1f] sm:$0x1] %vm146_vm0, %v676_v11  ;;  %s7528_s10 = smov (!%p685_p4, %s5559_s10), 0  ;;  %s689_s0 = scalar_lea.vmem %s7299_s2, %s7526_s11 }
 0x10d   : > { %s696_s17 = sld [smem:[#allocation5 + %s695_s22]]  ;;  %s7530_s10 = smov (!%p3273_p5, %s7528_s10), 39  ;;  %v690_v12 = vld [vmem:[%s689_s0] sm:$0x1] }
 0x10e   : > { %691 = vst.msk [vmem:[#allocation2 + $0x20] sm:$0x1] %vm146_vm0, %v690_v12  ;;  %s701_s16 = sld [smem:[#allocation6 + %s695_s22]]  ;;  %s729_s12 = sadd.s32 35, %s5035_s9 }
 0x10f   : > { %s692_s19 = scalar_lea.vmem %s7300_s3, %s7530_s10  ;;  %s5601_s20 = sld [smem:[#allocation5 + %s712_s5]] }
 0x110   : > { %v2313_v13 = vld [vmem:[#allocation2 + $0x18] sm:$0xff]  ;;  %v693_v14 = vld [vmem:[%s692_s19] sm:$0x1]  ;;  %s5605_s30 = sld [smem:[#allocation6 + %s712_s5]]  ;;  %s746_s22 = sadd.s32 36, %s5035_s9 }
 0x111   : > { %694 = vst.msk [vmem:[#allocation3 + $0x20] sm:$0x1] %vm146_vm0, %v693_v14  ;;  %s5608_s11 = sld [smem:[#allocation5 + %s729_s12]]  ;;  %s763_s10 = sadd.s32 37, %s5035_s9 }
 0x112   : > { %s5611_s14 = sld [smem:[#allocation6 + %s729_s12]]  ;;  %s797_s19 = sadd.s32 39, %s5035_s9 }
 0x113   : > { %v2329_v15 = vld [vmem:[#allocation3 + $0x18] sm:$0xff]  ;;  %p697_p6 = scmp.gt.s32.totalorder %s696_s17, 0  ;;  %p3278_p7 = scmp.lt.s32.totalorder %s696_s17, 49 }
 0x114   : > { %v2345_v16 = vmul.f32 %v2329_v15, %v2313_v13  ;;  %p702_p8 = scmp.gt.s32.totalorder %s701_s16, 0  ;;  %p3283_p9 = scmp.lt.s32.totalorder %s701_s16, 39 }
 0x115   : > { %s7532_s17 = smov (!%p697_p6, %s696_s17), 0  ;;  %p714_p10 = scmp.gt.s32.totalorder %s5601_s20, 0 }
 0x116   : > { %v2368_v17 = vsel %vm2358_vm1, %v2345_v16, 0.0  ;;  %s7534_s17 = smov (!%p3278_p7, %s7532_s17), 49  ;;  %s7536_s16 = smov (!%p702_p8, %s701_s16), 0 }
 0x117   : > { %2369 = vadd.xlane.f32.xlu1 %v2368_v17  ;;  %s706_s23 = scalar_lea.vmem %s7299_s2, %s7534_s17  ;;  %s7538_s16 = smov (!%p3283_p9, %s7536_s16), 39 }
 0x118   : > { %v707_v18 = vld [vmem:[%s706_s23] sm:$0x1]  ;;  %s715_s15 = scalar_select %p714_p10, %s5601_s20, 0 }
 0x119   : > { %708 = vst.msk [vmem:[#allocation2 + $0x21] sm:$0x1] %vm146_vm0, %v707_v18  ;;  %s709_s12 = scalar_lea.vmem %s7300_s3, %s7538_s16  ;;  %p3288_p11 = scmp.lt.s32.totalorder %s5601_s20, 49 }
 0x11a   : > { %v710_v19 = vld [vmem:[%s709_s12] sm:$0x1]  ;;  %p719_p12 = scmp.gt.s32.totalorder %s5605_s30, 0  ;;  %p3293_p13 = scmp.lt.s32.totalorder %s5605_s30, 39 }
 0x11b   : > { %711 = vst.msk [vmem:[#allocation3 + $0x21] sm:$0x1] %vm146_vm0, %v710_v19  ;;  %s7540_s15 = smov (!%p3288_p11, %s715_s15), 49  ;;  %p731_p0 = scmp.gt.s32.totalorder %s5608_s11, 0 }
 0x11c   : > { %s7542_s30 = smov (!%p719_p12, %s5605_s30), 0  ;;  %s723_s28 = scalar_lea.vmem %s7299_s2, %s7540_s15 }
 0x11d   : > { %s7544_s30 = smov (!%p3293_p13, %s7542_s30), 39  ;;  %v724_v20 = vld [vmem:[%s723_s28] sm:$0x1]  ;;  %p3298_p3 = scmp.lt.s32.totalorder %s5608_s11, 49 }
 0x11e   : > { %725 = vst.msk [vmem:[#allocation2 + $0x22] sm:$0x1] %vm146_vm0, %v724_v20  ;;  %s732_s16 = scalar_select %p731_p0, %s5608_s11, 0 }
 0x11f   : > { %s726_s5 = scalar_lea.vmem %s7300_s3, %s7544_s30  ;;  %p736_p4 = scmp.gt.s32.totalorder %s5611_s14, 0 }
 0x120   : > { %v727_v21 = vld [vmem:[%s726_s5] sm:$0x1]  ;;  %p3303_p5 = scmp.lt.s32.totalorder %s5611_s14, 39  ;;  %s7546_s16 = smov (!%p3298_p3, %s732_s16), 49 }
 0x121   : > { %728 = vst.msk [vmem:[#allocation3 + $0x22] sm:$0x1] %vm146_vm0, %v727_v21  ;;  %s7548_s14 = smov (!%p736_p4, %s5611_s14), 0  ;;  %s740_s15 = scalar_lea.vmem %s7299_s2, %s7546_s16 }
 0x122   : > { %s747_s13 = sld [smem:[#allocation5 + %s746_s22]]  ;;  %s7550_s14 = smov (!%p3303_p5, %s7548_s14), 39  ;;  %v741_v22 = vld [vmem:[%s740_s15] sm:$0x1] }
 0x123   : > { %742 = vst.msk [vmem:[#allocation2 + $0x23] sm:$0x1] %vm146_vm0, %v741_v22  ;;  %s752_s30 = sld [smem:[#allocation6 + %s746_s22]]  ;;  %s780_s11 = sadd.s32 38, %s5035_s9 }
 0x124   : > { %s743_s17 = scalar_lea.vmem %s7300_s3, %s7550_s14  ;;  %s764_s18 = sld [smem:[#allocation5 + %s763_s10]] }
 0x125   : > { %v744_v23 = vld [vmem:[%s743_s17] sm:$0x1]  ;;  %s5659_s28 = sld [smem:[#allocation6 + %s763_s10]]  ;;  %s814_s22 = sadd.s32 40, %s5035_s9 }
 0x126   : > { %745 = vst.msk [vmem:[#allocation3 + $0x23] sm:$0x1] %vm146_vm0, %v744_v23  ;;  %s5662_s16 = sld [smem:[#allocation5 + %s780_s11]]  ;;  %s848_s17 = sadd.s32 42, %s5035_s9 }
 0x127   : > { %s5665_s20 = sld [smem:[#allocation6 + %s780_s11]] }
 0x128   : > { %p748_p6 = scmp.gt.s32.totalorder %s747_s13, 0  ;;  %p3308_p7 = scmp.lt.s32.totalorder %s747_s13, 49 }
 0x129   : > { %p753_p8 = scmp.gt.s32.totalorder %s752_s30, 0  ;;  %p3313_p9 = scmp.lt.s32.totalorder %s752_s30, 39 }
 0x12a   : > { %s7552_s13 = smov (!%p748_p6, %s747_s13), 0  ;;  %p765_p10 = scmp.gt.s32.totalorder %s764_s18, 0 }
 0x12b   : > { %s7554_s13 = smov (!%p3308_p7, %s7552_s13), 49  ;;  %s7556_s30 = smov (!%p753_p8, %s752_s30), 0 }
 0x12c   : > { %s757_s5 = scalar_lea.vmem %s7299_s2, %s7554_s13  ;;  %s7558_s30 = smov (!%p3313_p9, %s7556_s30), 39 }
 0x12d   : > { %v758_v24 = vld [vmem:[%s757_s5] sm:$0x1]  ;;  %s766_s21 = scalar_select %p765_p10, %s764_s18, 0 }
 0x12e   : > { %759 = vst.msk [vmem:[#allocation2 + $0x24] sm:$0x1] %vm146_vm0, %v758_v24  ;;  %s760_s11 = scalar_lea.vmem %s7300_s3, %s7558_s30  ;;  %p3318_p11 = scmp.lt.s32.totalorder %s764_s18, 49 }
 0x12f   : > { %v761_v25 = vld [vmem:[%s760_s11] sm:$0x1]  ;;  %p770_p12 = scmp.gt.s32.totalorder %s5659_s28, 0  ;;  %p3323_p13 = scmp.lt.s32.totalorder %s5659_s28, 39 }
 0x130   : > { %762 = vst.msk [vmem:[#allocation3 + $0x24] sm:$0x1] %vm146_vm0, %v761_v25  ;;  %s7560_s21 = smov (!%p3318_p11, %s766_s21), 49  ;;  %p782_p0 = scmp.gt.s32.totalorder %s5662_s16, 0 }
 0x131   : > { %s7562_s28 = smov (!%p770_p12, %s5659_s28), 0  ;;  %s774_s12 = scalar_lea.vmem %s7299_s2, %s7560_s21 }
 0x132   : > { %s7564_s28 = smov (!%p3323_p13, %s7562_s28), 39  ;;  %v775_v26 = vld [vmem:[%s774_s12] sm:$0x1]  ;;  %p3328_p3 = scmp.lt.s32.totalorder %s5662_s16, 49 }
 0x133   : > { %776 = vst.msk [vmem:[#allocation2 + $0x25] sm:$0x1] %vm146_vm0, %v775_v26  ;;  %s783_s30 = scalar_select %p782_p0, %s5662_s16, 0 }
 0x134   : > { %s777_s14 = scalar_lea.vmem %s7300_s3, %s7564_s28  ;;  %p787_p4 = scmp.gt.s32.totalorder %s5665_s20, 0 }
 0x135   : > { %v778_v27 = vld [vmem:[%s777_s14] sm:$0x1]  ;;  %p3333_p5 = scmp.lt.s32.totalorder %s5665_s20, 39  ;;  %s7566_s30 = smov (!%p3328_p3, %s783_s30), 49 }
 0x136   : > { %779 = vst.msk [vmem:[#allocation3 + $0x25] sm:$0x1] %vm146_vm0, %v778_v27  ;;  %s7568_s20 = smov (!%p787_p4, %s5665_s20), 0  ;;  %s791_s21 = scalar_lea.vmem %s7299_s2, %s7566_s30 }
 0x137   : > { %s798_s23 = sld [smem:[#allocation5 + %s797_s19]]  ;;  %s7570_s20 = smov (!%p3333_p5, %s7568_s20), 39  ;;  %v792_v28 = vld [vmem:[%s791_s21] sm:$0x1] }
 0x138   : > { %793 = vst.msk [vmem:[#allocation2 + $0x26] sm:$0x1] %vm146_vm0, %v792_v28  ;;  %s803_s28 = sld [smem:[#allocation6 + %s797_s19]]  ;;  %s831_s16 = sadd.s32 41, %s5035_s9 }
 0x139   : > { %s794_s13 = scalar_lea.vmem %s7300_s3, %s7570_s20  ;;  %s815_s0 = sld [smem:[#allocation5 + %s814_s22]] }
 0x13a   : > { %v795_v29 = vld [vmem:[%s794_s13] sm:$0x1]  ;;  %s5709_s12 = sld [smem:[#allocation6 + %s814_s22]]  ;;  %s865_s19 = sadd.s32 43, %s5035_s9 }
 0x13b   : > { %796 = vst.msk [vmem:[#allocation3 + $0x26] sm:$0x1] %vm146_vm0, %v795_v29  ;;  %s5712_s30 = sld [smem:[#allocation5 + %s831_s16]]  ;;  %s882_s5 = sadd.s32 44, %s5035_s9 }
 0x13c   : > { %s5715_s18 = sld [smem:[#allocation6 + %s831_s16]]  ;;  %s899_s13 = sadd.s32 45, %s5035_s9 }
 0x13d   : > { %p799_p6 = scmp.gt.s32.totalorder %s798_s23, 0  ;;  %p3338_p7 = scmp.lt.s32.totalorder %s798_s23, 49 }
 0x13e   : > { %p804_p8 = scmp.gt.s32.totalorder %s803_s28, 0  ;;  %p3343_p9 = scmp.lt.s32.totalorder %s803_s28, 39 }
 0x13f   : > { %s7572_s23 = smov (!%p799_p6, %s798_s23), 0  ;;  %p816_p10 = scmp.gt.s32.totalorder %s815_s0, 0 }
 0x140   : > { %s7574_s23 = smov (!%p3338_p7, %s7572_s23), 49  ;;  %s7576_s28 = smov (!%p804_p8, %s803_s28), 0 }
 0x141   : > { %s808_s14 = scalar_lea.vmem %s7299_s2, %s7574_s23  ;;  %s7578_s28 = smov (!%p3343_p9, %s7576_s28), 39 }
 0x142   : > { %v809_v30 = vld [vmem:[%s808_s14] sm:$0x1]  ;;  %s817_s10 = scalar_select %p816_p10, %s815_s0, 0 }
 0x143   : > { %810 = vst.msk [vmem:[#allocation2 + $0x27] sm:$0x1] %vm146_vm0, %v809_v30  ;;  %s811_s16 = scalar_lea.vmem %s7300_s3, %s7578_s28  ;;  %p3348_p11 = scmp.lt.s32.totalorder %s815_s0, 49 }
 0x144   : > { %v812_v31 = vld [vmem:[%s811_s16] sm:$0x1]  ;;  %p821_p12 = scmp.gt.s32.totalorder %s5709_s12, 0  ;;  %p3353_p13 = scmp.lt.s32.totalorder %s5709_s12, 39 }
 0x145   : > { %813 = vst.msk [vmem:[#allocation3 + $0x27] sm:$0x1] %vm146_vm0, %v812_v31  ;;  %s7580_s10 = smov (!%p3348_p11, %s817_s10), 49  ;;  %p833_p0 = scmp.gt.s32.totalorder %s5712_s30, 0 }
 0x146   : > { %s7582_s12 = smov (!%p821_p12, %s5709_s12), 0  ;;  %s825_s11 = scalar_lea.vmem %s7299_s2, %s7580_s10 }
 0x147   : > { %s7584_s12 = smov (!%p3353_p13, %s7582_s12), 39  ;;  %v826_v32 = vld [vmem:[%s825_s11] sm:$0x1]  ;;  %p3358_p3 = scmp.lt.s32.totalorder %s5712_s30, 49 }
 0x148   : > { %827 = vst.msk [vmem:[#allocation2 + $0x28] sm:$0x1] %vm146_vm0, %v826_v32  ;;  %s834_s28 = scalar_select %p833_p0, %s5712_s30, 0 }
 0x149   : > { %s828_s20 = scalar_lea.vmem %s7300_s3, %s7584_s12  ;;  %p838_p4 = scmp.gt.s32.totalorder %s5715_s18, 0 }
 0x14a   : > { %v2314_v33 = vld [vmem:[#allocation2 + $0x20] sm:$0xff]  ;;  %p3363_p5 = scmp.lt.s32.totalorder %s5715_s18, 39  ;;  %s7586_s28 = smov (!%p3358_p3, %s834_s28), 49 }
 0x14b   : > { %v829_v34 = vld [vmem:[%s828_s20] sm:$0x1]  ;;  %s7588_s18 = smov (!%p838_p4, %s5715_s18), 0  ;;  %s842_s10 = scalar_lea.vmem %s7299_s2, %s7586_s28 }
 0x14c   : > { %v2330_v35 = vld [vmem:[#allocation3 + $0x20] sm:$0xff]  ;;  %830 = vst.msk [vmem:[#allocation3 + $0x28] sm:$0x1] %vm146_vm0, %v829_v34  ;;  %s849_s12 = sld [smem:[#allocation5 + %s848_s17]]  ;;  %s7590_s18 = smov (!%p3363_p5, %s7588_s18), 39 }
 0x14d   : > { %v2346_v36 = vmul.f32 %v2330_v35, %v2314_v33  ;;  %v843_v38 = vld [vmem:[%s842_s10] sm:$0x1]  ;;  %s854_s30 = sld [smem:[#allocation6 + %s848_s17]]  ;;  %s845_s23 = scalar_lea.vmem %s7300_s3, %s7590_s18 }
 0x14e   : > { %844 = vst.msk [vmem:[#allocation2 + $0x29] sm:$0x1] %vm146_vm0, %v843_v38  ;;  %s866_s15 = sld [smem:[#allocation5 + %s865_s19]]  ;;  %v846_v39 = vld [vmem:[%s845_s23] sm:$0x1]  ;;  %s916_s17 = sadd.s32 46, %s5035_s9 }
 0x14f   : > { %v2371_v37 = vsel %vm2358_vm1, %v2346_v36, 0.0  ;;  %s5760_s11 = sld [smem:[#allocation6 + %s865_s19]]  ;;  %847 = vst.msk [vmem:[#allocation3 + $0x29] sm:$0x1] %vm146_vm0, %v846_v39  ;;  %s950_s23 = sadd.s32 48, %s5035_s9 }
 0x150   : > { %2372 = vadd.xlane.f32.xlu0 %v2371_v37  ;;  %s5763_s28 = sld [smem:[#allocation5 + %s882_s5]] }
 0x151   : > { %s5766_s0 = sld [smem:[#allocation6 + %s882_s5]] }
 0x152   : > { %p850_p6 = scmp.gt.s32.totalorder %s849_s12, 0  ;;  %p3368_p7 = scmp.lt.s32.totalorder %s849_s12, 49 }
 0x153   : > { %p855_p8 = scmp.gt.s32.totalorder %s854_s30, 0  ;;  %p3373_p9 = scmp.lt.s32.totalorder %s854_s30, 39 }
 0x154   : > { %s7592_s12 = smov (!%p850_p6, %s849_s12), 0  ;;  %p867_p10 = scmp.gt.s32.totalorder %s866_s15, 0 }
 0x155   : > { %s7594_s12 = smov (!%p3368_p7, %s7592_s12), 49  ;;  %s7596_s30 = smov (!%p855_p8, %s854_s30), 0 }
 0x156   : > { %s859_s20 = scalar_lea.vmem %s7299_s2, %s7594_s12  ;;  %s7598_s30 = smov (!%p3373_p9, %s7596_s30), 39 }
 0x157   : > { %v860_v40 = vld [vmem:[%s859_s20] sm:$0x1]  ;;  %s868_s22 = scalar_select %p867_p10, %s866_s15, 0 }
 0x158   : > { %861 = vst.msk [vmem:[#allocation2 + $0x2a] sm:$0x1] %vm146_vm0, %v860_v40  ;;  %s862_s5 = scalar_lea.vmem %s7300_s3, %s7598_s30  ;;  %p3378_p11 = scmp.lt.s32.totalorder %s866_s15, 49 }
 0x159   : > { %v863_v41 = vld [vmem:[%s862_s5] sm:$0x1]  ;;  %p872_p12 = scmp.gt.s32.totalorder %s5760_s11, 0  ;;  %p3383_p13 = scmp.lt.s32.totalorder %s5760_s11, 39 }
 0x15a   : > { %864 = vst.msk [vmem:[#allocation3 + $0x2a] sm:$0x1] %vm146_vm0, %v863_v41  ;;  %s7600_s22 = smov (!%p3378_p11, %s868_s22), 49  ;;  %p884_p0 = scmp.gt.s32.totalorder %s5763_s28, 0 }
 0x15b   : > { %s7602_s11 = smov (!%p872_p12, %s5760_s11), 0  ;;  %s876_s16 = scalar_lea.vmem %s7299_s2, %s7600_s22 }
 0x15c   : > { %s7604_s11 = smov (!%p3383_p13, %s7602_s11), 39  ;;  %v877_v42 = vld [vmem:[%s876_s16] sm:$0x1]  ;;  %p3388_p3 = scmp.lt.s32.totalorder %s5763_s28, 49 }
 0x15d   : > { %878 = vst.msk [vmem:[#allocation2 + $0x2b] sm:$0x1] %vm146_vm0, %v877_v42  ;;  %s885_s30 = scalar_select %p884_p0, %s5763_s28, 0 }
 0x15e   : > { %s879_s18 = scalar_lea.vmem %s7300_s3, %s7604_s11  ;;  %p889_p4 = scmp.gt.s32.totalorder %s5766_s0, 0 }
 0x15f   : > { %v880_v43 = vld [vmem:[%s879_s18] sm:$0x1]  ;;  %p3393_p5 = scmp.lt.s32.totalorder %s5766_s0, 39  ;;  %s7606_s30 = smov (!%p3388_p3, %s885_s30), 49 }
 0x160   : > { %881 = vst.msk [vmem:[#allocation3 + $0x2b] sm:$0x1] %vm146_vm0, %v880_v43  ;;  %s7608_s0 = smov (!%p889_p4, %s5766_s0), 0  ;;  %s893_s22 = scalar_lea.vmem %s7299_s2, %s7606_s30 }
 0x161   : > { %s900_s14 = sld [smem:[#allocation5 + %s899_s13]]  ;;  %s7610_s0 = smov (!%p3393_p5, %s7608_s0), 39  ;;  %v894_v44 = vld [vmem:[%s893_s22] sm:$0x1] }
 0x162   : > { %895 = vst.msk [vmem:[#allocation2 + $0x2c] sm:$0x1] %vm146_vm0, %v894_v44  ;;  %s905_s11 = sld [smem:[#allocation6 + %s899_s13]]  ;;  %s933_s28 = sadd.s32 47, %s5035_s9 }
 0x163   : > { %s896_s12 = scalar_lea.vmem %s7300_s3, %s7610_s0  ;;  %s917_s21 = sld [smem:[#allocation5 + %s916_s17]] }
 0x164   : > { %v897_v45 = vld [vmem:[%s896_s12] sm:$0x1]  ;;  %s5810_s16 = sld [smem:[#allocation6 + %s916_s17]]  ;;  %s967_s13 = sadd.s32 49, %s5035_s9 }
 0x165   : > { %898 = vst.msk [vmem:[#allocation3 + $0x2c] sm:$0x1] %vm146_vm0, %v897_v45  ;;  %s5813_s30 = sld [smem:[#allocation5 + %s933_s28]]  ;;  %s1001_s12 = sadd.s32 51, %s5035_s9 }
 0x166   : > { %s5816_s15 = sld [smem:[#allocation6 + %s933_s28]] }
 0x167   : > { %p901_p6 = scmp.gt.s32.totalorder %s900_s14, 0  ;;  %p3398_p7 = scmp.lt.s32.totalorder %s900_s14, 49 }
 0x168   : > { %p906_p8 = scmp.gt.s32.totalorder %s905_s11, 0  ;;  %p3403_p9 = scmp.lt.s32.totalorder %s905_s11, 39 }
 0x169   : > { %s7612_s14 = smov (!%p901_p6, %s900_s14), 0  ;;  %p918_p10 = scmp.gt.s32.totalorder %s917_s21, 0 }
 0x16a   : > { %s7614_s14 = smov (!%p3398_p7, %s7612_s14), 49  ;;  %s7616_s11 = smov (!%p906_p8, %s905_s11), 0 }
 0x16b   : > { %s910_s18 = scalar_lea.vmem %s7299_s2, %s7614_s14  ;;  %s7618_s11 = smov (!%p3403_p9, %s7616_s11), 39 }
 0x16c   : > { %v911_v46 = vld [vmem:[%s910_s18] sm:$0x1]  ;;  %s919_s19 = scalar_select %p918_p10, %s917_s21, 0 }
 0x16d   : > { %912 = vst.msk [vmem:[#allocation2 + $0x2d] sm:$0x1] %vm146_vm0, %v911_v46  ;;  %s913_s28 = scalar_lea.vmem %s7300_s3, %s7618_s11  ;;  %p3408_p11 = scmp.lt.s32.totalorder %s917_s21, 49 }
 0x16e   : > { %v914_v47 = vld [vmem:[%s913_s28] sm:$0x1]  ;;  %p923_p12 = scmp.gt.s32.totalorder %s5810_s16, 0  ;;  %p3413_p13 = scmp.lt.s32.totalorder %s5810_s16, 39 }
 0x16f   : > { %915 = vst.msk [vmem:[#allocation3 + $0x2d] sm:$0x1] %vm146_vm0, %v914_v47  ;;  %s7620_s19 = smov (!%p3408_p11, %s919_s19), 49  ;;  %p935_p0 = scmp.gt.s32.totalorder %s5813_s30, 0 }
 0x170   : > { %s7622_s16 = smov (!%p923_p12, %s5810_s16), 0  ;;  %s927_s5 = scalar_lea.vmem %s7299_s2, %s7620_s19 }
 0x171   : > { %s7624_s16 = smov (!%p3413_p13, %s7622_s16), 39  ;;  %v928_v48 = vld [vmem:[%s927_s5] sm:$0x1]  ;;  %p3418_p3 = scmp.lt.s32.totalorder %s5813_s30, 49 }
 0x172   : > { %929 = vst.msk [vmem:[#allocation2 + $0x2e] sm:$0x1] %vm146_vm0, %v928_v48  ;;  %s936_s11 = scalar_select %p935_p0, %s5813_s30, 0 }
 0x173   : > { %s930_s0 = scalar_lea.vmem %s7300_s3, %s7624_s16  ;;  %p940_p4 = scmp.gt.s32.totalorder %s5816_s15, 0 }
 0x174   : > { %v931_v49 = vld [vmem:[%s930_s0] sm:$0x1]  ;;  %p3423_p5 = scmp.lt.s32.totalorder %s5816_s15, 39  ;;  %s7626_s11 = smov (!%p3418_p3, %s936_s11), 49 }
 0x175   : > { %932 = vst.msk [vmem:[#allocation3 + $0x2e] sm:$0x1] %vm146_vm0, %v931_v49  ;;  %s7628_s15 = smov (!%p940_p4, %s5816_s15), 0  ;;  %s944_s19 = scalar_lea.vmem %s7299_s2, %s7626_s11 }
 0x176   : > { %s951_s20 = sld [smem:[#allocation5 + %s950_s23]]  ;;  %s7630_s15 = smov (!%p3423_p5, %s7628_s15), 39  ;;  %v945_v50 = vld [vmem:[%s944_s19] sm:$0x1] }
 0x177   : > { %946 = vst.msk [vmem:[#allocation2 + $0x2f] sm:$0x1] %vm146_vm0, %v945_v50  ;;  %s956_s16 = sld [smem:[#allocation6 + %s950_s23]]  ;;  %s984_s30 = sadd.s32 50, %s5035_s9 }
 0x178   : > { %s947_s14 = scalar_lea.vmem %s7300_s3, %s7630_s15  ;;  %s5858_s10 = sld [smem:[#allocation5 + %s967_s13]] }
 0x179   : > { %v948_v51 = vld [vmem:[%s947_s14] sm:$0x1]  ;;  %s5862_s5 = sld [smem:[#allocation6 + %s967_s13]]  ;;  %s1018_s21 = sadd.s32 52, %s5035_s9 }
 0x17a   : > { %949 = vst.msk [vmem:[#allocation3 + $0x2f] sm:$0x1] %vm146_vm0, %v948_v51  ;;  %s5865_s11 = sld [smem:[#allocation5 + %s984_s30]]  ;;  %s1052_s14 = sadd.s32 54, %s5035_s9 }
 0x17b   : > { %s5868_s23 = sld [smem:[#allocation6 + %s984_s30]] }
 0x17c   : > { %p952_p6 = scmp.gt.s32.totalorder %s951_s20, 0  ;;  %p3428_p7 = scmp.lt.s32.totalorder %s951_s20, 49 }
 0x17d   : > { %p957_p8 = scmp.gt.s32.totalorder %s956_s16, 0  ;;  %p3433_p9 = scmp.lt.s32.totalorder %s956_s16, 39 }
 0x17e   : > { %s7632_s20 = smov (!%p952_p6, %s951_s20), 0  ;;  %v2315_v52 = vld [vmem:[#allocation2 + $0x28] sm:$0xff]  ;;  %p969_p10 = scmp.gt.s32.totalorder %s5858_s10, 0 }
 0x17f   : > { %s7634_s20 = smov (!%p3428_p7, %s7632_s20), 49  ;;  %s7636_s16 = smov (!%p957_p8, %s956_s16), 0 }
 0x180   : > { %s961_s0 = scalar_lea.vmem %s7299_s2, %s7634_s20  ;;  %s7638_s16 = smov (!%p3433_p9, %s7636_s16), 39 }
 0x181   : > { %v2331_v53 = vld [vmem:[#allocation3 + $0x28] sm:$0xff]  ;;  %v962_v55 = vld [vmem:[%s961_s0] sm:$0x1]  ;;  %s970_s17 = scalar_select %p969_p10, %s5858_s10, 0 }
 0x182   : > { %v2347_v54 = vmul.f32 %v2331_v53, %v2315_v52  ;;  %963 = vst.msk [vmem:[#allocation2 + $0x30] sm:$0x1] %vm146_vm0, %v962_v55  ;;  %s964_s30 = scalar_lea.vmem %s7300_s3, %s7638_s16  ;;  %p3438_p11 = scmp.lt.s32.totalorder %s5858_s10, 49 }
 0x183   : > { %v965_v57 = vld [vmem:[%s964_s30] sm:$0x1]  ;;  %p974_p12 = scmp.gt.s32.totalorder %s5862_s5, 0  ;;  %p3443_p13 = scmp.lt.s32.totalorder %s5862_s5, 39 }
 0x184   : > { %v2374_v56 = vsel %vm2358_vm1, %v2347_v54, 0.0  ;;  %966 = vst.msk [vmem:[#allocation3 + $0x30] sm:$0x1] %vm146_vm0, %v965_v57  ;;  %s7640_s17 = smov (!%p3438_p11, %s970_s17), 49  ;;  %p986_p0 = scmp.gt.s32.totalorder %s5865_s11, 0 }
 0x185   : > { %2375 = vadd.xlane.f32.xlu1 %v2374_v56  ;;  %s7642_s5 = smov (!%p974_p12, %s5862_s5), 0  ;;  %s978_s28 = scalar_lea.vmem %s7299_s2, %s7640_s17 }
 0x186   : > { %s7644_s5 = smov (!%p3443_p13, %s7642_s5), 39  ;;  %v979_v58 = vld [vmem:[%s978_s28] sm:$0x1]  ;;  %p3448_p3 = scmp.lt.s32.totalorder %s5865_s11, 49 }
 0x187   : > { %980 = vst.msk [vmem:[#allocation2 + $0x31] sm:$0x1] %vm146_vm0, %v979_v58  ;;  %s987_s16 = scalar_select %p986_p0, %s5865_s11, 0 }
 0x188   : > { %s981_s15 = scalar_lea.vmem %s7300_s3, %s7644_s5  ;;  %p991_p4 = scmp.gt.s32.totalorder %s5868_s23, 0 }
 0x189   : > { %v982_v59 = vld [vmem:[%s981_s15] sm:$0x1]  ;;  %p3453_p5 = scmp.lt.s32.totalorder %s5868_s23, 39  ;;  %s7646_s16 = smov (!%p3448_p3, %s987_s16), 49 }
 0x18a   : > { %983 = vst.msk [vmem:[#allocation3 + $0x31] sm:$0x1] %vm146_vm0, %v982_v59  ;;  %s7648_s23 = smov (!%p991_p4, %s5868_s23), 0  ;;  %s995_s17 = scalar_lea.vmem %s7299_s2, %s7646_s16 }
 0x18b   : > { %s1002_s18 = sld [smem:[#allocation5 + %s1001_s12]]  ;;  %s7650_s23 = smov (!%p3453_p5, %s7648_s23), 39  ;;  %v996_v60 = vld [vmem:[%s995_s17] sm:$0x1] }
 0x18c   : > { %997 = vst.msk [vmem:[#allocation2 + $0x32] sm:$0x1] %vm146_vm0, %v996_v60  ;;  %s1007_s5 = sld [smem:[#allocation6 + %s1001_s12]]  ;;  %s1035_s11 = sadd.s32 53, %s5035_s9 }
 0x18d   : > { %s998_s20 = scalar_lea.vmem %s7300_s3, %s7650_s23  ;;  %s1019_s22 = sld [smem:[#allocation5 + %s1018_s21]] }
 0x18e   : > { %v999_v61 = vld [vmem:[%s998_s20] sm:$0x1]  ;;  %s5916_s28 = sld [smem:[#allocation6 + %s1018_s21]]  ;;  %s1069_s12 = sadd.s32 55, %s5035_s9 }
 0x18f   : > { %1000 = vst.msk [vmem:[#allocation3 + $0x32] sm:$0x1] %vm146_vm0, %v999_v61  ;;  %s5919_s16 = sld [smem:[#allocation5 + %s1035_s11]]  ;;  %s1103_s20 = sadd.s32 57, %s5035_s9 }
 0x190   : > { %s5922_s10 = sld [smem:[#allocation6 + %s1035_s11]] }
 0x191   : > { %p1003_p6 = scmp.gt.s32.totalorder %s1002_s18, 0  ;;  %p3458_p7 = scmp.lt.s32.totalorder %s1002_s18, 49 }
 0x192   : > { %p1008_p8 = scmp.gt.s32.totalorder %s1007_s5, 0  ;;  %p3463_p9 = scmp.lt.s32.totalorder %s1007_s5, 39 }
 0x193   : > { %s7652_s18 = smov (!%p1003_p6, %s1002_s18), 0  ;;  %p1020_p10 = scmp.gt.s32.totalorder %s1019_s22, 0 }
 0x194   : > { %s7654_s18 = smov (!%p3458_p7, %s7652_s18), 49  ;;  %s7656_s5 = smov (!%p1008_p8, %s1007_s5), 0 }
 0x195   : > { %s1012_s15 = scalar_lea.vmem %s7299_s2, %s7654_s18  ;;  %s7658_s5 = smov (!%p3463_p9, %s7656_s5), 39 }
 0x196   : > { %v1013_v62 = vld [vmem:[%s1012_s15] sm:$0x1]  ;;  %s1021_s13 = scalar_select %p1020_p10, %s1019_s22, 0 }
 0x197   : > { %1014 = vst.msk [vmem:[#allocation2 + $0x33] sm:$0x1] %vm146_vm0, %v1013_v62  ;;  %s1015_s11 = scalar_lea.vmem %s7300_s3, %s7658_s5  ;;  %p3468_p11 = scmp.lt.s32.totalorder %s1019_s22, 49 }
 0x198   : > { %v1016_v63 = vld [vmem:[%s1015_s11] sm:$0x1]  ;;  %p1025_p12 = scmp.gt.s32.totalorder %s5916_s28, 0  ;;  %p3473_p13 = scmp.lt.s32.totalorder %s5916_s28, 39 }
 0x199   : > { %1017 = vst.msk [vmem:[#allocation3 + $0x33] sm:$0x1] %vm146_vm0, %v1016_v63  ;;  %s7660_s13 = smov (!%p3468_p11, %s1021_s13), 49  ;;  %p1037_p0 = scmp.gt.s32.totalorder %s5919_s16, 0 }
 0x19a   : > { %s7662_s28 = smov (!%p1025_p12, %s5916_s28), 0  ;;  %s1029_s30 = scalar_lea.vmem %s7299_s2, %s7660_s13 }
 0x19b   : > { %s7664_s28 = smov (!%p3473_p13, %s7662_s28), 39  ;;  %v1030_v0 = vld [vmem:[%s1029_s30] sm:$0x1]  ;;  %p3478_p3 = scmp.lt.s32.totalorder %s5919_s16, 49 }
 0x19c   : > { %1031 = vst.msk [vmem:[#allocation2 + $0x34] sm:$0x1] %vm146_vm0, %v1030_v0  ;;  %s1038_s5 = scalar_select %p1037_p0, %s5919_s16, 0 }
 0x19d   : > { %s1032_s23 = scalar_lea.vmem %s7300_s3, %s7664_s28  ;;  %p1042_p4 = scmp.gt.s32.totalorder %s5922_s10, 0 }
 0x19e   : > { %v1033_v1 = vld [vmem:[%s1032_s23] sm:$0x1]  ;;  %p3483_p5 = scmp.lt.s32.totalorder %s5922_s10, 39  ;;  %s7666_s5 = smov (!%p3478_p3, %s1038_s5), 49 }
 0x19f   : > { %1034 = vst.msk [vmem:[#allocation3 + $0x34] sm:$0x1] %vm146_vm0, %v1033_v1  ;;  %s7668_s10 = smov (!%p1042_p4, %s5922_s10), 0  ;;  %s1046_s13 = scalar_lea.vmem %s7299_s2, %s7666_s5 }
 0x1a0   : > { %s1053_s0 = sld [smem:[#allocation5 + %s1052_s14]]  ;;  %s7670_s10 = smov (!%p3483_p5, %s7668_s10), 39  ;;  %v1047_v2 = vld [vmem:[%s1046_s13] sm:$0x1] }
 0x1a1   : > { %1048 = vst.msk [vmem:[#allocation2 + $0x35] sm:$0x1] %vm146_vm0, %v1047_v2  ;;  %s1058_s28 = sld [smem:[#allocation6 + %s1052_s14]]  ;;  %s1086_s16 = sadd.s32 56, %s5035_s9 }
 0x1a2   : > { %s1049_s18 = scalar_lea.vmem %s7300_s3, %s7670_s10  ;;  %s1070_s19 = sld [smem:[#allocation5 + %s1069_s12]] }
 0x1a3   : > { %v1050_v3 = vld [vmem:[%s1049_s18] sm:$0x1]  ;;  %s5966_s30 = sld [smem:[#allocation6 + %s1069_s12]]  ;;  %s1120_s14 = sadd.s32 58, %s5035_s9 }
 0x1a4   : > { %1051 = vst.msk [vmem:[#allocation3 + $0x35] sm:$0x1] %vm146_vm0, %v1050_v3  ;;  %s5969_s5 = sld [smem:[#allocation5 + %s1086_s16]] }
 0x1a5   : > { %s5972_s22 = sld [smem:[#allocation6 + %s1086_s16]] }
 0x1a6   : > { %p1054_p6 = scmp.gt.s32.totalorder %s1053_s0, 0  ;;  %p3488_p7 = scmp.lt.s32.totalorder %s1053_s0, 49 }
 0x1a7   : > { %p1059_p8 = scmp.gt.s32.totalorder %s1058_s28, 0  ;;  %p3493_p9 = scmp.lt.s32.totalorder %s1058_s28, 39 }
 0x1a8   : > { %s7672_s0 = smov (!%p1054_p6, %s1053_s0), 0  ;;  %p1071_p10 = scmp.gt.s32.totalorder %s1070_s19, 0 }
 0x1a9   : > { %s7674_s0 = smov (!%p3488_p7, %s7672_s0), 49  ;;  %s7676_s28 = smov (!%p1059_p8, %s1058_s28), 0 }
 0x1aa   : > { %s1063_s23 = scalar_lea.vmem %s7299_s2, %s7674_s0  ;;  %s7678_s28 = smov (!%p3493_p9, %s7676_s28), 39 }
 0x1ab   : > { %v1064_v4 = vld [vmem:[%s1063_s23] sm:$0x1]  ;;  %s1072_s21 = scalar_select %p1071_p10, %s1070_s19, 0 }
 0x1ac   : > { %1065 = vst.msk [vmem:[#allocation2 + $0x36] sm:$0x1] %vm146_vm0, %v1064_v4  ;;  %s1066_s16 = scalar_lea.vmem %s7300_s3, %s7678_s28  ;;  %p3498_p11 = scmp.lt.s32.totalorder %s1070_s19, 49 }
 0x1ad   : > { %v1067_v5 = vld [vmem:[%s1066_s16] sm:$0x1]  ;;  %p1076_p12 = scmp.gt.s32.totalorder %s5966_s30, 0  ;;  %p3503_p13 = scmp.lt.s32.totalorder %s5966_s30, 39 }
 0x1ae   : > { %1068 = vst.msk [vmem:[#allocation3 + $0x36] sm:$0x1] %vm146_vm0, %v1067_v5  ;;  %s7680_s21 = smov (!%p3498_p11, %s1072_s21), 49  ;;  %p1088_p0 = scmp.gt.s32.totalorder %s5969_s5, 0 }
 0x1af   : > { %s7682_s30 = smov (!%p1076_p12, %s5966_s30), 0  ;;  %s1080_s11 = scalar_lea.vmem %s7299_s2, %s7680_s21 }
 0x1b0   : > { %s7684_s30 = smov (!%p3503_p13, %s7682_s30), 39  ;;  %v1081_v6 = vld [vmem:[%s1080_s11] sm:$0x1]  ;;  %p3508_p3 = scmp.lt.s32.totalorder %s5969_s5, 49 }
 0x1b1   : > { %1082 = vst.msk [vmem:[#allocation2 + $0x37] sm:$0x1] %vm146_vm0, %v1081_v6  ;;  %s1089_s28 = scalar_select %p1088_p0, %s5969_s5, 0 }
 0x1b2   : > { %s1083_s10 = scalar_lea.vmem %s7300_s3, %s7684_s30  ;;  %p1093_p4 = scmp.gt.s32.totalorder %s5972_s22, 0 }
 0x1b3   : > { %v1084_v7 = vld [vmem:[%s1083_s10] sm:$0x1]  ;;  %p3513_p5 = scmp.lt.s32.totalorder %s5972_s22, 39  ;;  %s7686_s28 = smov (!%p3508_p3, %s1089_s28), 49 }
 0x1b4   : > { %1085 = vst.msk [vmem:[#allocation3 + $0x37] sm:$0x1] %vm146_vm0, %v1084_v7  ;;  %s7688_s22 = smov (!%p1093_p4, %s5972_s22), 0  ;;  %s1097_s21 = scalar_lea.vmem %s7299_s2, %s7686_s28 }
 0x1b5   : > { %s1104_s15 = sld [smem:[#allocation5 + %s1103_s20]]  ;;  %s7690_s22 = smov (!%p3513_p5, %s7688_s22), 39  ;;  %v1098_v8 = vld [vmem:[%s1097_s21] sm:$0x1] }
 0x1b6   : > { %1099 = vst.msk [vmem:[#allocation2 + $0x38] sm:$0x1] %vm146_vm0, %v1098_v8  ;;  %s1109_s30 = sld [smem:[#allocation6 + %s1103_s20]]  ;;  %s1137_s5 = sadd.s32 59, %s5035_s9 }
 0x1b7   : > { %s1100_s0 = scalar_lea.vmem %s7300_s3, %s7690_s22  ;;  %s6014_s17 = sld [smem:[#allocation5 + %s1120_s14]] }
 0x1b8   : > { %v2316_v9 = vld [vmem:[#allocation2 + $0x30] sm:$0xff]  ;;  %v1101_v10 = vld [vmem:[%s1100_s0] sm:$0x1]  ;;  %s6018_s11 = sld [smem:[#allocation6 + %s1120_s14]]  ;;  %s1154_s20 = sadd.s32 60, %s5035_s9 }
 0x1b9   : > { %1102 = vst.msk [vmem:[#allocation3 + $0x38] sm:$0x1] %vm146_vm0, %v1101_v10  ;;  %s6021_s28 = sld [smem:[#allocation5 + %s1137_s5]]  ;;  %s1171_s22 = sadd.s32 61, %s5035_s9 }
 0x1ba   : > { %s6024_s18 = sld [smem:[#allocation6 + %s1137_s5]]  ;;  %s1205_s0 = sadd.s32 63, %s5035_s9 }
 0x1bb   : > { %v2332_v11 = vld [vmem:[#allocation3 + $0x30] sm:$0xff]  ;;  %p1105_p6 = scmp.gt.s32.totalorder %s1104_s15, 0  ;;  %p3518_p7 = scmp.lt.s32.totalorder %s1104_s15, 49 }
 0x1bc   : > { %v2348_v12 = vmul.f32 %v2332_v11, %v2316_v9  ;;  %p1110_p8 = scmp.gt.s32.totalorder %s1109_s30, 0  ;;  %p3523_p9 = scmp.lt.s32.totalorder %s1109_s30, 39 }
 0x1bd   : > { %s7692_s15 = smov (!%p1105_p6, %s1104_s15), 0  ;;  %p1122_p10 = scmp.gt.s32.totalorder %s6014_s17, 0 }
 0x1be   : > { %v2377_v13 = vsel %vm2358_vm1, %v2348_v12, 0.0  ;;  %s7694_s15 = smov (!%p3518_p7, %s7692_s15), 49  ;;  %s7696_s30 = smov (!%p1110_p8, %s1109_s30), 0 }
 0x1bf   : > { %2378 = vadd.xlane.f32.xlu0 %v2377_v13  ;;  %s1114_s10 = scalar_lea.vmem %s7299_s2, %s7694_s15  ;;  %s7698_s30 = smov (!%p3523_p9, %s7696_s30), 39 }
 0x1c0   : > { %v1115_v14 = vld [vmem:[%s1114_s10] sm:$0x1]  ;;  %s1123_s12 = scalar_select %p1122_p10, %s6014_s17, 0 }
 0x1c1   : > { %1116 = vst.msk [vmem:[#allocation2 + $0x39] sm:$0x1] %vm146_vm0, %v1115_v14  ;;  %s1117_s5 = scalar_lea.vmem %s7300_s3, %s7698_s30  ;;  %p3528_p11 = scmp.lt.s32.totalorder %s6014_s17, 49 }
 0x1c2   : > { %v1118_v15 = vld [vmem:[%s1117_s5] sm:$0x1]  ;;  %p1127_p12 = scmp.gt.s32.totalorder %s6018_s11, 0  ;;  %p3533_p13 = scmp.lt.s32.totalorder %s6018_s11, 39 }
 0x1c3   : > { %1119 = vst.msk [vmem:[#allocation3 + $0x39] sm:$0x1] %vm146_vm0, %v1118_v15  ;;  %s7700_s12 = smov (!%p3528_p11, %s1123_s12), 49  ;;  %p1139_p0 = scmp.gt.s32.totalorder %s6021_s28, 0 }
 0x1c4   : > { %s7702_s11 = smov (!%p1127_p12, %s6018_s11), 0  ;;  %s1131_s16 = scalar_lea.vmem %s7299_s2, %s7700_s12 }
 0x1c5   : > { %s7704_s11 = smov (!%p3533_p13, %s7702_s11), 39  ;;  %v1132_v16 = vld [vmem:[%s1131_s16] sm:$0x1]  ;;  %p3538_p3 = scmp.lt.s32.totalorder %s6021_s28, 49 }
 0x1c6   : > { %1133 = vst.msk [vmem:[#allocation2 + $0x3a] sm:$0x1] %vm146_vm0, %v1132_v16  ;;  %s1140_s30 = scalar_select %p1139_p0, %s6021_s28, 0 }
 0x1c7   : > { %s1134_s14 = scalar_lea.vmem %s7300_s3, %s7704_s11  ;;  %p1144_p4 = scmp.gt.s32.totalorder %s6024_s18, 0 }
 0x1c8   : > { %v1135_v17 = vld [vmem:[%s1134_s14] sm:$0x1]  ;;  %p3543_p5 = scmp.lt.s32.totalorder %s6024_s18, 39  ;;  %s7706_s30 = smov (!%p3538_p3, %s1140_s30), 49 }
 0x1c9   : > { %1136 = vst.msk [vmem:[#allocation3 + $0x3a] sm:$0x1] %vm146_vm0, %v1135_v17  ;;  %s7708_s18 = smov (!%p1144_p4, %s6024_s18), 0  ;;  %s1148_s12 = scalar_lea.vmem %s7299_s2, %s7706_s30 }
 0x1ca   : > { %s1155_s23 = sld [smem:[#allocation5 + %s1154_s20]]  ;;  %s7710_s18 = smov (!%p3543_p5, %s7708_s18), 39  ;;  %v1149_v18 = vld [vmem:[%s1148_s12] sm:$0x1] }
 0x1cb   : > { %1150 = vst.msk [vmem:[#allocation2 + $0x3b] sm:$0x1] %vm146_vm0, %v1149_v18  ;;  %s1160_s11 = sld [smem:[#allocation6 + %s1154_s20]]  ;;  %s1188_s28 = sadd.s32 62, %s5035_s9 }
 0x1cc   : > { %s1151_s15 = scalar_lea.vmem %s7300_s3, %s7710_s18  ;;  %s1172_s13 = sld [smem:[#allocation5 + %s1171_s22]] }
 0x1cd   : > { %v1152_v19 = vld [vmem:[%s1151_s15] sm:$0x1]  ;;  %s6072_s16 = sld [smem:[#allocation6 + %s1171_s22]]  ;;  %s1222_s20 = sadd.s32 64, %s5035_s9 }
 0x1ce   : > { %1153 = vst.msk [vmem:[#allocation3 + $0x3b] sm:$0x1] %vm146_vm0, %v1152_v19  ;;  %s6075_s30 = sld [smem:[#allocation5 + %s1188_s28]]  ;;  %s1256_s15 = sadd.s32 66, %s5035_s9 }
 0x1cf   : > { %s6078_s17 = sld [smem:[#allocation6 + %s1188_s28]] }
 0x1d0   : > { %p1156_p6 = scmp.gt.s32.totalorder %s1155_s23, 0  ;;  %p3548_p7 = scmp.lt.s32.totalorder %s1155_s23, 49 }
 0x1d1   : > { %p1161_p8 = scmp.gt.s32.totalorder %s1160_s11, 0  ;;  %p3553_p9 = scmp.lt.s32.totalorder %s1160_s11, 39 }
 0x1d2   : > { %s7712_s23 = smov (!%p1156_p6, %s1155_s23), 0  ;;  %p1173_p10 = scmp.gt.s32.totalorder %s1172_s13, 0 }
 0x1d3   : > { %s7714_s23 = smov (!%p3548_p7, %s7712_s23), 49  ;;  %s7716_s11 = smov (!%p1161_p8, %s1160_s11), 0 }
 0x1d4   : > { %s1165_s14 = scalar_lea.vmem %s7299_s2, %s7714_s23  ;;  %s7718_s11 = smov (!%p3553_p9, %s7716_s11), 39 }
 0x1d5   : > { %v1166_v20 = vld [vmem:[%s1165_s14] sm:$0x1]  ;;  %s1174_s19 = scalar_select %p1173_p10, %s1172_s13, 0 }
 0x1d6   : > { %1167 = vst.msk [vmem:[#allocation2 + $0x3c] sm:$0x1] %vm146_vm0, %v1166_v20  ;;  %s1168_s28 = scalar_lea.vmem %s7300_s3, %s7718_s11  ;;  %p3558_p11 = scmp.lt.s32.totalorder %s1172_s13, 49 }
 0x1d7   : > { %v1169_v21 = vld [vmem:[%s1168_s28] sm:$0x1]  ;;  %p1178_p12 = scmp.gt.s32.totalorder %s6072_s16, 0  ;;  %p3563_p13 = scmp.lt.s32.totalorder %s6072_s16, 39 }
 0x1d8   : > { %1170 = vst.msk [vmem:[#allocation3 + $0x3c] sm:$0x1] %vm146_vm0, %v1169_v21  ;;  %s7720_s19 = smov (!%p3558_p11, %s1174_s19), 49  ;;  %p1190_p0 = scmp.gt.s32.totalorder %s6075_s30, 0 }
 0x1d9   : > { %s7722_s16 = smov (!%p1178_p12, %s6072_s16), 0  ;;  %s1182_s5 = scalar_lea.vmem %s7299_s2, %s7720_s19 }
 0x1da   : > { %s7724_s16 = smov (!%p3563_p13, %s7722_s16), 39  ;;  %v1183_v22 = vld [vmem:[%s1182_s5] sm:$0x1]  ;;  %p3568_p3 = scmp.lt.s32.totalorder %s6075_s30, 49 }
 0x1db   : > { %1184 = vst.msk [vmem:[#allocation2 + $0x3d] sm:$0x1] %vm146_vm0, %v1183_v22  ;;  %s1191_s11 = scalar_select %p1190_p0, %s6075_s30, 0 }
 0x1dc   : > { %s1185_s18 = scalar_lea.vmem %s7300_s3, %s7724_s16  ;;  %p1195_p4 = scmp.gt.s32.totalorder %s6078_s17, 0 }
 0x1dd   : > { %v1186_v23 = vld [vmem:[%s1185_s18] sm:$0x1]  ;;  %p3573_p5 = scmp.lt.s32.totalorder %s6078_s17, 39  ;;  %s7726_s11 = smov (!%p3568_p3, %s1191_s11), 49 }
 0x1de   : > { %1187 = vst.msk [vmem:[#allocation3 + $0x3d] sm:$0x1] %vm146_vm0, %v1186_v23  ;;  %s7728_s17 = smov (!%p1195_p4, %s6078_s17), 0  ;;  %s1199_s19 = scalar_lea.vmem %s7299_s2, %s7726_s11 }
 0x1df   : > { %s1206_s10 = sld [smem:[#allocation5 + %s1205_s0]]  ;;  %s7730_s17 = smov (!%p3573_p5, %s7728_s17), 39  ;;  %v1200_v24 = vld [vmem:[%s1199_s19] sm:$0x1] }
 0x1e0   : > { %1201 = vst.msk [vmem:[#allocation2 + $0x3e] sm:$0x1] %vm146_vm0, %v1200_v24  ;;  %s1211_s16 = sld [smem:[#allocation6 + %s1205_s0]]  ;;  %s1239_s30 = sadd.s32 65, %s5035_s9 }
 0x1e1   : > { %s1202_s23 = scalar_lea.vmem %s7300_s3, %s7730_s17  ;;  %s1223_s21 = sld [smem:[#allocation5 + %s1222_s20]] }
 0x1e2   : > { %v1203_v25 = vld [vmem:[%s1202_s23] sm:$0x1]  ;;  %s6122_s5 = sld [smem:[#allocation6 + %s1222_s20]]  ;;  %s1273_s0 = sadd.s32 67, %s5035_s9 }
 0x1e3   : > { %1204 = vst.msk [vmem:[#allocation3 + $0x3e] sm:$0x1] %vm146_vm0, %v1203_v25  ;;  %s6125_s11 = sld [smem:[#allocation5 + %s1239_s30]]  ;;  %s1290_s14 = sadd.s32 68, %s5035_s9 }
 0x1e4   : > { %s6128_s13 = sld [smem:[#allocation6 + %s1239_s30]]  ;;  %s1307_s23 = sadd.s32 69, %s5035_s9 }
 0x1e5   : > { %p1207_p6 = scmp.gt.s32.totalorder %s1206_s10, 0  ;;  %p3578_p7 = scmp.lt.s32.totalorder %s1206_s10, 49 }
 0x1e6   : > { %p1212_p8 = scmp.gt.s32.totalorder %s1211_s16, 0  ;;  %p3583_p9 = scmp.lt.s32.totalorder %s1211_s16, 39 }
 0x1e7   : > { %s7732_s10 = smov (!%p1207_p6, %s1206_s10), 0  ;;  %p1224_p10 = scmp.gt.s32.totalorder %s1223_s21, 0 }
 0x1e8   : > { %s7734_s10 = smov (!%p3578_p7, %s7732_s10), 49  ;;  %s7736_s16 = smov (!%p1212_p8, %s1211_s16), 0 }
 0x1e9   : > { %s1216_s18 = scalar_lea.vmem %s7299_s2, %s7734_s10  ;;  %s7738_s16 = smov (!%p3583_p9, %s7736_s16), 39 }
 0x1ea   : > { %v1217_v26 = vld [vmem:[%s1216_s18] sm:$0x1]  ;;  %s1225_s22 = scalar_select %p1224_p10, %s1223_s21, 0 }
 0x1eb   : > { %1218 = vst.msk [vmem:[#allocation2 + $0x3f] sm:$0x1] %vm146_vm0, %v1217_v26  ;;  %s1219_s30 = scalar_lea.vmem %s7300_s3, %s7738_s16  ;;  %p3588_p11 = scmp.lt.s32.totalorder %s1223_s21, 49 }
 0x1ec   : > { %v1220_v27 = vld [vmem:[%s1219_s30] sm:$0x1]  ;;  %p1229_p12 = scmp.gt.s32.totalorder %s6122_s5, 0  ;;  %p3593_p13 = scmp.lt.s32.totalorder %s6122_s5, 39 }
 0x1ed   : > { %1221 = vst.msk [vmem:[#allocation3 + $0x3f] sm:$0x1] %vm146_vm0, %v1220_v27  ;;  %s7740_s22 = smov (!%p3588_p11, %s1225_s22), 49  ;;  %p1241_p0 = scmp.gt.s32.totalorder %s6125_s11, 0 }
 0x1ee   : > { %s7742_s5 = smov (!%p1229_p12, %s6122_s5), 0  ;;  %s1233_s28 = scalar_lea.vmem %s7299_s2, %s7740_s22 }
 0x1ef   : > { %s7744_s5 = smov (!%p3593_p13, %s7742_s5), 39  ;;  %v1234_v28 = vld [vmem:[%s1233_s28] sm:$0x1]  ;;  %p3598_p3 = scmp.lt.s32.totalorder %s6125_s11, 49 }
 0x1f0   : > { %1235 = vst.msk [vmem:[#allocation2 + $0x40] sm:$0x1] %vm146_vm0, %v1234_v28  ;;  %s1242_s16 = scalar_select %p1241_p0, %s6125_s11, 0 }
 0x1f1   : > { %s1236_s17 = scalar_lea.vmem %s7300_s3, %s7744_s5  ;;  %p1246_p4 = scmp.gt.s32.totalorder %s6128_s13, 0 }
 0x1f2   : > { %v2317_v29 = vld [vmem:[#allocation2 + $0x38] sm:$0xff]  ;;  %v1237_v30 = vld [vmem:[%s1236_s17] sm:$0x1]  ;;  %p3603_p5 = scmp.lt.s32.totalorder %s6128_s13, 39  ;;  %s7746_s16 = smov (!%p3598_p3, %s1242_s16), 49 }
 0x1f3   : > { %1238 = vst.msk [vmem:[#allocation3 + $0x40] sm:$0x1] %vm146_vm0, %v1237_v30  ;;  %s7748_s13 = smov (!%p1246_p4, %s6128_s13), 0  ;;  %s1250_s22 = scalar_lea.vmem %s7299_s2, %s7746_s16 }
 0x1f4   : > { %v2333_v31 = vld [vmem:[#allocation3 + $0x38] sm:$0xff]  ;;  %s1257_s5 = sld [smem:[#allocation5 + %s1256_s15]]  ;;  %s7750_s13 = smov (!%p3603_p5, %s7748_s13), 39  ;;  %v1251_v34 = vld [vmem:[%s1250_s22] sm:$0x1] }
 0x1f5   : > { %v2349_v32 = vmul.f32 %v2333_v31, %v2317_v29  ;;  %1252 = vst.msk [vmem:[#allocation2 + $0x41] sm:$0x1] %vm146_vm0, %v1251_v34  ;;  %s1262_s11 = sld [smem:[#allocation6 + %s1256_s15]]  ;;  %s1253_s10 = scalar_lea.vmem %s7300_s3, %s7750_s13 }
 0x1f6   : > { %s1274_s12 = sld [smem:[#allocation5 + %s1273_s0]]  ;;  %v1254_v35 = vld [vmem:[%s1253_s10] sm:$0x1]  ;;  %s1324_s15 = sadd.s32 70, %s5035_s9 }
 0x1f7   : > { %v2380_v33 = vsel %vm2358_vm1, %v2349_v32, 0.0  ;;  %s6173_s28 = sld [smem:[#allocation6 + %s1273_s0]]  ;;  %1255 = vst.msk [vmem:[#allocation3 + $0x41] sm:$0x1] %vm146_vm0, %v1254_v35  ;;  %s1358_s10 = sadd.s32 72, %s5035_s9 }
 0x1f8   : > { %2381 = vadd.xlane.f32.xlu1 %v2380_v33  ;;  %s6176_s16 = sld [smem:[#allocation5 + %s1290_s14]] }
 0x1f9   : > { %s6179_s21 = sld [smem:[#allocation6 + %s1290_s14]] }
 0x1fa   : > { %p1258_p6 = scmp.gt.s32.totalorder %s1257_s5, 0  ;;  %p3608_p7 = scmp.lt.s32.totalorder %s1257_s5, 49 }
 0x1fb   : > { %p1263_p8 = scmp.gt.s32.totalorder %s1262_s11, 0  ;;  %p3613_p9 = scmp.lt.s32.totalorder %s1262_s11, 39 }
 0x1fc   : > { %s7752_s5 = smov (!%p1258_p6, %s1257_s5), 0  ;;  %p1275_p10 = scmp.gt.s32.totalorder %s1274_s12, 0 }
 0x1fd   : > { %s7754_s5 = smov (!%p3608_p7, %s7752_s5), 49  ;;  %s7756_s11 = smov (!%p1263_p8, %s1262_s11), 0 }
 0x1fe   : > { %s1267_s17 = scalar_lea.vmem %s7299_s2, %s7754_s5  ;;  %s7758_s11 = smov (!%p3613_p9, %s7756_s11), 39 }
 0x1ff   : > { %v1268_v36 = vld [vmem:[%s1267_s17] sm:$0x1]  ;;  %s1276_s20 = scalar_select %p1275_p10, %s1274_s12, 0 }
 0x200   : > { %1269 = vst.msk [vmem:[#allocation2 + $0x42] sm:$0x1] %vm146_vm0, %v1268_v36  ;;  %s1270_s14 = scalar_lea.vmem %s7300_s3, %s7758_s11  ;;  %p3618_p11 = scmp.lt.s32.totalorder %s1274_s12, 49 }
 0x201   : > { %v1271_v37 = vld [vmem:[%s1270_s14] sm:$0x1]  ;;  %p1280_p12 = scmp.gt.s32.totalorder %s6173_s28, 0  ;;  %p3623_p13 = scmp.lt.s32.totalorder %s6173_s28, 39 }
 0x202   : > { %1272 = vst.msk [vmem:[#allocation3 + $0x42] sm:$0x1] %vm146_vm0, %v1271_v37  ;;  %s7760_s20 = smov (!%p3618_p11, %s1276_s20), 49  ;;  %p1292_p0 = scmp.gt.s32.totalorder %s6176_s16, 0 }
 0x203   : > { %s7762_s28 = smov (!%p1280_p12, %s6173_s28), 0  ;;  %s1284_s30 = scalar_lea.vmem %s7299_s2, %s7760_s20 }
 0x204   : > { %s7764_s28 = smov (!%p3623_p13, %s7762_s28), 39  ;;  %v1285_v38 = vld [vmem:[%s1284_s30] sm:$0x1]  ;;  %p3628_p3 = scmp.lt.s32.totalorder %s6176_s16, 49 }
 0x205   : > { %1286 = vst.msk [vmem:[#allocation2 + $0x43] sm:$0x1] %vm146_vm0, %v1285_v38  ;;  %s1293_s11 = scalar_select %p1292_p0, %s6176_s16, 0 }
 0x206   : > { %s1287_s13 = scalar_lea.vmem %s7300_s3, %s7764_s28  ;;  %p1297_p4 = scmp.gt.s32.totalorder %s6179_s21, 0 }
 0x207   : > { %v1288_v39 = vld [vmem:[%s1287_s13] sm:$0x1]  ;;  %p3633_p5 = scmp.lt.s32.totalorder %s6179_s21, 39  ;;  %s7766_s11 = smov (!%p3628_p3, %s1293_s11), 49 }
 0x208   : > { %1289 = vst.msk [vmem:[#allocation3 + $0x43] sm:$0x1] %vm146_vm0, %v1288_v39  ;;  %s7768_s21 = smov (!%p1297_p4, %s6179_s21), 0  ;;  %s1301_s20 = scalar_lea.vmem %s7299_s2, %s7766_s11 }
 0x209   : > { %s1308_s18 = sld [smem:[#allocation5 + %s1307_s23]]  ;;  %s7770_s21 = smov (!%p3633_p5, %s7768_s21), 39  ;;  %v1302_v40 = vld [vmem:[%s1301_s20] sm:$0x1] }
 0x20a   : > { %1303 = vst.msk [vmem:[#allocation2 + $0x44] sm:$0x1] %vm146_vm0, %v1302_v40  ;;  %s1313_s28 = sld [smem:[#allocation6 + %s1307_s23]]  ;;  %s1341_s16 = sadd.s32 71, %s5035_s9 }
 0x20b   : > { %s1304_s5 = scalar_lea.vmem %s7300_s3, %s7770_s21  ;;  %s1325_s19 = sld [smem:[#allocation5 + %s1324_s15]] }
 0x20c   : > { %v1305_v41 = vld [vmem:[%s1304_s5] sm:$0x1]  ;;  %s6223_s30 = sld [smem:[#allocation6 + %s1324_s15]]  ;;  %s1375_s23 = sadd.s32 73, %s5035_s9 }
 0x20d   : > { %1306 = vst.msk [vmem:[#allocation3 + $0x44] sm:$0x1] %vm146_vm0, %v1305_v41  ;;  %s6226_s11 = sld [smem:[#allocation5 + %s1341_s16]]  ;;  %s1409_s5 = sadd.s32 75, %s5035_s9 }
 0x20e   : > { %s6229_s12 = sld [smem:[#allocation6 + %s1341_s16]] }
 0x20f   : > { %p1309_p6 = scmp.gt.s32.totalorder %s1308_s18, 0  ;;  %p3638_p7 = scmp.lt.s32.totalorder %s1308_s18, 49 }
 0x210   : > { %p1314_p8 = scmp.gt.s32.totalorder %s1313_s28, 0  ;;  %p3643_p9 = scmp.lt.s32.totalorder %s1313_s28, 39 }
 0x211   : > { %s7772_s18 = smov (!%p1309_p6, %s1308_s18), 0  ;;  %p1326_p10 = scmp.gt.s32.totalorder %s1325_s19, 0 }
 0x212   : > { %s7774_s18 = smov (!%p3638_p7, %s7772_s18), 49  ;;  %s7776_s28 = smov (!%p1314_p8, %s1313_s28), 0 }
 0x213   : > { %s1318_s13 = scalar_lea.vmem %s7299_s2, %s7774_s18  ;;  %s7778_s28 = smov (!%p3643_p9, %s7776_s28), 39 }
 0x214   : > { %v1319_v42 = vld [vmem:[%s1318_s13] sm:$0x1]  ;;  %s1327_s0 = scalar_select %p1326_p10, %s1325_s19, 0 }
 0x215   : > { %1320 = vst.msk [vmem:[#allocation2 + $0x45] sm:$0x1] %vm146_vm0, %v1319_v42  ;;  %s1321_s16 = scalar_lea.vmem %s7300_s3, %s7778_s28  ;;  %p3648_p11 = scmp.lt.s32.totalorder %s1325_s19, 49 }
 0x216   : > { %v1322_v43 = vld [vmem:[%s1321_s16] sm:$0x1]  ;;  %p1331_p12 = scmp.gt.s32.totalorder %s6223_s30, 0  ;;  %p3653_p13 = scmp.lt.s32.totalorder %s6223_s30, 39 }
 0x217   : > { %1323 = vst.msk [vmem:[#allocation3 + $0x45] sm:$0x1] %vm146_vm0, %v1322_v43  ;;  %s7780_s0 = smov (!%p3648_p11, %s1327_s0), 49  ;;  %p1343_p0 = scmp.gt.s32.totalorder %s6226_s11, 0 }
 0x218   : > { %s7782_s30 = smov (!%p1331_p12, %s6223_s30), 0  ;;  %s1335_s14 = scalar_lea.vmem %s7299_s2, %s7780_s0 }
 0x219   : > { %s7784_s30 = smov (!%p3653_p13, %s7782_s30), 39  ;;  %v1336_v44 = vld [vmem:[%s1335_s14] sm:$0x1]  ;;  %p3658_p3 = scmp.lt.s32.totalorder %s6226_s11, 49 }
 0x21a   : > { %1337 = vst.msk [vmem:[#allocation2 + $0x46] sm:$0x1] %vm146_vm0, %v1336_v44  ;;  %s1344_s28 = scalar_select %p1343_p0, %s6226_s11, 0 }
 0x21b   : > { %s1338_s21 = scalar_lea.vmem %s7300_s3, %s7784_s30  ;;  %p1348_p4 = scmp.gt.s32.totalorder %s6229_s12, 0 }
 0x21c   : > { %v1339_v45 = vld [vmem:[%s1338_s21] sm:$0x1]  ;;  %p3663_p5 = scmp.lt.s32.totalorder %s6229_s12, 39  ;;  %s7786_s28 = smov (!%p3658_p3, %s1344_s28), 49 }
 0x21d   : > { %1340 = vst.msk [vmem:[#allocation3 + $0x46] sm:$0x1] %vm146_vm0, %v1339_v45  ;;  %s7788_s12 = smov (!%p1348_p4, %s6229_s12), 0  ;;  %s1352_s0 = scalar_lea.vmem %s7299_s2, %s7786_s28 }
 0x21e   : > { %s1359_s17 = sld [smem:[#allocation5 + %s1358_s10]]  ;;  %s7790_s12 = smov (!%p3663_p5, %s7788_s12), 39  ;;  %v1353_v46 = vld [vmem:[%s1352_s0] sm:$0x1] }
 0x21f   : > { %1354 = vst.msk [vmem:[#allocation2 + $0x47] sm:$0x1] %vm146_vm0, %v1353_v46  ;;  %s1364_s30 = sld [smem:[#allocation6 + %s1358_s10]]  ;;  %s1392_s11 = sadd.s32 74, %s5035_s9 }
 0x220   : > { %s1355_s18 = scalar_lea.vmem %s7300_s3, %s7790_s12  ;;  %s6271_s22 = sld [smem:[#allocation5 + %s1375_s23]] }
 0x221   : > { %v1356_v47 = vld [vmem:[%s1355_s18] sm:$0x1]  ;;  %s6275_s14 = sld [smem:[#allocation6 + %s1375_s23]]  ;;  %s1426_s19 = sadd.s32 76, %s5035_s9 }
 0x222   : > { %1357 = vst.msk [vmem:[#allocation3 + $0x47] sm:$0x1] %vm146_vm0, %v1356_v47  ;;  %s6278_s28 = sld [smem:[#allocation5 + %s1392_s11]]  ;;  %s1460_s18 = sadd.s32 78, %s5035_s9 }
 0x223   : > { %s6281_s10 = sld [smem:[#allocation6 + %s1392_s11]] }
 0x224   : > { %p1360_p6 = scmp.gt.s32.totalorder %s1359_s17, 0  ;;  %p3668_p7 = scmp.lt.s32.totalorder %s1359_s17, 49 }
 0x225   : > { %p1365_p8 = scmp.gt.s32.totalorder %s1364_s30, 0  ;;  %p3673_p9 = scmp.lt.s32.totalorder %s1364_s30, 39 }
 0x226   : > { %s7792_s17 = smov (!%p1360_p6, %s1359_s17), 0  ;;  %v2318_v48 = vld [vmem:[#allocation2 + $0x40] sm:$0xff]  ;;  %p1377_p10 = scmp.gt.s32.totalorder %s6271_s22, 0 }
 0x227   : > { %s7794_s17 = smov (!%p3668_p7, %s7792_s17), 49  ;;  %s7796_s30 = smov (!%p1365_p8, %s1364_s30), 0 }
 0x228   : > { %s1369_s21 = scalar_lea.vmem %s7299_s2, %s7794_s17  ;;  %s7798_s30 = smov (!%p3673_p9, %s7796_s30), 39 }
 0x229   : > { %v2334_v49 = vld [vmem:[#allocation3 + $0x40] sm:$0xff]  ;;  %s1378_s15 = scalar_select %p1377_p10, %s6271_s22, 0 }
 0x22a   : > { %v2350_v50 = vmul.f32 %v2334_v49, %v2318_v48  ;;  %v1370_v51 = vld [vmem:[%s1369_s21] sm:$0x1]  ;;  %s1372_s11 = scalar_lea.vmem %s7300_s3, %s7798_s30  ;;  %p3678_p11 = scmp.lt.s32.totalorder %s6271_s22, 49 }
 0x22b   : > { %1371 = vst.msk [vmem:[#allocation2 + $0x48] sm:$0x1] %vm146_vm0, %v1370_v51  ;;  %v1373_v53 = vld [vmem:[%s1372_s11] sm:$0x1]  ;;  %p1382_p12 = scmp.gt.s32.totalorder %s6275_s14, 0  ;;  %p3683_p13 = scmp.lt.s32.totalorder %s6275_s14, 39 }
 0x22c   : > { %v2383_v52 = vsel %vm2358_vm1, %v2350_v50, 0.0  ;;  %1374 = vst.msk [vmem:[#allocation3 + $0x48] sm:$0x1] %vm146_vm0, %v1373_v53  ;;  %s7800_s15 = smov (!%p3678_p11, %s1378_s15), 49  ;;  %p1394_p0 = scmp.gt.s32.totalorder %s6278_s28, 0 }
 0x22d   : > { %2384 = vadd.xlane.f32.xlu0 %v2383_v52  ;;  %s7802_s14 = smov (!%p1382_p12, %s6275_s14), 0  ;;  %s1386_s16 = scalar_lea.vmem %s7299_s2, %s7800_s15 }
 0x22e   : > { %s7804_s14 = smov (!%p3683_p13, %s7802_s14), 39  ;;  %v1387_v54 = vld [vmem:[%s1386_s16] sm:$0x1]  ;;  %p3688_p3 = scmp.lt.s32.totalorder %s6278_s28, 49 }
 0x22f   : > { %1388 = vst.msk [vmem:[#allocation2 + $0x49] sm:$0x1] %vm146_vm0, %v1387_v54  ;;  %s1395_s30 = scalar_select %p1394_p0, %s6278_s28, 0 }
 0x230   : > { %s1389_s12 = scalar_lea.vmem %s7300_s3, %s7804_s14  ;;  %p1399_p4 = scmp.gt.s32.totalorder %s6281_s10, 0 }
 0x231   : > { %v1390_v55 = vld [vmem:[%s1389_s12] sm:$0x1]  ;;  %p3693_p5 = scmp.lt.s32.totalorder %s6281_s10, 39  ;;  %s7806_s30 = smov (!%p3688_p3, %s1395_s30), 49 }
 0x232   : > { %1391 = vst.msk [vmem:[#allocation3 + $0x49] sm:$0x1] %vm146_vm0, %v1390_v55  ;;  %s7808_s10 = smov (!%p1399_p4, %s6281_s10), 0  ;;  %s1403_s15 = scalar_lea.vmem %s7299_s2, %s7806_s30 }
 0x233   : > { %s1410_s13 = sld [smem:[#allocation5 + %s1409_s5]]  ;;  %s7810_s10 = smov (!%p3693_p5, %s7808_s10), 39  ;;  %v1404_v56 = vld [vmem:[%s1403_s15] sm:$0x1] }
 0x234   : > { %1405 = vst.msk [vmem:[#allocation2 + $0x4a] sm:$0x1] %vm146_vm0, %v1404_v56  ;;  %s1415_s14 = sld [smem:[#allocation6 + %s1409_s5]]  ;;  %s1443_s28 = sadd.s32 77, %s5035_s9 }
 0x235   : > { %s1406_s17 = scalar_lea.vmem %s7300_s3, %s7810_s10  ;;  %s1427_s20 = sld [smem:[#allocation5 + %s1426_s19]] }
 0x236   : > { %v1407_v57 = vld [vmem:[%s1406_s17] sm:$0x1]  ;;  %s6329_s16 = sld [smem:[#allocation6 + %s1426_s19]]  ;;  %s1477_s5 = sadd.s32 79, %s5035_s9 }
 0x237   : > { %1408 = vst.msk [vmem:[#allocation3 + $0x4a] sm:$0x1] %vm146_vm0, %v1407_v57  ;;  %s6332_s30 = sld [smem:[#allocation5 + %s1443_s28]]  ;;  %s1511_s17 = sadd.s32 81, %s5035_s9 }
 0x238   : > { %s6335_s22 = sld [smem:[#allocation6 + %s1443_s28]] }
 0x239   : > { %p1411_p6 = scmp.gt.s32.totalorder %s1410_s13, 0  ;;  %p3698_p7 = scmp.lt.s32.totalorder %s1410_s13, 49 }
 0x23a   : > { %p1416_p8 = scmp.gt.s32.totalorder %s1415_s14, 0  ;;  %p3703_p9 = scmp.lt.s32.totalorder %s1415_s14, 39 }
 0x23b   : > { %s7812_s13 = smov (!%p1411_p6, %s1410_s13), 0  ;;  %p1428_p10 = scmp.gt.s32.totalorder %s1427_s20, 0 }
 0x23c   : > { %s7814_s13 = smov (!%p3698_p7, %s7812_s13), 49  ;;  %s7816_s14 = smov (!%p1416_p8, %s1415_s14), 0 }
 0x23d   : > { %s1420_s12 = scalar_lea.vmem %s7299_s2, %s7814_s13  ;;  %s7818_s14 = smov (!%p3703_p9, %s7816_s14), 39 }
 0x23e   : > { %v1421_v58 = vld [vmem:[%s1420_s12] sm:$0x1]  ;;  %s1429_s23 = scalar_select %p1428_p10, %s1427_s20, 0 }
 0x23f   : > { %1422 = vst.msk [vmem:[#allocation2 + $0x4b] sm:$0x1] %vm146_vm0, %v1421_v58  ;;  %s1423_s28 = scalar_lea.vmem %s7300_s3, %s7818_s14  ;;  %p3708_p11 = scmp.lt.s32.totalorder %s1427_s20, 49 }
 0x240   : > { %v1424_v59 = vld [vmem:[%s1423_s28] sm:$0x1]  ;;  %p1433_p12 = scmp.gt.s32.totalorder %s6329_s16, 0  ;;  %p3713_p13 = scmp.lt.s32.totalorder %s6329_s16, 39 }
 0x241   : > { %1425 = vst.msk [vmem:[#allocation3 + $0x4b] sm:$0x1] %vm146_vm0, %v1424_v59  ;;  %s7820_s23 = smov (!%p3708_p11, %s1429_s23), 49  ;;  %p1445_p0 = scmp.gt.s32.totalorder %s6332_s30, 0 }
 0x242   : > { %s7822_s16 = smov (!%p1433_p12, %s6329_s16), 0  ;;  %s1437_s11 = scalar_lea.vmem %s7299_s2, %s7820_s23 }
 0x243   : > { %s7824_s16 = smov (!%p3713_p13, %s7822_s16), 39  ;;  %v1438_v60 = vld [vmem:[%s1437_s11] sm:$0x1]  ;;  %p3718_p3 = scmp.lt.s32.totalorder %s6332_s30, 49 }
 0x244   : > { %1439 = vst.msk [vmem:[#allocation2 + $0x4c] sm:$0x1] %vm146_vm0, %v1438_v60  ;;  %s1446_s14 = scalar_select %p1445_p0, %s6332_s30, 0 }
 0x245   : > { %s1440_s10 = scalar_lea.vmem %s7300_s3, %s7824_s16  ;;  %p1450_p4 = scmp.gt.s32.totalorder %s6335_s22, 0 }
 0x246   : > { %v1441_v61 = vld [vmem:[%s1440_s10] sm:$0x1]  ;;  %p3723_p5 = scmp.lt.s32.totalorder %s6335_s22, 39  ;;  %s7826_s14 = smov (!%p3718_p3, %s1446_s14), 49 }
 0x247   : > { %1442 = vst.msk [vmem:[#allocation3 + $0x4c] sm:$0x1] %vm146_vm0, %v1441_v61  ;;  %s7828_s22 = smov (!%p1450_p4, %s6335_s22), 0  ;;  %s1454_s23 = scalar_lea.vmem %s7299_s2, %s7826_s14 }
 0x248   : > { %s1461_s21 = sld [smem:[#allocation5 + %s1460_s18]]  ;;  %s7830_s22 = smov (!%p3723_p5, %s7828_s22), 39  ;;  %v1455_v62 = vld [vmem:[%s1454_s23] sm:$0x1] }
 0x249   : > { %1456 = vst.msk [vmem:[#allocation2 + $0x4d] sm:$0x1] %vm146_vm0, %v1455_v62  ;;  %s1466_s16 = sld [smem:[#allocation6 + %s1460_s18]]  ;;  %s1494_s30 = sadd.s32 80, %s5035_s9 }
 0x24a   : > { %s1457_s13 = scalar_lea.vmem %s7300_s3, %s7830_s22  ;;  %s1478_s0 = sld [smem:[#allocation5 + %s1477_s5]] }
 0x24b   : > { %v1458_v63 = vld [vmem:[%s1457_s13] sm:$0x1]  ;;  %s6379_s11 = sld [smem:[#allocation6 + %s1477_s5]]  ;;  %s1528_s18 = sadd.s32 82, %s5035_s9 }
 0x24c   : > { %1459 = vst.msk [vmem:[#allocation3 + $0x4d] sm:$0x1] %vm146_vm0, %v1458_v63  ;;  %s6382_s14 = sld [smem:[#allocation5 + %s1494_s30]] }
 0x24d   : > { %s6385_s20 = sld [smem:[#allocation6 + %s1494_s30]] }
 0x24e   : > { %p1462_p6 = scmp.gt.s32.totalorder %s1461_s21, 0  ;;  %p3728_p7 = scmp.lt.s32.totalorder %s1461_s21, 49 }
 0x24f   : > { %p1467_p8 = scmp.gt.s32.totalorder %s1466_s16, 0  ;;  %p3733_p9 = scmp.lt.s32.totalorder %s1466_s16, 39 }
 0x250   : > { %s7832_s21 = smov (!%p1462_p6, %s1461_s21), 0  ;;  %p1479_p10 = scmp.gt.s32.totalorder %s1478_s0, 0 }
 0x251   : > { %s7834_s21 = smov (!%p3728_p7, %s7832_s21), 49  ;;  %s7836_s16 = smov (!%p1467_p8, %s1466_s16), 0 }
 0x252   : > { %s1471_s10 = scalar_lea.vmem %s7299_s2, %s7834_s21  ;;  %s7838_s16 = smov (!%p3733_p9, %s7836_s16), 39 }
 0x253   : > { %v1472_v0 = vld [vmem:[%s1471_s10] sm:$0x1]  ;;  %s1480_s19 = scalar_select %p1479_p10, %s1478_s0, 0 }
 0x254   : > { %1473 = vst.msk [vmem:[#allocation2 + $0x4e] sm:$0x1] %vm146_vm0, %v1472_v0  ;;  %s1474_s30 = scalar_lea.vmem %s7300_s3, %s7838_s16  ;;  %p3738_p11 = scmp.lt.s32.totalorder %s1478_s0, 49 }
 0x255   : > { %v1475_v1 = vld [vmem:[%s1474_s30] sm:$0x1]  ;;  %p1484_p12 = scmp.gt.s32.totalorder %s6379_s11, 0  ;;  %p3743_p13 = scmp.lt.s32.totalorder %s6379_s11, 39 }
 0x256   : > { %1476 = vst.msk [vmem:[#allocation3 + $0x4e] sm:$0x1] %vm146_vm0, %v1475_v1  ;;  %s7840_s19 = smov (!%p3738_p11, %s1480_s19), 49  ;;  %p1496_p0 = scmp.gt.s32.totalorder %s6382_s14, 0 }
 0x257   : > { %s7842_s11 = smov (!%p1484_p12, %s6379_s11), 0  ;;  %s1488_s28 = scalar_lea.vmem %s7299_s2, %s7840_s19 }
 0x258   : > { %s7844_s11 = smov (!%p3743_p13, %s7842_s11), 39  ;;  %v1489_v2 = vld [vmem:[%s1488_s28] sm:$0x1]  ;;  %p3748_p3 = scmp.lt.s32.totalorder %s6382_s14, 49 }
 0x259   : > { %1490 = vst.msk [vmem:[#allocation2 + $0x4f] sm:$0x1] %vm146_vm0, %v1489_v2  ;;  %s1497_s16 = scalar_select %p1496_p0, %s6382_s14, 0 }
 0x25a   : > { %s1491_s22 = scalar_lea.vmem %s7300_s3, %s7844_s11  ;;  %p1501_p4 = scmp.gt.s32.totalorder %s6385_s20, 0 }
 0x25b   : > { %v1492_v3 = vld [vmem:[%s1491_s22] sm:$0x1]  ;;  %p3753_p5 = scmp.lt.s32.totalorder %s6385_s20, 39  ;;  %s7846_s16 = smov (!%p3748_p3, %s1497_s16), 49 }
 0x25c   : > { %1493 = vst.msk [vmem:[#allocation3 + $0x4f] sm:$0x1] %vm146_vm0, %v1492_v3  ;;  %s7848_s20 = smov (!%p1501_p4, %s6385_s20), 0  ;;  %s1505_s19 = scalar_lea.vmem %s7299_s2, %s7846_s16 }
 0x25d   : > { %s1512_s12 = sld [smem:[#allocation5 + %s1511_s17]]  ;;  %s7850_s20 = smov (!%p3753_p5, %s7848_s20), 39  ;;  %v1506_v4 = vld [vmem:[%s1505_s19] sm:$0x1] }
 0x25e   : > { %1507 = vst.msk [vmem:[#allocation2 + $0x50] sm:$0x1] %vm146_vm0, %v1506_v4  ;;  %s1517_s11 = sld [smem:[#allocation6 + %s1511_s17]]  ;;  %s1545_s14 = sadd.s32 83, %s5035_s9 }
 0x25f   : > { %s1508_s21 = scalar_lea.vmem %s7300_s3, %s7850_s20  ;;  %s6427_s15 = sld [smem:[#allocation5 + %s1528_s18]] }
 0x260   : > { %v2319_v5 = vld [vmem:[#allocation2 + $0x48] sm:$0xff]  ;;  %v1509_v6 = vld [vmem:[%s1508_s21] sm:$0x1]  ;;  %s6431_s28 = sld [smem:[#allocation6 + %s1528_s18]]  ;;  %s1562_s17 = sadd.s32 84, %s5035_s9 }
 0x261   : > { %1510 = vst.msk [vmem:[#allocation3 + $0x50] sm:$0x1] %vm146_vm0, %v1509_v6  ;;  %s6434_s16 = sld [smem:[#allocation5 + %s1545_s14]]  ;;  %s1579_s20 = sadd.s32 85, %s5035_s9 }
 0x262   : > { %s6437_s13 = sld [smem:[#allocation6 + %s1545_s14]]  ;;  %s1613_s21 = sadd.s32 87, %s5035_s9 }
 0x263   : > { %v2335_v7 = vld [vmem:[#allocation3 + $0x48] sm:$0xff]  ;;  %p1513_p6 = scmp.gt.s32.totalorder %s1512_s12, 0  ;;  %p3758_p7 = scmp.lt.s32.totalorder %s1512_s12, 49 }
 0x264   : > { %v2351_v8 = vmul.f32 %v2335_v7, %v2319_v5  ;;  %p1518_p8 = scmp.gt.s32.totalorder %s1517_s11, 0  ;;  %p3763_p9 = scmp.lt.s32.totalorder %s1517_s11, 39 }
 0x265   : > { %s7852_s12 = smov (!%p1513_p6, %s1512_s12), 0  ;;  %p1530_p10 = scmp.gt.s32.totalorder %s6427_s15, 0 }
 0x266   : > { %v2386_v9 = vsel %vm2358_vm1, %v2351_v8, 0.0  ;;  %s7854_s12 = smov (!%p3758_p7, %s7852_s12), 49  ;;  %s7856_s11 = smov (!%p1518_p8, %s1517_s11), 0 }
 0x267   : > { %2387 = vadd.xlane.f32.xlu1 %v2386_v9  ;;  %s1522_s22 = scalar_lea.vmem %s7299_s2, %s7854_s12  ;;  %s7858_s11 = smov (!%p3763_p9, %s7856_s11), 39 }
 0x268   : > { %v1523_v10 = vld [vmem:[%s1522_s22] sm:$0x1]  ;;  %s1531_s5 = scalar_select %p1530_p10, %s6427_s15, 0 }
 0x269   : > { %1524 = vst.msk [vmem:[#allocation2 + $0x51] sm:$0x1] %vm146_vm0, %v1523_v10  ;;  %s1525_s14 = scalar_lea.vmem %s7300_s3, %s7858_s11  ;;  %p3768_p11 = scmp.lt.s32.totalorder %s6427_s15, 49 }
 0x26a   : > { %v1526_v11 = vld [vmem:[%s1525_s14] sm:$0x1]  ;;  %p1535_p12 = scmp.gt.s32.totalorder %s6431_s28, 0  ;;  %p3773_p13 = scmp.lt.s32.totalorder %s6431_s28, 39 }
 0x26b   : > { %1527 = vst.msk [vmem:[#allocation3 + $0x51] sm:$0x1] %vm146_vm0, %v1526_v11  ;;  %s7860_s5 = smov (!%p3768_p11, %s1531_s5), 49  ;;  %p1547_p0 = scmp.gt.s32.totalorder %s6434_s16, 0 }
 0x26c   : > { %s7862_s28 = smov (!%p1535_p12, %s6431_s28), 0  ;;  %s1539_s30 = scalar_lea.vmem %s7299_s2, %s7860_s5 }
 0x26d   : > { %s7864_s28 = smov (!%p3773_p13, %s7862_s28), 39  ;;  %v1540_v12 = vld [vmem:[%s1539_s30] sm:$0x1]  ;;  %p3778_p3 = scmp.lt.s32.totalorder %s6434_s16, 49 }
 0x26e   : > { %1541 = vst.msk [vmem:[#allocation2 + $0x52] sm:$0x1] %vm146_vm0, %v1540_v12  ;;  %s1548_s11 = scalar_select %p1547_p0, %s6434_s16, 0 }
 0x26f   : > { %s1542_s18 = scalar_lea.vmem %s7300_s3, %s7864_s28  ;;  %p1552_p4 = scmp.gt.s32.totalorder %s6437_s13, 0 }
 0x270   : > { %v1543_v13 = vld [vmem:[%s1542_s18] sm:$0x1]  ;;  %p3783_p5 = scmp.lt.s32.totalorder %s6437_s13, 39  ;;  %s7866_s11 = smov (!%p3778_p3, %s1548_s11), 49 }
 0x271   : > { %1544 = vst.msk [vmem:[#allocation3 + $0x52] sm:$0x1] %vm146_vm0, %v1543_v13  ;;  %s7868_s13 = smov (!%p1552_p4, %s6437_s13), 0  ;;  %s1556_s5 = scalar_lea.vmem %s7299_s2, %s7866_s11 }
 0x272   : > { %s1563_s10 = sld [smem:[#allocation5 + %s1562_s17]]  ;;  %s7870_s13 = smov (!%p3783_p5, %s7868_s13), 39  ;;  %v1557_v14 = vld [vmem:[%s1556_s5] sm:$0x1] }
 0x273   : > { %1558 = vst.msk [vmem:[#allocation2 + $0x53] sm:$0x1] %vm146_vm0, %v1557_v14  ;;  %s1568_s28 = sld [smem:[#allocation6 + %s1562_s17]]  ;;  %s1596_s16 = sadd.s32 86, %s5035_s9 }
 0x274   : > { %s1559_s12 = scalar_lea.vmem %s7300_s3, %s7870_s13  ;;  %s1580_s23 = sld [smem:[#allocation5 + %s1579_s20]] }
 0x275   : > { %v1560_v15 = vld [vmem:[%s1559_s12] sm:$0x1]  ;;  %s6485_s30 = sld [smem:[#allocation6 + %s1579_s20]]  ;;  %s1630_s17 = sadd.s32 88, %s5035_s9 }
 0x276   : > { %1561 = vst.msk [vmem:[#allocation3 + $0x53] sm:$0x1] %vm146_vm0, %v1560_v15  ;;  %s6488_s11 = sld [smem:[#allocation5 + %s1596_s16]]  ;;  %s1664_s12 = sadd.s32 90, %s5035_s9 }
 0x277   : > { %s6491_s15 = sld [smem:[#allocation6 + %s1596_s16]] }
 0x278   : > { %p1564_p6 = scmp.gt.s32.totalorder %s1563_s10, 0  ;;  %p3788_p7 = scmp.lt.s32.totalorder %s1563_s10, 49 }
 0x279   : > { %p1569_p8 = scmp.gt.s32.totalorder %s1568_s28, 0  ;;  %p3793_p9 = scmp.lt.s32.totalorder %s1568_s28, 39 }
 0x27a   : > { %s7872_s10 = smov (!%p1564_p6, %s1563_s10), 0  ;;  %p1581_p10 = scmp.gt.s32.totalorder %s1580_s23, 0 }
 0x27b   : > { %s7874_s10 = smov (!%p3788_p7, %s7872_s10), 49  ;;  %s7876_s28 = smov (!%p1569_p8, %s1568_s28), 0 }
 0x27c   : > { %s1573_s18 = scalar_lea.vmem %s7299_s2, %s7874_s10  ;;  %s7878_s28 = smov (!%p3793_p9, %s7876_s28), 39 }
 0x27d   : > { %v1574_v16 = vld [vmem:[%s1573_s18] sm:$0x1]  ;;  %s1582_s0 = scalar_select %p1581_p10, %s1580_s23, 0 }
 0x27e   : > { %1575 = vst.msk [vmem:[#allocation2 + $0x54] sm:$0x1] %vm146_vm0, %v1574_v16  ;;  %s1576_s16 = scalar_lea.vmem %s7300_s3, %s7878_s28  ;;  %p3798_p11 = scmp.lt.s32.totalorder %s1580_s23, 49 }
 0x27f   : > { %v1577_v17 = vld [vmem:[%s1576_s16] sm:$0x1]  ;;  %p1586_p12 = scmp.gt.s32.totalorder %s6485_s30, 0  ;;  %p3803_p13 = scmp.lt.s32.totalorder %s6485_s30, 39 }
 0x280   : > { %1578 = vst.msk [vmem:[#allocation3 + $0x54] sm:$0x1] %vm146_vm0, %v1577_v17  ;;  %s7880_s0 = smov (!%p3798_p11, %s1582_s0), 49  ;;  %p1598_p0 = scmp.gt.s32.totalorder %s6488_s11, 0 }
 0x281   : > { %s7882_s30 = smov (!%p1586_p12, %s6485_s30), 0  ;;  %s1590_s14 = scalar_lea.vmem %s7299_s2, %s7880_s0 }
 0x282   : > { %s7884_s30 = smov (!%p3803_p13, %s7882_s30), 39  ;;  %v1591_v18 = vld [vmem:[%s1590_s14] sm:$0x1]  ;;  %p3808_p3 = scmp.lt.s32.totalorder %s6488_s11, 49 }
 0x283   : > { %1592 = vst.msk [vmem:[#allocation2 + $0x55] sm:$0x1] %vm146_vm0, %v1591_v18  ;;  %s1599_s28 = scalar_select %p1598_p0, %s6488_s11, 0 }
 0x284   : > { %s1593_s13 = scalar_lea.vmem %s7300_s3, %s7884_s30  ;;  %p1603_p4 = scmp.gt.s32.totalorder %s6491_s15, 0 }
 0x285   : > { %v1594_v19 = vld [vmem:[%s1593_s13] sm:$0x1]  ;;  %p3813_p5 = scmp.lt.s32.totalorder %s6491_s15, 39  ;;  %s7886_s28 = smov (!%p3808_p3, %s1599_s28), 49 }
 0x286   : > { %1595 = vst.msk [vmem:[#allocation3 + $0x55] sm:$0x1] %vm146_vm0, %v1594_v19  ;;  %s7888_s15 = smov (!%p1603_p4, %s6491_s15), 0  ;;  %s1607_s0 = scalar_lea.vmem %s7299_s2, %s7886_s28 }
 0x287   : > { %s1614_s22 = sld [smem:[#allocation5 + %s1613_s21]]  ;;  %s7890_s15 = smov (!%p3813_p5, %s7888_s15), 39  ;;  %v1608_v20 = vld [vmem:[%s1607_s0] sm:$0x1] }
 0x288   : > { %1609 = vst.msk [vmem:[#allocation2 + $0x56] sm:$0x1] %vm146_vm0, %v1608_v20  ;;  %s1619_s30 = sld [smem:[#allocation6 + %s1613_s21]]  ;;  %s1647_s11 = sadd.s32 89, %s5035_s9 }
 0x289   : > { %s1610_s10 = scalar_lea.vmem %s7300_s3, %s7890_s15  ;;  %s1631_s19 = sld [smem:[#allocation5 + %s1630_s17]] }
 0x28a   : > { %v1611_v21 = vld [vmem:[%s1610_s10] sm:$0x1]  ;;  %s6535_s14 = sld [smem:[#allocation6 + %s1630_s17]]  ;;  %s1681_s21 = sadd.s32 91, %s5035_s9 }
 0x28b   : > { %1612 = vst.msk [vmem:[#allocation3 + $0x56] sm:$0x1] %vm146_vm0, %v1611_v21  ;;  %s6538_s28 = sld [smem:[#allocation5 + %s1647_s11]]  ;;  %s1698_s18 = sadd.s32 92, %s5035_s9 }
 0x28c   : > { %s6541_s23 = sld [smem:[#allocation6 + %s1647_s11]]  ;;  %s1715_s10 = sadd.s32 93, %s5035_s9 }
 0x28d   : > { %p1615_p6 = scmp.gt.s32.totalorder %s1614_s22, 0  ;;  %p3818_p7 = scmp.lt.s32.totalorder %s1614_s22, 49 }
 0x28e   : > { %p1620_p8 = scmp.gt.s32.totalorder %s1619_s30, 0  ;;  %p3823_p9 = scmp.lt.s32.totalorder %s1619_s30, 39 }
 0x28f   : > { %s7892_s22 = smov (!%p1615_p6, %s1614_s22), 0  ;;  %p1632_p10 = scmp.gt.s32.totalorder %s1631_s19, 0 }
 0x290   : > { %s7894_s22 = smov (!%p3818_p7, %s7892_s22), 49  ;;  %s7896_s30 = smov (!%p1620_p8, %s1619_s30), 0 }
 0x291   : > { %s1624_s13 = scalar_lea.vmem %s7299_s2, %s7894_s22  ;;  %s7898_s30 = smov (!%p3823_p9, %s7896_s30), 39 }
 0x292   : > { %v1625_v22 = vld [vmem:[%s1624_s13] sm:$0x1]  ;;  %s1633_s20 = scalar_select %p1632_p10, %s1631_s19, 0 }
 0x293   : > { %1626 = vst.msk [vmem:[#allocation2 + $0x57] sm:$0x1] %vm146_vm0, %v1625_v22  ;;  %s1627_s11 = scalar_lea.vmem %s7300_s3, %s7898_s30  ;;  %p3828_p11 = scmp.lt.s32.totalorder %s1631_s19, 49 }
 0x294   : > { %v1628_v23 = vld [vmem:[%s1627_s11] sm:$0x1]  ;;  %p1637_p12 = scmp.gt.s32.totalorder %s6535_s14, 0  ;;  %p3833_p13 = scmp.lt.s32.totalorder %s6535_s14, 39 }
 0x295   : > { %1629 = vst.msk [vmem:[#allocation3 + $0x57] sm:$0x1] %vm146_vm0, %v1628_v23  ;;  %s7900_s20 = smov (!%p3828_p11, %s1633_s20), 49  ;;  %p1649_p0 = scmp.gt.s32.totalorder %s6538_s28, 0 }
 0x296   : > { %s7902_s14 = smov (!%p1637_p12, %s6535_s14), 0  ;;  %s1641_s16 = scalar_lea.vmem %s7299_s2, %s7900_s20 }
 0x297   : > { %s7904_s14 = smov (!%p3833_p13, %s7902_s14), 39  ;;  %v1642_v24 = vld [vmem:[%s1641_s16] sm:$0x1]  ;;  %p3838_p3 = scmp.lt.s32.totalorder %s6538_s28, 49 }
 0x298   : > { %1643 = vst.msk [vmem:[#allocation2 + $0x58] sm:$0x1] %vm146_vm0, %v1642_v24  ;;  %s1650_s30 = scalar_select %p1649_p0, %s6538_s28, 0 }
 0x299   : > { %s1644_s15 = scalar_lea.vmem %s7300_s3, %s7904_s14  ;;  %p1654_p4 = scmp.gt.s32.totalorder %s6541_s23, 0 }
 0x29a   : > { %v2320_v25 = vld [vmem:[#allocation2 + $0x50] sm:$0xff]  ;;  %v1645_v26 = vld [vmem:[%s1644_s15] sm:$0x1]  ;;  %p3843_p5 = scmp.lt.s32.totalorder %s6541_s23, 39  ;;  %s7906_s30 = smov (!%p3838_p3, %s1650_s30), 49 }
 0x29b   : > { %1646 = vst.msk [vmem:[#allocation3 + $0x58] sm:$0x1] %vm146_vm0, %v1645_v26  ;;  %s7908_s23 = smov (!%p1654_p4, %s6541_s23), 0  ;;  %s1658_s20 = scalar_lea.vmem %s7299_s2, %s7906_s30 }
 0x29c   : > { %v2336_v27 = vld [vmem:[#allocation3 + $0x50] sm:$0xff]  ;;  %s1665_s14 = sld [smem:[#allocation5 + %s1664_s12]]  ;;  %s7910_s23 = smov (!%p3843_p5, %s7908_s23), 39  ;;  %v1659_v30 = vld [vmem:[%s1658_s20] sm:$0x1] }
 0x29d   : > { %v2352_v28 = vmul.f32 %v2336_v27, %v2320_v25  ;;  %1660 = vst.msk [vmem:[#allocation2 + $0x59] sm:$0x1] %vm146_vm0, %v1659_v30  ;;  %s1670_s28 = sld [smem:[#allocation6 + %s1664_s12]]  ;;  %s1661_s22 = scalar_lea.vmem %s7300_s3, %s7910_s23 }
 0x29e   : > { %s1682_s5 = sld [smem:[#allocation5 + %s1681_s21]]  ;;  %v1662_v31 = vld [vmem:[%s1661_s22] sm:$0x1]  ;;  %s1732_s12 = sadd.s32 94, %s5035_s9 }
 0x29f   : > { %v2389_v29 = vsel %vm2358_vm1, %v2352_v28, 0.0  ;;  %s6586_s16 = sld [smem:[#allocation6 + %s1681_s21]]  ;;  %1663 = vst.msk [vmem:[#allocation3 + $0x59] sm:$0x1] %vm146_vm0, %v1662_v31  ;;  %s1766_s22 = sadd.s32 96, %s5035_s9 }
 0x2a0   : > { %2390 = vadd.xlane.f32.xlu0 %v2389_v29  ;;  %s6589_s30 = sld [smem:[#allocation5 + %s1698_s18]] }
 0x2a1   : > { %s6592_s19 = sld [smem:[#allocation6 + %s1698_s18]] }
 0x2a2   : > { %p1666_p6 = scmp.gt.s32.totalorder %s1665_s14, 0  ;;  %p3848_p7 = scmp.lt.s32.totalorder %s1665_s14, 49 }
 0x2a3   : > { %p1671_p8 = scmp.gt.s32.totalorder %s1670_s28, 0  ;;  %p3853_p9 = scmp.lt.s32.totalorder %s1670_s28, 39 }
 0x2a4   : > { %s7912_s14 = smov (!%p1666_p6, %s1665_s14), 0  ;;  %p1683_p10 = scmp.gt.s32.totalorder %s1682_s5, 0 }
 0x2a5   : > { %s7914_s14 = smov (!%p3848_p7, %s7912_s14), 49  ;;  %s7916_s28 = smov (!%p1671_p8, %s1670_s28), 0 }
 0x2a6   : > { %s1675_s15 = scalar_lea.vmem %s7299_s2, %s7914_s14  ;;  %s7918_s28 = smov (!%p3853_p9, %s7916_s28), 39 }
 0x2a7   : > { %v1676_v32 = vld [vmem:[%s1675_s15] sm:$0x1]  ;;  %s1684_s17 = scalar_select %p1683_p10, %s1682_s5, 0 }
 0x2a8   : > { %1677 = vst.msk [vmem:[#allocation2 + $0x5a] sm:$0x1] %vm146_vm0, %v1676_v32  ;;  %s1678_s18 = scalar_lea.vmem %s7300_s3, %s7918_s28  ;;  %p3858_p11 = scmp.lt.s32.totalorder %s1682_s5, 49 }
 0x2a9   : > { %v1679_v33 = vld [vmem:[%s1678_s18] sm:$0x1]  ;;  %p1688_p12 = scmp.gt.s32.totalorder %s6586_s16, 0  ;;  %p3863_p13 = scmp.lt.s32.totalorder %s6586_s16, 39 }
 0x2aa   : > { %1680 = vst.msk [vmem:[#allocation3 + $0x5a] sm:$0x1] %vm146_vm0, %v1679_v33  ;;  %s7920_s17 = smov (!%p3858_p11, %s1684_s17), 49  ;;  %p1700_p0 = scmp.gt.s32.totalorder %s6589_s30, 0 }
 0x2ab   : > { %s7922_s16 = smov (!%p1688_p12, %s6586_s16), 0  ;;  %s1692_s11 = scalar_lea.vmem %s7299_s2, %s7920_s17 }
 0x2ac   : > { %s7924_s16 = smov (!%p3863_p13, %s7922_s16), 39  ;;  %v1693_v34 = vld [vmem:[%s1692_s11] sm:$0x1]  ;;  %p3868_p3 = scmp.lt.s32.totalorder %s6589_s30, 49 }
 0x2ad   : > { %1694 = vst.msk [vmem:[#allocation2 + $0x5b] sm:$0x1] %vm146_vm0, %v1693_v34  ;;  %s1701_s28 = scalar_select %p1700_p0, %s6589_s30, 0 }
 0x2ae   : > { %s1695_s23 = scalar_lea.vmem %s7300_s3, %s7924_s16  ;;  %p1705_p4 = scmp.gt.s32.totalorder %s6592_s19, 0 }
 0x2af   : > { %v1696_v35 = vld [vmem:[%s1695_s23] sm:$0x1]  ;;  %p3873_p5 = scmp.lt.s32.totalorder %s6592_s19, 39  ;;  %s7926_s28 = smov (!%p3868_p3, %s1701_s28), 49 }
 0x2b0   : > { %1697 = vst.msk [vmem:[#allocation3 + $0x5b] sm:$0x1] %vm146_vm0, %v1696_v35  ;;  %s7928_s19 = smov (!%p1705_p4, %s6592_s19), 0  ;;  %s1709_s17 = scalar_lea.vmem %s7299_s2, %s7926_s28 }
 0x2b1   : > { %s1716_s13 = sld [smem:[#allocation5 + %s1715_s10]]  ;;  %s7930_s19 = smov (!%p3873_p5, %s7928_s19), 39  ;;  %v1710_v36 = vld [vmem:[%s1709_s17] sm:$0x1] }
 0x2b2   : > { %1711 = vst.msk [vmem:[#allocation2 + $0x5c] sm:$0x1] %vm146_vm0, %v1710_v36  ;;  %s1721_s16 = sld [smem:[#allocation6 + %s1715_s10]]  ;;  %s1749_s30 = sadd.s32 95, %s5035_s9 }
 0x2b3   : > { %s1712_s14 = scalar_lea.vmem %s7300_s3, %s7930_s19  ;;  %s1733_s0 = sld [smem:[#allocation5 + %s1732_s12]] }
 0x2b4   : > { %v1713_v37 = vld [vmem:[%s1712_s14] sm:$0x1]  ;;  %s6636_s11 = sld [smem:[#allocation6 + %s1732_s12]]  ;;  %s1783_s10 = sadd.s32 97, %s5035_s9 }
 0x2b5   : > { %1714 = vst.msk [vmem:[#allocation3 + $0x5c] sm:$0x1] %vm146_vm0, %v1713_v37  ;;  %s6639_s28 = sld [smem:[#allocation5 + %s1749_s30]]  ;;  %s1817_s14 = sadd.s32 99, %s5035_s9 }
 0x2b6   : > { %s6642_s5 = sld [smem:[#allocation6 + %s1749_s30]] }
 0x2b7   : > { %p1717_p6 = scmp.gt.s32.totalorder %s1716_s13, 0  ;;  %p3878_p7 = scmp.lt.s32.totalorder %s1716_s13, 49 }
 0x2b8   : > { %p1722_p8 = scmp.gt.s32.totalorder %s1721_s16, 0  ;;  %p3883_p9 = scmp.lt.s32.totalorder %s1721_s16, 39 }
 0x2b9   : > { %s7932_s13 = smov (!%p1717_p6, %s1716_s13), 0  ;;  %p1734_p10 = scmp.gt.s32.totalorder %s1733_s0, 0 }
 0x2ba   : > { %s7934_s13 = smov (!%p3878_p7, %s7932_s13), 49  ;;  %s7936_s16 = smov (!%p1722_p8, %s1721_s16), 0 }
 0x2bb   : > { %s1726_s23 = scalar_lea.vmem %s7299_s2, %s7934_s13  ;;  %s7938_s16 = smov (!%p3883_p9, %s7936_s16), 39 }
 0x2bc   : > { %v1727_v38 = vld [vmem:[%s1726_s23] sm:$0x1]  ;;  %s1735_s21 = scalar_select %p1734_p10, %s1733_s0, 0 }
 0x2bd   : > { %1728 = vst.msk [vmem:[#allocation2 + $0x5d] sm:$0x1] %vm146_vm0, %v1727_v38  ;;  %s1729_s30 = scalar_lea.vmem %s7300_s3, %s7938_s16  ;;  %p3888_p11 = scmp.lt.s32.totalorder %s1733_s0, 49 }
 0x2be   : > { %v1730_v39 = vld [vmem:[%s1729_s30] sm:$0x1]  ;;  %p1739_p12 = scmp.gt.s32.totalorder %s6636_s11, 0  ;;  %p3893_p13 = scmp.lt.s32.totalorder %s6636_s11, 39 }
 0x2bf   : > { %1731 = vst.msk [vmem:[#allocation3 + $0x5d] sm:$0x1] %vm146_vm0, %v1730_v39  ;;  %s7940_s21 = smov (!%p3888_p11, %s1735_s21), 49  ;;  %p1751_p0 = scmp.gt.s32.totalorder %s6639_s28, 0 }
 0x2c0   : > { %s7942_s11 = smov (!%p1739_p12, %s6636_s11), 0  ;;  %s1743_s18 = scalar_lea.vmem %s7299_s2, %s7940_s21 }
 0x2c1   : > { %s7944_s11 = smov (!%p3893_p13, %s7942_s11), 39  ;;  %v1744_v40 = vld [vmem:[%s1743_s18] sm:$0x1]  ;;  %p3898_p3 = scmp.lt.s32.totalorder %s6639_s28, 49 }
 0x2c2   : > { %1745 = vst.msk [vmem:[#allocation2 + $0x5e] sm:$0x1] %vm146_vm0, %v1744_v40  ;;  %s1752_s16 = scalar_select %p1751_p0, %s6639_s28, 0 }
 0x2c3   : > { %s1746_s19 = scalar_lea.vmem %s7300_s3, %s7944_s11  ;;  %p1756_p4 = scmp.gt.s32.totalorder %s6642_s5, 0 }
 0x2c4   : > { %v1747_v41 = vld [vmem:[%s1746_s19] sm:$0x1]  ;;  %p3903_p5 = scmp.lt.s32.totalorder %s6642_s5, 39  ;;  %s7946_s16 = smov (!%p3898_p3, %s1752_s16), 49 }
 0x2c5   : > { %1748 = vst.msk [vmem:[#allocation3 + $0x5e] sm:$0x1] %vm146_vm0, %v1747_v41  ;;  %s7948_s5 = smov (!%p1756_p4, %s6642_s5), 0  ;;  %s1760_s21 = scalar_lea.vmem %s7299_s2, %s7946_s16 }
 0x2c6   : > { %s1767_s15 = sld [smem:[#allocation5 + %s1766_s22]]  ;;  %s7950_s5 = smov (!%p3903_p5, %s7948_s5), 39  ;;  %v1761_v42 = vld [vmem:[%s1760_s21] sm:$0x1] }
 0x2c7   : > { %1762 = vst.msk [vmem:[#allocation2 + $0x5f] sm:$0x1] %vm146_vm0, %v1761_v42  ;;  %s1772_s11 = sld [smem:[#allocation6 + %s1766_s22]]  ;;  %s1800_s28 = sadd.s32 98, %s5035_s9 }
 0x2c8   : > { %s1763_s13 = scalar_lea.vmem %s7300_s3, %s7950_s5  ;;  %s6684_s20 = sld [smem:[#allocation5 + %s1783_s10]] }
 0x2c9   : > { %v1764_v43 = vld [vmem:[%s1763_s13] sm:$0x1]  ;;  %s6688_s18 = sld [smem:[#allocation6 + %s1783_s10]]  ;;  %s1834_s0 = sadd.s32 100, %s5035_s9 }
 0x2ca   : > { %1765 = vst.msk [vmem:[#allocation3 + $0x5f] sm:$0x1] %vm146_vm0, %v1764_v43  ;;  %s6691_s16 = sld [smem:[#allocation5 + %s1800_s28]]  ;;  %s1868_s13 = sadd.s32 102, %s5035_s9 }
 0x2cb   : > { %s6694_s22 = sld [smem:[#allocation6 + %s1800_s28]] }
 0x2cc   : > { %p1768_p6 = scmp.gt.s32.totalorder %s1767_s15, 0  ;;  %p3908_p7 = scmp.lt.s32.totalorder %s1767_s15, 49 }
 0x2cd   : > { %p1773_p8 = scmp.gt.s32.totalorder %s1772_s11, 0  ;;  %p3913_p9 = scmp.lt.s32.totalorder %s1772_s11, 39 }
 0x2ce   : > { %s7952_s15 = smov (!%p1768_p6, %s1767_s15), 0  ;;  %v2321_v44 = vld [vmem:[#allocation2 + $0x58] sm:$0xff]  ;;  %p1785_p10 = scmp.gt.s32.totalorder %s6684_s20, 0 }
 0x2cf   : > { %s7954_s15 = smov (!%p3908_p7, %s7952_s15), 49  ;;  %s7956_s11 = smov (!%p1773_p8, %s1772_s11), 0 }
 0x2d0   : > { %s1777_s19 = scalar_lea.vmem %s7299_s2, %s7954_s15  ;;  %s7958_s11 = smov (!%p3913_p9, %s7956_s11), 39 }
 0x2d1   : > { %v2337_v45 = vld [vmem:[#allocation3 + $0x58] sm:$0xff]  ;;  %v1778_v47 = vld [vmem:[%s1777_s19] sm:$0x1]  ;;  %s1786_s12 = scalar_select %p1785_p10, %s6684_s20, 0 }
 0x2d2   : > { %v2353_v46 = vmul.f32 %v2337_v45, %v2321_v44  ;;  %1779 = vst.msk [vmem:[#allocation2 + $0x60] sm:$0x1] %vm146_vm0, %v1778_v47  ;;  %s1780_s28 = scalar_lea.vmem %s7300_s3, %s7958_s11  ;;  %p3918_p11 = scmp.lt.s32.totalorder %s6684_s20, 49 }
 0x2d3   : > { %v1781_v49 = vld [vmem:[%s1780_s28] sm:$0x1]  ;;  %p1790_p12 = scmp.gt.s32.totalorder %s6688_s18, 0  ;;  %p3923_p13 = scmp.lt.s32.totalorder %s6688_s18, 39 }
 0x2d4   : > { %v2392_v48 = vsel %vm2358_vm1, %v2353_v46, 0.0  ;;  %1782 = vst.msk [vmem:[#allocation3 + $0x60] sm:$0x1] %vm146_vm0, %v1781_v49  ;;  %s7960_s12 = smov (!%p3918_p11, %s1786_s12), 49  ;;  %p1802_p0 = scmp.gt.s32.totalorder %s6691_s16, 0 }
 0x2d5   : > { %2393 = vadd.xlane.f32.xlu1 %v2392_v48  ;;  %s7962_s18 = smov (!%p1790_p12, %s6688_s18), 0  ;;  %s1794_s30 = scalar_lea.vmem %s7299_s2, %s7960_s12 }
 0x2d6   : > { %s7964_s18 = smov (!%p3923_p13, %s7962_s18), 39  ;;  %v1795_v50 = vld [vmem:[%s1794_s30] sm:$0x1]  ;;  %p3928_p3 = scmp.lt.s32.totalorder %s6691_s16, 49 }
 0x2d7   : > { %1796 = vst.msk [vmem:[#allocation2 + $0x61] sm:$0x1] %vm146_vm0, %v1795_v50  ;;  %s1803_s11 = scalar_select %p1802_p0, %s6691_s16, 0 }
 0x2d8   : > { %s1797_s5 = scalar_lea.vmem %s7300_s3, %s7964_s18  ;;  %p1807_p4 = scmp.gt.s32.totalorder %s6694_s22, 0 }
 0x2d9   : > { %v1798_v51 = vld [vmem:[%s1797_s5] sm:$0x1]  ;;  %p3933_p5 = scmp.lt.s32.totalorder %s6694_s22, 39  ;;  %s7966_s11 = smov (!%p3928_p3, %s1803_s11), 49 }
 0x2da   : > { %1799 = vst.msk [vmem:[#allocation3 + $0x61] sm:$0x1] %vm146_vm0, %v1798_v51  ;;  %s7968_s22 = smov (!%p1807_p4, %s6694_s22), 0  ;;  %s1811_s12 = scalar_lea.vmem %s7299_s2, %s7966_s11 }
 0x2db   : > { %s1818_s23 = sld [smem:[#allocation5 + %s1817_s14]]  ;;  %s7970_s22 = smov (!%p3933_p5, %s7968_s22), 39  ;;  %v1812_v52 = vld [vmem:[%s1811_s12] sm:$0x1] }
 0x2dc   : > { %1813 = vst.msk [vmem:[#allocation2 + $0x62] sm:$0x1] %vm146_vm0, %v1812_v52  ;;  %s1823_s18 = sld [smem:[#allocation6 + %s1817_s14]]  ;;  %s1851_s16 = sadd.s32 101, %s5035_s9 }
 0x2dd   : > { %s1814_s15 = scalar_lea.vmem %s7300_s3, %s7970_s22  ;;  %s1835_s17 = sld [smem:[#allocation5 + %s1834_s0]] }
 0x2de   : > { %v1815_v53 = vld [vmem:[%s1814_s15] sm:$0x1]  ;;  %s6742_s30 = sld [smem:[#allocation6 + %s1834_s0]]  ;;  %s1885_s14 = sadd.s32 103, %s5035_s9 }
 0x2df   : > { %1816 = vst.msk [vmem:[#allocation3 + $0x62] sm:$0x1] %vm146_vm0, %v1815_v53  ;;  %s6745_s11 = sld [smem:[#allocation5 + %s1851_s16]]  ;;  %s1919_s15 = sadd.s32 105, %s5035_s9 }
 0x2e0   : > { %s6748_s20 = sld [smem:[#allocation6 + %s1851_s16]] }
 0x2e1   : > { %p1819_p6 = scmp.gt.s32.totalorder %s1818_s23, 0  ;;  %p3938_p7 = scmp.lt.s32.totalorder %s1818_s23, 49 }
 0x2e2   : > { %p1824_p8 = scmp.gt.s32.totalorder %s1823_s18, 0  ;;  %p3943_p9 = scmp.lt.s32.totalorder %s1823_s18, 39 }
 0x2e3   : > { %s7972_s23 = smov (!%p1819_p6, %s1818_s23), 0  ;;  %p1836_p10 = scmp.gt.s32.totalorder %s1835_s17, 0 }
 0x2e4   : > { %s7974_s23 = smov (!%p3938_p7, %s7972_s23), 49  ;;  %s7976_s18 = smov (!%p1824_p8, %s1823_s18), 0 }
 0x2e5   : > { %s1828_s5 = scalar_lea.vmem %s7299_s2, %s7974_s23  ;;  %s7978_s18 = smov (!%p3943_p9, %s7976_s18), 39 }
 0x2e6   : > { %v1829_v54 = vld [vmem:[%s1828_s5] sm:$0x1]  ;;  %s1837_s10 = scalar_select %p1836_p10, %s1835_s17, 0 }
 0x2e7   : > { %1830 = vst.msk [vmem:[#allocation2 + $0x63] sm:$0x1] %vm146_vm0, %v1829_v54  ;;  %s1831_s16 = scalar_lea.vmem %s7300_s3, %s7978_s18  ;;  %p3948_p11 = scmp.lt.s32.totalorder %s1835_s17, 49 }
 0x2e8   : > { %v1832_v55 = vld [vmem:[%s1831_s16] sm:$0x1]  ;;  %p1841_p12 = scmp.gt.s32.totalorder %s6742_s30, 0  ;;  %p3953_p13 = scmp.lt.s32.totalorder %s6742_s30, 39 }
 0x2e9   : > { %1833 = vst.msk [vmem:[#allocation3 + $0x63] sm:$0x1] %vm146_vm0, %v1832_v55  ;;  %s7980_s10 = smov (!%p3948_p11, %s1837_s10), 49  ;;  %p1853_p0 = scmp.gt.s32.totalorder %s6745_s11, 0 }
 0x2ea   : > { %s7982_s30 = smov (!%p1841_p12, %s6742_s30), 0  ;;  %s1845_s28 = scalar_lea.vmem %s7299_s2, %s7980_s10 }
 0x2eb   : > { %s7984_s30 = smov (!%p3953_p13, %s7982_s30), 39  ;;  %v1846_v56 = vld [vmem:[%s1845_s28] sm:$0x1]  ;;  %p3958_p3 = scmp.lt.s32.totalorder %s6745_s11, 49 }
 0x2ec   : > { %1847 = vst.msk [vmem:[#allocation2 + $0x64] sm:$0x1] %vm146_vm0, %v1846_v56  ;;  %s1854_s18 = scalar_select %p1853_p0, %s6745_s11, 0 }
 0x2ed   : > { %s1848_s22 = scalar_lea.vmem %s7300_s3, %s7984_s30  ;;  %p1858_p4 = scmp.gt.s32.totalorder %s6748_s20, 0 }
 0x2ee   : > { %v1849_v57 = vld [vmem:[%s1848_s22] sm:$0x1]  ;;  %p3963_p5 = scmp.lt.s32.totalorder %s6748_s20, 39  ;;  %s7986_s18 = smov (!%p3958_p3, %s1854_s18), 49 }
 0x2ef   : > { %1850 = vst.msk [vmem:[#allocation3 + $0x64] sm:$0x1] %vm146_vm0, %v1849_v57  ;;  %s7988_s20 = smov (!%p1858_p4, %s6748_s20), 0  ;;  %s1862_s10 = scalar_lea.vmem %s7299_s2, %s7986_s18 }
 0x2f0   : > { %s1869_s19 = sld [smem:[#allocation5 + %s1868_s13]]  ;;  %s7990_s20 = smov (!%p3963_p5, %s7988_s20), 39  ;;  %v1863_v58 = vld [vmem:[%s1862_s10] sm:$0x1] }
 0x2f1   : > { %1864 = vst.msk [vmem:[#allocation2 + $0x65] sm:$0x1] %vm146_vm0, %v1863_v58  ;;  %s1874_s30 = sld [smem:[#allocation6 + %s1868_s13]]  ;;  %s1902_s11 = sadd.s32 104, %s5035_s9 }
 0x2f2   : > { %s1865_s23 = scalar_lea.vmem %s7300_s3, %s7990_s20  ;;  %s1886_s21 = sld [smem:[#allocation5 + %s1885_s14]] }
 0x2f3   : > { %v1866_v59 = vld [vmem:[%s1865_s23] sm:$0x1]  ;;  %s6792_s28 = sld [smem:[#allocation6 + %s1885_s14]]  ;;  %s1936_s13 = sadd.s32 106, %s5035_s9 }
 0x2f4   : > { %1867 = vst.msk [vmem:[#allocation3 + $0x65] sm:$0x1] %vm146_vm0, %v1866_v59  ;;  %s6795_s18 = sld [smem:[#allocation5 + %s1902_s11]] }
 0x2f5   : > { %s6798_s17 = sld [smem:[#allocation6 + %s1902_s11]] }
 0x2f6   : > { %p1870_p6 = scmp.gt.s32.totalorder %s1869_s19, 0  ;;  %p3968_p7 = scmp.lt.s32.totalorder %s1869_s19, 49 }
 0x2f7   : > { %p1875_p8 = scmp.gt.s32.totalorder %s1874_s30, 0  ;;  %p3973_p9 = scmp.lt.s32.totalorder %s1874_s30, 39 }
 0x2f8   : > { %s7992_s19 = smov (!%p1870_p6, %s1869_s19), 0  ;;  %p1887_p10 = scmp.gt.s32.totalorder %s1886_s21, 0 }
 0x2f9   : > { %s7994_s19 = smov (!%p3968_p7, %s7992_s19), 49  ;;  %s7996_s30 = smov (!%p1875_p8, %s1874_s30), 0 }
 0x2fa   : > { %s1879_s22 = scalar_lea.vmem %s7299_s2, %s7994_s19  ;;  %s7998_s30 = smov (!%p3973_p9, %s7996_s30), 39 }
 0x2fb   : > { %v1880_v60 = vld [vmem:[%s1879_s22] sm:$0x1]  ;;  %s1888_s0 = scalar_select %p1887_p10, %s1886_s21, 0 }
 0x2fc   : > { %1881 = vst.msk [vmem:[#allocation2 + $0x66] sm:$0x1] %vm146_vm0, %v1880_v60  ;;  %s1882_s11 = scalar_lea.vmem %s7300_s3, %s7998_s30  ;;  %p3978_p11 = scmp.lt.s32.totalorder %s1886_s21, 49 }
 0x2fd   : > { %v1883_v61 = vld [vmem:[%s1882_s11] sm:$0x1]  ;;  %p1892_p12 = scmp.gt.s32.totalorder %s6792_s28, 0  ;;  %p3983_p13 = scmp.lt.s32.totalorder %s6792_s28, 39 }
 0x2fe   : > { %1884 = vst.msk [vmem:[#allocation3 + $0x66] sm:$0x1] %vm146_vm0, %v1883_v61  ;;  %s8000_s0 = smov (!%p3978_p11, %s1888_s0), 49  ;;  %p1904_p0 = scmp.gt.s32.totalorder %s6795_s18, 0 }
 0x2ff   : > { %s8002_s28 = smov (!%p1892_p12, %s6792_s28), 0  ;;  %s1896_s16 = scalar_lea.vmem %s7299_s2, %s8000_s0 }
 0x300   : > { %s8004_s28 = smov (!%p3983_p13, %s8002_s28), 39  ;;  %v1897_v62 = vld [vmem:[%s1896_s16] sm:$0x1]  ;;  %p3988_p3 = scmp.lt.s32.totalorder %s6795_s18, 49 }
 0x301   : > { %1898 = vst.msk [vmem:[#allocation2 + $0x67] sm:$0x1] %vm146_vm0, %v1897_v62  ;;  %s1905_s30 = scalar_select %p1904_p0, %s6795_s18, 0 }
 0x302   : > { %s1899_s20 = scalar_lea.vmem %s7300_s3, %s8004_s28  ;;  %p1909_p4 = scmp.gt.s32.totalorder %s6798_s17, 0 }
 0x303   : > { %v1900_v63 = vld [vmem:[%s1899_s20] sm:$0x1]  ;;  %p3993_p5 = scmp.lt.s32.totalorder %s6798_s17, 39  ;;  %s8006_s30 = smov (!%p3988_p3, %s1905_s30), 49 }
 0x304   : > { %1901 = vst.msk [vmem:[#allocation3 + $0x67] sm:$0x1] %vm146_vm0, %v1900_v63  ;;  %s8008_s17 = smov (!%p1909_p4, %s6798_s17), 0  ;;  %s1913_s0 = scalar_lea.vmem %s7299_s2, %s8006_s30 }
 0x305   : > { %s1920_s5 = sld [smem:[#allocation5 + %s1919_s15]]  ;;  %s8010_s17 = smov (!%p3993_p5, %s8008_s17), 39  ;;  %v1914_v0 = vld [vmem:[%s1913_s0] sm:$0x1] }
 0x306   : > { %1915 = vst.msk [vmem:[#allocation2 + $0x68] sm:$0x1] %vm146_vm0, %v1914_v0  ;;  %s1925_s28 = sld [smem:[#allocation6 + %s1919_s15]]  ;;  %s1953_s18 = sadd.s32 107, %s5035_s9  ;;  %v2361_v0 = vpop.xlane.xlu0 %2360 }
 0x307   : > { %s1916_s19 = scalar_lea.vmem %s7300_s3, %s8010_s17  ;;  %s6840_s12 = sld [smem:[#allocation5 + %s1936_s13]] }
 0x308   : > { %v2322_v1 = vld [vmem:[#allocation2 + $0x60] sm:$0xff]  ;;  %s6844_s16 = sld [smem:[#allocation6 + %s1936_s13]]  ;;  %s1970_s15 = sadd.s32 108, %s5035_s9 }
 0x309   : > { %v1917_v2 = vld [vmem:[%s1916_s19] sm:$0x1]  ;;  %s6847_s30 = sld [smem:[#allocation5 + %s1953_s18]]  ;;  %s1987_s17 = sadd.s32 109, %s5035_s9 }
 0x30a   : > { %1918 = vst.msk [vmem:[#allocation3 + $0x68] sm:$0x1] %vm146_vm0, %v1917_v2  ;;  %s6850_s23 = sld [smem:[#allocation6 + %s1953_s18]]  ;;  %s2021_s19 = sadd.s32 111, %s5035_s9  ;;  %v2364_v2 = vpop.xlane.xlu0 %2363 }
 0x30b   : > { %v2338_v3 = vld [vmem:[#allocation3 + $0x60] sm:$0xff]  ;;  %p1921_p6 = scmp.gt.s32.totalorder %s1920_s5, 0  ;;  %p3998_p7 = scmp.lt.s32.totalorder %s1920_s5, 49 }
 0x30c   : > { %v2354_v4 = vmul.f32 %v2338_v3, %v2322_v1  ;;  %p1926_p8 = scmp.gt.s32.totalorder %s1925_s28, 0  ;;  %p4003_p9 = scmp.lt.s32.totalorder %s1925_s28, 39  ;;  %v2367_v1 = vpop.xlane.xlu1 %2366 }
 0x30d   : > { %s8012_s5 = smov (!%p1921_p6, %s1920_s5), 0  ;;  %p1938_p10 = scmp.gt.s32.totalorder %s6840_s12, 0 }
 0x30e   : > { %v2395_v5 = vsel %vm2358_vm1, %v2354_v4, 0.0  ;;  %s8014_s5 = smov (!%p3998_p7, %s8012_s5), 49  ;;  %s8016_s28 = smov (!%p1926_p8, %s1925_s28), 0  ;;  %v2373_v4 = vpop.xlane.xlu0 %2372 }
 0x30f   : > { %2396 = vadd.xlane.f32.xlu0 %v2395_v5  ;;  %s1930_s20 = scalar_lea.vmem %s7299_s2, %s8014_s5  ;;  %s8018_s28 = smov (!%p4003_p9, %s8016_s28), 39  ;;  %v4229_v5 = vmul.f32 -1.442695, %v2364_v2 }
 0x310   : > { %v1931_v6 = vld [vmem:[%s1930_s20] sm:$0x1]  ;;  %s1939_s14 = scalar_select %p1938_p10, %s6840_s12, 0  ;;  %v2370_v3 = vpop.xlane.xlu1 %2369 }
 0x311   : > { %1932 = vst.msk [vmem:[#allocation2 + $0x69] sm:$0x1] %vm146_vm0, %v1931_v6  ;;  %s1933_s18 = scalar_lea.vmem %s7300_s3, %s8018_s28  ;;  %p4008_p11 = scmp.lt.s32.totalorder %s6840_s12, 49  ;;  %4800 = vpow2.f32 %v4229_v5 }
 0x312   : > { %v1934_v7 = vld [vmem:[%s1933_s18] sm:$0x1]  ;;  %p1943_p12 = scmp.gt.s32.totalorder %s6844_s16, 0  ;;  %p4013_p13 = scmp.lt.s32.totalorder %s6844_s16, 39 }
 0x313   : > { %1935 = vst.msk [vmem:[#allocation3 + $0x69] sm:$0x1] %vm146_vm0, %v1934_v7  ;;  %s8020_s14 = smov (!%p4008_p11, %s1939_s14), 49  ;;  %p1955_p0 = scmp.gt.s32.totalorder %s6847_s30, 0  ;;  %v4228_v7 = vmul.f32 -1.442695, %v2361_v0 }
 0x314   : > { %s8022_s16 = smov (!%p1943_p12, %s6844_s16), 0  ;;  %s1947_s11 = scalar_lea.vmem %s7299_s2, %s8020_s14  ;;  %v2376_v6 = vpop.xlane.xlu1 %2375 }
 0x315   : > { %s8024_s16 = smov (!%p4013_p13, %s8022_s16), 39  ;;  %v1948_v8 = vld [vmem:[%s1947_s11] sm:$0x1]  ;;  %p4018_p3 = scmp.lt.s32.totalorder %s6847_s30, 49  ;;  %4802 = vpow2.f32 %v4228_v7 }
 0x316   : > { %1949 = vst.msk [vmem:[#allocation2 + $0x6a] sm:$0x1] %vm146_vm0, %v1948_v8  ;;  %s1956_s28 = scalar_select %p1955_p0, %s6847_s30, 0  ;;  %v2379_v8 = vpop.xlane.xlu0 %2378 }
 0x317   : > { %s1950_s13 = scalar_lea.vmem %s7300_s3, %s8024_s16  ;;  %p1960_p4 = scmp.gt.s32.totalorder %s6850_s23, 0 }
 0x318   : > { %v1951_v9 = vld [vmem:[%s1950_s13] sm:$0x1]  ;;  %p4023_p5 = scmp.lt.s32.totalorder %s6850_s23, 39  ;;  %s8026_s28 = smov (!%p4018_p3, %s1956_s28), 49 }
 0x319   : > { %1952 = vst.msk [vmem:[#allocation3 + $0x6a] sm:$0x1] %vm146_vm0, %v1951_v9  ;;  %s8028_s23 = smov (!%p1960_p4, %s6850_s23), 0  ;;  %s1964_s14 = scalar_lea.vmem %s7299_s2, %s8026_s28  ;;  %v4230_v9 = vmul.f32 -1.442695, %v2367_v1 }
 0x31a   : > { %s1971_s22 = sld [smem:[#allocation5 + %s1970_s15]]  ;;  %s8030_s23 = smov (!%p4023_p5, %s8028_s23), 39  ;;  %v1965_v10 = vld [vmem:[%s1964_s14] sm:$0x1] }
 0x31b   : > { %1966 = vst.msk [vmem:[#allocation2 + $0x6b] sm:$0x1] %vm146_vm0, %v1965_v10  ;;  %s1976_s16 = sld [smem:[#allocation6 + %s1970_s15]]  ;;  %s2004_s30 = sadd.s32 110, %s5035_s9  ;;  %v4231_v10 = vmul.f32 -1.442695, %v2370_v3  ;;  %4804 = vpow2.f32 %v4230_v9 }
 0x31c   : > { %s1967_s5 = scalar_lea.vmem %s7300_s3, %s8030_s23  ;;  %s1988_s10 = sld [smem:[#allocation5 + %s1987_s17]] }
 0x31d   : > { %v1968_v11 = vld [vmem:[%s1967_s5] sm:$0x1]  ;;  %s6898_s11 = sld [smem:[#allocation6 + %s1987_s17]]  ;;  %s2038_s15 = sadd.s32 112, %s5035_s9  ;;  %4806 = vpow2.f32 %v4231_v10 }
 0x31e   : > { %1969 = vst.msk [vmem:[#allocation3 + $0x6b] sm:$0x1] %vm146_vm0, %v1968_v11  ;;  %s6901_s28 = sld [smem:[#allocation5 + %s2004_s30]]  ;;  %s2072_s5 = sadd.s32 114, %s5035_s9  ;;  %v2382_v11 = vpop.xlane.xlu1 %2381 }
 0x31f   : > { %s6904_s12 = sld [smem:[#allocation6 + %s2004_s30]] }
 0x320   : > { %p1972_p6 = scmp.gt.s32.totalorder %s1971_s22, 0  ;;  %p4028_p7 = scmp.lt.s32.totalorder %s1971_s22, 49 }
 0x321   : > { %p1977_p8 = scmp.gt.s32.totalorder %s1976_s16, 0  ;;  %p4033_p9 = scmp.lt.s32.totalorder %s1976_s16, 39 }
 0x322   : > { %s8032_s22 = smov (!%p1972_p6, %s1971_s22), 0  ;;  %p1989_p10 = scmp.gt.s32.totalorder %s1988_s10, 0 }
 0x323   : > { %s8034_s22 = smov (!%p4028_p7, %s8032_s22), 49  ;;  %s8036_s16 = smov (!%p1977_p8, %s1976_s16), 0 }
 0x324   : > { %s1981_s13 = scalar_lea.vmem %s7299_s2, %s8034_s22  ;;  %s8038_s16 = smov (!%p4033_p9, %s8036_s16), 39 }
 0x325   : > { %v1982_v12 = vld [vmem:[%s1981_s13] sm:$0x1]  ;;  %s1990_s21 = scalar_select %p1989_p10, %s1988_s10, 0 }
 0x326   : > { %1983 = vst.msk [vmem:[#allocation2 + $0x6c] sm:$0x1] %vm146_vm0, %v1982_v12  ;;  %s1984_s30 = scalar_lea.vmem %s7300_s3, %s8038_s16  ;;  %p4038_p11 = scmp.lt.s32.totalorder %s1988_s10, 49  ;;  %v2385_v12 = vpop.xlane.xlu0 %2384 }
 0x327   : > { %v1985_v13 = vld [vmem:[%s1984_s30] sm:$0x1]  ;;  %p1994_p12 = scmp.gt.s32.totalorder %s6898_s11, 0  ;;  %p4043_p13 = scmp.lt.s32.totalorder %s6898_s11, 39 }
 0x328   : > { %1986 = vst.msk [vmem:[#allocation3 + $0x6c] sm:$0x1] %vm146_vm0, %v1985_v13  ;;  %s8040_s21 = smov (!%p4038_p11, %s1990_s21), 49  ;;  %p2006_p0 = scmp.gt.s32.totalorder %s6901_s28, 0  ;;  %v4232_v13 = vmul.f32 -1.442695, %v2373_v4 }
 0x329   : > { %s8042_s11 = smov (!%p1994_p12, %s6898_s11), 0  ;;  %s1998_s18 = scalar_lea.vmem %s7299_s2, %s8040_s21 }
 0x32a   : > { %s8044_s11 = smov (!%p4043_p13, %s8042_s11), 39  ;;  %v1999_v14 = vld [vmem:[%s1998_s18] sm:$0x1]  ;;  %p4048_p3 = scmp.lt.s32.totalorder %s6901_s28, 49  ;;  %4808 = vpow2.f32 %v4232_v13 }
 0x32b   : > { %2000 = vst.msk [vmem:[#allocation2 + $0x6d] sm:$0x1] %vm146_vm0, %v1999_v14  ;;  %s2007_s16 = scalar_select %p2006_p0, %s6901_s28, 0  ;;  %v4233_v14 = vmul.f32 -1.442695, %v2376_v6 }
 0x32c   : > { %s2001_s23 = scalar_lea.vmem %s7300_s3, %s8044_s11  ;;  %p2011_p4 = scmp.gt.s32.totalorder %s6904_s12, 0 }
 0x32d   : > { %v2002_v15 = vld [vmem:[%s2001_s23] sm:$0x1]  ;;  %p4053_p5 = scmp.lt.s32.totalorder %s6904_s12, 39  ;;  %s8046_s16 = smov (!%p4048_p3, %s2007_s16), 49  ;;  %4810 = vpow2.f32 %v4233_v14 }
 0x32e   : > { %2003 = vst.msk [vmem:[#allocation3 + $0x6d] sm:$0x1] %vm146_vm0, %v2002_v15  ;;  %s8048_s12 = smov (!%p2011_p4, %s6904_s12), 0  ;;  %s2015_s21 = scalar_lea.vmem %s7299_s2, %s8046_s16  ;;  %v2388_v15 = vpop.xlane.xlu1 %2387 }
 0x32f   : > { %s2022_s20 = sld [smem:[#allocation5 + %s2021_s19]]  ;;  %s8050_s12 = smov (!%p4053_p5, %s8048_s12), 39  ;;  %v2016_v16 = vld [vmem:[%s2015_s21] sm:$0x1] }
 0x330   : > { %2017 = vst.msk [vmem:[#allocation2 + $0x6e] sm:$0x1] %vm146_vm0, %v2016_v16  ;;  %s2027_s11 = sld [smem:[#allocation6 + %s2021_s19]]  ;;  %s2055_s28 = sadd.s32 113, %s5035_s9  ;;  %v4234_v16 = vmul.f32 -1.442695, %v2379_v8 }
 0x331   : > { %s2018_s22 = scalar_lea.vmem %s7300_s3, %s8050_s12  ;;  %s2039_s0 = sld [smem:[#allocation5 + %s2038_s15]] }
 0x332   : > { %v2019_v17 = vld [vmem:[%s2018_s22] sm:$0x1]  ;;  %s6948_s18 = sld [smem:[#allocation6 + %s2038_s15]]  ;;  %s2089_s19 = sadd.s32 115, %s5035_s9  ;;  %4812 = vpow2.f32 %v4234_v16 }
 0x333   : > { %2020 = vst.msk [vmem:[#allocation3 + $0x6e] sm:$0x1] %vm146_vm0, %v2019_v17  ;;  %s6951_s16 = sld [smem:[#allocation5 + %s2055_s28]]  ;;  %s2106_s13 = sadd.s32 116, %s5035_s9  ;;  %v2391_v17 = vpop.xlane.xlu0 %2390 }
 0x334   : > { %s6954_s10 = sld [smem:[#allocation6 + %s2055_s28]]  ;;  %s2123_s22 = sadd.s32 117, %s5035_s9 }
 0x335   : > { %p2023_p6 = scmp.gt.s32.totalorder %s2022_s20, 0  ;;  %p4058_p7 = scmp.lt.s32.totalorder %s2022_s20, 49 }
 0x336   : > { %p2028_p8 = scmp.gt.s32.totalorder %s2027_s11, 0  ;;  %p4063_p9 = scmp.lt.s32.totalorder %s2027_s11, 39 }
 0x337   : > { %s8052_s20 = smov (!%p2023_p6, %s2022_s20), 0  ;;  %p2040_p10 = scmp.gt.s32.totalorder %s2039_s0, 0 }
 0x338   : > { %s8054_s20 = smov (!%p4058_p7, %s8052_s20), 49  ;;  %s8056_s11 = smov (!%p2028_p8, %s2027_s11), 0 }
 0x339   : > { %s2032_s23 = scalar_lea.vmem %s7299_s2, %s8054_s20  ;;  %s8058_s11 = smov (!%p4063_p9, %s8056_s11), 39 }
 0x33a   : > { %v2033_v18 = vld [vmem:[%s2032_s23] sm:$0x1]  ;;  %s2041_s17 = scalar_select %p2040_p10, %s2039_s0, 0 }
 0x33b   : > { %2034 = vst.msk [vmem:[#allocation2 + $0x6f] sm:$0x1] %vm146_vm0, %v2033_v18  ;;  %s2035_s28 = scalar_lea.vmem %s7300_s3, %s8058_s11  ;;  %p4068_p11 = scmp.lt.s32.totalorder %s2039_s0, 49  ;;  %v4235_v18 = vmul.f32 -1.442695, %v2382_v11 }
 0x33c   : > { %v2036_v19 = vld [vmem:[%s2035_s28] sm:$0x1]  ;;  %p2045_p12 = scmp.gt.s32.totalorder %s6948_s18, 0  ;;  %p4073_p13 = scmp.lt.s32.totalorder %s6948_s18, 39 }
 0x33d   : > { %2037 = vst.msk [vmem:[#allocation3 + $0x6f] sm:$0x1] %vm146_vm0, %v2036_v19  ;;  %s8060_s17 = smov (!%p4068_p11, %s2041_s17), 49  ;;  %p2057_p0 = scmp.gt.s32.totalorder %s6951_s16, 0  ;;  %v4801_v19 = vpop.eup %4800  ;;  %4814 = vpow2.f32 %v4235_v18 }
 0x33e   : > { %s8062_s18 = smov (!%p2045_p12, %s6948_s18), 0  ;;  %s2049_s30 = scalar_lea.vmem %s7299_s2, %s8060_s17 }
 0x33f   : > { %s8064_s18 = smov (!%p4073_p13, %s8062_s18), 39  ;;  %v2050_v20 = vld [vmem:[%s2049_s30] sm:$0x1]  ;;  %p4078_p3 = scmp.lt.s32.totalorder %s6951_s16, 49 }
 0x340   : > { %2051 = vst.msk [vmem:[#allocation2 + $0x70] sm:$0x1] %vm146_vm0, %v2050_v20  ;;  %s2058_s11 = scalar_select %p2057_p0, %s6951_s16, 0  ;;  %v4803_v20 = vpop.eup %4802 }
 0x341   : > { %s2052_s12 = scalar_lea.vmem %s7300_s3, %s8064_s18  ;;  %p2062_p4 = scmp.gt.s32.totalorder %s6954_s10, 0 }
 0x342   : > { %v2323_v21 = vld [vmem:[#allocation2 + $0x68] sm:$0xff]  ;;  %v2053_v22 = vld [vmem:[%s2052_s12] sm:$0x1]  ;;  %p4083_p5 = scmp.lt.s32.totalorder %s6954_s10, 39  ;;  %s8066_s11 = smov (!%p4078_p3, %s2058_s11), 49 }
 0x343   : > { %2054 = vst.msk [vmem:[#allocation3 + $0x70] sm:$0x1] %vm146_vm0, %v2053_v22  ;;  %s8068_s10 = smov (!%p2062_p4, %s6954_s10), 0  ;;  %s2066_s17 = scalar_lea.vmem %s7299_s2, %s8066_s11 }
 0x344   : > { %v2339_v23 = vld [vmem:[#allocation3 + $0x68] sm:$0xff]  ;;  %s2073_s18 = sld [smem:[#allocation5 + %s2072_s5]]  ;;  %s8070_s10 = smov (!%p4083_p5, %s8068_s10), 39  ;;  %v2067_v26 = vld [vmem:[%s2066_s17] sm:$0x1] }
 0x345   : > { %v2355_v24 = vmul.f32 %v2339_v23, %v2323_v21  ;;  %2068 = vst.msk [vmem:[#allocation2 + $0x71] sm:$0x1] %vm146_vm0, %v2067_v26  ;;  %s2078_s16 = sld [smem:[#allocation6 + %s2072_s5]]  ;;  %s2069_s20 = scalar_lea.vmem %s7300_s3, %s8070_s10  ;;  %v4236_v21 = vmul.f32 -1.442695, %v2385_v12 }
 0x346   : > { %s2090_s14 = sld [smem:[#allocation5 + %s2089_s19]]  ;;  %v2070_v27 = vld [vmem:[%s2069_s20] sm:$0x1]  ;;  %s2140_s5 = sadd.s32 118, %s5035_s9  ;;  %v4237_v23 = vmul.f32 -1.442695, %v2388_v15 }
 0x347   : > { %v2398_v25 = vsel %vm2358_vm1, %v2355_v24, 0.0  ;;  %s6999_s30 = sld [smem:[#allocation6 + %s2089_s19]]  ;;  %2071 = vst.msk [vmem:[#allocation3 + $0x71] sm:$0x1] %vm146_vm0, %v2070_v27  ;;  %s2174_s20 = sadd.s32 120, %s5035_s9  ;;  %v4805_v24 = vpop.eup %4804  ;;  %v2455_v27 = vadd.f32 1.0, %v4803_v20  ;;  %4816 = vpow2.f32 %v4236_v21 }
 0x348   : > { %2399 = vadd.xlane.f32.xlu1 %v2398_v25  ;;  %s7002_s11 = sld [smem:[#allocation5 + %s2106_s13]]  ;;  %v2456_v25 = vadd.f32 1.0, %v4801_v19  ;;  %4818 = vpow2.f32 %v4237_v23 }
 0x349   : > { %s7005_s0 = sld [smem:[#allocation6 + %s2106_s13]] }
 0x34a   : > { %p2074_p6 = scmp.gt.s32.totalorder %s2073_s18, 0  ;;  %p4088_p7 = scmp.lt.s32.totalorder %s2073_s18, 49  ;;  %4820 = vrcp.f32 %v2456_v25 }
 0x34b   : > { %p2079_p8 = scmp.gt.s32.totalorder %s2078_s16, 0  ;;  %p4093_p9 = scmp.lt.s32.totalorder %s2078_s16, 39  ;;  %4822 = vrcp.f32 %v2455_v27 }
 0x34c   : > { %s8072_s18 = smov (!%p2074_p6, %s2073_s18), 0  ;;  %p2091_p10 = scmp.gt.s32.totalorder %s2090_s14, 0 }
 0x34d   : > { %s8074_s18 = smov (!%p4088_p7, %s8072_s18), 49  ;;  %s8076_s16 = smov (!%p2079_p8, %s2078_s16), 0 }
 0x34e   : > { %s2083_s12 = scalar_lea.vmem %s7299_s2, %s8074_s18  ;;  %s8078_s16 = smov (!%p4093_p9, %s8076_s16), 39 }
 0x34f   : > { %v2084_v28 = vld [vmem:[%s2083_s12] sm:$0x1]  ;;  %s2092_s15 = scalar_select %p2091_p10, %s2090_s14, 0 }
 0x350   : > { %2085 = vst.msk [vmem:[#allocation2 + $0x72] sm:$0x1] %vm146_vm0, %v2084_v28  ;;  %s2086_s13 = scalar_lea.vmem %s7300_s3, %s8078_s16  ;;  %p4098_p11 = scmp.lt.s32.totalorder %s2090_s14, 49  ;;  %v4807_v28 = vpop.eup %4806 }
 0x351   : > { %v2087_v29 = vld [vmem:[%s2086_s13] sm:$0x1]  ;;  %p2096_p12 = scmp.gt.s32.totalorder %s6999_s30, 0  ;;  %p4103_p13 = scmp.lt.s32.totalorder %s6999_s30, 39 }
 0x352   : > { %2088 = vst.msk [vmem:[#allocation3 + $0x72] sm:$0x1] %vm146_vm0, %v2087_v29  ;;  %s8080_s15 = smov (!%p4098_p11, %s2092_s15), 49  ;;  %p2108_p0 = scmp.gt.s32.totalorder %s7002_s11, 0  ;;  %v4238_v29 = vmul.f32 -1.442695, %v2391_v17 }
 0x353   : > { %s8082_s30 = smov (!%p2096_p12, %s6999_s30), 0  ;;  %s2100_s28 = scalar_lea.vmem %s7299_s2, %s8080_s15 }
 0x354   : > { %s8084_s30 = smov (!%p4103_p13, %s8082_s30), 39  ;;  %v2101_v30 = vld [vmem:[%s2100_s28] sm:$0x1]  ;;  %p4108_p3 = scmp.lt.s32.totalorder %s7002_s11, 49  ;;  %4824 = vpow2.f32 %v4238_v29 }
 0x355   : > { %2102 = vst.msk [vmem:[#allocation2 + $0x73] sm:$0x1] %vm146_vm0, %v2101_v30  ;;  %s2109_s16 = scalar_select %p2108_p0, %s7002_s11, 0  ;;  %v2457_v30 = vadd.f32 1.0, %v4805_v24 }
 0x356   : > { %s2103_s10 = scalar_lea.vmem %s7300_s3, %s8084_s30  ;;  %p2113_p4 = scmp.gt.s32.totalorder %s7005_s0, 0 }
 0x357   : > { %v2104_v31 = vld [vmem:[%s2103_s10] sm:$0x1]  ;;  %p4113_p5 = scmp.lt.s32.totalorder %s7005_s0, 39  ;;  %s8086_s16 = smov (!%p4108_p3, %s2109_s16), 49  ;;  %4826 = vrcp.f32 %v2457_v30 }
 0x358   : > { %2105 = vst.msk [vmem:[#allocation3 + $0x73] sm:$0x1] %vm146_vm0, %v2104_v31  ;;  %s8088_s0 = smov (!%p2113_p4, %s7005_s0), 0  ;;  %s2117_s15 = scalar_lea.vmem %s7299_s2, %s8086_s16 }
 0x359   : > { %s2124_s23 = sld [smem:[#allocation5 + %s2123_s22]]  ;;  %s8090_s0 = smov (!%p4113_p5, %s8088_s0), 39  ;;  %v2118_v32 = vld [vmem:[%s2117_s15] sm:$0x1] }
 0x35a   : > { %2119 = vst.msk [vmem:[#allocation2 + $0x74] sm:$0x1] %vm146_vm0, %v2118_v32  ;;  %s2129_s30 = sld [smem:[#allocation6 + %s2123_s22]]  ;;  %s2157_s11 = sadd.s32 119, %s5035_s9 }
 0x35b   : > { %s2120_s18 = scalar_lea.vmem %s7300_s3, %s8090_s0  ;;  %s2141_s21 = sld [smem:[#allocation5 + %s2140_s5]] }
 0x35c   : > { %v2121_v33 = vld [vmem:[%s2120_s18] sm:$0x1]  ;;  %s7049_s28 = sld [smem:[#allocation6 + %s2140_s5]]  ;;  %s2191_s22 = sadd.s32 121, %s5035_s9 }
 0x35d   : > { %2122 = vst.msk [vmem:[#allocation3 + $0x74] sm:$0x1] %vm146_vm0, %v2121_v33  ;;  %s7052_s16 = sld [smem:[#allocation5 + %s2157_s11]]  ;;  %s2225_s18 = sadd.s32 123, %s5035_s9  ;;  %v2458_v33 = vadd.f32 1.0, %v4807_v28 }
 0x35e   : > { %s7055_s14 = sld [smem:[#allocation6 + %s2157_s11]]  ;;  %v2394_v22 = vpop.xlane.xlu1 %2393 }
 0x35f   : > { %p2125_p6 = scmp.gt.s32.totalorder %s2124_s23, 0  ;;  %p4118_p7 = scmp.lt.s32.totalorder %s2124_s23, 49  ;;  %v4239_v31 = vmul.f32 -1.442695, %v2394_v22 }
 0x360   : > { %p2130_p8 = scmp.gt.s32.totalorder %s2129_s30, 0  ;;  %p4123_p9 = scmp.lt.s32.totalorder %s2129_s30, 39 }
 0x361   : > { %s8092_s23 = smov (!%p2125_p6, %s2124_s23), 0  ;;  %p2142_p10 = scmp.gt.s32.totalorder %s2141_s21, 0  ;;  %4828 = vpow2.f32 %v4239_v31 }
 0x362   : > { %s8094_s23 = smov (!%p4118_p7, %s8092_s23), 49  ;;  %s8096_s30 = smov (!%p2130_p8, %s2129_s30), 0  ;;  %4830 = vrcp.f32 %v2458_v33 }
 0x363   : > { %s2134_s10 = scalar_lea.vmem %s7299_s2, %s8094_s23  ;;  %s8098_s30 = smov (!%p4123_p9, %s8096_s30), 39 }
 0x364   : > { %v2135_v34 = vld [vmem:[%s2134_s10] sm:$0x1]  ;;  %s2143_s19 = scalar_select %p2142_p10, %s2141_s21, 0 }
 0x365   : > { %2136 = vst.msk [vmem:[#allocation2 + $0x75] sm:$0x1] %vm146_vm0, %v2135_v34  ;;  %s2137_s11 = scalar_lea.vmem %s7300_s3, %s8098_s30  ;;  %p4128_p11 = scmp.lt.s32.totalorder %s2141_s21, 49  ;;  %v4809_v34 = vpop.eup %4808 }
 0x366   : > { %v2138_v35 = vld [vmem:[%s2137_s11] sm:$0x1]  ;;  %p2147_p12 = scmp.gt.s32.totalorder %s7049_s28, 0  ;;  %p4133_p13 = scmp.lt.s32.totalorder %s7049_s28, 39 }
 0x367   : > { %2139 = vst.msk [vmem:[#allocation3 + $0x75] sm:$0x1] %vm146_vm0, %v2138_v35  ;;  %s8100_s19 = smov (!%p4128_p11, %s2143_s19), 49  ;;  %p2159_p0 = scmp.gt.s32.totalorder %s7052_s16, 0 }
 0x368   : > { %s8102_s28 = smov (!%p2147_p12, %s7049_s28), 0  ;;  %s2151_s13 = scalar_lea.vmem %s7299_s2, %s8100_s19 }
 0x369   : > { %s8104_s28 = smov (!%p4133_p13, %s8102_s28), 39  ;;  %v2152_v36 = vld [vmem:[%s2151_s13] sm:$0x1]  ;;  %p4138_p3 = scmp.lt.s32.totalorder %s7052_s16, 49 }
 0x36a   : > { %2153 = vst.msk [vmem:[#allocation2 + $0x76] sm:$0x1] %vm146_vm0, %v2152_v36  ;;  %s2160_s30 = scalar_select %p2159_p0, %s7052_s16, 0  ;;  %v2519_v36 = vlaneseq }
 0x36b   : > { %s2154_s0 = scalar_lea.vmem %s7300_s3, %s8104_s28  ;;  %p2164_p4 = scmp.gt.s32.totalorder %s7055_s14, 0 }
 0x36c   : > { %v2155_v37 = vld [vmem:[%s2154_s0] sm:$0x1]  ;;  %p4143_p5 = scmp.lt.s32.totalorder %s7055_s14, 39  ;;  %s8106_s30 = smov (!%p4138_p3, %s2160_s30), 49 }
 0x36d   : > { %2156 = vst.msk [vmem:[#allocation3 + $0x76] sm:$0x1] %vm146_vm0, %v2155_v37  ;;  %s8108_s14 = smov (!%p2164_p4, %s7055_s14), 0  ;;  %s2168_s19 = scalar_lea.vmem %s7299_s2, %s8106_s30 }
 0x36e   : > { %s2175_s12 = sld [smem:[#allocation5 + %s2174_s20]]  ;;  %s8110_s14 = smov (!%p4143_p5, %s8108_s14), 39  ;;  %v2169_v38 = vld [vmem:[%s2168_s19] sm:$0x1] }
 0x36f   : > { %2170 = vst.msk [vmem:[#allocation2 + $0x77] sm:$0x1] %vm146_vm0, %v2169_v38  ;;  %s2180_s28 = sld [smem:[#allocation6 + %s2174_s20]]  ;;  %s2208_s16 = sadd.s32 122, %s5035_s9 }
 0x370   : > { %s2171_s23 = scalar_lea.vmem %s7300_s3, %s8110_s14  ;;  %s7097_s17 = sld [smem:[#allocation5 + %s2191_s22]] }
 0x371   : > { %v2172_v39 = vld [vmem:[%s2171_s23] sm:$0x1]  ;;  %s7101_s13 = sld [smem:[#allocation6 + %s2191_s22]]  ;;  %s2242_s21 = sadd.s32 124, %s5035_s9 }
 0x372   : > { %2173 = vst.msk [vmem:[#allocation3 + $0x77] sm:$0x1] %vm146_vm0, %v2172_v39  ;;  %s7104_s30 = sld [smem:[#allocation5 + %s2208_s16]]  ;;  %s2276_s23 = sadd.s32 126, %s5035_s9  ;;  %v4811_v39 = vpop.eup %4810 }
 0x373   : > { %s7107_s20 = sld [smem:[#allocation6 + %s2208_s16]] }
 0x374   : > { %p2176_p6 = scmp.gt.s32.totalorder %s2175_s12, 0  ;;  %p4148_p7 = scmp.lt.s32.totalorder %s2175_s12, 49 }
 0x375   : > { %p2181_p8 = scmp.gt.s32.totalorder %s2180_s28, 0  ;;  %p4153_p9 = scmp.lt.s32.totalorder %s2180_s28, 39 }
 0x376   : > { %s8112_s12 = smov (!%p2176_p6, %s2175_s12), 0  ;;  %v2324_v40 = vld [vmem:[#allocation2 + $0x70] sm:$0xff]  ;;  %p2193_p10 = scmp.gt.s32.totalorder %s7097_s17, 0 }
 0x377   : > { %s8114_s12 = smov (!%p4148_p7, %s8112_s12), 49  ;;  %s8116_s28 = smov (!%p2181_p8, %s2180_s28), 0 }
 0x378   : > { %s2185_s0 = scalar_lea.vmem %s7299_s2, %s8114_s12  ;;  %s8118_s28 = smov (!%p4153_p9, %s8116_s28), 39 }
 0x379   : > { %v2340_v41 = vld [vmem:[#allocation3 + $0x70] sm:$0xff]  ;;  %v2186_v43 = vld [vmem:[%s2185_s0] sm:$0x1]  ;;  %s2194_s5 = scalar_select %p2193_p10, %s7097_s17, 0 }
 0x37a   : > { %v2356_v42 = vmul.f32 %v2340_v41, %v2324_v40  ;;  %2187 = vst.msk [vmem:[#allocation2 + $0x78] sm:$0x1] %vm146_vm0, %v2186_v43  ;;  %s2188_s16 = scalar_lea.vmem %s7300_s3, %s8118_s28  ;;  %p4158_p11 = scmp.lt.s32.totalorder %s7097_s17, 49  ;;  %v2459_v40 = vadd.f32 1.0, %v4809_v34  ;;  %v4813_v41 = vpop.eup %4812  ;;  %v7222_v43 = vand.u32 127, %v2519_v36 }
 0x37b   : > { %v2189_v45 = vld [vmem:[%s2188_s16] sm:$0x1]  ;;  %p2198_p12 = scmp.gt.s32.totalorder %s7101_s13, 0  ;;  %p4163_p13 = scmp.lt.s32.totalorder %s7101_s13, 39 }
 0x37c   : > { %v2401_v44 = vsel %vm2358_vm1, %v2356_v42, 0.0  ;;  %2190 = vst.msk [vmem:[#allocation3 + $0x78] sm:$0x1] %vm146_vm0, %v2189_v45  ;;  %s8120_s5 = smov (!%p4158_p11, %s2194_s5), 49  ;;  %p2210_p0 = scmp.gt.s32.totalorder %s7104_s30, 0  ;;  %v2525_v45 = vadd.s32 4294967288, %v7222_v43 }
 0x37d   : > { %2402 = vadd.xlane.f32.xlu0 %v2401_v44  ;;  %s8122_s13 = smov (!%p2198_p12, %s7101_s13), 0  ;;  %s2202_s11 = scalar_lea.vmem %s7299_s2, %s8120_s5  ;;  %v2460_v44 = vadd.f32 1.0, %v4811_v39  ;;  %v2546_v1 = vadd.s32 4294967264, %v7222_v43  ;;  %v2553_v11 = vadd.s32 4294967256, %v7222_v43  ;;  %v2560_v15 = vadd.s32 4294967248, %v7222_v43 }
 0x37e   : > { %s8124_s13 = smov (!%p4163_p13, %s8122_s13), 39  ;;  %v2203_v46 = vld [vmem:[%s2202_s11] sm:$0x1]  ;;  %p4168_p3 = scmp.lt.s32.totalorder %s7104_s30, 49  ;;  %v2567_v22 = vadd.s32 4294967240, %v7222_v43  ;;  %v2574_v30 = vadd.s32 4294967232, %v7222_v43 }
 0x37f   : > { %2204 = vst.msk [vmem:[#allocation2 + $0x79] sm:$0x1] %vm146_vm0, %v2203_v46  ;;  %s2211_s28 = scalar_select %p2210_p0, %s7104_s30, 0  ;;  %v4815_v46 = vpop.eup %4814 }
 0x380   : > { %s2205_s14 = scalar_lea.vmem %s7300_s3, %s8124_s13  ;;  %p2215_p4 = scmp.gt.s32.totalorder %s7107_s20, 0 }
 0x381   : > { %v2206_v47 = vld [vmem:[%s2205_s14] sm:$0x1]  ;;  %p4173_p5 = scmp.lt.s32.totalorder %s7107_s20, 39  ;;  %s8126_s28 = smov (!%p4168_p3, %s2211_s28), 49 }
 0x382   : > { %2207 = vst.msk [vmem:[#allocation3 + $0x79] sm:$0x1] %vm146_vm0, %v2206_v47  ;;  %s8128_s20 = smov (!%p2215_p4, %s7107_s20), 0  ;;  %s2219_s5 = scalar_lea.vmem %s7299_s2, %s8126_s28  ;;  %v2461_v47 = vadd.f32 1.0, %v4813_v41 }
 0x383   : > { %s2226_s10 = sld [smem:[#allocation5 + %s2225_s18]]  ;;  %s8130_s20 = smov (!%p4173_p5, %s8128_s20), 39  ;;  %v2220_v48 = vld [vmem:[%s2219_s5] sm:$0x1] }
 0x384   : > { %2221 = vst.msk [vmem:[#allocation2 + $0x7a] sm:$0x1] %vm146_vm0, %v2220_v48  ;;  %s2231_s13 = sld [smem:[#allocation6 + %s2225_s18]]  ;;  %s2259_s30 = sadd.s32 125, %s5035_s9  ;;  %v7225_v48 = vshrl.u32 %v2519_v36, 7  ;;  %v2581_v36 = vadd.s32 4294967224, %v7222_v43 }
 0x385   : > { %s2222_s12 = scalar_lea.vmem %s7300_s3, %s8130_s20  ;;  %s2243_s15 = sld [smem:[#allocation5 + %s2242_s21]] }
 0x386   : > { %v2223_v49 = vld [vmem:[%s2222_s12] sm:$0x1]  ;;  %s7155_s11 = sld [smem:[#allocation6 + %s2242_s21]]  ;;  %s2293_s18 = sadd.s32 127, %s5035_s9  ;;  %v2549_v14 = vsub.s32 %v2546_v1, %v7225_v48  ;;  %v2556_v21 = vsub.s32 %v2553_v11, %v7225_v48 }
 0x387   : > { %2224 = vst.msk [vmem:[#allocation3 + $0x7a] sm:$0x1] %vm146_vm0, %v2223_v49  ;;  %s7158_s28 = sld [smem:[#allocation5 + %s2259_s30]]  ;;  %v4817_v49 = vpop.eup %4816 }
 0x388   : > { %s7161_s17 = sld [smem:[#allocation6 + %s2259_s30]] }
 0x389   : > { %p2227_p6 = scmp.gt.s32.totalorder %s2226_s10, 0  ;;  %p4178_p7 = scmp.lt.s32.totalorder %s2226_s10, 49 }
 0x38a   : > { %p2232_p8 = scmp.gt.s32.totalorder %s2231_s13, 0  ;;  %p4183_p9 = scmp.lt.s32.totalorder %s2231_s13, 39 }
 0x38b   : > { %s8132_s10 = smov (!%p2227_p6, %s2226_s10), 0  ;;  %p2244_p10 = scmp.gt.s32.totalorder %s2243_s15, 0 }
 0x38c   : > { %s8134_s10 = smov (!%p4178_p7, %s8132_s10), 49  ;;  %s8136_s13 = smov (!%p2232_p8, %s2231_s13), 0 }
 0x38d   : > { %s2236_s14 = scalar_lea.vmem %s7299_s2, %s8134_s10  ;;  %s8138_s13 = smov (!%p4183_p9, %s8136_s13), 39 }
 0x38e   : > { %v2237_v50 = vld [vmem:[%s2236_s14] sm:$0x1]  ;;  %s2245_s22 = scalar_select %p2244_p10, %s2243_s15, 0 }
 0x38f   : > { %2238 = vst.msk [vmem:[#allocation2 + $0x7b] sm:$0x1] %vm146_vm0, %v2237_v50  ;;  %s2239_s30 = scalar_lea.vmem %s7300_s3, %s8138_s13  ;;  %p4188_p11 = scmp.lt.s32.totalorder %s2243_s15, 49  ;;  %v4819_v50 = vpop.eup %4818 }
 0x390   : > { %v2240_v51 = vld [vmem:[%s2239_s30] sm:$0x1]  ;;  %p2249_p12 = scmp.gt.s32.totalorder %s7155_s11, 0  ;;  %p4193_p13 = scmp.lt.s32.totalorder %s7155_s11, 39 }
 0x391   : > { %2241 = vst.msk [vmem:[#allocation3 + $0x7b] sm:$0x1] %vm146_vm0, %v2240_v51  ;;  %s8140_s22 = smov (!%p4188_p11, %s2245_s22), 49  ;;  %p2261_p0 = scmp.gt.s32.totalorder %s7158_s28, 0  ;;  %v2462_v51 = vadd.f32 1.0, %v4815_v46  ;;  %v2595_v46 = vadd.s32 4294967208, %v7222_v43 }
 0x392   : > { %s8142_s11 = smov (!%p2249_p12, %s7155_s11), 0  ;;  %s2253_s16 = scalar_lea.vmem %s7299_s2, %s8140_s22 }
 0x393   : > { %s8144_s11 = smov (!%p4193_p13, %s8142_s11), 39  ;;  %v2254_v52 = vld [vmem:[%s2253_s16] sm:$0x1]  ;;  %p4198_p3 = scmp.lt.s32.totalorder %s7158_s28, 49 }
 0x394   : > { %2255 = vst.msk [vmem:[#allocation2 + $0x7c] sm:$0x1] %vm146_vm0, %v2254_v52  ;;  %s2262_s13 = scalar_select %p2261_p0, %s7158_s28, 0  ;;  %v2528_v52 = vsub.s32 %v2525_v45, %v7225_v48  ;;  %v2584_v45 = vsub.s32 %v2581_v36, %v7225_v48 }
 0x395   : > { %s2256_s20 = scalar_lea.vmem %s7300_s3, %s8144_s11  ;;  %p2266_p4 = scmp.gt.s32.totalorder %s7161_s17, 0 }
 0x396   : > { %v2257_v53 = vld [vmem:[%s2256_s20] sm:$0x1]  ;;  %p4203_p5 = scmp.lt.s32.totalorder %s7161_s17, 39  ;;  %s8146_s13 = smov (!%p4198_p3, %s2262_s13), 49 }
 0x397   : > { %2258 = vst.msk [vmem:[#allocation3 + $0x7c] sm:$0x1] %vm146_vm0, %v2257_v53  ;;  %s8148_s17 = smov (!%p2266_p4, %s7161_s17), 0  ;;  %s2270_s22 = scalar_lea.vmem %s7299_s2, %s8146_s13  ;;  %v4821_v53 = vpop.eup %4820 }
 0x398   : > { %s2277_s0 = sld [smem:[#allocation5 + %s2276_s23]]  ;;  %s8150_s17 = smov (!%p4203_p5, %s8148_s17), 39  ;;  %v2271_v54 = vld [vmem:[%s2270_s22] sm:$0x1]  ;;  %v2397_v26 = vpop.xlane.xlu0 %2396 }
 0x399   : > { %2272 = vst.msk [vmem:[#allocation2 + $0x7d] sm:$0x1] %vm146_vm0, %v2271_v54  ;;  %s2282_s11 = sld [smem:[#allocation6 + %s2276_s23]]  ;;  %s2273_s30 = scalar_lea.vmem %s7300_s3, %s8150_s17  ;;  %v4240_v35 = vmul.f32 -1.442695, %v2397_v26  ;;  %v2532_v54 = vadd.s32 4294967280, %v7222_v43  ;;  %v2563_v26 = vsub.s32 %v2560_v15, %v7225_v48 }
 0x39a   : > { %v2274_v55 = vld [vmem:[%s2273_s30] sm:$0x1]  ;;  %s2294_s10 = sld [smem:[#allocation5 + %s2293_s18]]  ;;  %s4244_s28 = sshll.u32 %s5007_s27, 4 }
 0x39b   : > { %2275 = vst.msk [vmem:[#allocation3 + $0x7d] sm:$0x1] %vm146_vm0, %v2274_v55  ;;  %s2299_s19 = sld [smem:[#allocation6 + %s2293_s18]]  ;;  %4832 = vpow2.f32 %v4240_v35  ;;  %v4823_v55 = vpop.eup %4822  ;;  %v2535_v0 = vsub.s32 %v2532_v54, %v7225_v48  ;;  %s7263_s16 = scalar_lea.hbm %s7301_s4, %s4244_s28 }
 0x39c   : > { %s4954_s27 = smov [#allocation7]  }
 0x39e   : > { %p2278_p6 = scmp.gt.s32.totalorder %s2277_s0, 0  ;;  %p4208_p7 = scmp.lt.s32.totalorder %s2277_s0, 49 }
 0x39f   : > { %p2283_p8 = scmp.gt.s32.totalorder %s2282_s11, 0  ;;  %p4213_p9 = scmp.lt.s32.totalorder %s2282_s11, 39 }
 0x3a0   : > { %s8152_s0 = smov (!%p2278_p6, %s2277_s0), 0  ;;  %p2295_p10 = scmp.gt.s32.totalorder %s2294_s10, 0 }
 0x3a1   : > { %s8154_s0 = smov (!%p4208_p7, %s8152_s0), 49  ;;  %s8156_s11 = smov (!%p2283_p8, %s2282_s11), 0 }
 0x3a2   : > { %s2287_s13 = scalar_lea.vmem %s7299_s2, %s8154_s0  ;;  %s8158_s11 = smov (!%p4213_p9, %s8156_s11), 39 }
 0x3a3   : > { %v2288_v56 = vld [vmem:[%s2287_s13] sm:$0x1]  ;;  %s2296_s17 = scalar_select %p2295_p10, %s2294_s10, 0 }
 0x3a4   : > { %2289 = vst.msk [vmem:[#allocation2 + $0x7e] sm:$0x1] %vm146_vm0, %v2288_v56  ;;  %s2290_s9 = scalar_lea.vmem %s7300_s3, %s8158_s11  ;;  %p4218_p11 = scmp.lt.s32.totalorder %s2294_s10, 49  ;;  %v2463_v56 = vadd.f32 1.0, %v4817_v49 }
 0x3a5   : > { %v2291_v57 = vld [vmem:[%s2290_s9] sm:$0x1]  ;;  %p2300_p12 = scmp.gt.s32.totalorder %s2299_s19, 0  ;;  %p4223_p13 = scmp.lt.s32.totalorder %s2299_s19, 39 }
 0x3a6   : > { %2292 = vst.msk [vmem:[#allocation3 + $0x7e] sm:$0x1] %vm146_vm0, %v2291_v57  ;;  %s8160_s17 = smov (!%p4218_p11, %s2296_s17), 49  ;;  %v2523_v57 = vsub.s32 %v7222_v43, %v7225_v48  ;;  %s131_s11 = sand.u32 1, %s4942_s24  }
 0x3a7   : > { %s8162_s19 = smov (!%p2300_p12, %s2299_s19), 0  ;;  %s2304_s21 = scalar_lea.vmem %s7299_s2, %s8160_s17 }
 0x3a8   : > { %s8164_s19 = smov (!%p4223_p13, %s8162_s19), 39  ;;  %v2305_v58 = vld [vmem:[%s2304_s21] sm:$0x1]  ;;  %v2524_v5 = vrot.slane %v4823_v55, %v2523_v57  ;;  %v2598_v57 = vsub.s32 %v2595_v46, %v7225_v48  ;;  %s132_s5 = scalar_lea.vmem [#allocation7], %s131_s11 }
 0x3a9   : > { %2306 = vst.msk [vmem:[#allocation2 + $0x7f] sm:$0x1] %vm146_vm0, %v2305_v58  ;;  %s2307_s0 = scalar_lea.vmem %s7300_s3, %s8164_s19  ;;  %v2539_v58 = vadd.s32 4294967272, %v7222_v43  ;;  %s2645_s30 = sshll.u32 %s132_s5, 4  ;;  %s2646_s30 = int_to_ptr.vmem [resolvable:$true] %s2645_s30 }
 0x3aa   : > { %v2308_v59 = vld [vmem:[%s2307_s0] sm:$0x1]  ;;  %s2633_s23 = scalar_lea.sflag [#allocation8], %s131_s11  ;;  %s4888_s13 = scalar_lea.vmem %s2646_s30, 16 }
 0x3ab   : > { %2309 = vst.msk [vmem:[#allocation3 + $0x7f] sm:$0x1] %vm146_vm0, %v2308_v59  ;;  %v4825_v59 = vpop.eup %4824  ;;  %v2542_v6 = vsub.s32 %v2539_v58, %v7225_v48  ;;  %v2609_v58 = vadd.s32 4294967192, %v7222_v43  ;;  %vm2628_vm0 = vcmask 1048512   ;;  %p4889_p0 = scmp.ne.s32.totalorder %s2646_s30, %s4888_s13  ;;  %s4892_s17 = sshll.u32 %s4954_s27, 4  ;;  %s4893_s17 = int_to_ptr.vmem [resolvable:$false] %s4892_s17 }
 0x3ac   : > { %v2465_v4 = vadd.f32 1.0, %v4825_v59  ;;  %s4894_s12 = scalar_lea.vmem %s4893_s17, 32  ;;  %p4895_p5 = scmp.lt.s32.totalorder %s2646_s30, %s4893_s17 }
 0x3ad   : > { %p4890_p3 = pnand %p4889_p0, %p5024_p1  ;;  %p4896_p6 = scmp.lt.s32.totalorder %s4894_s12, %s4888_s13 }
 0x3af   : > { %p4891_p4 = pneg %p4890_p3  ;;  %p4897_p7 = por %p4896_p6, %p4895_p5 }
 0x3b0   : > { %v2325_v60 = vld [vmem:[#allocation2 + $0x78] sm:$0xff] }
 0x3b1   : > { %p4898_p8 = pnand %p4897_p7, %p4891_p4 }
 0x3b2   : > { %v2341_v61 = vld [vmem:[#allocation3 + $0x78] sm:$0xff] }
 0x3b3   : > { %v2357_v62 = vmul.f32 %v2341_v61, %v2325_v60  ;;  %v2464_v60 = vadd.f32 1.0, %v4819_v50  ;;  %v4827_v61 = vpop.eup %4826 }
 0x3b4   : > { %v2536_v13 = vrot.slane %v4827_v61, %v2535_v0 }
 0x3b5   : > { %v2404_v63 = vsel %vm2358_vm1, %v2357_v62, 0.0  ;;  %v2529_v62 = vrot.slane %v4821_v53, %v2528_v52 }
 0x3b6   : > { %2405 = vadd.xlane.f32.xlu1 %v2404_v63  ;;  %v4829_v63 = vpop.eup %4828 }
 0x3b7   : > { %v4831_v2 = vpop.eup %4830  ;;  %v2466_v9 = vadd.f32 1.0, %v4829_v63  ;;  %v2531_v10 = vsel %vm2530_vm2, %v2529_v62, %v2524_v5  ;;  %v2616_v62 = vadd.s32 4294967184, %v7222_v43 }
 0x3b8   : > { %v4833_v7 = vpop.eup %4832  ;;  %v2543_v18 = vrot.slane %v4831_v2, %v2542_v6  ;;  %v2538_v20 = vsel %vm2537_vm3, %v2536_v13, %v2531_v10  ;;  %v2612_v2 = vsub.s32 %v2609_v58, %v7225_v48 }
 0x3b9   : > { %v2467_v17 = vadd.f32 1.0, %v4833_v7  ;;  %v2619_v6 = vsub.s32 %v2616_v62, %v7225_v48 }
 0x3ba   : > { %v2545_v29 = vsel %vm2544_vm4, %v2543_v18, %v2538_v20 }
 0x3d1   : > { %v2400_v32 = vpop.xlane.xlu1 %2399 }
 0x3d2   : > { %v4241_v38 = vmul.f32 -1.442695, %v2400_v32  ;;  %v2570_v32 = vsub.s32 %v2567_v22, %v7225_v48 }
 0x3d4   : > { %4834 = vpow2.f32 %v4241_v38  ;;  %v2588_v38 = vadd.s32 4294967216, %v7222_v43 }
 0x3d5   : > { %4836 = vrcp.f32 %v2459_v40 }
 0x3d6   : > { %v2591_v50 = vsub.s32 %v2588_v38, %v7225_v48 }
 0x3e1   : > { %v4835_v12 = vpop.eup %4834 }
 0x3e2   : > { %v4837_v16 = vpop.eup %4836  ;;  %v2468_v24 = vadd.f32 1.0, %v4835_v12 }
 0x3e3   : > { %v2550_v25 = vrot.slane %v4837_v16, %v2549_v14 }
 0x3e5   : > { %v2552_v34 = vsel %vm2551_vm5, %v2550_v25, %v2545_v29 }
 0x406   : > { %v2403_v37 = vpop.xlane.xlu0 %2402 }
 0x407   : > { %v4242_v42 = vmul.f32 -1.442695, %v2403_v37  ;;  %v2577_v37 = vsub.s32 %v2574_v30, %v7225_v48 }
 0x409   : > { %4838 = vpow2.f32 %v4242_v42 }
 0x40a   : > { %4840 = vrcp.f32 %v2460_v44 }
 0x40b   : > { %4842 = vrcp.f32 %v2461_v47 }
 0x40c   : > { %4844 = vrcp.f32 %v2462_v51  ;;  %v2602_v51 = vadd.s32 4294967200, %v7222_v43 }
 0x40d   : > { %4846 = vrcp.f32 %v2463_v56 }
 0x40e   : > { %4848 = vrcp.f32 %v2464_v60  ;;  %v2605_v61 = vsub.s32 %v2602_v51, %v7225_v48 }
 0x416   : > { %v4839_v19 = vpop.eup %4838 }
 0x417   : > { %v4841_v23 = vpop.eup %4840  ;;  %v2469_v28 = vadd.f32 1.0, %v4839_v19 }
 0x418   : > { %v4843_v27 = vpop.eup %4842  ;;  %v2557_v31 = vrot.slane %v4841_v23, %v2556_v21 }
 0x419   : > { %v4845_v33 = vpop.eup %4844  ;;  %v2564_v35 = vrot.slane %v4843_v27, %v2563_v26 }
 0x41a   : > { %v4847_v39 = vpop.eup %4846  ;;  %v2559_v41 = vsel %vm2558_vm6, %v2557_v31, %v2552_v34  ;;  %v2571_v42 = vrot.slane %v4845_v33, %v2570_v32 }
 0x41b   : > { %v4849_v40 = vpop.eup %4848  ;;  %v2566_v44 = vsel %vm2565_vm7, %v2564_v35, %v2559_v41  ;;  %v2578_v49 = vrot.slane %v4847_v39, %v2577_v37 }
 0x41c   : > { %v2573_v54 = vsel %vm2572_vm8, %v2571_v42, %v2566_v44  ;;  %v2585_v56 = vrot.slane %v4849_v40, %v2584_v45 }
 0x41d   : > { %v2580_v59 = vsel %vm2579_vm9, %v2578_v49, %v2573_v54 }
 0x41e   : > { %v2587_v0 = vsel %vm2586_vm10, %v2585_v56, %v2580_v59 }
 0x43f   : > { %v2406_v3 = vpop.xlane.xlu1 %2405 }
 0x440   : > { %v4243_v8 = vmul.f32 -1.442695, %v2406_v3 }
 0x442   : > { %4850 = vpow2.f32 %v4243_v8  ;;  %v2623_v8 = vadd.s32 4294967176, %v7222_v43 }
 0x443   : > { %4852 = vrcp.f32 %v2465_v4 }
 0x444   : > { %4854 = vrcp.f32 %v2466_v9  ;;  %v2626_v13 = vsub.s32 %v2623_v8, %v7225_v48 }
 0x445   : > { %4856 = vrcp.f32 %v2467_v17 }
 0x446   : > { %4858 = vrcp.f32 %v2468_v24 }
 0x447   : > { %4860 = vrcp.f32 %v2469_v28 }
 0x44f   : > { %v4851_v47 = vpop.eup %4850 }
 0x450   : > { %v4853_v52 = vpop.eup %4852  ;;  %v2470_v53 = vadd.f32 1.0, %v4851_v47 }
 0x451   : > { %v4855_v55 = vpop.eup %4854  ;;  %v2592_v60 = vrot.slane %v4853_v52, %v2591_v50 }
 0x452   : > { %4862 = vrcp.f32 %v2470_v53  ;;  %v4857_v63 = vpop.eup %4856  ;;  %v2599_v1 = vrot.slane %v4855_v55, %v2598_v57 }
 0x453   : > { %v4859_v3 = vpop.eup %4858  ;;  %v2594_v4 = vsel %vm2593_vm11, %v2592_v60, %v2587_v0  ;;  %v2606_v5 = vrot.slane %v4857_v63, %v2605_v61 }
 0x454   : > { %v4861_v7 = vpop.eup %4860  ;;  %v2601_v9 = vsel %vm2600_vm12, %v2599_v1, %v2594_v4  ;;  %v2613_v10 = vrot.slane %v4859_v3, %v2612_v2 }
 0x455   : > { %v2608_v11 = vsel %vm2607_vm13, %v2606_v5, %v2601_v9  ;;  %v2620_v12 = vrot.slane %v4861_v7, %v2619_v6 }
 0x456   : > { %v2615_v14 = vsel %vm2614_vm14, %v2613_v10, %v2608_v11 }
 0x457   : > { %v2622_v16 = vsel %vm2621_vm15, %v2620_v12, %v2615_v14 }
 0x45f   : > { %v4863_v15 = vpop.eup %4862 }
 0x460   : > { %v2627_v17 = vrot.slane %v4863_v15, %v2626_v13 }
 0x462   : > { %v2629_v43 = vsel %vm2628_vm0, %v2627_v17, %v2622_v16 }
 0x463   : > { %2631 = vst [vmem:[%s132_s5] sm:$0x1] %v2629_v43 }
 0x464   : > { %4901 = shalt.err (!%p4898_p8)
}
 0x465   : > { %s4902_s15 = scalar_lea.hbm %s7263_s16, 16  ;;  %s4906_s20 = scalar_lea.hbm %s7301_s4, 32 }
 0x466   : > { %p4903_p9 = scmp.ne.s32.totalorder %s7263_s16, %s4902_s15  ;;  %p4907_p12 = scmp.lt.s32.totalorder %s7263_s16, %s7301_s4 }
 0x467   : > { %p4908_p13 = scmp.lt.s32.totalorder %s4906_s20, %s4902_s15 }
 0x468   : > { %p4904_p10 = pnand %p4903_p9, %p5024_p1 }
 0x469   : > { %p4909_p0 = por %p4908_p13, %p4907_p12 }
 0x46a   : > { %p4905_p11 = pneg %p4904_p10 }
 0x46c   : > { %p4910_p3 = pnand %p4909_p0, %p4905_p11 }
 0x46e   : > { %4913 = shalt.err (!%p4910_p3)
}
 0x46f   : > { %4759 = dma.vmem_to_hbm [thread:$0]  (%p5024_p1), %s2646_s30, 16, %s7263_s16, %s2633_s23  }
 0x470 PF: > { %p4765_p4 = scmp.ge.s32.totalorder %s4950_s26, 2  ;;  %s2657_s22 = sand.u32 1, %s4938_s1  }
 0x471   : > { %s2658_s0 = scalar_lea.sflag [#allocation8], %s2657_s22 }
 0x472   : > { %p4762_p5 = pnand %p4765_p4, %p5028_p2 }
 0x474   : > { %p4763_p6 = pneg %p4762_p5 }
 0x476   : > { %4933 = dma.done.wait (%p4763_p6), %s2658_s0, 16  }
 0x477   : > { %4935 = vsyncadd (%p4763_p6), %s2658_s0, 4294967280  ;;  %p24_p7 = scmp.ge.s32.totalorder %s5011_s29, 4   ;;  %s7305_s1 = smov %s4942_s24 }
 0x478   : > { %s7306_s24 = smov %s4946_s25  ;;  %s7307_s25 = smov %s5022_s6 }
 0x479   : > { %s7308_s26 = smov %s5011_s29  ;;  %26 = sbr.rel (!%p24_p7) target bundleno = 28 (0x1c), region = 316 }
 0x47e   :  { %2662 = vsyncpa [#allocation8], 1 }
 0x47f   :  { %2664 = vsyncpa [#allocation8 + $0x1], 1 }

</bundles_post_ra>
